<compile_context>
chip_gen: v7x
topology: tpu7x:2x2x1
jax: 0.10.0
libtpu: 0.0.40
codegen_flags: <defaults>
</compile_context>

<pallas_src>
import functools

import jax
import jax.numpy as jnp
from jax.experimental import pallas as pl
from jax.experimental.pallas import tpu as pltpu

_BN_EPS = 1e-5


# -----------------------------------------------------------------------------
# Wrapper-side weight preprocessing (tiny XLA ops, traced once per jit).
# -----------------------------------------------------------------------------
def _build_conv1_band(w1_hwio):
    """(3,3,1,32) HWIO -> (3, 128, 1024) banded matrices, one per vertical tap.

    LHS lane s = image column (0..27, rest zero).  Output lane
    L = p*512 + n*32 + c with output column j = 2n + p (n<=13), channel c.
    """
    w = w1_hwio.reshape(3, 3, 32)                      # (ki, kj, c)
    s = jnp.arange(128)[:, None, None]                 # (128,1,1)
    n = jnp.arange(14)[None, :, None]                  # (1,14,1)
    p = jnp.arange(2)[None, None, :]                   # (1,1,2)
    kj = s - (2 * n + p) + 1                           # tap index, (128,14,2)
    valid = (kj >= 0) & (kj <= 2) & (s <= 27)
    kj_c = jnp.clip(kj, 0, 2)
    band = w[:, kj_c, :]                               # (3,128,14,2,32)
    band = jnp.where(valid[None, :, :, :, None], band, 0.0)
    band = jnp.pad(band, ((0, 0), (0, 0), (0, 2), (0, 0), (0, 0)))  # n 14->16
    band = jnp.transpose(band, (0, 1, 3, 2, 4))        # (3,128,2,16,32)
    return band.reshape(3, 128, 1024)


def _build_conv2_band(w2_hwio):
    """(3,3,32,64) HWIO -> (3, 512, 1024) banded matrices.

    LHS lane K = jp*32 + cin (pooled column jp<=13).  Output lane
    L = p*512 + n2*64 + cout with output column j2 = 2*n2 + p (n2<=6).
    """
    jp = jnp.arange(16)[:, None, None]                 # (16,1,1)
    n2 = jnp.arange(7)[None, :, None]                  # (1,7,1)
    p = jnp.arange(2)[None, None, :]                   # (1,1,2)
    kj2 = jp - (2 * n2 + p) + 1                        # (16,7,2)
    valid = (kj2 >= 0) & (kj2 <= 2) & (jp <= 13)
    kj2_c = jnp.clip(kj2, 0, 2)
    band = w2_hwio[:, kj2_c, :, :]                     # (3,16,7,2,32,64)
    band = jnp.where(valid[None, :, :, :, None, None], band, 0.0)
    band = jnp.transpose(band, (0, 1, 4, 3, 2, 5))     # (3,16,32,2,7,64)
    band = jnp.pad(band, ((0, 0), (0, 0), (0, 0), (0, 0), (0, 1), (0, 0)))
    return band.reshape(3, 512, 1024)


def _build_fc1_fold(fc1_w):
    """torch fc1 weight (H, 3136) -> (7, 512, H); folds the NCHW flatten.

    torch flatten index f = c2*49 + i3*7 + j3; kernel lane = j3*64 + c2.
    """
    h = fc1_w.shape[0]
    w = fc1_w.reshape(h, 64, 7, 7)                     # (h, c2, i3, j3)
    w = jnp.transpose(w, (2, 3, 1, 0))                 # (i3, j3, c2, h)
    w = jnp.pad(w, ((0, 0), (0, 1), (0, 0), (0, 0)))   # j3 7->8
    return w.reshape(7, 512, h)


def _expand_affine(vec, n_valid, n_total):
    """Per-channel affine -> per-lane vector matching the banded output layout."""
    c = vec.shape[0]
    half = jnp.concatenate(
        [jnp.tile(vec, n_valid), jnp.zeros(((n_total - n_valid) * c,), vec.dtype)])
    return jnp.concatenate([half, half]).reshape(1, 2 * n_total * c)


# -----------------------------------------------------------------------------
# The fused kernel.
# -----------------------------------------------------------------------------
def _mnist_fused_kernel(x_ref,
                        m1_ref, s1_ref, b1_ref,
                        m2_ref, s2_ref, b2_ref,
                        w1fc_ref, fc1b_ref, w2fc_ref, fc2b_ref,
                        o_ref,
                        cs1, cs2, p2s):
    f32 = jnp.float32
    bf16 = jnp.bfloat16
    tb = x_ref.shape[0]
    r = tb * 8

    # ---- conv1 LHS: slot k, sublane m of batch b holds image row 4m + k - 1.
    # Only the two halo rows need explicit zeros: lanes >= 28 multiply zeroed
    # rows of the banded RHS, and sublane 7 of every slot only feeds output
    # rows that are never read downstream.
    x = x_ref[...]                                      # (tb, 4, 7, 128) f32
    cs1[0, :, 0:1, :] = jnp.zeros((tb, 1, 128), f32)    # image row -1 (top pad)
    cs1[5, :, 6:7, :] = jnp.zeros((tb, 1, 128), f32)    # image row 28 (bot pad)
    cs1[0, :, 1:7, :] = x[:, 3, 0:6, :]                 # rows 4m-1 (m>=1)
    cs1[1, :, 0:7, :] = x[:, 0]                         # rows 4m
    cs1[2, :, 0:7, :] = x[:, 1]                         # rows 4m+1
    cs1[3, :, 0:7, :] = x[:, 2]                         # rows 4m+2
    cs1[4, :, 0:7, :] = x[:, 3]                         # rows 4m+3
    cs1[5, :, 0:6, :] = x[:, 0, 1:7, :]                 # rows 4m+4 (m<=5)

    # ---- conv1 + BN1 affine: 3 matmuls, 4 row phases stacked along M.
    lhs0 = cs1[0:4].reshape(4 * r, 128).astype(bf16)
    lhs1 = cs1[1:5].reshape(4 * r, 128).astype(bf16)
    lhs2 = cs1[2:6].reshape(4 * r, 128).astype(bf16)
    acc = jnp.dot(lhs0, m1_ref[0], preferred_element_type=f32)
    acc = acc + jnp.dot(lhs1, m1_ref[1], preferred_element_type=f32)
    acc = acc + jnp.dot(lhs2, m1_ref[2], preferred_element_type=f32)
    t_all = acc * s1_ref[...] + b1_ref[...]             # (4r, 1024)

    def hmax(v):                                        # max over column parity
        return jnp.maximum(v[:, :512], v[:, 512:])

    # ReLU + 2x2 maxpool: pe = pooled rows 2m, po = pooled rows 2m+1.
    pe = jnp.maximum(jnp.maximum(hmax(t_all[0:r]), hmax(t_all[r:2 * r])), 0.0)
    po = jnp.maximum(jnp.maximum(hmax(t_all[2 * r:3 * r]),
                                 hmax(t_all[3 * r:4 * r])), 0.0)
    pe_r = pe.reshape(tb, 8, 512)
    po_r = po.reshape(tb, 8, 512)

    # ---- conv2 LHS slots: [rows 2m-1 | rows 2m | rows 2m+1 | rows 2m+2].
    cs2[0, :, 0:1, :] = jnp.zeros((tb, 1, 512), f32)    # pooled row -1 (pad)
    cs2[0, :, 1:8, :] = po_r[:, 0:7, :]
    cs2[1, :, :, :] = pe_r
    cs2[2, :, :, :] = po_r
    cs2[3, :, 0:6, :] = pe_r[:, 1:7, :]
    cs2[3, :, 6:7, :] = jnp.zeros((tb, 1, 512), f32)    # pooled row 14 (pad)

    # ---- conv2 + BN2 affine: 3 matmuls, even/odd output rows stacked along M.
    L0 = cs2[0:2].reshape(2 * r, 512).astype(bf16)
    L1 = cs2[1:3].reshape(2 * r, 512).astype(bf16)
    L2 = cs2[2:4].reshape(2 * r, 512).astype(bf16)
    acc2 = jnp.dot(L0, m2_ref[0], preferred_element_type=f32)
    acc2 = acc2 + jnp.dot(L1, m2_ref[1], preferred_element_type=f32)
    acc2 = acc2 + jnp.dot(L2, m2_ref[2], preferred_element_type=f32)
    u = acc2 * s2_ref[...] + b2_ref[...]                # (2r, 1024)

    pool2 = jnp.maximum(jnp.maximum(hmax(u[0:r]), hmax(u[r:2 * r])), 0.0)
    p2s[...] = pool2.reshape(tb, 8, 512)

    # ---- flatten (folded into fc1 weights) + fc1 + ReLU + fc2 ---------------
    hidden = w1fc_ref.shape[2]
    acc_fc = jnp.zeros((tb, hidden), f32)
    for i3 in range(7):
        rows = p2s[:, i3, :].astype(bf16)               # (tb, 512)
        acc_fc = acc_fc + jnp.dot(rows, w1fc_ref[i3],
                                  preferred_element_type=f32)
    h1 = jnp.maximum(acc_fc + fc1b_ref[...], 0.0)
    logits = jnp.dot(h1.astype(bf16), w2fc_ref[...],
                     preferred_element_type=f32) + fc2b_ref[...]
    o_ref[...] = logits.astype(o_ref.dtype)


# -----------------------------------------------------------------------------
# Public forward (PyTorch-layout params, NCHW input).
# -----------------------------------------------------------------------------
@functools.partial(jax.jit, static_argnames=("batch_tile",))
def mnist_net_forward(x_nchw, params, *, batch_tile=64):
    b = x_nchw.shape[0]
    assert x_nchw.shape[1:] == (1, 28, 28), "MNISTNet expects (B, 1, 28, 28)"
    num_classes = params["fc2_w"].shape[0]
    ncp = max(128, -(-num_classes // 128) * 128)        # lane-padded classifier

    tb = max(1, min(batch_tile, b))
    bp = -(-b // tb) * tb

    x = x_nchw.reshape(b, 28, 28).astype(jnp.float32)
    if bp != b:
        x = jnp.pad(x, ((0, bp - b), (0, 0), (0, 0)))
    # Phase-major, lane-padded input slab: xb[b, p, m, :28] = image row 4m+p.
    xb = jnp.transpose(x.reshape(bp, 7, 4, 28), (0, 2, 1, 3))
    xb = jnp.pad(xb, ((0, 0), (0, 0), (0, 0), (0, 100)))     # (bp, 4, 7, 128)

    # Banded conv weights / folded fc1 (bf16 MXU operands).
    w1_hwio = jnp.transpose(params["conv1_w"], (2, 3, 1, 0))  # (3,3,1,32)
    w2_hwio = jnp.transpose(params["conv2_w"], (2, 3, 1, 0))  # (3,3,32,64)
    m1 = _build_conv1_band(w1_hwio).astype(jnp.bfloat16)
    m2 = _build_conv2_band(w2_hwio).astype(jnp.bfloat16)
    w1fc = _build_fc1_fold(params["fc1_w"]).astype(jnp.bfloat16)
    w2fc = jnp.pad(jnp.transpose(params["fc2_w"]),
                   ((0, 0), (0, ncp - num_classes))).astype(jnp.bfloat16)

    # Eval-mode BN folded into a per-lane affine (conv bias folded in too).
    sc1 = params["bn1_gamma"] / jnp.sqrt(params["bn1_var"] + _BN_EPS)
    bi1 = params["bn1_beta"] + (params["conv1_b"] - params["bn1_mean"]) * sc1
    sc2 = params["bn2_gamma"] / jnp.sqrt(params["bn2_var"] + _BN_EPS)
    bi2 = params["bn2_beta"] + (params["conv2_b"] - params["bn2_mean"]) * sc2
    s1v = _expand_affine(sc1.astype(jnp.float32), 14, 16)     # (1, 1024)
    b1v = _expand_affine(bi1.astype(jnp.float32), 14, 16)
    s2v = _expand_affine(sc2.astype(jnp.float32), 7, 8)       # (1, 1024)
    b2v = _expand_affine(bi2.astype(jnp.float32), 7, 8)
    fc1b = params["fc1_b"].reshape(1, -1).astype(jnp.float32)
    fc2b = jnp.pad(params["fc2_b"],
                   (0, ncp - num_classes)).reshape(1, -1).astype(jnp.float32)

    full = lambda shape: pl.BlockSpec(shape, lambda i: (0,) * len(shape))

    out = pl.pallas_call(
        _mnist_fused_kernel,
        out_shape=jax.ShapeDtypeStruct((bp, ncp), jnp.float32),
        grid=(bp // tb,),
        in_specs=[
            pl.BlockSpec((tb, 4, 7, 128), lambda i: (i, 0, 0, 0)),
            full((3, 128, 1024)), full((1, 1024)), full((1, 1024)),
            full((3, 512, 1024)), full((1, 1024)), full((1, 1024)),
            full(w1fc.shape), full(fc1b.shape),
            full(w2fc.shape), full(fc2b.shape),
        ],
        out_specs=pl.BlockSpec((tb, ncp), lambda i: (i, 0)),
        scratch_shapes=[
            pltpu.VMEM((6, tb, 8, 128), jnp.float32),   # conv1 row-shifted LHS
            pltpu.VMEM((4, tb, 8, 512), jnp.float32),   # conv2 row-shifted LHS
            pltpu.VMEM((tb, 8, 512), jnp.float32),      # pooled conv2 output
        ],
        compiler_params=pltpu.CompilerParams(
            dimension_semantics=("parallel",),
            vmem_limit_bytes=52 * 1024 * 1024,
        ),
    )(xb, m1, s1v, b1v, m2, s2v, b2v, w1fc, fc1b, w2fc, fc2b)
    return out[:b, :num_classes]


# -----------------------------------------------------------------------------
# Deterministic synthetic parameters (PyTorch layouts) and pure-JAX reference.
# -----------------------------------------------------------------------------
def init_params(key, num_classes=10, hidden_size=128):
    ks = jax.random.split(key, 16)
    nrm = lambda k, shape, s: s * jax.random.normal(k, shape, jnp.float32)
    p = {
        "conv1_w": nrm(ks[0], (32, 1, 3, 3), (2.0 / 9) ** 0.5),
        "conv1_b": nrm(ks[1], (32,), 0.05),
        "conv2_w": nrm(ks[2], (64, 32, 3, 3), (2.0 / (9 * 32)) ** 0.5),
        "conv2_b": nrm(ks[3], (64,), 0.05),
        "bn1_gamma": 1.0 + nrm(ks[4], (32,), 0.1),
        "bn1_beta": nrm(ks[5], (32,), 0.1),
        "bn1_mean": nrm(ks[6], (32,), 0.1),
        "bn1_var": 1.0 + 0.1 * jax.random.uniform(ks[7], (32,)),
        "bn2_gamma": 1.0 + nrm(ks[8], (64,), 0.1),
        "bn2_beta": nrm(ks[9], (64,), 0.1),
        "bn2_mean": nrm(ks[10], (64,), 0.1),
        "bn2_var": 1.0 + 0.1 * jax.random.uniform(ks[11], (64,)),
        "fc1_w": nrm(ks[12], (hidden_size, 64 * 7 * 7), (2.0 / (64 * 7 * 7)) ** 0.5),
        "fc1_b": nrm(ks[13], (hidden_size,), 0.05),
        "fc2_w": nrm(ks[14], (num_classes, hidden_size), (2.0 / hidden_size) ** 0.5),
        "fc2_b": nrm(ks[15], (num_classes,), 0.05),
    }
    return p


@jax.jit
def _reference_forward(x_nchw, params):
    x = x_nchw.astype(jnp.float32)

    def conv(v, w, bias):
        y = jax.lax.conv_general_dilated(
            v, w, window_strides=(1, 1), padding=((1, 1), (1, 1)),
            dimension_numbers=("NCHW", "OIHW", "NCHW"))
        return y + bias[None, :, None, None]

    def bn(v, g, beta, mean, var):
        s = g / jnp.sqrt(var + _BN_EPS)
        return (v - mean[None, :, None, None]) * s[None, :, None, None] \
            + beta[None, :, None, None]

    def pool(v):
        n, c, hh, ww = v.shape
        return jnp.max(v.reshape(n, c, hh // 2, 2, ww // 2, 2), axis=(3, 5))

    y = pool(jax.nn.relu(bn(conv(x, params["conv1_w"], params["conv1_b"]),
                            params["bn1_gamma"], params["bn1_beta"],
                            params["bn1_mean"], params["bn1_var"])))
    y = pool(jax.nn.relu(bn(conv(y, params["conv2_w"], params["conv2_b"]),
                            params["bn2_gamma"], params["bn2_beta"],
                            params["bn2_mean"], params["bn2_var"])))
    y = y.reshape(y.shape[0], -1)
    y = jax.nn.relu(y @ params["fc1_w"].T + params["fc1_b"])
    return y @ params["fc2_w"].T + params["fc2_b"]


if __name__ == "__main__":
    key = jax.random.PRNGKey(0)
    kx, kp = jax.random.split(key)
    # MNIST-shaped input: spatial must be 28 so that fc1 sees 64*7*7 features.
    x = jax.random.normal(kx, (2, 1, 28, 28), jnp.float32)
    params = init_params(kp, num_classes=10, hidden_size=128)

    logits = mnist_net_forward(x, params)
    logits = jax.block_until_ready(logits)
    assert logits.shape == (2, 10) and logits.dtype == jnp.float32

    ref = jax.block_until_ready(_reference_forward(x, params))
    err = float(jnp.max(jnp.abs(logits - ref)))
    scale = float(jnp.max(jnp.abs(ref)))
    assert err <= 0.1 * max(1.0, scale), f"mismatch: err={err} scale={scale}"
    print("KERNEL_OK")
</pallas_src>

<mosaic_0001>
module attributes {stable_mosaic.version = 11 : i64} {
  func.func @_mnist_fused_kernel(%arg0: i32, %arg1: memref<2x4x7x128xf32, #tpu.memory_space<vmem>>, %arg2: memref<3x128x1024xbf16, #tpu.memory_space<vmem>>, %arg3: memref<1x1024xf32, #tpu.memory_space<vmem>>, %arg4: memref<1x1024xf32, #tpu.memory_space<vmem>>, %arg5: memref<3x512x1024xbf16, #tpu.memory_space<vmem>>, %arg6: memref<1x1024xf32, #tpu.memory_space<vmem>>, %arg7: memref<1x1024xf32, #tpu.memory_space<vmem>>, %arg8: memref<7x512x128xbf16, #tpu.memory_space<vmem>>, %arg9: memref<1x128xf32, #tpu.memory_space<vmem>>, %arg10: memref<128x128xbf16, #tpu.memory_space<vmem>>, %arg11: memref<1x128xf32, #tpu.memory_space<vmem>>, %arg12: memref<2x128xf32, #tpu.memory_space<vmem>>, %arg13: memref<6x2x8x128xf32, #tpu.memory_space<vmem>>, %arg14: memref<4x2x8x512xf32, #tpu.memory_space<vmem>>, %arg15: memref<2x8x512xf32, #tpu.memory_space<vmem>>) attributes {dimension_semantics = [#tpu.dimension_semantics<parallel>], iteration_bounds = array<i64: 1>, scalar_prefetch = 0 : i64, scratch_operands = 3 : i64, tpu.core_type = #tpu.core_type<tc>, window_params = [{transform_indices = @transform_0, window_bounds = array<i64: 2, 4, 7, 128>}, {pipeline_mode = #tpu.pipeline_mode<synchronous>, transform_indices = @transform_1, window_bounds = array<i64: 3, 128, 1024>}, {pipeline_mode = #tpu.pipeline_mode<synchronous>, transform_indices = @transform_2, window_bounds = array<i64: 1, 1024>}, {pipeline_mode = #tpu.pipeline_mode<synchronous>, transform_indices = @transform_3, window_bounds = array<i64: 1, 1024>}, {pipeline_mode = #tpu.pipeline_mode<synchronous>, transform_indices = @transform_4, window_bounds = array<i64: 3, 512, 1024>}, {pipeline_mode = #tpu.pipeline_mode<synchronous>, transform_indices = @transform_5, window_bounds = array<i64: 1, 1024>}, {pipeline_mode = #tpu.pipeline_mode<synchronous>, transform_indices = @transform_6, window_bounds = array<i64: 1, 1024>}, {pipeline_mode = #tpu.pipeline_mode<synchronous>, transform_indices = @transform_7, window_bounds = array<i64: 7, 512, 128>}, {pipeline_mode = #tpu.pipeline_mode<synchronous>, transform_indices = @transform_8, window_bounds = array<i64: 1, 128>}, {pipeline_mode = #tpu.pipeline_mode<synchronous>, transform_indices = @transform_9, window_bounds = array<i64: 128, 128>}, {pipeline_mode = #tpu.pipeline_mode<synchronous>, transform_indices = @transform_10, window_bounds = array<i64: 1, 128>}, {transform_indices = @transform_11, window_bounds = array<i64: 2, 128>}]} {
    %c0 = arith.constant 0 : index
    %c0_0 = arith.constant 0 : index
    %c0_1 = arith.constant 0 : index
    %c0_2 = arith.constant 0 : index
    %0 = vector.load %arg1[%c0, %c0_0, %c0_1, %c0_2] : memref<2x4x7x128xf32, #tpu.memory_space<vmem>>, vector<2x4x7x128xf32>
    %cst = arith.constant 0.000000e+00 : f32
    %1 = vector.broadcast %cst : f32 to vector<2x1x128xf32>
    %c0_3 = arith.constant 0 : index
    %c0_4 = arith.constant 0 : index
    %c0_5 = arith.constant 0 : index
    %c0_6 = arith.constant 0 : index
    %2 = vector.load %arg13[%c0_3, %c0_4, %c0_5, %c0_6] : memref<6x2x8x128xf32, #tpu.memory_space<vmem>>, vector<1x2x1x128xf32>
    %3 = vector.shape_cast %2 : vector<1x2x1x128xf32> to vector<2x1x128xf32>
    %4 = vector.shape_cast %1 : vector<2x1x128xf32> to vector<1x2x1x128xf32>
    tpu.vector_store %arg13[%c0_3, %c0_4, %c0_5, %c0_6], %4 {strides = array<i32>} : memref<6x2x8x128xf32, #tpu.memory_space<vmem>>, vector<1x2x1x128xf32>,
    %cst_7 = arith.constant 0.000000e+00 : f32
    %5 = vector.broadcast %cst_7 : f32 to vector<2x1x128xf32>
    %c5 = arith.constant 5 : index
    %c0_8 = arith.constant 0 : index
    %c6 = arith.constant 6 : index
    %c0_9 = arith.constant 0 : index
    %6 = vector.load %arg13[%c5, %c0_8, %c6, %c0_9] : memref<6x2x8x128xf32, #tpu.memory_space<vmem>>, vector<1x2x1x128xf32>
    %7 = vector.shape_cast %6 : vector<1x2x1x128xf32> to vector<2x1x128xf32>
    %8 = vector.shape_cast %5 : vector<2x1x128xf32> to vector<1x2x1x128xf32>
    tpu.vector_store %arg13[%c5, %c0_8, %c6, %c0_9], %8 {strides = array<i32>} : memref<6x2x8x128xf32, #tpu.memory_space<vmem>>, vector<1x2x1x128xf32>,
    %9 = vector.extract_strided_slice %0 {offsets = [0, 3, 0, 0], sizes = [2, 1, 6, 128], strides = [1, 1, 1, 1]} : vector<2x4x7x128xf32> to vector<2x1x6x128xf32>
    %10 = vector.shape_cast %9 : vector<2x1x6x128xf32> to vector<2x6x128xf32>
    %c0_10 = arith.constant 0 : index
    %c0_11 = arith.constant 0 : index
    %c1 = arith.constant 1 : index
    %c0_12 = arith.constant 0 : index
    %11 = vector.load %arg13[%c0_10, %c0_11, %c1, %c0_12] : memref<6x2x8x128xf32, #tpu.memory_space<vmem>>, vector<1x2x6x128xf32>
    %12 = vector.shape_cast %11 : vector<1x2x6x128xf32> to vector<2x6x128xf32>
    %13 = vector.shape_cast %10 : vector<2x6x128xf32> to vector<1x2x6x128xf32>
    tpu.vector_store %arg13[%c0_10, %c0_11, %c1, %c0_12], %13 {strides = array<i32>} : memref<6x2x8x128xf32, #tpu.memory_space<vmem>>, vector<1x2x6x128xf32>,
    %14 = vector.extract_strided_slice %0 {offsets = [0, 0, 0, 0], sizes = [2, 1, 7, 128], strides = [1, 1, 1, 1]} : vector<2x4x7x128xf32> to vector<2x1x7x128xf32>
    %15 = vector.shape_cast %14 : vector<2x1x7x128xf32> to vector<2x7x128xf32>
    %c1_13 = arith.constant 1 : index
    %c0_14 = arith.constant 0 : index
    %c0_15 = arith.constant 0 : index
    %c0_16 = arith.constant 0 : index
    %16 = vector.load %arg13[%c1_13, %c0_14, %c0_15, %c0_16] : memref<6x2x8x128xf32, #tpu.memory_space<vmem>>, vector<1x2x7x128xf32>
    %17 = vector.shape_cast %16 : vector<1x2x7x128xf32> to vector<2x7x128xf32>
    %18 = vector.shape_cast %15 : vector<2x7x128xf32> to vector<1x2x7x128xf32>
    tpu.vector_store %arg13[%c1_13, %c0_14, %c0_15, %c0_16], %18 {strides = array<i32>} : memref<6x2x8x128xf32, #tpu.memory_space<vmem>>, vector<1x2x7x128xf32>,
    %19 = vector.extract_strided_slice %0 {offsets = [0, 1, 0, 0], sizes = [2, 1, 7, 128], strides = [1, 1, 1, 1]} : vector<2x4x7x128xf32> to vector<2x1x7x128xf32>
    %20 = vector.shape_cast %19 : vector<2x1x7x128xf32> to vector<2x7x128xf32>
    %c2 = arith.constant 2 : index
    %c0_17 = arith.constant 0 : index
    %c0_18 = arith.constant 0 : index
    %c0_19 = arith.constant 0 : index
    %21 = vector.load %arg13[%c2, %c0_17, %c0_18, %c0_19] : memref<6x2x8x128xf32, #tpu.memory_space<vmem>>, vector<1x2x7x128xf32>
    %22 = vector.shape_cast %21 : vector<1x2x7x128xf32> to vector<2x7x128xf32>
    %23 = vector.shape_cast %20 : vector<2x7x128xf32> to vector<1x2x7x128xf32>
    tpu.vector_store %arg13[%c2, %c0_17, %c0_18, %c0_19], %23 {strides = array<i32>} : memref<6x2x8x128xf32, #tpu.memory_space<vmem>>, vector<1x2x7x128xf32>,
    %24 = vector.extract_strided_slice %0 {offsets = [0, 2, 0, 0], sizes = [2, 1, 7, 128], strides = [1, 1, 1, 1]} : vector<2x4x7x128xf32> to vector<2x1x7x128xf32>
    %25 = vector.shape_cast %24 : vector<2x1x7x128xf32> to vector<2x7x128xf32>
    %c3 = arith.constant 3 : index
    %c0_20 = arith.constant 0 : index
    %c0_21 = arith.constant 0 : index
    %c0_22 = arith.constant 0 : index
    %26 = vector.load %arg13[%c3, %c0_20, %c0_21, %c0_22] : memref<6x2x8x128xf32, #tpu.memory_space<vmem>>, vector<1x2x7x128xf32>
    %27 = vector.shape_cast %26 : vector<1x2x7x128xf32> to vector<2x7x128xf32>
    %28 = vector.shape_cast %25 : vector<2x7x128xf32> to vector<1x2x7x128xf32>
    tpu.vector_store %arg13[%c3, %c0_20, %c0_21, %c0_22], %28 {strides = array<i32>} : memref<6x2x8x128xf32, #tpu.memory_space<vmem>>, vector<1x2x7x128xf32>,
    %29 = vector.extract_strided_slice %0 {offsets = [0, 3, 0, 0], sizes = [2, 1, 7, 128], strides = [1, 1, 1, 1]} : vector<2x4x7x128xf32> to vector<2x1x7x128xf32>
    %30 = vector.shape_cast %29 : vector<2x1x7x128xf32> to vector<2x7x128xf32>
    %c4 = arith.constant 4 : index
    %c0_23 = arith.constant 0 : index
    %c0_24 = arith.constant 0 : index
    %c0_25 = arith.constant 0 : index
    %31 = vector.load %arg13[%c4, %c0_23, %c0_24, %c0_25] : memref<6x2x8x128xf32, #tpu.memory_space<vmem>>, vector<1x2x7x128xf32>
    %32 = vector.shape_cast %31 : vector<1x2x7x128xf32> to vector<2x7x128xf32>
    %33 = vector.shape_cast %30 : vector<2x7x128xf32> to vector<1x2x7x128xf32>
    tpu.vector_store %arg13[%c4, %c0_23, %c0_24, %c0_25], %33 {strides = array<i32>} : memref<6x2x8x128xf32, #tpu.memory_space<vmem>>, vector<1x2x7x128xf32>,
    %34 = vector.extract_strided_slice %0 {offsets = [0, 0, 1, 0], sizes = [2, 1, 6, 128], strides = [1, 1, 1, 1]} : vector<2x4x7x128xf32> to vector<2x1x6x128xf32>
    %35 = vector.shape_cast %34 : vector<2x1x6x128xf32> to vector<2x6x128xf32>
    %c5_26 = arith.constant 5 : index
    %c0_27 = arith.constant 0 : index
    %c0_28 = arith.constant 0 : index
    %c0_29 = arith.constant 0 : index
    %36 = vector.load %arg13[%c5_26, %c0_27, %c0_28, %c0_29] : memref<6x2x8x128xf32, #tpu.memory_space<vmem>>, vector<1x2x6x128xf32>
    %37 = vector.shape_cast %36 : vector<1x2x6x128xf32> to vector<2x6x128xf32>
    %38 = vector.shape_cast %35 : vector<2x6x128xf32> to vector<1x2x6x128xf32>
    tpu.vector_store %arg13[%c5_26, %c0_27, %c0_28, %c0_29], %38 {strides = array<i32>} : memref<6x2x8x128xf32, #tpu.memory_space<vmem>>, vector<1x2x6x128xf32>,
    %c0_30 = arith.constant 0 : index
    %c0_31 = arith.constant 0 : index
    %c0_32 = arith.constant 0 : index
    %c0_33 = arith.constant 0 : index
    %39 = vector.load %arg13[%c0_30, %c0_31, %c0_32, %c0_33] : memref<6x2x8x128xf32, #tpu.memory_space<vmem>>, vector<4x2x8x128xf32>
    %40 = vector.shape_cast %39 : vector<4x2x8x128xf32> to vector<64x128xf32>
    %41 = arith.truncf %40 : vector<64x128xf32> to vector<64x128xbf16>
    %c1_34 = arith.constant 1 : index
    %c0_35 = arith.constant 0 : index
    %c0_36 = arith.constant 0 : index
    %c0_37 = arith.constant 0 : index
    %42 = vector.load %arg13[%c1_34, %c0_35, %c0_36, %c0_37] : memref<6x2x8x128xf32, #tpu.memory_space<vmem>>, vector<4x2x8x128xf32>
    %43 = vector.shape_cast %42 : vector<4x2x8x128xf32> to vector<64x128xf32>
    %44 = arith.truncf %43 : vector<64x128xf32> to vector<64x128xbf16>
    %c2_38 = arith.constant 2 : index
    %c0_39 = arith.constant 0 : index
    %c0_40 = arith.constant 0 : index
    %c0_41 = arith.constant 0 : index
    %45 = vector.load %arg13[%c2_38, %c0_39, %c0_40, %c0_41] : memref<6x2x8x128xf32, #tpu.memory_space<vmem>>, vector<4x2x8x128xf32>
    %46 = vector.shape_cast %45 : vector<4x2x8x128xf32> to vector<64x128xf32>
    %47 = arith.truncf %46 : vector<64x128xf32> to vector<64x128xbf16>
    %c0_42 = arith.constant 0 : index
    %c0_43 = arith.constant 0 : index
    %c0_44 = arith.constant 0 : index
    %48 = vector.load %arg2[%c0_42, %c0_43, %c0_44] : memref<3x128x1024xbf16, #tpu.memory_space<vmem>>, vector<1x128x1024xbf16>
    %49 = vector.shape_cast %48 : vector<1x128x1024xbf16> to vector<128x1024xbf16>
    %cst_45 = arith.constant dense<0.000000e+00> : vector<64x1024xf32>
    %50 = tpu.matmul %41, %49, %cst_45 {dimension_numbers = #tpu.dot_dimension_numbers<[1], [0], [0], [1], [0, 0, 1, 1], [], []>} : vector<64x128xbf16>, vector<128x1024xbf16>, vector<64x1024xf32> -> vector<64x1024xf32>
    %c1_46 = arith.constant 1 : index
    %c0_47 = arith.constant 0 : index
    %c0_48 = arith.constant 0 : index
    %51 = vector.load %arg2[%c1_46, %c0_47, %c0_48] : memref<3x128x1024xbf16, #tpu.memory_space<vmem>>, vector<1x128x1024xbf16>
    %52 = vector.shape_cast %51 : vector<1x128x1024xbf16> to vector<128x1024xbf16>
    %cst_49 = arith.constant dense<0.000000e+00> : vector<64x1024xf32>
    %53 = tpu.matmul %44, %52, %cst_49 {dimension_numbers = #tpu.dot_dimension_numbers<[1], [0], [0], [1], [0, 0, 1, 1], [], []>} : vector<64x128xbf16>, vector<128x1024xbf16>, vector<64x1024xf32> -> vector<64x1024xf32>
    %54 = arith.addf %50, %53 : vector<64x1024xf32>
    %c2_50 = arith.constant 2 : index
    %c0_51 = arith.constant 0 : index
    %c0_52 = arith.constant 0 : index
    %55 = vector.load %arg2[%c2_50, %c0_51, %c0_52] : memref<3x128x1024xbf16, #tpu.memory_space<vmem>>, vector<1x128x1024xbf16>
    %56 = vector.shape_cast %55 : vector<1x128x1024xbf16> to vector<128x1024xbf16>
    %cst_53 = arith.constant dense<0.000000e+00> : vector<64x1024xf32>
    %57 = tpu.matmul %47, %56, %cst_53 {dimension_numbers = #tpu.dot_dimension_numbers<[1], [0], [0], [1], [0, 0, 1, 1], [], []>} : vector<64x128xbf16>, vector<128x1024xbf16>, vector<64x1024xf32> -> vector<64x1024xf32>
    %58 = arith.addf %54, %57 : vector<64x1024xf32>
    %c0_54 = arith.constant 0 : index
    %c0_55 = arith.constant 0 : index
    %59 = vector.load %arg3[%c0_54, %c0_55] : memref<1x1024xf32, #tpu.memory_space<vmem>>, vector<1x1024xf32>
    %60 = vector.broadcast %59 : vector<1x1024xf32> to vector<64x1024xf32>
    %61 = arith.mulf %58, %60 : vector<64x1024xf32>
    %c0_56 = arith.constant 0 : index
    %c0_57 = arith.constant 0 : index
    %62 = vector.load %arg4[%c0_56, %c0_57] : memref<1x1024xf32, #tpu.memory_space<vmem>>, vector<1x1024xf32>
    %63 = vector.broadcast %62 : vector<1x1024xf32> to vector<64x1024xf32>
    %64 = arith.addf %61, %63 : vector<64x1024xf32>
    %65 = vector.extract_strided_slice %64 {offsets = [0, 0], sizes = [16, 1024], strides = [1, 1]} : vector<64x1024xf32> to vector<16x1024xf32>
    %66 = vector.extract_strided_slice %65 {offsets = [0, 0], sizes = [16, 512], strides = [1, 1]} : vector<16x1024xf32> to vector<16x512xf32>
    %67 = vector.extract_strided_slice %65 {offsets = [0, 512], sizes = [16, 512], strides = [1, 1]} : vector<16x1024xf32> to vector<16x512xf32>
    %68 = arith.maximumf %66, %67 : vector<16x512xf32>
    %69 = vector.extract_strided_slice %64 {offsets = [16, 0], sizes = [16, 1024], strides = [1, 1]} : vector<64x1024xf32> to vector<16x1024xf32>
    %70 = vector.extract_strided_slice %69 {offsets = [0, 0], sizes = [16, 512], strides = [1, 1]} : vector<16x1024xf32> to vector<16x512xf32>
    %71 = vector.extract_strided_slice %69 {offsets = [0, 512], sizes = [16, 512], strides = [1, 1]} : vector<16x1024xf32> to vector<16x512xf32>
    %72 = arith.maximumf %70, %71 : vector<16x512xf32>
    %73 = arith.maximumf %68, %72 : vector<16x512xf32>
    %cst_58 = arith.constant 0.000000e+00 : f32
    %74 = vector.broadcast %cst_58 : f32 to vector<16x512xf32>
    %75 = arith.maximumf %73, %74 : vector<16x512xf32>
    %76 = vector.extract_strided_slice %64 {offsets = [32, 0], sizes = [16, 1024], strides = [1, 1]} : vector<64x1024xf32> to vector<16x1024xf32>
    %77 = vector.extract_strided_slice %76 {offsets = [0, 0], sizes = [16, 512], strides = [1, 1]} : vector<16x1024xf32> to vector<16x512xf32>
    %78 = vector.extract_strided_slice %76 {offsets = [0, 512], sizes = [16, 512], strides = [1, 1]} : vector<16x1024xf32> to vector<16x512xf32>
    %79 = arith.maximumf %77, %78 : vector<16x512xf32>
    %80 = vector.extract_strided_slice %64 {offsets = [48, 0], sizes = [16, 1024], strides = [1, 1]} : vector<64x1024xf32> to vector<16x1024xf32>
    %81 = vector.extract_strided_slice %80 {offsets = [0, 0], sizes = [16, 512], strides = [1, 1]} : vector<16x1024xf32> to vector<16x512xf32>
    %82 = vector.extract_strided_slice %80 {offsets = [0, 512], sizes = [16, 512], strides = [1, 1]} : vector<16x1024xf32> to vector<16x512xf32>
    %83 = arith.maximumf %81, %82 : vector<16x512xf32>
    %84 = arith.maximumf %79, %83 : vector<16x512xf32>
    %cst_59 = arith.constant 0.000000e+00 : f32
    %85 = vector.broadcast %cst_59 : f32 to vector<16x512xf32>
    %86 = arith.maximumf %84, %85 : vector<16x512xf32>
    %87 = vector.shape_cast %75 : vector<16x512xf32> to vector<2x8x512xf32>
    %88 = vector.shape_cast %86 : vector<16x512xf32> to vector<2x8x512xf32>
    %cst_60 = arith.constant 0.000000e+00 : f32
    %89 = vector.broadcast %cst_60 : f32 to vector<2x1x512xf32>
    %c0_61 = arith.constant 0 : index
    %c0_62 = arith.constant 0 : index
    %c0_63 = arith.constant 0 : index
    %c0_64 = arith.constant 0 : index
    %90 = vector.load %arg14[%c0_61, %c0_62, %c0_63, %c0_64] : memref<4x2x8x512xf32, #tpu.memory_space<vmem>>, vector<1x2x1x512xf32>
    %91 = vector.shape_cast %90 : vector<1x2x1x512xf32> to vector<2x1x512xf32>
    %92 = vector.shape_cast %89 : vector<2x1x512xf32> to vector<1x2x1x512xf32>
    tpu.vector_store %arg14[%c0_61, %c0_62, %c0_63, %c0_64], %92 {strides = array<i32>} : memref<4x2x8x512xf32, #tpu.memory_space<vmem>>, vector<1x2x1x512xf32>,
    %93 = vector.extract_strided_slice %88 {offsets = [0, 0, 0], sizes = [2, 7, 512], strides = [1, 1, 1]} : vector<2x8x512xf32> to vector<2x7x512xf32>
    %c0_65 = arith.constant 0 : index
    %c0_66 = arith.constant 0 : index
    %c1_67 = arith.constant 1 : index
    %c0_68 = arith.constant 0 : index
    %94 = vector.load %arg14[%c0_65, %c0_66, %c1_67, %c0_68] : memref<4x2x8x512xf32, #tpu.memory_space<vmem>>, vector<1x2x7x512xf32>
    %95 = vector.shape_cast %94 : vector<1x2x7x512xf32> to vector<2x7x512xf32>
    %96 = vector.shape_cast %93 : vector<2x7x512xf32> to vector<1x2x7x512xf32>
    tpu.vector_store %arg14[%c0_65, %c0_66, %c1_67, %c0_68], %96 {strides = array<i32>} : memref<4x2x8x512xf32, #tpu.memory_space<vmem>>, vector<1x2x7x512xf32>,
    %c1_69 = arith.constant 1 : index
    %c0_70 = arith.constant 0 : index
    %c0_71 = arith.constant 0 : index
    %c0_72 = arith.constant 0 : index
    %97 = vector.load %arg14[%c1_69, %c0_70, %c0_71, %c0_72] : memref<4x2x8x512xf32, #tpu.memory_space<vmem>>, vector<1x2x8x512xf32>
    %98 = vector.shape_cast %97 : vector<1x2x8x512xf32> to vector<2x8x512xf32>
    %99 = vector.shape_cast %87 : vector<2x8x512xf32> to vector<1x2x8x512xf32>
    tpu.vector_store %arg14[%c1_69, %c0_70, %c0_71, %c0_72], %99 {strides = array<i32>} : memref<4x2x8x512xf32, #tpu.memory_space<vmem>>, vector<1x2x8x512xf32>,
    %c2_73 = arith.constant 2 : index
    %c0_74 = arith.constant 0 : index
    %c0_75 = arith.constant 0 : index
    %c0_76 = arith.constant 0 : index
    %100 = vector.load %arg14[%c2_73, %c0_74, %c0_75, %c0_76] : memref<4x2x8x512xf32, #tpu.memory_space<vmem>>, vector<1x2x8x512xf32>
    %101 = vector.shape_cast %100 : vector<1x2x8x512xf32> to vector<2x8x512xf32>
    %102 = vector.shape_cast %88 : vector<2x8x512xf32> to vector<1x2x8x512xf32>
    tpu.vector_store %arg14[%c2_73, %c0_74, %c0_75, %c0_76], %102 {strides = array<i32>} : memref<4x2x8x512xf32, #tpu.memory_space<vmem>>, vector<1x2x8x512xf32>,
    %103 = vector.extract_strided_slice %87 {offsets = [0, 1, 0], sizes = [2, 6, 512], strides = [1, 1, 1]} : vector<2x8x512xf32> to vector<2x6x512xf32>
    %c3_77 = arith.constant 3 : index
    %c0_78 = arith.constant 0 : index
    %c0_79 = arith.constant 0 : index
    %c0_80 = arith.constant 0 : index
    %104 = vector.load %arg14[%c3_77, %c0_78, %c0_79, %c0_80] : memref<4x2x8x512xf32, #tpu.memory_space<vmem>>, vector<1x2x6x512xf32>
    %105 = vector.shape_cast %104 : vector<1x2x6x512xf32> to vector<2x6x512xf32>
    %106 = vector.shape_cast %103 : vector<2x6x512xf32> to vector<1x2x6x512xf32>
    tpu.vector_store %arg14[%c3_77, %c0_78, %c0_79, %c0_80], %106 {strides = array<i32>} : memref<4x2x8x512xf32, #tpu.memory_space<vmem>>, vector<1x2x6x512xf32>,
    %cst_81 = arith.constant 0.000000e+00 : f32
    %107 = vector.broadcast %cst_81 : f32 to vector<2x1x512xf32>
    %c3_82 = arith.constant 3 : index
    %c0_83 = arith.constant 0 : index
    %c6_84 = arith.constant 6 : index
    %c0_85 = arith.constant 0 : index
    %108 = vector.load %arg14[%c3_82, %c0_83, %c6_84, %c0_85] : memref<4x2x8x512xf32, #tpu.memory_space<vmem>>, vector<1x2x1x512xf32>
    %109 = vector.shape_cast %108 : vector<1x2x1x512xf32> to vector<2x1x512xf32>
    %110 = vector.shape_cast %107 : vector<2x1x512xf32> to vector<1x2x1x512xf32>
    tpu.vector_store %arg14[%c3_82, %c0_83, %c6_84, %c0_85], %110 {strides = array<i32>} : memref<4x2x8x512xf32, #tpu.memory_space<vmem>>, vector<1x2x1x512xf32>,
    %c0_86 = arith.constant 0 : index
    %c0_87 = arith.constant 0 : index
    %c0_88 = arith.constant 0 : index
    %c0_89 = arith.constant 0 : index
    %111 = vector.load %arg14[%c0_86, %c0_87, %c0_88, %c0_89] : memref<4x2x8x512xf32, #tpu.memory_space<vmem>>, vector<2x2x8x512xf32>
    %112 = vector.shape_cast %111 : vector<2x2x8x512xf32> to vector<32x512xf32>
    %113 = arith.truncf %112 : vector<32x512xf32> to vector<32x512xbf16>
    %c1_90 = arith.constant 1 : index
    %c0_91 = arith.constant 0 : index
    %c0_92 = arith.constant 0 : index
    %c0_93 = arith.constant 0 : index
    %114 = vector.load %arg14[%c1_90, %c0_91, %c0_92, %c0_93] : memref<4x2x8x512xf32, #tpu.memory_space<vmem>>, vector<2x2x8x512xf32>
    %115 = vector.shape_cast %114 : vector<2x2x8x512xf32> to vector<32x512xf32>
    %116 = arith.truncf %115 : vector<32x512xf32> to vector<32x512xbf16>
    %c2_94 = arith.constant 2 : index
    %c0_95 = arith.constant 0 : index
    %c0_96 = arith.constant 0 : index
    %c0_97 = arith.constant 0 : index
    %117 = vector.load %arg14[%c2_94, %c0_95, %c0_96, %c0_97] : memref<4x2x8x512xf32, #tpu.memory_space<vmem>>, vector<2x2x8x512xf32>
    %118 = vector.shape_cast %117 : vector<2x2x8x512xf32> to vector<32x512xf32>
    %119 = arith.truncf %118 : vector<32x512xf32> to vector<32x512xbf16>
    %c0_98 = arith.constant 0 : index
    %c0_99 = arith.constant 0 : index
    %c0_100 = arith.constant 0 : index
    %120 = vector.load %arg5[%c0_98, %c0_99, %c0_100] : memref<3x512x1024xbf16, #tpu.memory_space<vmem>>, vector<1x512x1024xbf16>
    %121 = vector.shape_cast %120 : vector<1x512x1024xbf16> to vector<512x1024xbf16>
    %cst_101 = arith.constant dense<0.000000e+00> : vector<32x1024xf32>
    %122 = tpu.matmul %113, %121, %cst_101 {dimension_numbers = #tpu.dot_dimension_numbers<[1], [0], [0], [1], [0, 0, 1, 1], [], []>} : vector<32x512xbf16>, vector<512x1024xbf16>, vector<32x1024xf32> -> vector<32x1024xf32>
    %c1_102 = arith.constant 1 : index
    %c0_103 = arith.constant 0 : index
    %c0_104 = arith.constant 0 : index
    %123 = vector.load %arg5[%c1_102, %c0_103, %c0_104] : memref<3x512x1024xbf16, #tpu.memory_space<vmem>>, vector<1x512x1024xbf16>
    %124 = vector.shape_cast %123 : vector<1x512x1024xbf16> to vector<512x1024xbf16>
    %cst_105 = arith.constant dense<0.000000e+00> : vector<32x1024xf32>
    %125 = tpu.matmul %116, %124, %cst_105 {dimension_numbers = #tpu.dot_dimension_numbers<[1], [0], [0], [1], [0, 0, 1, 1], [], []>} : vector<32x512xbf16>, vector<512x1024xbf16>, vector<32x1024xf32> -> vector<32x1024xf32>
    %126 = arith.addf %122, %125 : vector<32x1024xf32>
    %c2_106 = arith.constant 2 : index
    %c0_107 = arith.constant 0 : index
    %c0_108 = arith.constant 0 : index
    %127 = vector.load %arg5[%c2_106, %c0_107, %c0_108] : memref<3x512x1024xbf16, #tpu.memory_space<vmem>>, vector<1x512x1024xbf16>
    %128 = vector.shape_cast %127 : vector<1x512x1024xbf16> to vector<512x1024xbf16>
    %cst_109 = arith.constant dense<0.000000e+00> : vector<32x1024xf32>
    %129 = tpu.matmul %119, %128, %cst_109 {dimension_numbers = #tpu.dot_dimension_numbers<[1], [0], [0], [1], [0, 0, 1, 1], [], []>} : vector<32x512xbf16>, vector<512x1024xbf16>, vector<32x1024xf32> -> vector<32x1024xf32>
    %130 = arith.addf %126, %129 : vector<32x1024xf32>
    %c0_110 = arith.constant 0 : index
    %c0_111 = arith.constant 0 : index
    %131 = vector.load %arg6[%c0_110, %c0_111] : memref<1x1024xf32, #tpu.memory_space<vmem>>, vector<1x1024xf32>
    %132 = vector.broadcast %131 : vector<1x1024xf32> to vector<32x1024xf32>
    %133 = arith.mulf %130, %132 : vector<32x1024xf32>
    %c0_112 = arith.constant 0 : index
    %c0_113 = arith.constant 0 : index
    %134 = vector.load %arg7[%c0_112, %c0_113] : memref<1x1024xf32, #tpu.memory_space<vmem>>, vector<1x1024xf32>
    %135 = vector.broadcast %134 : vector<1x1024xf32> to vector<32x1024xf32>
    %136 = arith.addf %133, %135 : vector<32x1024xf32>
    %137 = vector.extract_strided_slice %136 {offsets = [0, 0], sizes = [16, 1024], strides = [1, 1]} : vector<32x1024xf32> to vector<16x1024xf32>
    %138 = vector.extract_strided_slice %137 {offsets = [0, 0], sizes = [16, 512], strides = [1, 1]} : vector<16x1024xf32> to vector<16x512xf32>
    %139 = vector.extract_strided_slice %137 {offsets = [0, 512], sizes = [16, 512], strides = [1, 1]} : vector<16x1024xf32> to vector<16x512xf32>
    %140 = arith.maximumf %138, %139 : vector<16x512xf32>
    %141 = vector.extract_strided_slice %136 {offsets = [16, 0], sizes = [16, 1024], strides = [1, 1]} : vector<32x1024xf32> to vector<16x1024xf32>
    %142 = vector.extract_strided_slice %141 {offsets = [0, 0], sizes = [16, 512], strides = [1, 1]} : vector<16x1024xf32> to vector<16x512xf32>
    %143 = vector.extract_strided_slice %141 {offsets = [0, 512], sizes = [16, 512], strides = [1, 1]} : vector<16x1024xf32> to vector<16x512xf32>
    %144 = arith.maximumf %142, %143 : vector<16x512xf32>
    %145 = arith.maximumf %140, %144 : vector<16x512xf32>
    %cst_114 = arith.constant 0.000000e+00 : f32
    %146 = vector.broadcast %cst_114 : f32 to vector<16x512xf32>
    %147 = arith.maximumf %145, %146 : vector<16x512xf32>
    %148 = vector.shape_cast %147 : vector<16x512xf32> to vector<2x8x512xf32>
    %c0_115 = arith.constant 0 : index
    %c0_116 = arith.constant 0 : index
    %c0_117 = arith.constant 0 : index
    %149 = vector.load %arg15[%c0_115, %c0_116, %c0_117] : memref<2x8x512xf32, #tpu.memory_space<vmem>>, vector<2x8x512xf32>
    tpu.vector_store %arg15[%c0_115, %c0_116, %c0_117], %148 {strides = array<i32>} : memref<2x8x512xf32, #tpu.memory_space<vmem>>, vector<2x8x512xf32>,
    %cst_118 = arith.constant 0.000000e+00 : f32
    %150 = vector.broadcast %cst_118 : f32 to vector<2x128xf32>
    %c0_119 = arith.constant 0 : index
    %c0_120 = arith.constant 0 : index
    %c0_121 = arith.constant 0 : index
    %151 = vector.load %arg15[%c0_119, %c0_120, %c0_121] : memref<2x8x512xf32, #tpu.memory_space<vmem>>, vector<2x1x512xf32>
    %152 = vector.shape_cast %151 : vector<2x1x512xf32> to vector<2x512xf32>
    %153 = arith.truncf %152 : vector<2x512xf32> to vector<2x512xbf16>
    %c0_122 = arith.constant 0 : index
    %c0_123 = arith.constant 0 : index
    %c0_124 = arith.constant 0 : index
    %154 = vector.load %arg8[%c0_122, %c0_123, %c0_124] : memref<7x512x128xbf16, #tpu.memory_space<vmem>>, vector<1x512x128xbf16>
    %155 = vector.shape_cast %154 : vector<1x512x128xbf16> to vector<512x128xbf16>
    %cst_125 = arith.constant dense<0.000000e+00> : vector<2x128xf32>
    %156 = tpu.matmul %153, %155, %cst_125 {dimension_numbers = #tpu.dot_dimension_numbers<[1], [0], [0], [1], [0, 0, 1, 1], [], []>} : vector<2x512xbf16>, vector<512x128xbf16>, vector<2x128xf32> -> vector<2x128xf32>
    %157 = arith.addf %150, %156 : vector<2x128xf32>
    %c0_126 = arith.constant 0 : index
    %c1_127 = arith.constant 1 : index
    %c0_128 = arith.constant 0 : index
    %158 = vector.load %arg15[%c0_126, %c1_127, %c0_128] : memref<2x8x512xf32, #tpu.memory_space<vmem>>, vector<2x1x512xf32>
    %159 = vector.shape_cast %158 : vector<2x1x512xf32> to vector<2x512xf32>
    %160 = arith.truncf %159 : vector<2x512xf32> to vector<2x512xbf16>
    %c1_129 = arith.constant 1 : index
    %c0_130 = arith.constant 0 : index
    %c0_131 = arith.constant 0 : index
    %161 = vector.load %arg8[%c1_129, %c0_130, %c0_131] : memref<7x512x128xbf16, #tpu.memory_space<vmem>>, vector<1x512x128xbf16>
    %162 = vector.shape_cast %161 : vector<1x512x128xbf16> to vector<512x128xbf16>
    %cst_132 = arith.constant dense<0.000000e+00> : vector<2x128xf32>
    %163 = tpu.matmul %160, %162, %cst_132 {dimension_numbers = #tpu.dot_dimension_numbers<[1], [0], [0], [1], [0, 0, 1, 1], [], []>} : vector<2x512xbf16>, vector<512x128xbf16>, vector<2x128xf32> -> vector<2x128xf32>
    %164 = arith.addf %157, %163 : vector<2x128xf32>
    %c0_133 = arith.constant 0 : index
    %c2_134 = arith.constant 2 : index
    %c0_135 = arith.constant 0 : index
    %165 = vector.load %arg15[%c0_133, %c2_134, %c0_135] : memref<2x8x512xf32, #tpu.memory_space<vmem>>, vector<2x1x512xf32>
    %166 = vector.shape_cast %165 : vector<2x1x512xf32> to vector<2x512xf32>
    %167 = arith.truncf %166 : vector<2x512xf32> to vector<2x512xbf16>
    %c2_136 = arith.constant 2 : index
    %c0_137 = arith.constant 0 : index
    %c0_138 = arith.constant 0 : index
    %168 = vector.load %arg8[%c2_136, %c0_137, %c0_138] : memref<7x512x128xbf16, #tpu.memory_space<vmem>>, vector<1x512x128xbf16>
    %169 = vector.shape_cast %168 : vector<1x512x128xbf16> to vector<512x128xbf16>
    %cst_139 = arith.constant dense<0.000000e+00> : vector<2x128xf32>
    %170 = tpu.matmul %167, %169, %cst_139 {dimension_numbers = #tpu.dot_dimension_numbers<[1], [0], [0], [1], [0, 0, 1, 1], [], []>} : vector<2x512xbf16>, vector<512x128xbf16>, vector<2x128xf32> -> vector<2x128xf32>
    %171 = arith.addf %164, %170 : vector<2x128xf32>
    %c0_140 = arith.constant 0 : index
    %c3_141 = arith.constant 3 : index
    %c0_142 = arith.constant 0 : index
    %172 = vector.load %arg15[%c0_140, %c3_141, %c0_142] : memref<2x8x512xf32, #tpu.memory_space<vmem>>, vector<2x1x512xf32>
    %173 = vector.shape_cast %172 : vector<2x1x512xf32> to vector<2x512xf32>
    %174 = arith.truncf %173 : vector<2x512xf32> to vector<2x512xbf16>
    %c3_143 = arith.constant 3 : index
    %c0_144 = arith.constant 0 : index
    %c0_145 = arith.constant 0 : index
    %175 = vector.load %arg8[%c3_143, %c0_144, %c0_145] : memref<7x512x128xbf16, #tpu.memory_space<vmem>>, vector<1x512x128xbf16>
    %176 = vector.shape_cast %175 : vector<1x512x128xbf16> to vector<512x128xbf16>
    %cst_146 = arith.constant dense<0.000000e+00> : vector<2x128xf32>
    %177 = tpu.matmul %174, %176, %cst_146 {dimension_numbers = #tpu.dot_dimension_numbers<[1], [0], [0], [1], [0, 0, 1, 1], [], []>} : vector<2x512xbf16>, vector<512x128xbf16>, vector<2x128xf32> -> vector<2x128xf32>
    %178 = arith.addf %171, %177 : vector<2x128xf32>
    %c0_147 = arith.constant 0 : index
    %c4_148 = arith.constant 4 : index
    %c0_149 = arith.constant 0 : index
    %179 = vector.load %arg15[%c0_147, %c4_148, %c0_149] : memref<2x8x512xf32, #tpu.memory_space<vmem>>, vector<2x1x512xf32>
    %180 = vector.shape_cast %179 : vector<2x1x512xf32> to vector<2x512xf32>
    %181 = arith.truncf %180 : vector<2x512xf32> to vector<2x512xbf16>
    %c4_150 = arith.constant 4 : index
    %c0_151 = arith.constant 0 : index
    %c0_152 = arith.constant 0 : index
    %182 = vector.load %arg8[%c4_150, %c0_151, %c0_152] : memref<7x512x128xbf16, #tpu.memory_space<vmem>>, vector<1x512x128xbf16>
    %183 = vector.shape_cast %182 : vector<1x512x128xbf16> to vector<512x128xbf16>
    %cst_153 = arith.constant dense<0.000000e+00> : vector<2x128xf32>
    %184 = tpu.matmul %181, %183, %cst_153 {dimension_numbers = #tpu.dot_dimension_numbers<[1], [0], [0], [1], [0, 0, 1, 1], [], []>} : vector<2x512xbf16>, vector<512x128xbf16>, vector<2x128xf32> -> vector<2x128xf32>
    %185 = arith.addf %178, %184 : vector<2x128xf32>
    %c0_154 = arith.constant 0 : index
    %c5_155 = arith.constant 5 : index
    %c0_156 = arith.constant 0 : index
    %186 = vector.load %arg15[%c0_154, %c5_155, %c0_156] : memref<2x8x512xf32, #tpu.memory_space<vmem>>, vector<2x1x512xf32>
    %187 = vector.shape_cast %186 : vector<2x1x512xf32> to vector<2x512xf32>
    %188 = arith.truncf %187 : vector<2x512xf32> to vector<2x512xbf16>
    %c5_157 = arith.constant 5 : index
    %c0_158 = arith.constant 0 : index
    %c0_159 = arith.constant 0 : index
    %189 = vector.load %arg8[%c5_157, %c0_158, %c0_159] : memref<7x512x128xbf16, #tpu.memory_space<vmem>>, vector<1x512x128xbf16>
    %190 = vector.shape_cast %189 : vector<1x512x128xbf16> to vector<512x128xbf16>
    %cst_160 = arith.constant dense<0.000000e+00> : vector<2x128xf32>
    %191 = tpu.matmul %188, %190, %cst_160 {dimension_numbers = #tpu.dot_dimension_numbers<[1], [0], [0], [1], [0, 0, 1, 1], [], []>} : vector<2x512xbf16>, vector<512x128xbf16>, vector<2x128xf32> -> vector<2x128xf32>
    %192 = arith.addf %185, %191 : vector<2x128xf32>
    %c0_161 = arith.constant 0 : index
    %c6_162 = arith.constant 6 : index
    %c0_163 = arith.constant 0 : index
    %193 = vector.load %arg15[%c0_161, %c6_162, %c0_163] : memref<2x8x512xf32, #tpu.memory_space<vmem>>, vector<2x1x512xf32>
    %194 = vector.shape_cast %193 : vector<2x1x512xf32> to vector<2x512xf32>
    %195 = arith.truncf %194 : vector<2x512xf32> to vector<2x512xbf16>
    %c6_164 = arith.constant 6 : index
    %c0_165 = arith.constant 0 : index
    %c0_166 = arith.constant 0 : index
    %196 = vector.load %arg8[%c6_164, %c0_165, %c0_166] : memref<7x512x128xbf16, #tpu.memory_space<vmem>>, vector<1x512x128xbf16>
    %197 = vector.shape_cast %196 : vector<1x512x128xbf16> to vector<512x128xbf16>
    %cst_167 = arith.constant dense<0.000000e+00> : vector<2x128xf32>
    %198 = tpu.matmul %195, %197, %cst_167 {dimension_numbers = #tpu.dot_dimension_numbers<[1], [0], [0], [1], [0, 0, 1, 1], [], []>} : vector<2x512xbf16>, vector<512x128xbf16>, vector<2x128xf32> -> vector<2x128xf32>
    %199 = arith.addf %192, %198 : vector<2x128xf32>
    %c0_168 = arith.constant 0 : index
    %c0_169 = arith.constant 0 : index
    %200 = vector.load %arg9[%c0_168, %c0_169] : memref<1x128xf32, #tpu.memory_space<vmem>>, vector<1x128xf32>
    %201 = vector.broadcast %200 : vector<1x128xf32> to vector<2x128xf32>
    %202 = arith.addf %199, %201 : vector<2x128xf32>
    %cst_170 = arith.constant 0.000000e+00 : f32
    %203 = vector.broadcast %cst_170 : f32 to vector<2x128xf32>
    %204 = arith.maximumf %202, %203 : vector<2x128xf32>
    %205 = arith.truncf %204 : vector<2x128xf32> to vector<2x128xbf16>
    %c0_171 = arith.constant 0 : index
    %c0_172 = arith.constant 0 : index
    %206 = vector.load %arg10[%c0_171, %c0_172] : memref<128x128xbf16, #tpu.memory_space<vmem>>, vector<128x128xbf16>
    %cst_173 = arith.constant dense<0.000000e+00> : vector<2x128xf32>
    %207 = tpu.matmul %205, %206, %cst_173 {dimension_numbers = #tpu.dot_dimension_numbers<[1], [0], [0], [1], [0, 0, 1, 1], [], []>} : vector<2x128xbf16>, vector<128x128xbf16>, vector<2x128xf32> -> vector<2x128xf32>
    %c0_174 = arith.constant 0 : index
    %c0_175 = arith.constant 0 : index
    %208 = vector.load %arg11[%c0_174, %c0_175] : memref<1x128xf32, #tpu.memory_space<vmem>>, vector<1x128xf32>
    %209 = vector.broadcast %208 : vector<1x128xf32> to vector<2x128xf32>
    %210 = arith.addf %207, %209 : vector<2x128xf32>
    %c0_176 = arith.constant 0 : index
    %c0_177 = arith.constant 0 : index
    %211 = vector.load %arg12[%c0_176, %c0_177] : memref<2x128xf32, #tpu.memory_space<vmem>>, vector<2x128xf32>
    tpu.vector_store %arg12[%c0_176, %c0_177], %210 {strides = array<i32>} : memref<2x128xf32, #tpu.memory_space<vmem>>, vector<2x128xf32>,
    return
  }
  func.func @transform_0(%arg0: i32) -> (i32, i32, i32, i32) {
    %c0_i32 = arith.constant 0 : i32
    %c0_i32_0 = arith.constant 0 : i32
    %c0_i32_1 = arith.constant 0 : i32
    %c0_i32_2 = arith.constant 0 : i32
    return %arg0, %c0_i32, %c0_i32_0, %c0_i32_1 : i32, i32, i32, i32
  }
  func.func @transform_1(%arg0: i32) -> (i32, i32, i32) {
    %c0_i32 = arith.constant 0 : i32
    %c0_i32_0 = arith.constant 0 : i32
    %c0_i32_1 = arith.constant 0 : i32
    %c0_i32_2 = arith.constant 0 : i32
    return %c0_i32, %c0_i32_0, %c0_i32_1 : i32, i32, i32
  }
  func.func @transform_2(%arg0: i32) -> (i32, i32) {
    %c0_i32 = arith.constant 0 : i32
    %c0_i32_0 = arith.constant 0 : i32
    %c0_i32_1 = arith.constant 0 : i32
    return %c0_i32, %c0_i32_0 : i32, i32
  }
  func.func @transform_3(%arg0: i32) -> (i32, i32) {
    %c0_i32 = arith.constant 0 : i32
    %c0_i32_0 = arith.constant 0 : i32
    %c0_i32_1 = arith.constant 0 : i32
    return %c0_i32, %c0_i32_0 : i32, i32
  }
  func.func @transform_4(%arg0: i32) -> (i32, i32, i32) {
    %c0_i32 = arith.constant 0 : i32
    %c0_i32_0 = arith.constant 0 : i32
    %c0_i32_1 = arith.constant 0 : i32
    %c0_i32_2 = arith.constant 0 : i32
    return %c0_i32, %c0_i32_0, %c0_i32_1 : i32, i32, i32
  }
  func.func @transform_5(%arg0: i32) -> (i32, i32) {
    %c0_i32 = arith.constant 0 : i32
    %c0_i32_0 = arith.constant 0 : i32
    %c0_i32_1 = arith.constant 0 : i32
    return %c0_i32, %c0_i32_0 : i32, i32
  }
  func.func @transform_6(%arg0: i32) -> (i32, i32) {
    %c0_i32 = arith.constant 0 : i32
    %c0_i32_0 = arith.constant 0 : i32
    %c0_i32_1 = arith.constant 0 : i32
    return %c0_i32, %c0_i32_0 : i32, i32
  }
  func.func @transform_7(%arg0: i32) -> (i32, i32, i32) {
    %c0_i32 = arith.constant 0 : i32
    %c0_i32_0 = arith.constant 0 : i32
    %c0_i32_1 = arith.constant 0 : i32
    %c0_i32_2 = arith.constant 0 : i32
    return %c0_i32, %c0_i32_0, %c0_i32_1 : i32, i32, i32
  }
  func.func @transform_8(%arg0: i32) -> (i32, i32) {
    %c0_i32 = arith.constant 0 : i32
    %c0_i32_0 = arith.constant 0 : i32
    %c0_i32_1 = arith.constant 0 : i32
    return %c0_i32, %c0_i32_0 : i32, i32
  }
  func.func @transform_9(%arg0: i32) -> (i32, i32) {
    %c0_i32 = arith.constant 0 : i32
    %c0_i32_0 = arith.constant 0 : i32
    %c0_i32_1 = arith.constant 0 : i32
    return %c0_i32, %c0_i32_0 : i32, i32
  }
  func.func @transform_10(%arg0: i32) -> (i32, i32) {
    %c0_i32 = arith.constant 0 : i32
    %c0_i32_0 = arith.constant 0 : i32
    %c0_i32_1 = arith.constant 0 : i32
    return %c0_i32, %c0_i32_0 : i32, i32
  }
  func.func @transform_11(%arg0: i32) -> (i32, i32) {
    %c0_i32 = arith.constant 0 : i32
    %c0_i32_0 = arith.constant 0 : i32
    return %arg0, %c0_i32 : i32, i32
  }
}

</mosaic_0001>

<bundles_post_ra>
// kernel: tile.23
= control target key start
LH: loop header
LB: loop body
LE: loop exit
PB: predicated region body
PF: predicated region fallthrough
CT: control target
= control target key end

     0   :  { %s28_s0 = inlined_call_operand.vmem [shape: f32[32], index: 0, kind: input, shape index: {}]   ;;  %s29_s1 = inlined_call_operand.vmem [shape: f32[14,32], index: 1, kind: output, shape index: {}]  }
   0x1   :  { %v4_v0 = vld [vmem:[%s28_s0] ss:$0 sm:$0xff] }
   0x2   :  { %5 = vst [vmem:[%s29_s1] sm:$0xff] %v4_v0  ;;  %8 = vst [vmem:[%s29_s1 + $0x8] sm:$0xff] %v4_v0 }

// kernel: tile.24
= control target key start
LH: loop header
LB: loop body
LE: loop exit
PB: predicated region body
PF: predicated region fallthrough
CT: control target
= control target key end

     0   :  { %s35_s8 = smov 96   ;;  %vm3_vm0 = vcmask 261120   ;;  %s37_s15 = smov 64   ;;  %vm9_vm1 = vcmask 1048320   ;;  %vm15_vm2 = vcmask 785920   ;;  %vm21_vm3 = vcmask 523520   ;;  %s63_s0 = inlined_call_operand.vmem [shape: f32[14,32], index: 0, kind: input, shape index: {}]   ;;  %s64_s1 = inlined_call_operand.vmem [shape: f32[448], index: 1, kind: output, shape index: {}]  }
   0x1   :  { %v29_v0 = vld [vmem:[%s63_s0 + $0x3] ss:$4 sm:$0x7]   ;;  %v30_v1 = vld [vmem:[%s63_s0 + $0x2] ss:$4 sm:$0x7]  }
   0x2   :  { %7 = vrot.lane.b32.xlu0 %v29_v0, %s35_s8  ;;  %v31_v2 = vld [vmem:[%s63_s0 + $0x1] ss:$4 sm:$0xf]   ;;  %v2_v3 = vld [vmem:[%s63_s0] ss:$4 sm:$0xf]  }
   0x3   :  { %s36_s0 = smov 32   ;;  %4 = vst.msk [vmem:[#allocation0] sm:$0xf] %vm3_vm0, %v2_v3  }
   0x4   :  { %19 = vrot.lane.b32.xlu1 %v31_v2, %s36_s0 }
   0x6   :  { %13 = vrot.lane.b32.xlu0 %v30_v1, %s37_s15 }
  0x74   :  { %v8_v4 = vpop.permute.xlu0 %7  }
  0x75   :  { %10 = vst.msk [vmem:[#allocation0] sm:$0x7] %vm9_vm1, %v8_v4  }
  0x76   :  { %v20_v5 = vpop.permute.xlu1 %19  }
  0x78   :  { %v14_v6 = vpop.permute.xlu0 %13  }
  0x79   :  { %16 = vst.msk [vmem:[#allocation0] sm:$0x7] %vm15_vm2, %v14_v6  }
  0x7a   :  { %22 = vst.msk [vmem:[#allocation0] sm:$0xf] %vm21_vm3, %v20_v5  }
  0x81   :  { %v26_v7 = vld [vmem:[#allocation0] sm:$0xf] }
  0x82   :  { %28 = vst [vmem:[%s64_s1] sm:$0xf] %v26_v7 }

// kernel: tile.34
= control target key start
LH: loop header
LB: loop body
LE: loop exit
PB: predicated region body
PF: predicated region fallthrough
CT: control target
= control target key end

     0   :  { %vm3_vm0 = vcmask 523264   ;;  %s19_s8 = smov 64   ;;  %vm9_vm1 = vcmask 1048064   ;;  %s39_s0 = inlined_call_operand.vmem [shape: f32[7,64], index: 0, kind: input, shape index: {}]   ;;  %s40_s1 = inlined_call_operand.vmem [shape: f32[448], index: 1, kind: output, shape index: {}]  }
   0x1   :  { %v17_v0 = vld [vmem:[%s39_s0 + $0x1] ss:$2 sm:$0x7]   ;;  %v2_v1 = vld [vmem:[%s39_s0] ss:$2 sm:$0xf]  }
   0x2   :  { %7 = vrot.lane.b32.xlu0 %v17_v0, %s19_s8  ;;  %4 = vst.msk [vmem:[#allocation0] sm:$0xf] %vm3_vm0, %v2_v1  }
  0x74   :  { %v8_v2 = vpop.permute.xlu0 %7  }
  0x75   :  { %10 = vst.msk [vmem:[#allocation0] sm:$0x7] %vm9_vm1, %v8_v2  }
  0x7c   :  { %v14_v3 = vld [vmem:[#allocation0] sm:$0xf] }
  0x7d   :  { %16 = vst [vmem:[%s40_s1] sm:$0xf] %v14_v3 }

// kernel: tile.33
= control target key start
LH: loop header
LB: loop body
LE: loop exit
PB: predicated region body
PF: predicated region fallthrough
CT: control target
= control target key end

     0   :  { %s22_s0 = inlined_call_operand.vmem [shape: f32[64], index: 0, kind: input, shape index: {}]   ;;  %s23_s1 = inlined_call_operand.vmem [shape: f32[7,64], index: 1, kind: output, shape index: {}]  }
   0x1   :  { %v4_v0 = vld [vmem:[%s22_s0] ss:$0 sm:$0xff] }
   0x2   :  { %5 = vst [vmem:[%s23_s1] sm:$0xff] %v4_v0 }

// kernel: mnist_net_forward.1
= control target key start
LH: loop header
LB: loop body
LE: loop exit
PB: predicated region body
PF: predicated region fallthrough
CT: control target
= control target key end

     0   :  { %v14953_v8 = vmov 0   ;;  %v19643_v9 = vmov 0.0   ;;  %s19631_s0 = inlined_call_operand.vmem [shape: f32[2,4,7,128], index: 0, kind: input, shape index: {}]   ;;  %s19632_s1 = inlined_call_operand.vmem [shape: bf16[3,128,1024], index: 1, kind: input, shape index: {}]   ;;  %s19633_s2 = inlined_call_operand.vmem [shape: f32[1,1024], index: 2, kind: input, shape index: {}]   ;;  %s19634_s3 = inlined_call_operand.vmem [shape: f32[1,1024], index: 3, kind: input, shape index: {}]   ;;  %s19635_s4 = inlined_call_operand.vmem [shape: bf16[3,512,1024], index: 4, kind: input, shape index: {}]   ;;  %s19636_s5 = inlined_call_operand.vmem [shape: f32[1,1024], index: 5, kind: input, shape index: {}]   ;;  %s19637_s6 = inlined_call_operand.vmem [shape: f32[1,1024], index: 6, kind: input, shape index: {}]   ;;  %s19638_s7 = inlined_call_operand.vmem [shape: bf16[7,512,128], index: 7, kind: input, shape index: {}]   ;;  %s19639_s8 = inlined_call_operand.vmem [shape: f32[1,128], index: 8, kind: input, shape index: {}]   ;;  %s19640_s9 = inlined_call_operand.vmem [shape: bf16[128,128], index: 9, kind: input, shape index: {}]   ;;  %s19641_s10 = inlined_call_operand.vmem [shape: f32[1,128], index: 10, kind: input, shape index: {}]   ;;  %s19642_s11 = inlined_call_operand.hbm [shape: f32[2,128], index: 11, kind: output, shape index: {}]  }
   0x1   :  { %v11850_v0 = vld [vmem:[%s19632_s1 + $0x200] sm:$0xff]  ;;  %v11851_v2 = vld [vmem:[%s19632_s1 + $0x208] sm:$0xff]  ;;  %586 = vmatprep.mubr.bf16.mxu0 %v14953_v8  ;;  %659 = vmatprep.mubr.bf16.mxu1 %v14953_v8  ;;  %48 = vst [vmem:[#allocation2] sm:$0x1] %v19643_v9  ;;  %49 = vst [vmem:[#allocation2 + $0x8] sm:$0x1] %v19643_v9 }
   0x2   :  { %v11854_v1 = vld [vmem:[%s19632_s1 + $0x220] sm:$0xff]  ;;  %v11855_v4 = vld [vmem:[%s19632_s1 + $0x228] sm:$0xff]  ;;  %51 = vst [vmem:[#allocation2 + $0x56] sm:$0x1] %v19643_v9  ;;  %52 = vst [vmem:[#allocation2 + $0x5e] sm:$0x1] %v19643_v9 }
   0x3   :  { %v11915_v3 = vcombine.high %v11850_v0, %v11854_v1  ;;  %v11914_v5 = vcombine.low %v11850_v0, %v11854_v1  ;;  %v11858_v6 = vld [vmem:[%s19632_s1 + $0x240] sm:$0xff]  ;;  %v11917_v10 = vcombine.high %v11851_v2, %v11855_v4  ;;  %v11916_v11 = vcombine.low %v11851_v2, %v11855_v4  ;;  %v11859_v13 = vld [vmem:[%s19632_s1 + $0x248] sm:$0xff]  ;;  %v42_v51 = vld [vmem:[%s19631_s0 + $0x10] sm:$0x7f] }
   0x4   :  { %v11862_v7 = vld [vmem:[%s19632_s1 + $0x260] sm:$0xff]  ;;  %v11863_v14 = vld [vmem:[%s19632_s1 + $0x268] sm:$0xff]  ;;  %v46_v52 = vld [vmem:[%s19631_s0 + $0x30] sm:$0x7f]  ;;  %62 = vst [vmem:[#allocation2 + $0x30] sm:$0x7f] %v42_v51 }
   0x5   :  { %v11923_v12 = vcombine.high %v11858_v6, %v11862_v7  ;;  %v11866_v15 = vld [vmem:[%s19632_s1 + $0x280] sm:$0xff]  ;;  %554 = vmatprep.subr.bf16.mxu0 %v11915_v3  ;;  %v11925_v16 = vcombine.high %v11859_v13, %v11863_v14  ;;  %v11867_v18 = vld [vmem:[%s19632_s1 + $0x288] sm:$0xff]  ;;  %627 = vmatprep.subr.bf16.mxu1 %v11917_v10  ;;  %v11922_v20 = vcombine.low %v11858_v6, %v11862_v7  ;;  %v43_v61 = vld [vmem:[%s19631_s0 + $0x18] sm:$0x7f] }
   0x6   :  { %v11870_v17 = vld [vmem:[%s19632_s1 + $0x2a0] sm:$0xff]  ;;  %v11871_v19 = vld [vmem:[%s19632_s1 + $0x2a8] sm:$0xff]  ;;  %555 = vmatpush1.bf16.msra.mxu0 %v11914_v5  ;;  %628 = vmatpush1.bf16.msra.mxu1 %v11916_v11  ;;  %v11924_v21 = vcombine.low %v11859_v13, %v11863_v14  ;;  %63 = vst [vmem:[#allocation2 + $0x38] sm:$0x7f] %v46_v52  ;;  %v47_v62 = vld [vmem:[%s19631_s0 + $0x38] sm:$0x7f] }
   0x7   :  { %556 = vmatprep.subr.bf16.mxu0 %v11923_v12  ;;  %v11931_v22 = vcombine.high %v11866_v15, %v11870_v17  ;;  %629 = vmatprep.subr.bf16.mxu1 %v11925_v16  ;;  %v11933_v23 = vcombine.high %v11867_v18, %v11871_v19  ;;  %v11874_v24 = vld [vmem:[%s19632_s1 + $0x2c0] sm:$0xff]  ;;  %v11875_v26 = vld [vmem:[%s19632_s1 + $0x2c8] sm:$0xff]  ;;  %v11930_v28 = vcombine.low %v11866_v15, %v11870_v17  ;;  %v11852_v10 = vld [vmem:[%s19632_s1 + $0x210] sm:$0xff] }
   0x8   :  { %v11878_v25 = vld [vmem:[%s19632_s1 + $0x2e0] sm:$0xff]  ;;  %v11879_v27 = vld [vmem:[%s19632_s1 + $0x2e8] sm:$0xff]  ;;  %v11932_v29 = vcombine.low %v11867_v18, %v11871_v19  ;;  %53 = vst [vmem:[#allocation2 + $0x1] sm:$0x3f] %v43_v61  ;;  %54 = vst [vmem:[#allocation2 + $0x9] sm:$0x3f] %v47_v62 }
   0x9   :  { %v11939_v30 = vcombine.high %v11874_v24, %v11878_v25  ;;  %v11941_v31 = vcombine.high %v11875_v26, %v11879_v27  ;;  %v11882_v32 = vld [vmem:[%s19632_s1 + $0x300] sm:$0xff]  ;;  %v11883_v35 = vld [vmem:[%s19632_s1 + $0x308] sm:$0xff]  ;;  %v11938_v38 = vcombine.low %v11874_v24, %v11878_v25  ;;  %v11940_v39 = vcombine.low %v11875_v26, %v11879_v27  ;;  %65 = vst [vmem:[#allocation2 + $0x40] sm:$0x7f] %v43_v61  ;;  %v11856_v11 = vld [vmem:[%s19632_s1 + $0x230] sm:$0xff] }
   0xa   :  { %557 = vmatpush1.bf16.msra.mxu0 %v11922_v20  ;;  %630 = vmatpush1.bf16.msra.mxu1 %v11924_v21  ;;  %v11886_v33 = vld [vmem:[%s19632_s1 + $0x320] sm:$0xff]  ;;  %v11887_v36 = vld [vmem:[%s19632_s1 + $0x328] sm:$0xff]  ;;  %66 = vst [vmem:[#allocation2 + $0x48] sm:$0x7f] %v47_v62  ;;  %v11853_v12 = vld [vmem:[%s19632_s1 + $0x218] sm:$0xff]  ;;  %v11919_v18 = vcombine.high %v11852_v10, %v11856_v11  ;;  %v11918_v25 = vcombine.low %v11852_v10, %v11856_v11 }
   0xb   :  { %558 = vmatprep.subr.bf16.mxu0 %v11931_v22  ;;  %631 = vmatprep.subr.bf16.mxu1 %v11933_v23  ;;  %v40_v34 = vld [vmem:[%s19631_s0] sm:$0x7f]  ;;  %v11947_v40 = vcombine.high %v11882_v32, %v11886_v33  ;;  %v11949_v42 = vcombine.high %v11883_v35, %v11887_v36  ;;  %v41_v44 = vld [vmem:[%s19631_s0 + $0x8] sm:$0x7f]  ;;  %v11946_v48 = vcombine.low %v11882_v32, %v11886_v33  ;;  %v11857_v13 = vld [vmem:[%s19632_s1 + $0x238] sm:$0xff] }
   0xc   :  { %v44_v37 = vld [vmem:[%s19631_s0 + $0x20] sm:$0x7f]  ;;  %56 = vst [vmem:[#allocation2 + $0x10] sm:$0x7f] %v40_v34  ;;  %67 = vst [vmem:[#allocation2 + $0x4f] sm:$0x7e] %v40_v34  ;;  %v11948_v49 = vcombine.low %v11883_v35, %v11887_v36  ;;  %v11921_v19 = vcombine.high %v11853_v12, %v11857_v13  ;;  %v11920_v26 = vcombine.low %v11853_v12, %v11857_v13 }
   0xd   :  { %57 = vst [vmem:[#allocation2 + $0x18] sm:$0x7f] %v44_v37  ;;  %68 = vst [vmem:[#allocation2 + $0x57] sm:$0x7e] %v44_v37  ;;  %v11890_v41 = vld [vmem:[%s19632_s1 + $0x340] sm:$0xff]  ;;  %v11891_v46 = vld [vmem:[%s19632_s1 + $0x348] sm:$0xff] }
   0xe   :  { %559 = vmatpush1.bf16.msra.mxu0 %v11930_v28  ;;  %632 = vmatpush1.bf16.msra.mxu1 %v11932_v29  ;;  %v11894_v43 = vld [vmem:[%s19632_s1 + $0x360] sm:$0xff]  ;;  %v45_v45 = vld [vmem:[%s19631_s0 + $0x28] sm:$0x7f]  ;;  %59 = vst [vmem:[#allocation2 + $0x20] sm:$0x7f] %v41_v44  ;;  %v11860_v20 = vld [vmem:[%s19632_s1 + $0x250] sm:$0xff] }
   0xf   :  { %560 = vmatprep.subr.bf16.mxu0 %v11939_v30  ;;  %633 = vmatprep.subr.bf16.mxu1 %v11941_v31  ;;  %v11895_v47 = vld [vmem:[%s19632_s1 + $0x368] sm:$0xff]  ;;  %60 = vst [vmem:[#allocation2 + $0x28] sm:$0x7f] %v45_v45  ;;  %v11955_v50 = vcombine.high %v11890_v41, %v11894_v43  ;;  %v11898_v54 = vld [vmem:[%s19632_s1 + $0x380] sm:$0xff]  ;;  %v11954_v58 = vcombine.low %v11890_v41, %v11894_v43  ;;  %v11864_v21 = vld [vmem:[%s19632_s1 + $0x270] sm:$0xff] }
  0x10   :  { %v11957_v53 = vcombine.high %v11891_v46, %v11895_v47  ;;  %v11902_v55 = vld [vmem:[%s19632_s1 + $0x3a0] sm:$0xff]  ;;  %v11899_v56 = vld [vmem:[%s19632_s1 + $0x388] sm:$0xff]  ;;  %v11956_v59 = vcombine.low %v11891_v46, %v11895_v47  ;;  %v11861_v23 = vld [vmem:[%s19632_s1 + $0x258] sm:$0xff]  ;;  %v11927_v27 = vcombine.high %v11860_v20, %v11864_v21  ;;  %v11926_v33 = vcombine.low %v11860_v20, %v11864_v21 }
  0x11   :  { %v11903_v57 = vld [vmem:[%s19632_s1 + $0x3a8] sm:$0xff]  ;;  %v11963_v60 = vcombine.high %v11898_v54, %v11902_v55  ;;  %v11906_v0 = vld [vmem:[%s19632_s1 + $0x3c0] sm:$0xff]  ;;  %v11962_v4 = vcombine.low %v11898_v54, %v11902_v55  ;;  %v11865_v24 = vld [vmem:[%s19632_s1 + $0x278] sm:$0xff] }
  0x12   :  { %561 = vmatpush1.bf16.msra.mxu0 %v11938_v38  ;;  %634 = vmatpush1.bf16.msra.mxu1 %v11940_v39  ;;  %v11965_v63 = vcombine.high %v11899_v56, %v11903_v57  ;;  %v11910_v1 = vld [vmem:[%s19632_s1 + $0x3e0] sm:$0xff]  ;;  %v11907_v2 = vld [vmem:[%s19632_s1 + $0x3c8] sm:$0xff]  ;;  %v11964_v5 = vcombine.low %v11899_v56, %v11903_v57  ;;  %v11929_v28 = vcombine.high %v11861_v23, %v11865_v24  ;;  %v11868_v29 = vld [vmem:[%s19632_s1 + $0x290] sm:$0xff] }
  0x13   :  { %562 = vmatprep.subr.bf16.mxu0 %v11947_v40  ;;  %635 = vmatprep.subr.bf16.mxu1 %v11949_v42  ;;  %v11911_v3 = vld [vmem:[%s19632_s1 + $0x3e8] sm:$0xff]  ;;  %v11971_v6 = vcombine.high %v11906_v0, %v11910_v1  ;;  %v11970_v14 = vcombine.low %v11906_v0, %v11910_v1  ;;  %v81_v15 = vld [vmem:[#allocation2 + $0x10] sm:$0xff]  ;;  %v11869_v31 = vld [vmem:[%s19632_s1 + $0x298] sm:$0xff]  ;;  %v11928_v36 = vcombine.low %v11861_v23, %v11865_v24 }
  0x14   :  { %v11973_v7 = vcombine.high %v11907_v2, %v11911_v3  ;;  %v82_v16 = vld [vmem:[#allocation2 + $0x18] sm:$0xff]  ;;  %v11972_v17 = vcombine.low %v11907_v2, %v11911_v3  ;;  %v11872_v30 = vld [vmem:[%s19632_s1 + $0x2b0] sm:$0xff]  ;;  %v87_v10 = vld [vmem:[#allocation2 + $0x40] sm:$0xff] }
  0x15   :  { %v15161_v22 = vpack.c.bf16 %v82_v16, %v81_v15  ;;  %v11873_v32 = vld [vmem:[%s19632_s1 + $0x2b8] sm:$0xff]  ;;  %v83_v34 = vld [vmem:[#allocation2 + $0x20] sm:$0xff]  ;;  %v11935_v37 = vcombine.high %v11868_v29, %v11872_v30  ;;  %v11876_v39 = vld [vmem:[%s19632_s1 + $0x2d0] sm:$0xff]  ;;  %v11934_v44 = vcombine.low %v11868_v29, %v11872_v30 }
  0x16   :  { %563 = vmatpush1.bf16.msra.mxu0 %v11946_v48  ;;  %636 = vmatpush1.bf16.msra.mxu1 %v11948_v49  ;;  %v84_v35 = vld [vmem:[#allocation2 + $0x28] sm:$0xff]  ;;  %v11937_v38 = vcombine.high %v11869_v31, %v11873_v32  ;;  %v11880_v40 = vld [vmem:[%s19632_s1 + $0x2f0] sm:$0xff]  ;;  %v11877_v42 = vld [vmem:[%s19632_s1 + $0x2d8] sm:$0xff]  ;;  %v11936_v45 = vcombine.low %v11869_v31, %v11873_v32 }
  0x17   :  { %564 = vmatprep.subr.bf16.mxu0 %v11955_v50  ;;  %637 = vmatprep.subr.bf16.mxu1 %v11957_v53  ;;  %v15191_v41 = vpack.c.bf16 %v84_v35, %v83_v34  ;;  %v11881_v43 = vld [vmem:[%s19632_s1 + $0x2f8] sm:$0xff]  ;;  %v11943_v46 = vcombine.high %v11876_v39, %v11880_v40  ;;  %v11884_v48 = vld [vmem:[%s19632_s1 + $0x310] sm:$0xff]  ;;  %v11942_v52 = vcombine.low %v11876_v39, %v11880_v40  ;;  %v88_v11 = vld [vmem:[#allocation2 + $0x48] sm:$0xff] }
  0x18   :  { %v11945_v47 = vcombine.high %v11877_v42, %v11881_v43  ;;  %v11888_v49 = vld [vmem:[%s19632_s1 + $0x330] sm:$0xff]  ;;  %v11885_v50 = vld [vmem:[%s19632_s1 + $0x318] sm:$0xff]  ;;  %v11944_v55 = vcombine.low %v11877_v42, %v11881_v43  ;;  %v117_v34 = vld [vmem:[%s19632_s1 + $0x60] sm:$0xff] }
  0x19   :  { %v11889_v51 = vld [vmem:[%s19632_s1 + $0x338] sm:$0xff]  ;;  %v85_v53 = vld [vmem:[#allocation2 + $0x30] sm:$0xff]  ;;  %v11951_v56 = vcombine.high %v11884_v48, %v11888_v49  ;;  %v114_v35 = vld [vmem:[%s19632_s1 + $0x48] sm:$0xff] }
  0x1a   :  { %565 = vmatpush1.bf16.msra.mxu0 %v11954_v58  ;;  %638 = vmatpush1.bf16.msra.mxu1 %v11956_v59  ;;  %v86_v54 = vld [vmem:[#allocation2 + $0x38] sm:$0xff]  ;;  %v11953_v57 = vcombine.high %v11885_v50, %v11889_v51  ;;  %v11892_v58 = vld [vmem:[%s19632_s1 + $0x350] sm:$0xff]  ;;  %v11952_v0 = vcombine.low %v11885_v50, %v11889_v51  ;;  %v121_v42 = vld [vmem:[%s19632_s1 + $0x80] sm:$0xff] }
  0x1b   :  { %566 = vmatprep.subr.bf16.mxu0 %v11963_v60  ;;  %639 = vmatprep.subr.bf16.mxu1 %v11965_v63  ;;  %v11896_v59 = vld [vmem:[%s19632_s1 + $0x370] sm:$0xff]  ;;  %v15221_v60 = vpack.c.bf16 %v86_v54, %v85_v53  ;;  %v11893_v61 = vld [vmem:[%s19632_s1 + $0x358] sm:$0xff]  ;;  %v11950_v63 = vcombine.low %v11884_v48, %v11888_v49  ;;  %v125_v43 = vld [vmem:[%s19632_s1 + $0xa0] sm:$0xff] }
  0x1c   :  { %v11897_v62 = vld [vmem:[%s19632_s1 + $0x378] sm:$0xff]  ;;  %v11959_v1 = vcombine.high %v11892_v58, %v11896_v59  ;;  %v11900_v3 = vld [vmem:[%s19632_s1 + $0x390] sm:$0xff]  ;;  %v11995_v48 = vcombine.high %v121_v42, %v125_v43  ;;  %v129_v49 = vld [vmem:[%s19632_s1 + $0xc0] sm:$0xff]  ;;  %v11994_v54 = vcombine.low %v121_v42, %v125_v43 }
  0x1d   :  { %v11961_v2 = vcombine.high %v11893_v61, %v11897_v62  ;;  %v11960_v12 = vcombine.low %v11893_v61, %v11897_v62  ;;  %v11908_v15 = vld [vmem:[%s19632_s1 + $0x3d0] sm:$0xff]  ;;  %v133_v50 = vld [vmem:[%s19632_s1 + $0xe0] sm:$0xff]  ;;  %v134_v53 = vld [vmem:[%s19632_s1 + $0xe8] sm:$0xff] }
  0x1e   :  { %567 = vmatpush1.bf16.msra.mxu0 %v11962_v4  ;;  %640 = vmatpush1.bf16.msra.mxu1 %v11964_v5  ;;  %v11904_v4 = vld [vmem:[%s19632_s1 + $0x3b0] sm:$0xff]  ;;  %v11901_v5 = vld [vmem:[%s19632_s1 + $0x398] sm:$0xff]  ;;  %v142_v61 = vld [vmem:[%s19632_s1 + $0x128] sm:$0xff] }
  0x1f   :  { %568 = vmatprep.subr.bf16.mxu0 %v11971_v6  ;;  %641 = vmatprep.subr.bf16.mxu1 %v11973_v7  ;;  %v11905_v6 = vld [vmem:[%s19632_s1 + $0x3b8] sm:$0xff]  ;;  %v11958_v7 = vcombine.low %v11892_v58, %v11896_v59  ;;  %v11967_v13 = vcombine.high %v11900_v3, %v11904_v4  ;;  %v11912_v16 = vld [vmem:[%s19632_s1 + $0x3f0] sm:$0xff]  ;;  %v11966_v20 = vcombine.low %v11900_v3, %v11904_v4  ;;  %v138_v59 = vld [vmem:[%s19632_s1 + $0x108] sm:$0xff] }
  0x20   :  { %v11968_v21 = vcombine.low %v11901_v5, %v11905_v6  ;;  %v11975_v23 = vcombine.high %v11908_v15, %v11912_v16  ;;  %v11974_v29 = vcombine.low %v11908_v15, %v11912_v16  ;;  %v12003_v58 = vcombine.high %v129_v49, %v133_v50  ;;  %v146_v4 = vld [vmem:[%s19632_s1 + $0x148] sm:$0xff]  ;;  %v116_v43 = vld [vmem:[%s19632_s1 + $0x58] sm:$0xff] }
  0x21   :  { %v158_v15 = vld [vmem:[%s19632_s1 + $0x1a8] sm:$0xff] }
  0x22   :  { %569 = vmatpush1.bf16.msra.mxu0 %v11970_v14  ;;  %642 = vmatpush1.bf16.msra.mxu1 %v11972_v17  ;;  %v11969_v14 = vcombine.high %v11901_v5, %v11905_v6  ;;  %v15251_v17 = vpack.c.bf16 %v88_v11, %v87_v10  ;;  %v150_v5 = vld [vmem:[%s19632_s1 + $0x168] sm:$0xff]  ;;  %v12013_v6 = vcombine.high %v138_v59, %v142_v61  ;;  %v153_v10 = vld [vmem:[%s19632_s1 + $0x180] sm:$0xff] }
  0x23   :  { %700 = vmatprep.subr.bf16.mxu0 %v11919_v18  ;;  %773 = vmatprep.subr.bf16.mxu1 %v11921_v19  ;;  %v11909_v18 = vld [vmem:[%s19632_s1 + $0x3d8] sm:$0xff]  ;;  %v157_v11 = vld [vmem:[%s19632_s1 + $0x1a0] sm:$0xff]  ;;  %v12021_v16 = vcombine.high %v146_v4, %v150_v5 }
  0x24   :  { %v11913_v19 = vld [vmem:[%s19632_s1 + $0x3f8] sm:$0xff] }
  0x25   :  { %587 = vmatmul.mubr.bf16.vlgmr.msra.gmra.mrb[0].mxu0 %v15161_v22  ;;  %660 = vmatmul.mubr.bf16.vlgmr.msra.gmra.mrb[0].mxu1 %v15161_v22  ;;  %v11977_v24 = vcombine.high %v11909_v18, %v11913_v19  ;;  %v11976_v30 = vcombine.low %v11909_v18, %v11913_v19  ;;  %v161_v19 = vld [vmem:[%s19632_s1 + $0x1c0] sm:$0xff] }
  0x26   :  { %701 = vmatpush1.bf16.msra.mxu0 %v11918_v25  ;;  %774 = vmatpush1.bf16.msra.mxu1 %v11920_v26  ;;  %v105_v25 = vld [vmem:[%s19632_s1] sm:$0xff] }
  0x27   :  { %702 = vmatprep.subr.bf16.mxu0 %v11927_v27  ;;  %775 = vmatprep.subr.bf16.mxu1 %v11929_v28  ;;  %v109_v26 = vld [vmem:[%s19632_s1 + $0x20] sm:$0xff]  ;;  %v106_v27 = vld [vmem:[%s19632_s1 + $0x8] sm:$0xff] }
  0x28   :  { %596 = vmatprep.mubr.bf16.mxu0 %v14953_v8  ;;  %669 = vmatprep.mubr.bf16.mxu1 %v14953_v8  ;;  %v110_v28 = vld [vmem:[%s19632_s1 + $0x28] sm:$0xff]  ;;  %v11979_v31 = vcombine.high %v105_v25, %v109_v26 }
  0x29   :  { %v11981_v32 = vcombine.high %v106_v27, %v110_v28 }
  0x2a   :  { %703 = vmatpush1.bf16.msra.mxu0 %v11926_v33  ;;  %776 = vmatpush1.bf16.msra.mxu1 %v11928_v36  ;;  %v113_v33 = vld [vmem:[%s19632_s1 + $0x40] sm:$0xff]  ;;  %v118_v36 = vld [vmem:[%s19632_s1 + $0x68] sm:$0xff] }
  0x2b   :  { %704 = vmatprep.subr.bf16.mxu0 %v11935_v37  ;;  %777 = vmatprep.subr.bf16.mxu1 %v11937_v38  ;;  %v11978_v37 = vcombine.low %v105_v25, %v109_v26  ;;  %v11980_v38 = vcombine.low %v106_v27, %v110_v28  ;;  %v11987_v39 = vcombine.high %v113_v33, %v117_v34  ;;  %v166_v25 = vld [vmem:[%s19632_s1 + $0x1e8] sm:$0xff]  ;;  %v107_v28 = vld [vmem:[%s19632_s1 + $0x10] sm:$0xff] }
  0x2c   :  { %v11989_v40 = vcombine.high %v114_v35, %v118_v36  ;;  %v12026_v27 = vcombine.low %v153_v10, %v157_v11 }
  0x2d   :  { %597 = vmatmul.mubr.bf16.gmra.mrb[4].mxu0 %v15191_v41  ;;  %670 = vmatmul.mubr.bf16.gmra.mrb[4].mxu1 %v15191_v41 }
  0x2e   :  { %705 = vmatpush1.bf16.msra.mxu0 %v11934_v44  ;;  %778 = vmatpush1.bf16.msra.mxu1 %v11936_v45  ;;  %v122_v44 = vld [vmem:[%s19632_s1 + $0x88] sm:$0xff] }
  0x2f   :  { %706 = vmatprep.subr.bf16.mxu0 %v11943_v46  ;;  %779 = vmatprep.subr.bf16.mxu1 %v11945_v47  ;;  %v126_v45 = vld [vmem:[%s19632_s1 + $0xa8] sm:$0xff]  ;;  %v11986_v46 = vcombine.low %v113_v33, %v117_v34  ;;  %v11988_v47 = vcombine.low %v114_v35, %v118_v36  ;;  %v112_v33 = vld [vmem:[%s19632_s1 + $0x38] sm:$0xff]  ;;  %v69_v35 = vld [vmem:[#allocation2] sm:$0xff] }
  0x30   :  { %606 = vmatprep.mubr.bf16.mxu0 %v14953_v8  ;;  %679 = vmatprep.mubr.bf16.mxu1 %v14953_v8  ;;  %v11997_v51 = vcombine.high %v122_v44, %v126_v45  ;;  %v70_v36 = vld [vmem:[#allocation2 + $0x8] sm:$0xff] }
  0x32   :  { %707 = vmatpush1.bf16.msra.mxu0 %v11942_v52  ;;  %780 = vmatpush1.bf16.msra.mxu1 %v11944_v55  ;;  %v130_v52 = vld [vmem:[%s19632_s1 + $0xc8] sm:$0xff]  ;;  %v137_v55 = vld [vmem:[%s19632_s1 + $0x100] sm:$0xff] }
  0x33   :  { %708 = vmatprep.subr.bf16.mxu0 %v11951_v56  ;;  %781 = vmatprep.subr.bf16.mxu1 %v11953_v57  ;;  %v141_v56 = vld [vmem:[%s19632_s1 + $0x120] sm:$0xff]  ;;  %v11996_v57 = vcombine.low %v122_v44, %v126_v45  ;;  %v12005_v62 = vcombine.high %v130_v52, %v134_v53  ;;  %v120_v44 = vld [vmem:[%s19632_s1 + $0x78] sm:$0xff] }
  0x34   :  { %v12011_v3 = vcombine.high %v137_v55, %v141_v56 }
  0x35   :  { %607 = vmatmul.mubr.bf16.gmra.mrb[8].mxu0 %v15221_v60  ;;  %680 = vmatmul.mubr.bf16.gmra.mrb[8].mxu1 %v15221_v60 }
  0x36   :  { %709 = vmatpush1.bf16.msra.mxu0 %v11950_v63  ;;  %782 = vmatpush1.bf16.msra.mxu1 %v11952_v0  ;;  %v12002_v63 = vcombine.low %v129_v49, %v133_v50  ;;  %v145_v0 = vld [vmem:[%s19632_s1 + $0x140] sm:$0xff]  ;;  %v127_v49 = vld [vmem:[%s19632_s1 + $0xb0] sm:$0xff] }
  0x37   :  { %710 = vmatprep.subr.bf16.mxu0 %v11959_v1  ;;  %783 = vmatprep.subr.bf16.mxu1 %v11961_v2  ;;  %v149_v1 = vld [vmem:[%s19632_s1 + $0x160] sm:$0xff]  ;;  %v12004_v2 = vcombine.low %v130_v52, %v134_v53  ;;  %v124_v52 = vld [vmem:[%s19632_s1 + $0x98] sm:$0xff] }
  0x38   :  { %616 = vmatprep.mubr.bf16.mxu0 %v14953_v8  ;;  %689 = vmatprep.mubr.bf16.mxu1 %v14953_v8  ;;  %v12018_v18 = vcombine.low %v145_v0, %v149_v1  ;;  %v128_v53 = vld [vmem:[%s19632_s1 + $0xb8] sm:$0xff] }
  0x3a   :  { %711 = vmatpush1.bf16.msra.mxu0 %v11958_v7  ;;  %784 = vmatpush1.bf16.msra.mxu1 %v11960_v12  ;;  %v12010_v7 = vcombine.low %v137_v55, %v141_v56  ;;  %v12012_v12 = vcombine.low %v138_v59, %v142_v61  ;;  %v131_v56 = vld [vmem:[%s19632_s1 + $0xd0] sm:$0xff]  ;;  %v132_v61 = vld [vmem:[%s19632_s1 + $0xd8] sm:$0xff] }
  0x3b   :  { %712 = vmatprep.subr.bf16.mxu0 %v11967_v13  ;;  %785 = vmatprep.subr.bf16.mxu1 %v11969_v14  ;;  %v12019_v13 = vcombine.high %v145_v0, %v149_v1  ;;  %v154_v14 = vld [vmem:[%s19632_s1 + $0x188] sm:$0xff]  ;;  %v139_v1 = vld [vmem:[%s19632_s1 + $0x110] sm:$0xff] }
  0x3c   :  { %v12029_v26 = vcombine.high %v154_v14, %v158_v15 }
  0x3d   :  { %617 = vmatmul.mubr.bf16.gmra.mrb[12].mxu0 %v15251_v17  ;;  %690 = vmatmul.mubr.bf16.gmra.mrb[12].mxu1 %v15251_v17 }
  0x3e   :  { %713 = vmatpush1.bf16.msra.mxu0 %v11966_v20  ;;  %786 = vmatpush1.bf16.msra.mxu1 %v11968_v21  ;;  %v165_v20 = vld [vmem:[%s19632_s1 + $0x1e0] sm:$0xff]  ;;  %v12020_v21 = vcombine.low %v146_v4, %v150_v5  ;;  %v140_v5 = vld [vmem:[%s19632_s1 + $0x118] sm:$0xff] }
  0x3f   :  { %714 = vmatprep.subr.bf16.mxu0 %v11975_v23  ;;  %787 = vmatprep.subr.bf16.mxu1 %v11977_v24  ;;  %v12027_v23 = vcombine.high %v153_v10, %v157_v11  ;;  %v162_v24 = vld [vmem:[%s19632_s1 + $0x1c8] sm:$0xff]  ;;  %v147_v11 = vld [vmem:[%s19632_s1 + $0x150] sm:$0xff] }
  0x40   :  { %732 = vmatprep.mubr.bf16.mxu0 %v14953_v8  ;;  %805 = vmatprep.mubr.bf16.mxu1 %v14953_v8  ;;  %v12037_v34 = vcombine.high %v162_v24, %v166_v25 }
  0x42   :  { %715 = vmatpush1.bf16.msra.mxu0 %v11974_v29  ;;  %788 = vmatpush1.bf16.msra.mxu1 %v11976_v30  ;;  %v111_v29 = vld [vmem:[%s19632_s1 + $0x30] sm:$0xff]  ;;  %v12028_v30 = vcombine.low %v154_v14, %v158_v15  ;;  %v148_v15 = vld [vmem:[%s19632_s1 + $0x158] sm:$0xff] }
  0x43   :  { %1166 = vmatprep.subr.bf16.mxu0 %v11979_v31  ;;  %1239 = vmatprep.subr.bf16.mxu1 %v11981_v32  ;;  %v12035_v31 = vcombine.high %v161_v19, %v165_v20  ;;  %v108_v32 = vld [vmem:[%s19632_s1 + $0x18] sm:$0xff]  ;;  %v11983_v42 = vcombine.high %v107_v28, %v111_v29 }
  0x44   :  { %v11985_v45 = vcombine.high %v108_v32, %v112_v33  ;;  %v11984_v50 = vcombine.low %v108_v32, %v112_v33  ;;  %v164_v33 = vld [vmem:[%s19632_s1 + $0x1d8] sm:$0xff] }
  0x45   :  { %733 = vmatmul.mubr.bf16.vlgmr.msra.gmra.mrb[16].mxu0 %v15161_v22  ;;  %806 = vmatmul.mubr.bf16.vlgmr.msra.gmra.mrb[16].mxu1 %v15161_v22 }
  0x46   :  { %1167 = vmatpush1.bf16.msra.mxu0 %v11978_v37  ;;  %1240 = vmatpush1.bf16.msra.mxu1 %v11980_v38  ;;  %v12034_v37 = vcombine.low %v161_v19, %v165_v20  ;;  %v115_v38 = vld [vmem:[%s19632_s1 + $0x50] sm:$0xff] }
  0x47   :  { %1168 = vmatprep.subr.bf16.mxu0 %v11987_v39  ;;  %1241 = vmatprep.subr.bf16.mxu1 %v11989_v40  ;;  %v119_v39 = vld [vmem:[%s19632_s1 + $0x70] sm:$0xff]  ;;  %v12036_v40 = vcombine.low %v162_v24, %v166_v25  ;;  %v156_v25 = vld [vmem:[%s19632_s1 + $0x198] sm:$0xff] }
  0x48   :  { %742 = vmatprep.mubr.bf16.mxu0 %v14953_v8  ;;  %815 = vmatprep.mubr.bf16.mxu1 %v14953_v8  ;;  %v11990_v55 = vcombine.low %v115_v38, %v119_v39  ;;  %v155_v20 = vld [vmem:[%s19632_s1 + $0x190] sm:$0xff] }
  0x4a   :  { %1169 = vmatpush1.bf16.msra.mxu0 %v11986_v46  ;;  %1242 = vmatpush1.bf16.msra.mxu1 %v11988_v47  ;;  %v15399_v46 = vpack.c.bf16 %v70_v36, %v69_v35  ;;  %v11982_v47 = vcombine.low %v107_v28, %v111_v29  ;;  %v163_v29 = vld [vmem:[%s19632_s1 + $0x1d0] sm:$0xff] }
  0x4b   :  { %1170 = vmatprep.subr.bf16.mxu0 %v11995_v48  ;;  %1243 = vmatprep.subr.bf16.mxu1 %v11997_v51  ;;  %v123_v48 = vld [vmem:[%s19632_s1 + $0x90] sm:$0xff]  ;;  %v11991_v51 = vcombine.high %v115_v38, %v119_v39  ;;  %v12046_v38 = vld [vmem:[%s19632_s1 + $0x420] sm:$0xff] }
  0x4c   :  { %v11999_v59 = vcombine.high %v123_v48, %v127_v49  ;;  %v11998_v0 = vcombine.low %v123_v48, %v127_v49  ;;  %v12054_v48 = vld [vmem:[%s19632_s1 + $0x460] sm:$0xff] }
  0x4d   :  { %743 = vmatmul.mubr.bf16.gmra.mrb[20].mxu0 %v15191_v41  ;;  %816 = vmatmul.mubr.bf16.gmra.mrb[20].mxu1 %v15191_v41 }
  0x4e   :  { %1171 = vmatpush1.bf16.msra.mxu0 %v11994_v54  ;;  %1244 = vmatpush1.bf16.msra.mxu1 %v11996_v57  ;;  %v11993_v54 = vcombine.high %v116_v43, %v120_v44  ;;  %v135_v57 = vld [vmem:[%s19632_s1 + $0xf0] sm:$0xff] }
  0x4f   :  { %1172 = vmatprep.subr.bf16.mxu0 %v12003_v58  ;;  %1245 = vmatprep.subr.bf16.mxu1 %v12005_v62  ;;  %v11992_v58 = vcombine.low %v116_v43, %v120_v44  ;;  %v136_v62 = vld [vmem:[%s19632_s1 + $0xf8] sm:$0xff]  ;;  %v12007_v4 = vcombine.high %v131_v56, %v135_v57  ;;  %v12006_v10 = vcombine.low %v131_v56, %v135_v57  ;;  %v12047_v43 = vld [vmem:[%s19632_s1 + $0x428] sm:$0xff]  ;;  %v12062_v56 = vld [vmem:[%s19632_s1 + $0x4a0] sm:$0xff] }
  0x50   :  { %752 = vmatprep.mubr.bf16.mxu0 %v14953_v8  ;;  %825 = vmatprep.mubr.bf16.mxu1 %v14953_v8 }
  0x52   :  { %1173 = vmatpush1.bf16.msra.mxu0 %v12002_v63  ;;  %1246 = vmatpush1.bf16.msra.mxu1 %v12004_v2  ;;  %v12001_v63 = vcombine.high %v124_v52, %v128_v53  ;;  %v143_v2 = vld [vmem:[%s19632_s1 + $0x130] sm:$0xff] }
  0x53   :  { %1174 = vmatprep.subr.bf16.mxu0 %v12011_v3  ;;  %1247 = vmatprep.subr.bf16.mxu1 %v12013_v6  ;;  %v12000_v3 = vcombine.low %v124_v52, %v128_v53  ;;  %v144_v6 = vld [vmem:[%s19632_s1 + $0x138] sm:$0xff]  ;;  %v12015_v14 = vcombine.high %v139_v1, %v143_v2  ;;  %v12014_v19 = vcombine.low %v139_v1, %v143_v2  ;;  %v12055_v52 = vld [vmem:[%s19632_s1 + $0x468] sm:$0xff]  ;;  %v12070_v1 = vld [vmem:[%s19632_s1 + $0x4e0] sm:$0xff] }
  0x55   :  { %753 = vmatmul.mubr.bf16.gmra.mrb[24].mxu0 %v15221_v60  ;;  %826 = vmatmul.mubr.bf16.gmra.mrb[24].mxu1 %v15221_v60 }
  0x56   :  { %1175 = vmatpush1.bf16.msra.mxu0 %v12010_v7  ;;  %1248 = vmatpush1.bf16.msra.mxu1 %v12012_v12  ;;  %v12009_v7 = vcombine.high %v132_v61, %v136_v62  ;;  %v151_v12 = vld [vmem:[%s19632_s1 + $0x170] sm:$0xff] }
  0x57   :  { %1176 = vmatprep.subr.bf16.mxu0 %v12019_v13  ;;  %1249 = vmatprep.subr.bf16.mxu1 %v12021_v16  ;;  %v12008_v13 = vcombine.low %v132_v61, %v136_v62  ;;  %v152_v16 = vld [vmem:[%s19632_s1 + $0x178] sm:$0xff]  ;;  %v12023_v24 = vcombine.high %v147_v11, %v151_v12  ;;  %v12022_v28 = vcombine.low %v147_v11, %v151_v12  ;;  %v12063_v61 = vld [vmem:[%s19632_s1 + $0x4a8] sm:$0xff] }
  0x58   :  { %762 = vmatprep.mubr.bf16.mxu0 %v14953_v8  ;;  %835 = vmatprep.mubr.bf16.mxu1 %v14953_v8 }
  0x5a   :  { %1177 = vmatpush1.bf16.msra.mxu0 %v12018_v18  ;;  %1250 = vmatpush1.bf16.msra.mxu1 %v12020_v21  ;;  %v12017_v18 = vcombine.high %v140_v5, %v144_v6  ;;  %v159_v21 = vld [vmem:[%s19632_s1 + $0x1b0] sm:$0xff] }
  0x5b   :  { %1178 = vmatprep.subr.bf16.mxu0 %v12027_v23  ;;  %1251 = vmatprep.subr.bf16.mxu1 %v12029_v26  ;;  %v12016_v23 = vcombine.low %v140_v5, %v144_v6  ;;  %v160_v26 = vld [vmem:[%s19632_s1 + $0x1b8] sm:$0xff]  ;;  %v12031_v32 = vcombine.high %v155_v20, %v159_v21  ;;  %v12030_v36 = vcombine.low %v155_v20, %v159_v21 }
  0x5c   :  { %v12033_v35 = vcombine.high %v156_v25, %v160_v26  ;;  %v12032_v39 = vcombine.low %v156_v25, %v160_v26  ;;  %v12090_v26 = vld [vmem:[%s19632_s1 + $0x580] sm:$0xff] }
  0x5d   :  { %763 = vmatmul.mubr.bf16.gmra.mrb[28].mxu0 %v15251_v17  ;;  %836 = vmatmul.mubr.bf16.gmra.mrb[28].mxu1 %v15251_v17 }
  0x5e   :  { %1179 = vmatpush1.bf16.msra.mxu0 %v12026_v27  ;;  %1252 = vmatpush1.bf16.msra.mxu1 %v12028_v30  ;;  %v12025_v27 = vcombine.high %v148_v15, %v152_v16  ;;  %v167_v30 = vld [vmem:[%s19632_s1 + $0x1f0] sm:$0xff] }
  0x5f   :  { %1180 = vmatprep.subr.bf16.mxu0 %v12035_v31  ;;  %1253 = vmatprep.subr.bf16.mxu1 %v12037_v34  ;;  %v12024_v31 = vcombine.low %v148_v15, %v152_v16  ;;  %v168_v34 = vld [vmem:[%s19632_s1 + $0x1f8] sm:$0xff] }
  0x60   :  { %1198 = vmatprep.mubr.bf16.mxu0 %v14953_v8  ;;  %1271 = vmatprep.mubr.bf16.mxu1 %v14953_v8  ;;  %v12041_v44 = vcombine.high %v164_v33, %v168_v34  ;;  %v12040_v49 = vcombine.low %v164_v33, %v168_v34  ;;  %v12098_v34 = vld [vmem:[%s19632_s1 + $0x5c0] sm:$0xff] }
  0x62   :  { %1181 = vmatpush1.bf16.msra.mxu0 %v12034_v37  ;;  %1254 = vmatpush1.bf16.msra.mxu1 %v12036_v40  ;;  %v12042_v37 = vld [vmem:[%s19632_s1 + $0x400] sm:$0xff]  ;;  %v12039_v40 = vcombine.high %v163_v29, %v167_v30 }
  0x63   :  { %1312 = vmatprep.subr.bf16.mxu0 %v11983_v42  ;;  %1385 = vmatprep.subr.bf16.mxu1 %v11985_v45  ;;  %v12043_v42 = vld [vmem:[%s19632_s1 + $0x408] sm:$0xff]  ;;  %v12038_v45 = vcombine.low %v163_v29, %v167_v30 }
  0x64   :  { %v12109_v53 = vcombine.high %v12043_v42, %v12047_v43  ;;  %v12108_v57 = vcombine.low %v12043_v42, %v12047_v43  ;;  %v12091_v30 = vld [vmem:[%s19632_s1 + $0x588] sm:$0xff]  ;;  %v12044_v43 = vld [vmem:[%s19632_s1 + $0x410] sm:$0xff] }
  0x65   :  { %1199 = vmatmul.mubr.bf16.vlgmr.msra.gmra.mrb[0].mxu0 %v15399_v46  ;;  %1272 = vmatmul.mubr.bf16.vlgmr.msra.gmra.mrb[0].mxu1 %v15399_v46 }
  0x66   :  { %1313 = vmatpush1.bf16.msra.mxu0 %v11982_v47  ;;  %1386 = vmatpush1.bf16.msra.mxu1 %v11984_v50  ;;  %v12050_v47 = vld [vmem:[%s19632_s1 + $0x440] sm:$0xff]  ;;  %v12107_v50 = vcombine.high %v12042_v37, %v12046_v38 }
  0x67   :  { %1314 = vmatprep.subr.bf16.mxu0 %v11991_v51  ;;  %1387 = vmatprep.subr.bf16.mxu1 %v11993_v54  ;;  %v12051_v51 = vld [vmem:[%s19632_s1 + $0x448] sm:$0xff]  ;;  %v12106_v54 = vcombine.low %v12042_v37, %v12046_v38 }
  0x68   :  { %1208 = vmatprep.mubr.bf16.mxu0 %v14953_v8  ;;  %1281 = vmatprep.mubr.bf16.mxu1 %v14953_v8  ;;  %v12117_v62 = vcombine.high %v12051_v51, %v12055_v52  ;;  %v12116_v2 = vcombine.low %v12051_v51, %v12055_v52  ;;  %v12099_v38 = vld [vmem:[%s19632_s1 + $0x5c8] sm:$0xff]  ;;  %v12052_v52 = vld [vmem:[%s19632_s1 + $0x450] sm:$0xff] }
  0x6a   :  { %1315 = vmatpush1.bf16.msra.mxu0 %v11990_v55  ;;  %1388 = vmatpush1.bf16.msra.mxu1 %v11992_v58  ;;  %v12058_v55 = vld [vmem:[%s19632_s1 + $0x480] sm:$0xff]  ;;  %v12115_v58 = vcombine.high %v12050_v47, %v12054_v48 }
  0x6b   :  { %1316 = vmatprep.subr.bf16.mxu0 %v11999_v59  ;;  %1389 = vmatprep.subr.bf16.mxu1 %v12001_v63  ;;  %v12059_v59 = vld [vmem:[%s19632_s1 + $0x488] sm:$0xff]  ;;  %v12114_v63 = vcombine.low %v12050_v47, %v12054_v48  ;;  %v12122_v6 = vcombine.low %v12058_v55, %v12062_v56  ;;  %v12045_v48 = vld [vmem:[%s19632_s1 + $0x418] sm:$0xff] }
  0x6c   :  { %v12125_v5 = vcombine.high %v12059_v59, %v12063_v61  ;;  %v12124_v11 = vcombine.low %v12059_v59, %v12063_v61  ;;  %v12060_v61 = vld [vmem:[%s19632_s1 + $0x490] sm:$0xff] }
  0x6d   :  { %1209 = vmatmul.mubr.bf16.gmra.mrb[4].mxu0 %v15161_v22  ;;  %1282 = vmatmul.mubr.bf16.gmra.mrb[4].mxu1 %v15161_v22 }
  0x6e   :  { %1317 = vmatpush1.bf16.msra.mxu0 %v11998_v0  ;;  %1390 = vmatpush1.bf16.msra.mxu1 %v12000_v3  ;;  %v12066_v0 = vld [vmem:[%s19632_s1 + $0x4c0] sm:$0xff]  ;;  %v12123_v3 = vcombine.high %v12058_v55, %v12062_v56  ;;  %v12053_v56 = vld [vmem:[%s19632_s1 + $0x458] sm:$0xff] }
  0x6f   :  { %1318 = vmatprep.subr.bf16.mxu0 %v12007_v4  ;;  %1391 = vmatprep.subr.bf16.mxu1 %v12009_v7  ;;  %v12067_v4 = vld [vmem:[%s19632_s1 + $0x4c8] sm:$0xff]  ;;  %v12074_v7 = vld [vmem:[%s19632_s1 + $0x500] sm:$0xff]  ;;  %v12131_v12 = vcombine.high %v12066_v0, %v12070_v1  ;;  %v12130_v16 = vcombine.low %v12066_v0, %v12070_v1  ;;  %v12061_v1 = vld [vmem:[%s19632_s1 + $0x498] sm:$0xff] }
  0x70   :  { %1218 = vmatprep.mubr.bf16.mxu0 %v14953_v8  ;;  %1291 = vmatprep.mubr.bf16.mxu1 %v14953_v8 }
  0x72   :  { %1319 = vmatpush1.bf16.msra.mxu0 %v12006_v10  ;;  %1392 = vmatpush1.bf16.msra.mxu1 %v12008_v13  ;;  %v12078_v10 = vld [vmem:[%s19632_s1 + $0x520] sm:$0xff]  ;;  %v12075_v13 = vld [vmem:[%s19632_s1 + $0x508] sm:$0xff] }
  0x73   :  { %1320 = vmatprep.subr.bf16.mxu0 %v12015_v14  ;;  %1393 = vmatprep.subr.bf16.mxu1 %v12017_v18  ;;  %v12079_v14 = vld [vmem:[%s19632_s1 + $0x528] sm:$0xff]  ;;  %v12082_v18 = vld [vmem:[%s19632_s1 + $0x540] sm:$0xff]  ;;  %v12139_v21 = vcombine.high %v12074_v7, %v12078_v10  ;;  %v12138_v25 = vcombine.low %v12074_v7, %v12078_v10  ;;  %v12069_v10 = vld [vmem:[%s19632_s1 + $0x4d8] sm:$0xff] }
  0x75   :  { %1219 = vmatmul.mubr.bf16.gmra.mrb[8].mxu0 %v15191_v41  ;;  %1292 = vmatmul.mubr.bf16.gmra.mrb[8].mxu1 %v15191_v41 }
  0x76   :  { %1321 = vmatpush1.bf16.msra.mxu0 %v12014_v19  ;;  %1394 = vmatpush1.bf16.msra.mxu1 %v12016_v23  ;;  %v12086_v19 = vld [vmem:[%s19632_s1 + $0x560] sm:$0xff]  ;;  %v12083_v23 = vld [vmem:[%s19632_s1 + $0x548] sm:$0xff] }
  0x77   :  { %1322 = vmatprep.subr.bf16.mxu0 %v12023_v24  ;;  %1395 = vmatprep.subr.bf16.mxu1 %v12025_v27  ;;  %v12141_v24 = vcombine.high %v12075_v13, %v12079_v14  ;;  %v12094_v27 = vld [vmem:[%s19632_s1 + $0x5a0] sm:$0xff]  ;;  %v12147_v29 = vcombine.high %v12082_v18, %v12086_v19  ;;  %v12146_v33 = vcombine.low %v12082_v18, %v12086_v19  ;;  %v12077_v19 = vld [vmem:[%s19632_s1 + $0x518] sm:$0xff] }
  0x78   :  { %1228 = vmatprep.mubr.bf16.mxu0 %v14953_v8  ;;  %1301 = vmatprep.mubr.bf16.mxu1 %v14953_v8  ;;  %v12155_v37 = vcombine.high %v12090_v26, %v12094_v27  ;;  %v12154_v42 = vcombine.low %v12090_v26, %v12094_v27  ;;  %v12085_v27 = vld [vmem:[%s19632_s1 + $0x558] sm:$0xff] }
  0x7a   :  { %1323 = vmatpush1.bf16.msra.mxu0 %v12022_v28  ;;  %1396 = vmatpush1.bf16.msra.mxu1 %v12024_v31  ;;  %v12140_v28 = vcombine.low %v12075_v13, %v12079_v14  ;;  %v12095_v31 = vld [vmem:[%s19632_s1 + $0x5a8] sm:$0xff]  ;;  %v12076_v14 = vld [vmem:[%s19632_s1 + $0x510] sm:$0xff] }
  0x7b   :  { %1324 = vmatprep.subr.bf16.mxu0 %v12031_v32  ;;  %1397 = vmatprep.subr.bf16.mxu1 %v12033_v35  ;;  %v12102_v35 = vld [vmem:[%s19632_s1 + $0x5e0] sm:$0xff] }
  0x7c   :  { %v12163_v47 = vcombine.high %v12098_v34, %v12102_v35  ;;  %v12162_v51 = vcombine.low %v12098_v34, %v12102_v35  ;;  %v12093_v35 = vld [vmem:[%s19632_s1 + $0x598] sm:$0xff] }
  0x7d   :  { %1229 = vmatmul.mubr.bf16.gmra.mrb[12].mxu0 %v15221_v60  ;;  %1302 = vmatmul.mubr.bf16.gmra.mrb[12].mxu1 %v15221_v60 }
  0x7e   :  { %1325 = vmatpush1.bf16.msra.mxu0 %v12030_v36  ;;  %1398 = vmatpush1.bf16.msra.mxu1 %v12032_v39  ;;  %v12103_v39 = vld [vmem:[%s19632_s1 + $0x5e8] sm:$0xff] }
  0x7f   :  { %1326 = vmatprep.subr.bf16.mxu0 %v12039_v40  ;;  %1399 = vmatprep.subr.bf16.mxu1 %v12041_v44  ;;  %v12157_v40 = vcombine.high %v12091_v30, %v12095_v31  ;;  %v12048_v44 = vld [vmem:[%s19632_s1 + $0x430] sm:$0xff] }
  0x80   :  { %1344 = vmatprep.mubr.bf16.mxu0 %v14953_v8  ;;  %1417 = vmatprep.mubr.bf16.mxu1 %v14953_v8  ;;  %v12111_v55 = vcombine.high %v12044_v43, %v12048_v44  ;;  %v12110_v59 = vcombine.low %v12044_v43, %v12048_v44  ;;  %v12104_v43 = vld [vmem:[%s19632_s1 + $0x5f0] sm:$0xff] }
  0x82   :  { %1327 = vmatpush1.bf16.msra.mxu0 %v12038_v45  ;;  %1400 = vmatpush1.bf16.msra.mxu1 %v12040_v49  ;;  %v12156_v45 = vcombine.low %v12091_v30, %v12095_v31  ;;  %v12049_v49 = vld [vmem:[%s19632_s1 + $0x438] sm:$0xff]  ;;  %v12092_v31 = vld [vmem:[%s19632_s1 + $0x590] sm:$0xff] }
  0x83   :  { %1843 = vmatprep.subr.bf16.mxu0 %v12107_v50  ;;  %1916 = vmatprep.subr.bf16.mxu1 %v12109_v53  ;;  %v12165_v50 = vcombine.high %v12099_v38, %v12103_v39  ;;  %v12056_v53 = vld [vmem:[%s19632_s1 + $0x470] sm:$0xff] }
  0x84   :  { %v12119_v0 = vcombine.high %v12052_v52, %v12056_v53 }
  0x85   :  { %1345 = vmatmul.mubr.bf16.vlgmr.msra.gmra.mrb[16].mxu0 %v15399_v46  ;;  %1418 = vmatmul.mubr.bf16.vlgmr.msra.gmra.mrb[16].mxu1 %v15399_v46  ;;  %v12071_v46 = vld [vmem:[%s19632_s1 + $0x4e8] sm:$0xff] }
  0x86   :  { %1844 = vmatpush1.bf16.msra.mxu0 %v12106_v54  ;;  %1917 = vmatpush1.bf16.msra.mxu1 %v12108_v57  ;;  %v12133_v15 = vcombine.high %v12067_v4, %v12071_v46  ;;  %v12132_v20 = vcombine.low %v12067_v4, %v12071_v46  ;;  %v12164_v54 = vcombine.low %v12099_v38, %v12103_v39  ;;  %v12057_v57 = vld [vmem:[%s19632_s1 + $0x478] sm:$0xff]  ;;  %v12068_v46 = vld [vmem:[%s19632_s1 + $0x4d0] sm:$0xff] }
  0x87   :  { %1845 = vmatprep.subr.bf16.mxu0 %v12115_v58  ;;  %1918 = vmatprep.subr.bf16.mxu1 %v12117_v62  ;;  %v12113_v58 = vcombine.high %v12045_v48, %v12049_v49  ;;  %v12064_v62 = vld [vmem:[%s19632_s1 + $0x4b0] sm:$0xff]  ;;  %v12118_v4 = vcombine.low %v12052_v52, %v12056_v53  ;;  %v100_v39 = vld [vmem:[#allocation2 + $0x58] sm:$0xff] }
  0x88   :  { %1354 = vmatprep.mubr.bf16.mxu0 %v14953_v8  ;;  %1427 = vmatprep.mubr.bf16.mxu1 %v14953_v8  ;;  %v12127_v7 = vcombine.high %v12060_v61, %v12064_v62  ;;  %v12126_v13 = vcombine.low %v12060_v61, %v12064_v62  ;;  %v99_v38 = vld [vmem:[#allocation2 + $0x50] sm:$0xff] }
  0x8a   :  { %1846 = vmatpush1.bf16.msra.mxu0 %v12114_v63  ;;  %1919 = vmatpush1.bf16.msra.mxu1 %v12116_v2  ;;  %v12112_v63 = vcombine.low %v12045_v48, %v12049_v49  ;;  %v12065_v2 = vld [vmem:[%s19632_s1 + $0x4b8] sm:$0xff] }
  0x8b   :  { %1847 = vmatprep.subr.bf16.mxu0 %v12123_v3  ;;  %1920 = vmatprep.subr.bf16.mxu1 %v12125_v5  ;;  %v12121_v3 = vcombine.high %v12053_v56, %v12057_v57  ;;  %v12072_v5 = vld [vmem:[%s19632_s1 + $0x4f0] sm:$0xff]  ;;  %v12105_v48 = vld [vmem:[%s19632_s1 + $0x5f8] sm:$0xff] }
  0x8c   :  { %v12135_v18 = vcombine.high %v12068_v46, %v12072_v5 }
  0x8d   :  { %1355 = vmatmul.mubr.bf16.gmra.mrb[20].mxu0 %v15161_v22  ;;  %1428 = vmatmul.mubr.bf16.gmra.mrb[20].mxu1 %v15161_v22  ;;  %v12087_v22 = vld [vmem:[%s19632_s1 + $0x568] sm:$0xff] }
  0x8e   :  { %1848 = vmatpush1.bf16.msra.mxu0 %v12122_v6  ;;  %1921 = vmatpush1.bf16.msra.mxu1 %v12124_v11  ;;  %v12149_v32 = vcombine.high %v12083_v23, %v12087_v22  ;;  %v12148_v36 = vcombine.low %v12083_v23, %v12087_v22  ;;  %v12120_v6 = vcombine.low %v12053_v56, %v12057_v57  ;;  %v12073_v11 = vld [vmem:[%s19632_s1 + $0x4f8] sm:$0xff]  ;;  %v12084_v22 = vld [vmem:[%s19632_s1 + $0x550] sm:$0xff] }
  0x8f   :  { %1849 = vmatprep.subr.bf16.mxu0 %v12131_v12  ;;  %1922 = vmatprep.subr.bf16.mxu1 %v12133_v15  ;;  %v12129_v12 = vcombine.high %v12061_v1, %v12065_v2  ;;  %v12080_v15 = vld [vmem:[%s19632_s1 + $0x530] sm:$0xff]  ;;  %v12134_v23 = vcombine.low %v12068_v46, %v12072_v5 }
  0x90   :  { %1364 = vmatprep.mubr.bf16.mxu0 %v14953_v8  ;;  %1437 = vmatprep.mubr.bf16.mxu1 %v14953_v8  ;;  %v12143_v26 = vcombine.high %v12076_v14, %v12080_v15  ;;  %v12142_v30 = vcombine.low %v12076_v14, %v12080_v15 }
  0x92   :  { %1850 = vmatpush1.bf16.msra.mxu0 %v12130_v16  ;;  %1923 = vmatpush1.bf16.msra.mxu1 %v12132_v20  ;;  %v12128_v16 = vcombine.low %v12061_v1, %v12065_v2  ;;  %v12081_v20 = vld [vmem:[%s19632_s1 + $0x538] sm:$0xff] }
  0x93   :  { %1851 = vmatprep.subr.bf16.mxu0 %v12139_v21  ;;  %1924 = vmatprep.subr.bf16.mxu1 %v12141_v24  ;;  %v12137_v21 = vcombine.high %v12069_v10, %v12073_v11  ;;  %v12088_v24 = vld [vmem:[%s19632_s1 + $0x570] sm:$0xff] }
  0x94   :  { %v12151_v34 = vcombine.high %v12084_v22, %v12088_v24 }
  0x95   :  { %1365 = vmatmul.mubr.bf16.gmra.mrb[24].mxu0 %v15191_v41  ;;  %1438 = vmatmul.mubr.bf16.gmra.mrb[24].mxu1 %v15191_v41 }
  0x96   :  { %1852 = vmatpush1.bf16.msra.mxu0 %v12138_v25  ;;  %1925 = vmatpush1.bf16.msra.mxu1 %v12140_v28  ;;  %v12136_v25 = vcombine.low %v12069_v10, %v12073_v11  ;;  %v12089_v28 = vld [vmem:[%s19632_s1 + $0x578] sm:$0xff] }
  0x97   :  { %1853 = vmatprep.subr.bf16.mxu0 %v12147_v29  ;;  %1926 = vmatprep.subr.bf16.mxu1 %v12149_v32  ;;  %v12145_v29 = vcombine.high %v12077_v19, %v12081_v20  ;;  %v12096_v32 = vld [vmem:[%s19632_s1 + $0x5b0] sm:$0xff]  ;;  %v12152_v44 = vcombine.low %v12085_v27, %v12089_v28 }
  0x98   :  { %1374 = vmatprep.mubr.bf16.mxu0 %v14953_v8  ;;  %1447 = vmatprep.mubr.bf16.mxu1 %v14953_v8 }
  0x9a   :  { %1854 = vmatpush1.bf16.msra.mxu0 %v12146_v33  ;;  %1927 = vmatpush1.bf16.msra.mxu1 %v12148_v36  ;;  %v12144_v33 = vcombine.low %v12077_v19, %v12081_v20  ;;  %v12097_v36 = vld [vmem:[%s19632_s1 + $0x5b8] sm:$0xff] }
  0x9b   :  { %1855 = vmatprep.subr.bf16.mxu0 %v12155_v37  ;;  %1928 = vmatprep.subr.bf16.mxu1 %v12157_v40  ;;  %v12153_v37 = vcombine.high %v12085_v27, %v12089_v28  ;;  %v12150_v40 = vcombine.low %v12084_v22, %v12088_v24  ;;  %v12161_v49 = vcombine.high %v12093_v35, %v12097_v36 }
  0x9c   :  { %v12160_v52 = vcombine.low %v12093_v35, %v12097_v36 }
  0x9d   :  { %1375 = vmatmul.mubr.bf16.gmra.mrb[28].mxu0 %v15221_v60  ;;  %1448 = vmatmul.mubr.bf16.gmra.mrb[28].mxu1 %v15221_v60 }
  0x9e   :  { %1856 = vmatpush1.bf16.msra.mxu0 %v12154_v42  ;;  %1929 = vmatpush1.bf16.msra.mxu1 %v12156_v45  ;;  %v12100_v42 = vld [vmem:[%s19632_s1 + $0x5d0] sm:$0xff]  ;;  %v12159_v45 = vcombine.high %v12092_v31, %v12096_v32 }
  0x9f   :  { %1857 = vmatprep.subr.bf16.mxu0 %v12163_v47  ;;  %1930 = vmatprep.subr.bf16.mxu1 %v12165_v50  ;;  %v12101_v47 = vld [vmem:[%s19632_s1 + $0x5d8] sm:$0xff]  ;;  %v104_v50 = vpack.c.bf16 %v100_v39, %v99_v38  ;;  %v12167_v53 = vcombine.high %v12100_v42, %v12104_v43 }
  0xa0   :  { %1875 = vmatprep.mubr.bf16.mxu0 %v14953_v8  ;;  %1948 = vmatprep.mubr.bf16.mxu1 %v14953_v8  ;;  %v12168_v56 = vcombine.low %v12101_v47, %v12105_v48 }
  0xa2   :  { %1858 = vmatpush1.bf16.msra.mxu0 %v12162_v51  ;;  %1931 = vmatpush1.bf16.msra.mxu1 %v12164_v54  ;;  %v12158_v51 = vcombine.low %v12092_v31, %v12096_v32  ;;  %v12169_v54 = vcombine.high %v12101_v47, %v12105_v48 }
  0xa3   :  { %1989 = vmatprep.subr.bf16.mxu0 %v12111_v55  ;;  %2062 = vmatprep.subr.bf16.mxu1 %v12113_v58  ;;  %v12166_v55 = vcombine.low %v12100_v42, %v12104_v43 }
  0xa5   :  { %1876 = vmatmul.mubr.bf16.vlgmr.msra.gmra.mrb[0].mxu0 %v15191_v41  ;;  %1949 = vmatmul.mubr.bf16.vlgmr.msra.gmra.mrb[0].mxu1 %v15191_v41 }
  0xa6   :  { %1990 = vmatpush1.bf16.msra.mxu0 %v12110_v59  ;;  %2063 = vmatpush1.bf16.msra.mxu1 %v12112_v63 }
  0xa7   :  { %1991 = vmatprep.subr.bf16.mxu0 %v12119_v0  ;;  %2064 = vmatprep.subr.bf16.mxu1 %v12121_v3 }
  0xa8   :  { %1885 = vmatprep.mubr.bf16.mxu0 %v14953_v8  ;;  %1958 = vmatprep.mubr.bf16.mxu1 %v14953_v8 }
  0xaa   :  { %1992 = vmatpush1.bf16.msra.mxu0 %v12118_v4  ;;  %2065 = vmatpush1.bf16.msra.mxu1 %v12120_v6 }
  0xab   :  { %1993 = vmatprep.subr.bf16.mxu0 %v12127_v7  ;;  %2066 = vmatprep.subr.bf16.mxu1 %v12129_v12 }
  0xad   :  { %1886 = vmatmul.mubr.bf16.gmra.mrb[4].mxu0 %v15221_v60  ;;  %1959 = vmatmul.mubr.bf16.gmra.mrb[4].mxu1 %v15221_v60 }
  0xae   :  { %1994 = vmatpush1.bf16.msra.mxu0 %v12126_v13  ;;  %2067 = vmatpush1.bf16.msra.mxu1 %v12128_v16 }
  0xaf   :  { %1995 = vmatprep.subr.bf16.mxu0 %v12135_v18  ;;  %2068 = vmatprep.subr.bf16.mxu1 %v12137_v21 }
  0xb0   :  { %1895 = vmatprep.mubr.bf16.mxu0 %v14953_v8  ;;  %1968 = vmatprep.mubr.bf16.mxu1 %v14953_v8 }
  0xb2   :  { %1996 = vmatpush1.bf16.msra.mxu0 %v12134_v23  ;;  %2069 = vmatpush1.bf16.msra.mxu1 %v12136_v25 }
  0xb3   :  { %1997 = vmatprep.subr.bf16.mxu0 %v12143_v26  ;;  %2070 = vmatprep.subr.bf16.mxu1 %v12145_v29 }
  0xb5   :  { %1896 = vmatmul.mubr.bf16.gmra.mrb[8].mxu0 %v15251_v17  ;;  %1969 = vmatmul.mubr.bf16.gmra.mrb[8].mxu1 %v15251_v17 }
  0xb6   :  { %1998 = vmatpush1.bf16.msra.mxu0 %v12142_v30  ;;  %2071 = vmatpush1.bf16.msra.mxu1 %v12144_v33 }
  0xb7   :  { %1999 = vmatprep.subr.bf16.mxu0 %v12151_v34  ;;  %2072 = vmatprep.subr.bf16.mxu1 %v12153_v37 }
  0xb8   :  { %1905 = vmatprep.mubr.bf16.mxu0 %v14953_v8  ;;  %1978 = vmatprep.mubr.bf16.mxu1 %v14953_v8 }
  0xba   :  { %2000 = vmatpush1.bf16.msra.mxu0 %v12150_v40  ;;  %2073 = vmatpush1.bf16.msra.mxu1 %v12152_v44 }
  0xbb   :  { %2001 = vmatprep.subr.bf16.mxu0 %v12159_v45  ;;  %2074 = vmatprep.subr.bf16.mxu1 %v12161_v49 }
  0xbd   :  { %1906 = vmatmul.mubr.bf16.gmra.mrb[12].mxu0 %v104_v50  ;;  %1979 = vmatmul.mubr.bf16.gmra.mrb[12].mxu1 %v104_v50 }
  0xbe   :  { %2002 = vmatpush1.bf16.msra.mxu0 %v12158_v51  ;;  %2075 = vmatpush1.bf16.msra.mxu1 %v12160_v52 }
  0xbf   :  { %2003 = vmatprep.subr.bf16.mxu0 %v12167_v53  ;;  %2076 = vmatprep.subr.bf16.mxu1 %v12169_v54 }
  0xc0   :  { %2021 = vmatprep.mubr.bf16.mxu0 %v14953_v8  ;;  %2094 = vmatprep.mubr.bf16.mxu1 %v14953_v8 }
  0xc2   :  { %2004 = vmatpush1.bf16.msra.mxu0 %v12166_v55  ;;  %2077 = vmatpush1.bf16.msra.mxu1 %v12168_v56 }
  0xc5   :  { %2022 = vmatmul.mubr.bf16.vlgmr.msra.gmra.mrb[16].mxu0 %v15191_v41  ;;  %2095 = vmatmul.mubr.bf16.vlgmr.msra.gmra.mrb[16].mxu1 %v15191_v41 }
  0xc6   :  { %2031 = vmatprep.mubr.bf16.mxu0 %v14953_v8  ;;  %2104 = vmatprep.mubr.bf16.mxu1 %v14953_v8 }
  0xcd   :  { %2032 = vmatmul.mubr.bf16.gmra.mrb[20].mxu0 %v15221_v60  ;;  %2105 = vmatmul.mubr.bf16.gmra.mrb[20].mxu1 %v15221_v60 }
  0xce   :  { %2041 = vmatprep.mubr.bf16.mxu0 %v14953_v8  ;;  %2114 = vmatprep.mubr.bf16.mxu1 %v14953_v8 }
  0xd5   :  { %2042 = vmatmul.mubr.bf16.gmra.mrb[24].mxu0 %v15251_v17  ;;  %2115 = vmatmul.mubr.bf16.gmra.mrb[24].mxu1 %v15251_v17 }
  0xd6   :  { %2051 = vmatprep.mubr.bf16.mxu0 %v14953_v8  ;;  %2124 = vmatprep.mubr.bf16.mxu1 %v14953_v8 }
  0xdd   :  { %2052 = vmatmul.mubr.bf16.gmra.mrb[28].mxu0 %v104_v50  ;;  %2125 = vmatmul.mubr.bf16.gmra.mrb[28].mxu1 %v104_v50 }
  0xde   :  { %16 = vsyncpa [#allocation6], 0  ;;  %v12170_v41 = vld [vmem:[%s19635_s4 + $0x800] sm:$0xff]  ;;  %v12171_v57 = vld [vmem:[%s19635_s4 + $0x808] sm:$0xff]  ;;  %vm9000_vm1 = vcmask 1041409   ;;  %vm14955_vm2 = vmmov 0  }
  0xdf   :  { %v12174_v60 = vld [vmem:[%s19635_s4 + $0x820] sm:$0xff]  ;;  %v12175_v8 = vld [vmem:[%s19635_s4 + $0x828] sm:$0xff]  ;;  %s14956_s14 = smov [#allocation5]  }
  0xe0   :  { %v12427_v17 = vcombine.high %v12170_v41, %v12174_v60  ;;  %v12426_v58 = vcombine.low %v12170_v41, %v12174_v60  ;;  %v12428_v59 = vcombine.low %v12171_v57, %v12175_v8  ;;  %v12429_v61 = vcombine.high %v12171_v57, %v12175_v8  ;;  %v12178_v62 = vld [vmem:[%s19635_s4 + $0x840] sm:$0xff]  ;;  %v12179_v0 = vld [vmem:[%s19635_s4 + $0x848] sm:$0xff]  ;;  %s11840_s15 = sshll.u32 %s14956_s14, 4  ;;  %s11841_s15 = int_to_ptr.vmem [resolvable:$true] %s11840_s15 }
  0xe1   :  { %v12182_v63 = vld [vmem:[%s19635_s4 + $0x860] sm:$0xff]  ;;  %v12183_v2 = vld [vmem:[%s19635_s4 + $0x868] sm:$0xff]  ;;  %s14929_s16 = scalar_lea.vmem %s11841_s15, 32  ;;  %p14934_p1 = scmp.lt.s32.totalorder %s11841_s15, %s11841_s15 }
  0xe2   :  { %4438 = vmatprep.subr.bf16.mxu0 %v12427_v17  ;;  %4544 = vmatprep.subr.bf16.mxu1 %v12429_v61  ;;  %v12435_v1 = vcombine.high %v12178_v62, %v12182_v63  ;;  %v12434_v3 = vcombine.low %v12178_v62, %v12182_v63  ;;  %v12436_v4 = vcombine.low %v12179_v0, %v12183_v2  ;;  %v12186_v5 = vld [vmem:[%s19635_s4 + $0x880] sm:$0xff]  ;;  %v12187_v7 = vld [vmem:[%s19635_s4 + $0x888] sm:$0xff]  ;;  %p14930_p0 = scmp.ne.s32.totalorder %s11841_s15, %s14929_s16  ;;  %p14935_p2 = scmp.lt.s32.totalorder %s14929_s16, %s14929_s16 }
  0xe3   :  { %4439 = vmatpush1.bf16.msra.mxu0 %v12426_v58  ;;  %4545 = vmatpush1.bf16.msra.mxu1 %v12428_v59  ;;  %v12437_v46 = vcombine.high %v12179_v0, %v12183_v2  ;;  %v12190_v6 = vld [vmem:[%s19635_s4 + $0x8a0] sm:$0xff]  ;;  %v12191_v11 = vld [vmem:[%s19635_s4 + $0x8a8] sm:$0xff] }
  0xe4   :  { %4440 = vmatprep.subr.bf16.mxu0 %v12435_v1  ;;  %v12443_v10 = vcombine.high %v12186_v5, %v12190_v6  ;;  %v12442_v12 = vcombine.low %v12186_v5, %v12190_v6  ;;  %v12444_v13 = vcombine.low %v12187_v7, %v12191_v11  ;;  %v12445_v14 = vcombine.high %v12187_v7, %v12191_v11  ;;  %v12194_v15 = vld [vmem:[%s19635_s4 + $0x8c0] sm:$0xff]  ;;  %v12195_v18 = vld [vmem:[%s19635_s4 + $0x8c8] sm:$0xff]  ;;  %p14936_p3 = por %p14935_p2, %p14934_p1 }
  0xe5   :  { %4546 = vmatprep.subr.bf16.mxu1 %v12437_v46  ;;  %v12198_v16 = vld [vmem:[%s19635_s4 + $0x8e0] sm:$0xff]  ;;  %v12199_v20 = vld [vmem:[%s19635_s4 + $0x8e8] sm:$0xff] }
  0xe6   :  { %v12451_v19 = vcombine.high %v12194_v15, %v12198_v16  ;;  %v12450_v21 = vcombine.low %v12194_v15, %v12198_v16  ;;  %v12452_v23 = vcombine.low %v12195_v18, %v12199_v20  ;;  %v12453_v22 = vcombine.high %v12195_v18, %v12199_v20  ;;  %v12202_v24 = vld [vmem:[%s19635_s4 + $0x900] sm:$0xff]  ;;  %v12203_v26 = vld [vmem:[%s19635_s4 + $0x908] sm:$0xff]  ;;  %p14937_p4 = pnand %p14936_p3, %p14930_p0 }
  0xe7   :  { %4441 = vmatpush1.bf16.msra.mxu0 %v12434_v3  ;;  %4547 = vmatpush1.bf16.msra.mxu1 %v12436_v4  ;;  %v12206_v25 = vld [vmem:[%s19635_s4 + $0x920] sm:$0xff]  ;;  %v12207_v28 = vld [vmem:[%s19635_s4 + $0x928] sm:$0xff] }
  0xe8   :  { %4442 = vmatprep.subr.bf16.mxu0 %v12443_v10  ;;  %4548 = vmatprep.subr.bf16.mxu1 %v12445_v14  ;;  %v12459_v27 = vcombine.high %v12202_v24, %v12206_v25  ;;  %v12458_v29 = vcombine.low %v12202_v24, %v12206_v25  ;;  %v12460_v30 = vcombine.low %v12203_v26, %v12207_v28  ;;  %v12210_v32 = vld [vmem:[%s19635_s4 + $0x940] sm:$0xff]  ;;  %v12211_v34 = vld [vmem:[%s19635_s4 + $0x948] sm:$0xff] }
  0xe9   :  { %v12461_v31 = vcombine.high %v12203_v26, %v12207_v28  ;;  %v12214_v33 = vld [vmem:[%s19635_s4 + $0x960] sm:$0xff]  ;;  %v12215_v36 = vld [vmem:[%s19635_s4 + $0x968] sm:$0xff] }
  0xea   :  { %v12467_v35 = vcombine.high %v12210_v32, %v12214_v33  ;;  %v12466_v37 = vcombine.low %v12210_v32, %v12214_v33  ;;  %v12468_v38 = vcombine.low %v12211_v34, %v12215_v36  ;;  %v12469_v39 = vcombine.high %v12211_v34, %v12215_v36  ;;  %v12218_v40 = vld [vmem:[%s19635_s4 + $0x980] sm:$0xff]  ;;  %v12219_v43 = vld [vmem:[%s19635_s4 + $0x988] sm:$0xff] }
  0xeb   :  { %4443 = vmatpush1.bf16.msra.mxu0 %v12442_v12  ;;  %4549 = vmatpush1.bf16.msra.mxu1 %v12444_v13  ;;  %v12222_v42 = vld [vmem:[%s19635_s4 + $0x9a0] sm:$0xff]  ;;  %v12223_v45 = vld [vmem:[%s19635_s4 + $0x9a8] sm:$0xff] }
  0xec   :  { %4444 = vmatprep.subr.bf16.mxu0 %v12451_v19  ;;  %4550 = vmatprep.subr.bf16.mxu1 %v12453_v22  ;;  %v12475_v44 = vcombine.high %v12218_v40, %v12222_v42  ;;  %v12474_v47 = vcombine.low %v12218_v40, %v12222_v42  ;;  %v12476_v48 = vcombine.low %v12219_v43, %v12223_v45  ;;  %v12226_v50 = vld [vmem:[%s19635_s4 + $0x9c0] sm:$0xff]  ;;  %v12227_v52 = vld [vmem:[%s19635_s4 + $0x9c8] sm:$0xff] }
  0xed   :  { %v12477_v49 = vcombine.high %v12219_v43, %v12223_v45  ;;  %v12230_v51 = vld [vmem:[%s19635_s4 + $0x9e0] sm:$0xff]  ;;  %v12231_v54 = vld [vmem:[%s19635_s4 + $0x9e8] sm:$0xff] }
  0xee   :  { %v12483_v53 = vcombine.high %v12226_v50, %v12230_v51  ;;  %v12482_v55 = vcombine.low %v12226_v50, %v12230_v51  ;;  %v12484_v56 = vcombine.low %v12227_v52, %v12231_v54  ;;  %v12485_v41 = vcombine.high %v12227_v52, %v12231_v54  ;;  %v12234_v60 = vld [vmem:[%s19635_s4 + $0xa00] sm:$0xff]  ;;  %v12235_v17 = vld [vmem:[%s19635_s4 + $0xa08] sm:$0xff] }
  0xef   :  { %4445 = vmatpush1.bf16.msra.mxu0 %v12450_v21  ;;  %4551 = vmatpush1.bf16.msra.mxu1 %v12452_v23  ;;  %v12238_v57 = vld [vmem:[%s19635_s4 + $0xa20] sm:$0xff]  ;;  %v12239_v58 = vld [vmem:[%s19635_s4 + $0xa28] sm:$0xff] }
  0xf0   :  { %4446 = vmatprep.subr.bf16.mxu0 %v12459_v27  ;;  %4552 = vmatprep.subr.bf16.mxu1 %v12461_v31  ;;  %v12491_v8 = vcombine.high %v12234_v60, %v12238_v57  ;;  %v12490_v59 = vcombine.low %v12234_v60, %v12238_v57  ;;  %v12492_v61 = vcombine.low %v12235_v17, %v12239_v58  ;;  %v12242_v63 = vld [vmem:[%s19635_s4 + $0xa40] sm:$0xff]  ;;  %v12243_v1 = vld [vmem:[%s19635_s4 + $0xa48] sm:$0xff] }
  0xf1   :  { %v12493_v62 = vcombine.high %v12235_v17, %v12239_v58  ;;  %v12246_v0 = vld [vmem:[%s19635_s4 + $0xa60] sm:$0xff]  ;;  %v12247_v3 = vld [vmem:[%s19635_s4 + $0xa68] sm:$0xff]  ;;  %v2201_v58 = vlaneseq }
  0xf2   :  { %v12499_v2 = vcombine.high %v12242_v63, %v12246_v0  ;;  %v12498_v4 = vcombine.low %v12242_v63, %v12246_v0  ;;  %v12500_v46 = vcombine.low %v12243_v1, %v12247_v3  ;;  %v12501_v5 = vcombine.high %v12243_v1, %v12247_v3  ;;  %v12250_v6 = vld [vmem:[%s19635_s4 + $0xa80] sm:$0xff]  ;;  %v12251_v10 = vld [vmem:[%s19635_s4 + $0xa88] sm:$0xff] }
  0xf3   :  { %4447 = vmatpush1.bf16.msra.mxu0 %v12458_v29  ;;  %4553 = vmatpush1.bf16.msra.mxu1 %v12460_v30  ;;  %v12254_v7 = vld [vmem:[%s19635_s4 + $0xaa0] sm:$0xff]  ;;  %v12255_v12 = vld [vmem:[%s19635_s4 + $0xaa8] sm:$0xff]  ;;  %vm2477_vm0 = vcmp.lt.s32.totalorder %v2201_v58, 512 }
  0xf4   :  { %4448 = vmatprep.subr.bf16.mxu0 %v12467_v35  ;;  %4554 = vmatprep.subr.bf16.mxu1 %v12469_v39  ;;  %v12507_v11 = vcombine.high %v12250_v6, %v12254_v7  ;;  %v12506_v13 = vcombine.low %v12250_v6, %v12254_v7  ;;  %v12508_v14 = vcombine.low %v12251_v10, %v12255_v12  ;;  %v12258_v16 = vld [vmem:[%s19635_s4 + $0xac0] sm:$0xff]  ;;  %v12259_v19 = vld [vmem:[%s19635_s4 + $0xac8] sm:$0xff] }
  0xf5   :  { %v12509_v15 = vcombine.high %v12251_v10, %v12255_v12  ;;  %v12262_v18 = vld [vmem:[%s19635_s4 + $0xae0] sm:$0xff]  ;;  %v12263_v21 = vld [vmem:[%s19635_s4 + $0xae8] sm:$0xff]  ;;  %2479 = vst.msk [vmem:[#allocation3] ss:$8 sm:$0xf] %vm2477_vm0, %v19643_v9  ;;  %v2202_v10 = vshrl.u32 %v2201_v58, 7 }
  0xf6   :  { %v12515_v20 = vcombine.high %v12258_v16, %v12262_v18  ;;  %v12514_v23 = vcombine.low %v12258_v16, %v12262_v18  ;;  %v12516_v22 = vcombine.low %v12259_v19, %v12263_v21  ;;  %v12517_v24 = vcombine.high %v12259_v19, %v12263_v21  ;;  %v12266_v25 = vld [vmem:[%s19635_s4 + $0xb00] sm:$0xff]  ;;  %v12267_v27 = vld [vmem:[%s19635_s4 + $0xb08] sm:$0xff]  ;;  %2482 = vst.msk [vmem:[#allocation3 + $0x20] ss:$8 sm:$0xf] %vm2477_vm0, %v19643_v9 }
  0xf7   :  { %4449 = vmatpush1.bf16.msra.mxu0 %v12466_v37  ;;  %4555 = vmatpush1.bf16.msra.mxu1 %v12468_v38  ;;  %v12270_v26 = vld [vmem:[%s19635_s4 + $0xb20] sm:$0xff]  ;;  %v12271_v29 = vld [vmem:[%s19635_s4 + $0xb28] sm:$0xff]  ;;  %2568 = vst.msk [vmem:[#allocation3 + $0xc6] ss:$8 sm:$0xf] %vm2477_vm0, %v19643_v9  ;;  %v15960_v19 = vsub.s32 2, %v2202_v10 }
  0xf8   :  { %4450 = vmatprep.subr.bf16.mxu0 %v12475_v44  ;;  %4556 = vmatprep.subr.bf16.mxu1 %v12477_v49  ;;  %v12523_v28 = vcombine.high %v12266_v25, %v12270_v26  ;;  %v12522_v30 = vcombine.low %v12266_v25, %v12270_v26  ;;  %v12524_v31 = vcombine.low %v12267_v27, %v12271_v29  ;;  %v12274_v33 = vld [vmem:[%s19635_s4 + $0xb40] sm:$0xff]  ;;  %v12275_v35 = vld [vmem:[%s19635_s4 + $0xb48] sm:$0xff]  ;;  %v15964_v21 = vsub.s32 3, %v2202_v10 }
  0xf9   :  { %v12525_v32 = vcombine.high %v12267_v27, %v12271_v29  ;;  %v12278_v34 = vld [vmem:[%s19635_s4 + $0xb60] sm:$0xff]  ;;  %v12279_v37 = vld [vmem:[%s19635_s4 + $0xb68] sm:$0xff]  ;;  %2571 = vst.msk [vmem:[#allocation3 + $0xe6] ss:$8 sm:$0xf] %vm2477_vm0, %v19643_v9  ;;  %19676 = vst [vmem:[#allocation12_spill] sm:$0xff] %v15960_v19 }
  0xfa   :  { %v12531_v36 = vcombine.high %v12274_v33, %v12278_v34  ;;  %v12530_v38 = vcombine.low %v12274_v33, %v12278_v34  ;;  %v12532_v39 = vcombine.low %v12275_v35, %v12279_v37  ;;  %v12533_v40 = vcombine.high %v12275_v35, %v12279_v37  ;;  %v12282_v42 = vld [vmem:[%s19635_s4 + $0xb80] sm:$0xff]  ;;  %v12283_v44 = vld [vmem:[%s19635_s4 + $0xb88] sm:$0xff]  ;;  %19678 = vst [vmem:[#allocation14_spill] sm:$0xff] %v15964_v21 }
  0xfb   :  { %4451 = vmatpush1.bf16.msra.mxu0 %v12474_v47  ;;  %4557 = vmatpush1.bf16.msra.mxu1 %v12476_v48  ;;  %v12286_v43 = vld [vmem:[%s19635_s4 + $0xba0] sm:$0xff]  ;;  %v12287_v47 = vld [vmem:[%s19635_s4 + $0xba8] sm:$0xff]  ;;  %v15978_v27 = vsub.s32 4, %v2202_v10  ;;  %v15994_v34 = vsub.s32 5, %v2202_v10 }
  0xfc   :  { %4452 = vmatprep.subr.bf16.mxu0 %v12483_v53  ;;  %4558 = vmatprep.subr.bf16.mxu1 %v12485_v41  ;;  %v12539_v45 = vcombine.high %v12282_v42, %v12286_v43  ;;  %v12538_v48 = vcombine.low %v12282_v42, %v12286_v43  ;;  %v12540_v49 = vcombine.low %v12283_v44, %v12287_v47  ;;  %v12290_v51 = vld [vmem:[%s19635_s4 + $0xbc0] sm:$0xff]  ;;  %v12291_v53 = vld [vmem:[%s19635_s4 + $0xbc8] sm:$0xff] }
  0xfd   :  { %v12541_v50 = vcombine.high %v12283_v44, %v12287_v47  ;;  %v12294_v52 = vld [vmem:[%s19635_s4 + $0xbe0] sm:$0xff]  ;;  %19679 = vst [vmem:[#allocation15_spill] sm:$0xff] %v15978_v27  ;;  %19681 = vst [vmem:[#allocation17_spill] sm:$0xff] %v15994_v34 }
  0xfe   :  { %v12547_v54 = vcombine.high %v12290_v51, %v12294_v52  ;;  %v15918_v57 = vld [vmem:[%s19635_s4 + $0xc00] sm:$0xff] }
  0xff   :  { %4453 = vmatpush1.bf16.msra.mxu0 %v12482_v55  ;;  %4559 = vmatpush1.bf16.msra.mxu1 %v12484_v56  ;;  %v12295_v55 = vld [vmem:[%s19635_s4 + $0xbe8] sm:$0xff]  ;;  %v12546_v56 = vcombine.low %v12290_v51, %v12294_v52  ;;  %v15923_v17 = vld [vmem:[%s19635_s4 + $0xc20] sm:$0xff] }
 0x100   :  { %4454 = vmatprep.subr.bf16.mxu0 %v12491_v8  ;;  %4560 = vmatprep.subr.bf16.mxu1 %v12493_v62  ;;  %v12548_v41 = vcombine.low %v12291_v53, %v12295_v55  ;;  %v12549_v60 = vcombine.high %v12291_v53, %v12295_v55  ;;  %19672 = vst [vmem:[#allocation8_spill] sm:$0xff] %v15923_v17  ;;  %v15928_v8 = vld [vmem:[%s19635_s4 + $0xc08] sm:$0xff]  ;;  %v2199_v18 = vld [vmem:[%s19633_s2] sm:$0xff] }
 0x101   :  { %19673 = vst [vmem:[#allocation9_spill] sm:$0xff] %v15928_v8  ;;  %v2305_v25 = vld [vmem:[%s19634_s3] sm:$0xff]  ;;  %v15983_v29 = vrot.slane %v2199_v18, %v15960_v19 }
 0x102   :  { %v15997_v35 = vrot.slane %v2305_v25, %v15960_v19  ;;  %v16003_v37 = vrot.slane %v2305_v25, %v15964_v21  ;;  %v16012_v47 = vrot.slane %v2305_v25, %v15978_v27 }
 0x103   :  { %4455 = vmatpush1.bf16.msra.mxu0 %v12490_v59  ;;  %4561 = vmatpush1.bf16.msra.mxu1 %v12492_v61  ;;  %v12555_v59 = vcombine.high %v15918_v57, %v15923_v17  ;;  %v15935_v61 = vld [vmem:[%s19635_s4 + $0xc28] sm:$0xff] }
 0x104   :  { %4456 = vmatprep.subr.bf16.mxu0 %v12499_v2  ;;  %4562 = vmatprep.subr.bf16.mxu1 %v12501_v5  ;;  %19674 = vst [vmem:[#allocation10_spill] sm:$0xff] %v15935_v61  ;;  %v12557_v0 = vcombine.high %v15928_v8, %v15935_v61 }
 0x107   :  { %4457 = vmatpush1.bf16.msra.mxu0 %v12498_v4  ;;  %4563 = vmatpush1.bf16.msra.mxu1 %v12500_v46 }
 0x108   :  { %4458 = vmatprep.subr.bf16.mxu0 %v12507_v11  ;;  %4564 = vmatprep.subr.bf16.mxu1 %v12509_v15 }
 0x10b   :  { %4459 = vmatpush1.bf16.msra.mxu0 %v12506_v13  ;;  %4565 = vmatpush1.bf16.msra.mxu1 %v12508_v14  ;;  %v15951_v14 = vsub.s32 0, %v2202_v10 }
 0x10c   :  { %4460 = vmatprep.subr.bf16.mxu0 %v12515_v20  ;;  %4566 = vmatprep.subr.bf16.mxu1 %v12517_v24  ;;  %v15962_v20 = vsub.s32 1, %v2202_v10 }
 0x10d   :  { %19675 = vst [vmem:[#allocation11_spill] sm:$0xff] %v15951_v14  ;;  %v15976_v26 = vrot.slane %v2199_v18, %v15951_v14 }
 0x10e   :  { %19677 = vst [vmem:[#allocation13_spill] sm:$0xff] %v15962_v20 }
 0x10f   :  { %4461 = vmatpush1.bf16.msra.mxu0 %v12514_v23  ;;  %4567 = vmatpush1.bf16.msra.mxu1 %v12516_v22 }
 0x110   :  { %4462 = vmatprep.subr.bf16.mxu0 %v12523_v28  ;;  %4568 = vmatprep.subr.bf16.mxu1 %v12525_v32  ;;  %v15980_v28 = vsub.s32 6, %v2202_v10  ;;  %v15992_v32 = vrot.slane %v2305_v25, %v15951_v14 }
 0x112   :  { %19680 = vst [vmem:[#allocation16_spill] sm:$0xff] %v15980_v28 }
 0x113   :  { %4463 = vmatpush1.bf16.msra.mxu0 %v12522_v30  ;;  %4569 = vmatpush1.bf16.msra.mxu1 %v12524_v31  ;;  %v15986_v30 = vrot.slane %v2199_v18, %v15962_v20  ;;  %v15989_v31 = vrot.slane %v2199_v18, %v15964_v21 }
 0x114   :  { %4464 = vmatprep.subr.bf16.mxu0 %v12531_v36  ;;  %4570 = vmatprep.subr.bf16.mxu1 %v12533_v40  ;;  %v16000_v36 = vrot.slane %v2305_v25, %v15962_v20  ;;  %v16005_v40 = vsub.s32 7, %v2202_v10 }
 0x116   :  { %19682 = vst [vmem:[#allocation18_spill] sm:$0xff] %v16005_v40  ;;  %v16055_v10 = vrot.slane %v2199_v18, %v16005_v40 }
 0x117   :  { %4465 = vmatpush1.bf16.msra.mxu0 %v12530_v38  ;;  %4571 = vmatpush1.bf16.msra.mxu1 %v12532_v39 }
 0x118   :  { %4466 = vmatprep.subr.bf16.mxu0 %v12539_v45  ;;  %4572 = vmatprep.subr.bf16.mxu1 %v12541_v50  ;;  %v16009_v45 = vrot.slane %v2199_v18, %v15978_v27 }
 0x11b   :  { %4467 = vmatpush1.bf16.msra.mxu0 %v12538_v48  ;;  %4573 = vmatpush1.bf16.msra.mxu1 %v12540_v49  ;;  %v16015_v48 = vrot.slane %v2199_v18, %v15980_v28  ;;  %v16020_v49 = vld [vmem:[%s19635_s4 + $0xc40] sm:$0xff] }
 0x11c   :  { %4468 = vmatprep.subr.bf16.mxu0 %v12547_v54  ;;  %4574 = vmatprep.subr.bf16.mxu1 %v12549_v60  ;;  %19683 = vst [vmem:[#allocation19_spill] sm:$0xff] %v16020_v49  ;;  %v16039_v60 = vld [vmem:[%s19635_s4 + $0xc68] sm:$0xff] }
 0x11d   :  { %19686 = vst [vmem:[#allocation22_spill] sm:$0xff] %v16039_v60 }
 0x11f   :  { %4469 = vmatpush1.bf16.msra.mxu0 %v12546_v56  ;;  %4575 = vmatpush1.bf16.msra.mxu1 %v12548_v41  ;;  %v16029_v56 = vld [vmem:[%s19635_s4 + $0xc60] sm:$0xff]  ;;  %v16034_v41 = vld [vmem:[%s19635_s4 + $0xc48] sm:$0xff] }
 0x120   :  { %4491 = vmatprep.subr.bf16.mxu0 %v12555_v59  ;;  %4597 = vmatprep.subr.bf16.mxu1 %v12557_v0  ;;  %19684 = vst [vmem:[#allocation20_spill] sm:$0xff] %v16029_v56  ;;  %19685 = vst [vmem:[#allocation21_spill] sm:$0xff] %v16034_v41 }
 0x178   :  { %v1877_v1 = vpop.f32.mrb[0].mxu0  ;;  %v1950_v2 = vpop.f32.mrb[0].mxu1 }
 0x179   :  { %v1879_v3 = vpop.f32.mrb[1].mxu0  ;;  %v1952_v4 = vpop.f32.mrb[1].mxu1  ;;  %v2241_v42 = vmul.f32 %v15976_v26, %v1877_v1  ;;  %v2243_v50 = vmul.f32 %v15983_v29, %v1950_v2  ;;  %v16045_v2 = vrot.slane %v2199_v18, %v15994_v34 }
 0x17a   :  { %v1881_v46 = vpop.f32.mrb[2].mxu0  ;;  %v1954_v5 = vpop.f32.mrb[2].mxu1  ;;  %v2242_v51 = vmul.f32 %v15986_v30, %v1879_v3  ;;  %v2244_v52 = vmul.f32 %v15989_v31, %v1952_v4  ;;  %v16049_v4 = vrot.slane %v2305_v25, %v15980_v28 }
 0x17b   :  { %v1883_v6 = vpop.f32.mrb[3].mxu0  ;;  %v1956_v7 = vpop.f32.mrb[3].mxu1  ;;  %v2249_v53 = vmul.f32 %v15976_v26, %v1881_v46  ;;  %v2251_v58 = vmul.f32 %v15983_v29, %v1954_v5  ;;  %v16052_v46 = vrot.slane %v2305_v25, %v15994_v34  ;;  %v16058_v5 = vadd.f32 %v15992_v32, %v2241_v42 }
 0x17c   :  { %v2250_v59 = vmul.f32 %v15986_v30, %v1883_v6  ;;  %v2252_v0 = vmul.f32 %v15989_v31, %v1956_v7  ;;  %v16061_v6 = vrot.slane %v2305_v25, %v16005_v40  ;;  %v16068_v9 = vadd.f32 %v15997_v35, %v2243_v50 }
 0x17d   :  { %v16071_v63 = vadd.f32 %v16000_v36, %v2242_v51  ;;  %v16074_v18 = vadd.f32 %v16003_v37, %v2244_v52  ;;  %v16077_v42 = vadd.f32 %v15992_v32, %v2249_v53  ;;  %v16080_v25 = vadd.f32 %v15997_v35, %v2251_v58 }
 0x17e   :  { %v16083_v7 = vadd.f32 %v16000_v36, %v2250_v59 }
 0x180   :  { %v1887_v11 = vpop.f32.mrb[4].mxu0  ;;  %v15947_v12 = vpop.f32.mrb[4].mxu1 }
 0x181   :  { %v15949_v13 = vpop.f32.mrb[5].mxu0  ;;  %v15953_v15 = vpop.f32.mrb[5].mxu1  ;;  %v2257_v3 = vmul.f32 %v15976_v26, %v1887_v11  ;;  %v16086_v11 = vadd.f32 %v16003_v37, %v2252_v0  ;;  %v2259_v50 = vmul.f32 %v15983_v29, %v15947_v12 }
 0x182   :  { %v15955_v16 = vpop.f32.mrb[6].mxu0  ;;  %v15966_v23 = vpop.f32.mrb[6].mxu1  ;;  %v2258_v52 = vmul.f32 %v15986_v30, %v15949_v13  ;;  %v2260_v53 = vmul.f32 %v15989_v31, %v15953_v15 }
 0x183   :  { %v15968_v22 = vpop.f32.mrb[7].mxu0  ;;  %v15970_v24 = vpop.f32.mrb[7].mxu1  ;;  %v16091_v62 = vadd.f32 %v15992_v32, %v2257_v3  ;;  %v2265_v58 = vmul.f32 %v15976_v26, %v15955_v16  ;;  %v2267_v0 = vmul.f32 %v15983_v29, %v15966_v23  ;;  %v16111_v19 = vadd.f32 %v15997_v35, %v2259_v50 }
 0x184   :  { %v2266_v12 = vmul.f32 %v15986_v30, %v15968_v22  ;;  %v2268_v3 = vmul.f32 %v15989_v31, %v15970_v24 }
 0x185   :  { %v16127_v50 = vadd.f32 %v15997_v35, %v2267_v0 }
 0x188   :  { %v1897_v33 = vpop.f32.mrb[8].mxu0  ;;  %v1970_v38 = vpop.f32.mrb[8].mxu1 }
 0x189   :  { %v1899_v39 = vpop.f32.mrb[9].mxu0  ;;  %v1972_v43 = vpop.f32.mrb[9].mxu1  ;;  %v2273_v34 = vmul.f32 %v15976_v26, %v1897_v33  ;;  %v2275_v15 = vmul.f32 %v15983_v29, %v1970_v38  ;;  %v16117_v38 = vadd.f32 %v16000_v36, %v2258_v52 }
 0x18a   :  { %v1901_v44 = vpop.f32.mrb[10].mxu0  ;;  %v1974_v54 = vpop.f32.mrb[10].mxu1  ;;  %v2274_v27 = vmul.f32 %v15986_v30, %v1899_v39  ;;  %v2276_v16 = vmul.f32 %v15989_v31, %v1972_v43  ;;  %v16120_v39 = vadd.f32 %v16003_v37, %v2260_v53  ;;  %v16123_v43 = vadd.f32 %v15992_v32, %v2265_v58 }
 0x18b   :  { %v1903_v55 = vpop.f32.mrb[11].mxu0  ;;  %v1976_v1 = vpop.f32.mrb[11].mxu1  ;;  %v2281_v21 = vmul.f32 %v15976_v26, %v1901_v44  ;;  %v2283_v22 = vmul.f32 %v15983_v29, %v1974_v54  ;;  %v16130_v54 = vadd.f32 %v16000_v36, %v2266_v12  ;;  %v16139_v52 = vadd.f32 %v15997_v35, %v2275_v15 }
 0x18c   :  { %v2282_v24 = vmul.f32 %v15986_v30, %v1903_v55  ;;  %v2284_v33 = vmul.f32 %v15989_v31, %v1976_v1  ;;  %v16133_v55 = vadd.f32 %v16003_v37, %v2268_v3  ;;  %v16136_v1 = vadd.f32 %v15992_v32, %v2273_v34 }
 0x18d   :  { %v16142_v53 = vadd.f32 %v16000_v36, %v2274_v27  ;;  %v16148_v58 = vadd.f32 %v15992_v32, %v2281_v21  ;;  %v16151_v0 = vadd.f32 %v15997_v35, %v2283_v22 }
 0x18e   :  { %v16154_v12 = vadd.f32 %v16000_v36, %v2282_v24  ;;  %v16157_v34 = vadd.f32 %v16003_v37, %v2284_v33 }
 0x190   :  { %v1907_v51 = vpop.f32.mrb[12].mxu0  ;;  %v1980_v59 = vpop.f32.mrb[12].mxu1 }
 0x191   :  { %v1909_v40 = vpop.f32.mrb[13].mxu0  ;;  %v1982_v13 = vpop.f32.mrb[13].mxu1  ;;  %v2289_v44 = vmul.f32 %v15976_v26, %v1907_v51  ;;  %v16145_v51 = vadd.f32 %v16003_v37, %v2276_v16  ;;  %v2291_v3 = vmul.f32 %v15983_v29, %v1980_v59 }
 0x192   :  { %v1911_v28 = vpop.f32.mrb[14].mxu0  ;;  %v1984_v20 = vpop.f32.mrb[14].mxu1  ;;  %v2290_v16 = vmul.f32 %v15986_v30, %v1909_v40  ;;  %v2292_v21 = vmul.f32 %v15989_v31, %v1982_v13 }
 0x193   :  { %v1913_v23 = vpop.f32.mrb[15].mxu0  ;;  %v1986_v14 = vpop.f32.mrb[15].mxu1  ;;  %v16161_v27 = vadd.f32 %v15992_v32, %v2289_v44  ;;  %v2297_v24 = vmul.f32 %v15976_v26, %v1911_v28  ;;  %v2299_v49 = vmul.f32 %v15983_v29, %v1984_v20 }
 0x194   :  { %v2298_v44 = vmul.f32 %v15986_v30, %v1913_v23 }
 0x198   :  { %v2023_v15 = vpop.f32.mrb[16].mxu0  ;;  %v2096_v22 = vpop.f32.mrb[16].mxu1 }
 0x199   :  { %v2245_v41 = vmul.f32 %v16009_v45, %v2023_v15  ;;  %v2025_v60 = vpop.f32.mrb[17].mxu0  ;;  %v2247_v33 = vmul.f32 %v16015_v48, %v2096_v22  ;;  %v2098_v56 = vpop.f32.mrb[17].mxu1 }
 0x19a   :  { %v2246_v59 = vmul.f32 %v16045_v2, %v2025_v60  ;;  %v2027_v61 = vpop.f32.mrb[18].mxu0  ;;  %v2248_v13 = vmul.f32 %v16055_v10, %v2098_v56  ;;  %v2100_v8 = vpop.f32.mrb[18].mxu1 }
 0x19b   :  { %v2351_v40 = vadd.f32 %v16012_v47, %v2245_v41  ;;  %v2253_v15 = vmul.f32 %v16009_v45, %v2027_v61  ;;  %v2029_v17 = vpop.f32.mrb[19].mxu0  ;;  %v2353_v26 = vadd.f32 %v16049_v4, %v2247_v33  ;;  %v2255_v28 = vmul.f32 %v16015_v48, %v2100_v8  ;;  %v2102_v60 = vpop.f32.mrb[19].mxu1 }
 0x19c   :  { %v2352_v20 = vadd.f32 %v16052_v46, %v2246_v59  ;;  %v2254_v29 = vmul.f32 %v16045_v2, %v2029_v17  ;;  %v2354_v30 = vadd.f32 %v16061_v6, %v2248_v13  ;;  %v2256_v56 = vmul.f32 %v16055_v10, %v2102_v60 }
 0x19d   :  { %v2411_v22 = vmax.f32 %v16058_v5, %v2351_v40  ;;  %v2359_v41 = vadd.f32 %v16012_v47, %v2253_v15  ;;  %v2413_v61 = vmax.f32 %v16068_v9, %v2353_v26  ;;  %v2361_v33 = vadd.f32 %v16049_v4, %v2255_v28 }
 0x19e   :  { %v2412_v23 = vmax.f32 %v16071_v63, %v2352_v20  ;;  %v2360_v59 = vadd.f32 %v16052_v46, %v2254_v29  ;;  %v2300_v8 = vmul.f32 %v15989_v31, %v1986_v14  ;;  %v2414_v17 = vmax.f32 %v16074_v18, %v2354_v30 }
 0x19f   :  { %v2415_v5 = vmax.f32 %v16077_v42, %v2359_v41  ;;  %v16190_v40 = vadd.f32 %v16061_v6, %v2256_v56  ;;  %v16193_v13 = vadd.f32 %v15997_v35, %v2291_v3  ;;  %v16196_v9 = vadd.f32 %v16000_v36, %v2290_v16 }
 0x1a0   :  { %v2417_v63 = vmax.f32 %v16080_v25, %v2361_v33  ;;  %v2416_v15 = vmax.f32 %v16083_v7, %v2360_v59  ;;  %v2033_v26 = vpop.f32.mrb[20].mxu0  ;;  %v16201_v14 = vadd.f32 %v16003_v37, %v2292_v21  ;;  %v16204_v31 = vadd.f32 %v15992_v32, %v2297_v24  ;;  %v2106_v3 = vpop.f32.mrb[20].mxu1 }
 0x1a1   :  { %v2418_v18 = vmax.f32 %v16086_v11, %v16190_v40  ;;  %v2261_v42 = vmul.f32 %v16009_v45, %v2033_v26  ;;  %v2035_v20 = vpop.f32.mrb[21].mxu0  ;;  %v16210_v16 = vadd.f32 %v15997_v35, %v2299_v49  ;;  %v16213_v25 = vadd.f32 %v16000_v36, %v2298_v44  ;;  %v2108_v28 = vpop.f32.mrb[21].mxu1 }
 0x1a2   :  { %v2263_v7 = vmul.f32 %v16015_v48, %v2106_v3  ;;  %v2262_v21 = vmul.f32 %v16045_v2, %v2035_v20  ;;  %v2037_v32 = vpop.f32.mrb[22].mxu0  ;;  %v16218_v24 = vadd.f32 %v16003_v37, %v2300_v8  ;;  %v2264_v29 = vmul.f32 %v16055_v10, %v2108_v28  ;;  %v2110_v35 = vpop.f32.mrb[22].mxu1 }
 0x1a3   :  { %v2367_v11 = vadd.f32 %v16012_v47, %v2261_v42  ;;  %v2269_v60 = vmul.f32 %v16009_v45, %v2037_v32  ;;  %v2039_v49 = vpop.f32.mrb[23].mxu0  ;;  %v2271_v30 = vmul.f32 %v16015_v48, %v2110_v35  ;;  %v2112_v56 = vpop.f32.mrb[23].mxu1 }
 0x1a4   :  { %v2369_v36 = vadd.f32 %v16049_v4, %v2263_v7  ;;  %v2368_v44 = vadd.f32 %v16052_v46, %v2262_v21  ;;  %v2270_v41 = vmul.f32 %v16045_v2, %v2039_v49  ;;  %v2370_v33 = vadd.f32 %v16061_v6, %v2264_v29 }
 0x1a5   :  { %v2419_v37 = vmax.f32 %v16091_v62, %v2367_v11  ;;  %v2375_v59 = vadd.f32 %v16012_v47, %v2269_v60  ;;  %v2272_v8 = vmul.f32 %v16055_v10, %v2112_v56  ;;  %v2377_v42 = vadd.f32 %v16049_v4, %v2271_v30 }
 0x1a6   :  { %v2421_v40 = vmax.f32 %v16111_v19, %v2369_v36  ;;  %v2420_v26 = vmax.f32 %v16117_v38, %v2368_v44  ;;  %v2376_v3 = vadd.f32 %v16052_v46, %v2270_v41  ;;  %v2422_v7 = vmax.f32 %v16120_v39, %v2370_v33 }
 0x1a7   :  { %v2427_v20 = vmax.f32 %v2411_v22, %v2419_v37  ;;  %v2423_v21 = vmax.f32 %v16123_v43, %v2375_v59  ;;  %v2378_v62 = vadd.f32 %v16061_v6, %v2272_v8  ;;  %v2425_v11 = vmax.f32 %v16127_v50, %v2377_v42 }
 0x1a8   :  { %v2429_v28 = vmax.f32 %v2413_v61, %v2421_v40  ;;  %v2428_v32 = vmax.f32 %v2412_v23, %v2420_v26  ;;  %v2424_v29 = vmax.f32 %v16130_v54, %v2376_v3  ;;  %v2043_v19 = vpop.f32.mrb[24].mxu0  ;;  %v2430_v38 = vmax.f32 %v2414_v17, %v2422_v7  ;;  %v2116_v22 = vpop.f32.mrb[24].mxu1 }
 0x1a9   :  { %v16240_v60 = vmax.f32 %v2427_v20, 0.0  ;;  %v2431_v35 = vmax.f32 %v2415_v5, %v2423_v21  ;;  %v2426_v49 = vmax.f32 %v16133_v55, %v2378_v62  ;;  %v2045_v36 = vpop.f32.mrb[25].mxu0  ;;  %v2433_v44 = vmax.f32 %v2417_v63, %v2425_v11  ;;  %v2118_v23 = vpop.f32.mrb[25].mxu1 }
 0x1aa   :  { %v16243_v39 = vmax.f32 %v2429_v28, 0.0  ;;  %v16245_v43 = vmax.f32 %v2428_v32, 0.0  ;;  %v2432_v61 = vmax.f32 %v2416_v15, %v2424_v29  ;;  %v2047_v30 = vpop.f32.mrb[26].mxu0  ;;  %v16249_v54 = vmax.f32 %v2430_v38, 0.0  ;;  %v2120_v55 = vpop.f32.mrb[26].mxu1 }
 0x1ab   :  { %2517 = vst [vmem:[#allocation3 + $0x40] sm:$0xff] %v16240_v60  ;;  %v2542_v50 = vrot.slane %v16240_v60, 1  ;;  %v16251_v17 = vmax.f32 %v2431_v35, 0.0  ;;  %v2434_v5 = vmax.f32 %v2418_v18, %v2426_v49  ;;  %v2049_v41 = vpop.f32.mrb[27].mxu0  ;;  %v16257_v15 = vmax.f32 %v2433_v44, 0.0  ;;  %v2122_v33 = vpop.f32.mrb[27].mxu1 }
 0x1ac   :  { %2519 = vst [vmem:[#allocation3 + $0x50] sm:$0xff] %v16243_v39  ;;  %v2544_v56 = vrot.slane %v16243_v39, 1  ;;  %2518 = vst [vmem:[#allocation3 + $0x48] sm:$0xff] %v16245_v43  ;;  %v2543_v63 = vrot.slane %v16245_v43, 1  ;;  %v16259_v37 = vmax.f32 %v2432_v61, 0.0  ;;  %v2545_v18 = vrot.slane %v16249_v54, 1 }
 0x1ad   :  { %2559 = vst [vmem:[#allocation3 + $0xc0] sm:$0x3f] %v2542_v50  ;;  %2520 = vst [vmem:[#allocation3 + $0x58] sm:$0xff] %v16249_v54  ;;  %v2546_v59 = vrot.slane %v16251_v17, 1  ;;  %v16265_v8 = vmax.f32 %v2434_v5, 0.0  ;;  %v2277_v40 = vmul.f32 %v16009_v45, %v2043_v19  ;;  %v2548_v26 = vrot.slane %v16257_v15, 1 }
 0x1ae   :  { %2521 = vst [vmem:[#allocation3 + $0x60] sm:$0xff] %v16251_v17  ;;  %2561 = vst [vmem:[#allocation3 + $0xd0] sm:$0x3f] %v2544_v56  ;;  %v2547_v42 = vrot.slane %v16259_v37, 1  ;;  %v2279_v3 = vmul.f32 %v16015_v48, %v2116_v22  ;;  %v2278_v20 = vmul.f32 %v16045_v2, %v2045_v36  ;;  %v2280_v62 = vmul.f32 %v16055_v10, %v2118_v23 }
 0x1af   :  { %2560 = vst [vmem:[#allocation3 + $0xc8] sm:$0x3f] %v2543_v63  ;;  %2523 = vst [vmem:[#allocation3 + $0x70] sm:$0xff] %v16257_v15  ;;  %v2549_v7 = vrot.slane %v16265_v8, 1  ;;  %v2383_v21 = vadd.f32 %v16012_v47, %v2277_v40  ;;  %v2285_v28 = vmul.f32 %v16009_v45, %v2047_v30  ;;  %v2287_v29 = vmul.f32 %v16015_v48, %v2120_v55 }
 0x1b0   :  { %2522 = vst [vmem:[#allocation3 + $0x68] sm:$0xff] %v16259_v37  ;;  %2562 = vst [vmem:[#allocation3 + $0xd8] sm:$0x3f] %v2545_v18  ;;  %v2385_v32 = vadd.f32 %v16049_v4, %v2279_v3  ;;  %v2384_v11 = vadd.f32 %v16052_v46, %v2278_v20  ;;  %v2286_v19 = vmul.f32 %v16045_v2, %v2049_v41  ;;  %v2053_v38 = vpop.f32.mrb[28].mxu0  ;;  %v2126_v44 = vpop.f32.mrb[28].mxu1 }
 0x1b1   :  { %2563 = vst [vmem:[#allocation3 + $0xe0] sm:$0x3f] %v2546_v59  ;;  %2524 = vst [vmem:[#allocation3 + $0x78] sm:$0xff] %v16265_v8  ;;  %v2443_v35 = vmax.f32 %v16136_v1, %v2383_v21  ;;  %v2386_v49 = vadd.f32 %v16061_v6, %v2280_v62  ;;  %v2391_v22 = vadd.f32 %v16012_v47, %v2285_v28  ;;  %v2055_v61 = vpop.f32.mrb[29].mxu0  ;;  %v2128_v55 = vpop.f32.mrb[29].mxu1 }
 0x1b2   :  { %2565 = vst [vmem:[#allocation3 + $0xf0] sm:$0x3f] %v2548_v26  ;;  %2564 = vst [vmem:[#allocation3 + $0xe8] sm:$0x3f] %v2547_v42  ;;  %v2288_v36 = vmul.f32 %v16055_v10, %v2122_v33  ;;  %v2445_v23 = vmax.f32 %v16139_v52, %v2385_v32  ;;  %v2444_v30 = vmax.f32 %v16142_v53, %v2384_v11  ;;  %v2057_v41 = vpop.f32.mrb[30].mxu0  ;;  %v2130_v18 = vpop.f32.mrb[30].mxu1 }
 0x1b3   :  { %2566 = vst [vmem:[#allocation3 + $0xf8] sm:$0x3f] %v2549_v7  ;;  %v2393_v50 = vadd.f32 %v16049_v4, %v2287_v29  ;;  %v2392_v5 = vadd.f32 %v16052_v46, %v2286_v19  ;;  %v2446_v1 = vmax.f32 %v16145_v51, %v2386_v49  ;;  %v2447_v56 = vmax.f32 %v16148_v58, %v2391_v22  ;;  %v2059_v59 = vpop.f32.mrb[31].mxu0  ;;  %v2132_v42 = vpop.f32.mrb[31].mxu1 }
 0x1b4   :  { %v2394_v63 = vadd.f32 %v16061_v6, %v2288_v36  ;;  %v2293_v33 = vmul.f32 %v16009_v45, %v2053_v38  ;;  %v2295_v40 = vmul.f32 %v16015_v48, %v2126_v44  ;;  %v2294_v26 = vmul.f32 %v16045_v2, %v2055_v61 }
 0x1b5   :  { %v2449_v52 = vmax.f32 %v16151_v0, %v2393_v50  ;;  %v2448_v53 = vmax.f32 %v16154_v12, %v2392_v5  ;;  %v2296_v58 = vmul.f32 %v16055_v10, %v2128_v55  ;;  %v2301_v20 = vmul.f32 %v16009_v45, %v2057_v41 }
 0x1b6   :  { %v2450_v3 = vmax.f32 %v16157_v34, %v2394_v63  ;;  %v2399_v51 = vadd.f32 %v16012_v47, %v2293_v33  ;;  %v2401_v7 = vadd.f32 %v16049_v4, %v2295_v40  ;;  %v2400_v21 = vadd.f32 %v16052_v46, %v2294_v26  ;;  %v12314_v33 = vld [vmem:[%s19635_s4 + $0xc80] sm:$0xff] }
 0x1b7   :  { %v2303_v0 = vmul.f32 %v16015_v48, %v2130_v18  ;;  %v2302_v12 = vmul.f32 %v16045_v2, %v2059_v59  ;;  %v2402_v28 = vadd.f32 %v16061_v6, %v2296_v58  ;;  %v2407_v34 = vadd.f32 %v16012_v47, %v2301_v20  ;;  %v19694_v20 = vld [vmem:[#allocation22_spill] sm:$0xff] }
 0x1b8   :  { %v2451_v62 = vmax.f32 %v16161_v27, %v2399_v51  ;;  %v2304_v32 = vmul.f32 %v16055_v10, %v2132_v42  ;;  %v2453_v11 = vmax.f32 %v16193_v13, %v2401_v7  ;;  %v2452_v45 = vmax.f32 %v16196_v9, %v2400_v21  ;;  %v19687_v42 = vld [vmem:[#allocation8_spill] sm:$0xff]  ;;  %v19695_v7 = vld [vmem:[#allocation21_spill] sm:$0xff] }
 0x1b9   :  { %v2409_v29 = vadd.f32 %v16049_v4, %v2303_v0  ;;  %v2408_v19 = vadd.f32 %v16052_v46, %v2302_v12  ;;  %v2454_v48 = vmax.f32 %v16201_v14, %v2402_v28  ;;  %v2455_v2 = vmax.f32 %v16204_v31, %v2407_v34  ;;  %v12322_v28 = vld [vmem:[%s19635_s4 + $0xcc0] sm:$0xff] }
 0x1ba   :  { %v2459_v38 = vmax.f32 %v2443_v35, %v2451_v62  ;;  %v2410_v27 = vadd.f32 %v16061_v6, %v2304_v32  ;;  %v2461_v49 = vmax.f32 %v2445_v23, %v2453_v11  ;;  %v2460_v22 = vmax.f32 %v2444_v30, %v2452_v45  ;;  %v12326_v34 = vld [vmem:[%s19635_s4 + $0xce0] sm:$0xff]  ;;  %v12323_v32 = vld [vmem:[%s19635_s4 + $0xcc8] sm:$0xff] }
 0x1bb   :  { %v2457_v47 = vmax.f32 %v16210_v16, %v2409_v29  ;;  %v2456_v10 = vmax.f32 %v16213_v25, %v2408_v19  ;;  %v2462_v36 = vmax.f32 %v2446_v1, %v2454_v48  ;;  %v2463_v9 = vmax.f32 %v2447_v56, %v2455_v2  ;;  %v12327_v11 = vld [vmem:[%s19635_s4 + $0xce8] sm:$0xff]  ;;  %v12330_v48 = vld [vmem:[%s19635_s4 + $0xd00] sm:$0xff] }
 0x1bc   :  { %v2467_v13 = vmax.f32 %v2459_v38, 0.0  ;;  %v2458_v4 = vmax.f32 %v16218_v24, %v2410_v27  ;;  %v2469_v44 = vmax.f32 %v2461_v49, 0.0  ;;  %v2468_v46 = vmax.f32 %v2460_v22, 0.0  ;;  %v12334_v2 = vld [vmem:[%s19635_s4 + $0xd20] sm:$0xff]  ;;  %v12331_v27 = vld [vmem:[%s19635_s4 + $0xd08] sm:$0xff] }
 0x1bd   :  { %v2465_v35 = vmax.f32 %v2449_v52, %v2457_v47  ;;  %v2464_v61 = vmax.f32 %v2448_v53, %v2456_v10  ;;  %v2470_v31 = vmax.f32 %v2462_v36, 0.0  ;;  %v2471_v50 = vmax.f32 %v2463_v9, 0.0  ;;  %v12335_v49 = vld [vmem:[%s19635_s4 + $0xd28] sm:$0xff]  ;;  %v12338_v36 = vld [vmem:[%s19635_s4 + $0xd40] sm:$0xff] }
 0x1be   :  { %v2492_v14 = vrot.slane %v2467_v13, 7  ;;  %2526 = vst [vmem:[#allocation3 + $0x80] sm:$0xff] %v2467_v13  ;;  %v2466_v6 = vmax.f32 %v2450_v3, %v2458_v4  ;;  %v2494_v23 = vrot.slane %v2469_v44, 7  ;;  %2528 = vst [vmem:[#allocation3 + $0x90] sm:$0xff] %v2469_v44  ;;  %v2493_v30 = vrot.slane %v2468_v46, 7  ;;  %v12342_v9 = vld [vmem:[%s19635_s4 + $0xd60] sm:$0xff] }
 0x1bf   :  { %2527 = vst [vmem:[#allocation3 + $0x88] sm:$0xff] %v2468_v46  ;;  %v2473_v16 = vmax.f32 %v2465_v35, 0.0  ;;  %v2472_v25 = vmax.f32 %v2464_v61, 0.0  ;;  %v2495_v5 = vrot.slane %v2470_v31, 7  ;;  %2529 = vst [vmem:[#allocation3 + $0x98] sm:$0xff] %v2470_v31  ;;  %v2496_v55 = vrot.slane %v2471_v50, 7 }
 0x1c0   :  { %2508 = vst [vmem:[#allocation3] sm:$0xfe] %v2492_v14  ;;  %2530 = vst [vmem:[#allocation3 + $0xa0] sm:$0xff] %v2471_v50  ;;  %v2474_v24 = vmax.f32 %v2466_v6, 0.0  ;;  %v16323_v41 = vpack.c.bf16 %v16259_v37, %v16245_v43  ;;  %v16327_v63 = vpack.c.bf16 %v16251_v17, %v16240_v60  ;;  %v12318_v37 = vld [vmem:[%s19635_s4 + $0xca0] sm:$0xff]  ;;  %v12315_v60 = vld [vmem:[%s19635_s4 + $0xc88] sm:$0xff]  ;;  %v16345_v59 = vpack.c.bf16 %v2471_v50, %v2467_v13 }
 0x1c1   :  { %2510 = vst [vmem:[#allocation3 + $0x10] sm:$0xfe] %v2494_v23  ;;  %2509 = vst [vmem:[#allocation3 + $0x8] sm:$0xfe] %v2493_v30  ;;  %v2498_v1 = vrot.slane %v2473_v16, 7  ;;  %v2497_v56 = vrot.slane %v2472_v25, 7  ;;  %v16332_v18 = vpack.c.bf16 %v2472_v25, %v2468_v46  ;;  %v16349_v52 = vpack.c.bf16 %v16265_v8, %v16249_v54 }
 0x1c2   :  { %2532 = vst [vmem:[#allocation3 + $0xb0] sm:$0xff] %v2473_v16  ;;  %2531 = vst [vmem:[#allocation3 + $0xa8] sm:$0xff] %v2472_v25  ;;  %v2499_v43 = vrot.slane %v2474_v24, 7  ;;  %4470 = vmatprep.mubr.bf16.mxu0 %v16323_v41  ;;  %4576 = vmatprep.mubr.bf16.mxu1 %v16323_v41  ;;  %v12319_v17 = vld [vmem:[%s19635_s4 + $0xca8] sm:$0xff]  ;;  %v16353_v53 = vpack.c.bf16 %v16257_v15, %v16243_v39  ;;  %v16357_v40 = vpack.c.bf16 %v2474_v24, %v2470_v31  ;;  %v19690_v8 = vld [vmem:[#allocation10_spill] sm:$0xff] }
 0x1c3   :  { %2511 = vst [vmem:[#allocation3 + $0x18] sm:$0xfe] %v2495_v5  ;;  %2512 = vst [vmem:[#allocation3 + $0x20] sm:$0xfe] %v2496_v55  ;;  %4471 = vmatmul.mubr.bf16.vlgmr.msra.gmra.mrb[32].mxu0 %v16327_v63  ;;  %4577 = vmatmul.mubr.bf16.vlgmr.msra.gmra.mrb[32].mxu1 %v16327_v63  ;;  %v16359_v26 = vpack.c.bf16 %v2473_v16, %v2469_v44  ;;  %v19688_v3 = vcombine.low %v15918_v57, %v19687_v42  ;;  %v19689_v54 = vld [vmem:[#allocation9_spill] sm:$0xff]  ;;  %v19692_v39 = vld [vmem:[#allocation20_spill] sm:$0xff] }
 0x1c4   :  { %2533 = vst [vmem:[#allocation3 + $0xb8] sm:$0xff] %v2474_v24  ;;  %2514 = vst [vmem:[#allocation3 + $0x30] sm:$0xfe] %v2498_v1  ;;  %v19691_v51 = vcombine.low %v19689_v54, %v19690_v8  ;;  %v19693_v15 = vld [vmem:[#allocation19_spill] sm:$0xff]  ;;  %v12564_v21 = vcombine.low %v19695_v7, %v19694_v20  ;;  %v19697_v12 = vcombine.high %v19695_v7, %v19694_v20  ;;  %4480 = vmatprep.mubr.bf16.mxu0 %v16332_v18  ;;  %v12339_v4 = vld [vmem:[%s19635_s4 + $0xd48] sm:$0xff] }
 0x1c5   :  { %2513 = vst [vmem:[#allocation3 + $0x28] sm:$0xfe] %v2497_v56  ;;  %2515 = vst [vmem:[#allocation3 + $0x38] sm:$0xfe] %v2499_v43  ;;  %4492 = vmatpush1.bf16.msra.mxu0 %v19688_v3  ;;  %v12562_v58 = vcombine.low %v19693_v15, %v19692_v39  ;;  %v19696_v0 = vcombine.high %v19693_v15, %v19692_v39  ;;  %v12571_v57 = vcombine.high %v12314_v33, %v12318_v37  ;;  %v12343_v44 = vld [vmem:[%s19635_s4 + $0xd68] sm:$0xff]  ;;  %v12346_v31 = vld [vmem:[%s19635_s4 + $0xd80] sm:$0xff] }
 0x1c6   :  { %4598 = vmatpush1.bf16.msra.mxu1 %v19691_v51  ;;  %v12573_v62 = vcombine.high %v12315_v60, %v12319_v17  ;;  %4586 = vmatprep.mubr.bf16.mxu1 %v16332_v18  ;;  %v12570_v45 = vcombine.low %v12314_v33, %v12318_v37  ;;  %v12572_v29 = vcombine.low %v12315_v60, %v12319_v17  ;;  %v12350_v50 = vld [vmem:[%s19635_s4 + $0xda0] sm:$0xff]  ;;  %v12347_v6 = vld [vmem:[%s19635_s4 + $0xd88] sm:$0xff] }
 0x1c7   :  { %4493 = vmatprep.subr.bf16.mxu0 %v19696_v0  ;;  %4599 = vmatprep.subr.bf16.mxu1 %v19697_v12  ;;  %v12579_v19 = vcombine.high %v12322_v28, %v12326_v34  ;;  %v12581_v38 = vcombine.high %v12323_v32, %v12327_v11  ;;  %v12578_v22 = vcombine.low %v12322_v28, %v12326_v34  ;;  %v12351_v23 = vld [vmem:[%s19635_s4 + $0xda8] sm:$0xff]  ;;  %v12354_v55 = vld [vmem:[%s19635_s4 + $0xdc0] sm:$0xff] }
 0x1c8   :  { %v12580_v47 = vcombine.low %v12323_v32, %v12327_v11  ;;  %v12587_v10 = vcombine.high %v12330_v48, %v12334_v2  ;;  %v12589_v13 = vcombine.high %v12331_v27, %v12335_v49  ;;  %v12586_v46 = vcombine.low %v12330_v48, %v12334_v2  ;;  %v12358_v24 = vld [vmem:[%s19635_s4 + $0xde0] sm:$0xff]  ;;  %v12355_v1 = vld [vmem:[%s19635_s4 + $0xdc8] sm:$0xff] }
 0x1c9   :  { %4494 = vmatpush1.bf16.msra.mxu0 %v12562_v58  ;;  %v12588_v35 = vcombine.low %v12331_v27, %v12335_v49  ;;  %v12595_v61 = vcombine.high %v12338_v36, %v12342_v9  ;;  %v12597_v14 = vcombine.high %v12339_v4, %v12343_v44  ;;  %v12594_v30 = vcombine.low %v12338_v36, %v12342_v9  ;;  %v12359_v56 = vld [vmem:[%s19635_s4 + $0xde8] sm:$0xff]  ;;  %v12362_v17 = vld [vmem:[%s19635_s4 + $0xe00] sm:$0xff] }
 0x1ca   :  { %4600 = vmatpush1.bf16.msra.mxu1 %v12564_v21  ;;  %4495 = vmatprep.subr.bf16.mxu0 %v12571_v57  ;;  %v12596_v16 = vcombine.low %v12339_v4, %v12343_v44  ;;  %v12603_v25 = vcombine.high %v12346_v31, %v12350_v50  ;;  %v12605_v5 = vcombine.high %v12347_v6, %v12351_v23  ;;  %v12366_v42 = vld [vmem:[%s19635_s4 + $0xe20] sm:$0xff]  ;;  %v12363_v3 = vld [vmem:[%s19635_s4 + $0xe08] sm:$0xff] }
 0x1cb   :  { %4601 = vmatprep.subr.bf16.mxu1 %v12573_v62  ;;  %4481 = vmatmul.mubr.bf16.gmra.mrb[36].mxu0 %v16345_v59  ;;  %v12602_v33 = vcombine.low %v12346_v31, %v12350_v50  ;;  %v12604_v43 = vcombine.low %v12347_v6, %v12351_v23  ;;  %v12611_v37 = vcombine.high %v12354_v55, %v12358_v24  ;;  %v12367_v54 = vld [vmem:[%s19635_s4 + $0xe28] sm:$0xff]  ;;  %v12370_v58 = vld [vmem:[%s19635_s4 + $0xe40] sm:$0xff] }
 0x1cc   :  { %4587 = vmatmul.mubr.bf16.gmra.mrb[36].mxu1 %v16345_v59  ;;  %4523 = vmatprep.mubr.bf16.mxu0 %v16349_v52  ;;  %v12613_v60 = vcombine.high %v12355_v1, %v12359_v56  ;;  %v12610_v8 = vcombine.low %v12354_v55, %v12358_v24  ;;  %v12612_v51 = vcombine.low %v12355_v1, %v12359_v56  ;;  %v12374_v20 = vld [vmem:[%s19635_s4 + $0xe60] sm:$0xff]  ;;  %v12371_v7 = vld [vmem:[%s19635_s4 + $0xe48] sm:$0xff] }
 0x1cd   :  { %4496 = vmatpush1.bf16.msra.mxu0 %v12570_v45  ;;  %4629 = vmatprep.mubr.bf16.mxu1 %v16349_v52  ;;  %v12619_v39 = vcombine.high %v12362_v17, %v12366_v42  ;;  %v12621_v15 = vcombine.high %v12363_v3, %v12367_v54  ;;  %v12375_v21 = vld [vmem:[%s19635_s4 + $0xe68] sm:$0xff]  ;;  %v12618_v0 = vcombine.low %v12362_v17, %v12366_v42  ;;  %v12378_v28 = vld [vmem:[%s19635_s4 + $0xe80] sm:$0xff] }
 0x1ce   :  { %4602 = vmatpush1.bf16.msra.mxu1 %v12572_v29  ;;  %4497 = vmatprep.subr.bf16.mxu0 %v12579_v19  ;;  %v12620_v12 = vcombine.low %v12363_v3, %v12367_v54  ;;  %v12627_v57 = vcombine.high %v12370_v58, %v12374_v20  ;;  %v12629_v62 = vcombine.high %v12371_v7, %v12375_v21  ;;  %v12382_v34 = vld [vmem:[%s19635_s4 + $0xea0] sm:$0xff]  ;;  %v12379_v32 = vld [vmem:[%s19635_s4 + $0xe88] sm:$0xff] }
 0x1cf   :  { %4603 = vmatprep.subr.bf16.mxu1 %v12581_v38  ;;  %v12383_v11 = vld [vmem:[%s19635_s4 + $0xea8] sm:$0xff]  ;;  %v12626_v45 = vcombine.low %v12370_v58, %v12374_v20  ;;  %v12628_v29 = vcombine.low %v12371_v7, %v12375_v21  ;;  %v12635_v19 = vcombine.high %v12378_v28, %v12382_v34  ;;  %v12386_v48 = vld [vmem:[%s19635_s4 + $0xec0] sm:$0xff]  ;;  %v12172_v58 = vld [vmem:[%s19635_s4 + $0x810] sm:$0xff] }
 0x1d0   :  { %v12637_v38 = vcombine.high %v12379_v32, %v12383_v11  ;;  %v12390_v2 = vld [vmem:[%s19635_s4 + $0xee0] sm:$0xff]  ;;  %v12387_v27 = vld [vmem:[%s19635_s4 + $0xec8] sm:$0xff]  ;;  %v12176_v20 = vld [vmem:[%s19635_s4 + $0x830] sm:$0xff] }
 0x1d1   :  { %4498 = vmatpush1.bf16.msra.mxu0 %v12578_v22  ;;  %v12391_v49 = vld [vmem:[%s19635_s4 + $0xee8] sm:$0xff]  ;;  %v12634_v22 = vcombine.low %v12378_v28, %v12382_v34  ;;  %v12394_v36 = vld [vmem:[%s19635_s4 + $0xf00] sm:$0xff]  ;;  %v12173_v7 = vld [vmem:[%s19635_s4 + $0x818] sm:$0xff] }
 0x1d2   :  { %4604 = vmatpush1.bf16.msra.mxu1 %v12580_v47  ;;  %4499 = vmatprep.subr.bf16.mxu0 %v12587_v10  ;;  %v12636_v47 = vcombine.low %v12379_v32, %v12383_v11  ;;  %v12643_v10 = vcombine.high %v12386_v48, %v12390_v2  ;;  %v12398_v9 = vld [vmem:[%s19635_s4 + $0xf20] sm:$0xff]  ;;  %v12395_v4 = vld [vmem:[%s19635_s4 + $0xf08] sm:$0xff]  ;;  %v12177_v21 = vld [vmem:[%s19635_s4 + $0x838] sm:$0xff] }
 0x1d3   :  { %4605 = vmatprep.subr.bf16.mxu1 %v12589_v13  ;;  %v12645_v13 = vcombine.high %v12387_v27, %v12391_v49  ;;  %v12399_v44 = vld [vmem:[%s19635_s4 + $0xf28] sm:$0xff]  ;;  %v12402_v31 = vld [vmem:[%s19635_s4 + $0xf40] sm:$0xff]  ;;  %v12180_v28 = vld [vmem:[%s19635_s4 + $0x850] sm:$0xff] }
 0x1d4   :  { %v12406_v50 = vld [vmem:[%s19635_s4 + $0xf60] sm:$0xff]  ;;  %v12403_v6 = vld [vmem:[%s19635_s4 + $0xf48] sm:$0xff]  ;;  %v12184_v34 = vld [vmem:[%s19635_s4 + $0x870] sm:$0xff] }
 0x1d5   :  { %4500 = vmatpush1.bf16.msra.mxu0 %v12586_v46  ;;  %v12642_v46 = vcombine.low %v12386_v48, %v12390_v2  ;;  %v12407_v23 = vld [vmem:[%s19635_s4 + $0xf68] sm:$0xff]  ;;  %v12410_v55 = vld [vmem:[%s19635_s4 + $0xf80] sm:$0xff]  ;;  %v12181_v32 = vld [vmem:[%s19635_s4 + $0x858] sm:$0xff] }
 0x1d6   :  { %4606 = vmatpush1.bf16.msra.mxu1 %v12588_v35  ;;  %4501 = vmatprep.subr.bf16.mxu0 %v12595_v61  ;;  %v12644_v35 = vcombine.low %v12387_v27, %v12391_v49  ;;  %v12651_v61 = vcombine.high %v12394_v36, %v12398_v9  ;;  %v12414_v24 = vld [vmem:[%s19635_s4 + $0xfa0] sm:$0xff]  ;;  %v12411_v1 = vld [vmem:[%s19635_s4 + $0xf88] sm:$0xff]  ;;  %v12185_v11 = vld [vmem:[%s19635_s4 + $0x878] sm:$0xff] }
 0x1d7   :  { %4607 = vmatprep.subr.bf16.mxu1 %v12597_v14  ;;  %v12653_v14 = vcombine.high %v12395_v4, %v12399_v44  ;;  %v12415_v56 = vld [vmem:[%s19635_s4 + $0xfa8] sm:$0xff]  ;;  %v12418_v17 = vld [vmem:[%s19635_s4 + $0xfc0] sm:$0xff]  ;;  %v12188_v48 = vld [vmem:[%s19635_s4 + $0x890] sm:$0xff] }
 0x1d8   :  { %v12422_v42 = vld [vmem:[%s19635_s4 + $0xfe0] sm:$0xff]  ;;  %v12419_v3 = vld [vmem:[%s19635_s4 + $0xfc8] sm:$0xff]  ;;  %v12192_v2 = vld [vmem:[%s19635_s4 + $0x8b0] sm:$0xff] }
 0x1d9   :  { %4502 = vmatpush1.bf16.msra.mxu0 %v12594_v30  ;;  %v12650_v30 = vcombine.low %v12394_v36, %v12398_v9  ;;  %v12423_v54 = vld [vmem:[%s19635_s4 + $0xfe8] sm:$0xff]  ;;  %v12189_v27 = vld [vmem:[%s19635_s4 + $0x898] sm:$0xff]  ;;  %v12196_v36 = vld [vmem:[%s19635_s4 + $0x8d0] sm:$0xff] }
 0x1da   :  { %4608 = vmatpush1.bf16.msra.mxu1 %v12596_v16  ;;  %4503 = vmatprep.subr.bf16.mxu0 %v12603_v25  ;;  %v12652_v16 = vcombine.low %v12395_v4, %v12399_v44  ;;  %v12659_v25 = vcombine.high %v12402_v31, %v12406_v50  ;;  %v12193_v49 = vld [vmem:[%s19635_s4 + $0x8b8] sm:$0xff]  ;;  %v12200_v9 = vld [vmem:[%s19635_s4 + $0x8f0] sm:$0xff] }
 0x1db   :  { %4609 = vmatprep.subr.bf16.mxu1 %v12605_v5  ;;  %v12661_v5 = vcombine.high %v12403_v6, %v12407_v23  ;;  %v12197_v4 = vld [vmem:[%s19635_s4 + $0x8d8] sm:$0xff] }
 0x1dc   :  { %v12201_v44 = vld [vmem:[%s19635_s4 + $0x8f8] sm:$0xff] }
 0x1dd   :  { %4504 = vmatpush1.bf16.msra.mxu0 %v12602_v33  ;;  %v12658_v33 = vcombine.low %v12402_v31, %v12406_v50  ;;  %v12204_v31 = vld [vmem:[%s19635_s4 + $0x910] sm:$0xff] }
 0x1de   :  { %4610 = vmatpush1.bf16.msra.mxu1 %v12604_v43  ;;  %4505 = vmatprep.subr.bf16.mxu0 %v12611_v37  ;;  %v12660_v43 = vcombine.low %v12403_v6, %v12407_v23  ;;  %v12667_v37 = vcombine.high %v12410_v55, %v12414_v24  ;;  %v12208_v50 = vld [vmem:[%s19635_s4 + $0x930] sm:$0xff]  ;;  %v12205_v6 = vld [vmem:[%s19635_s4 + $0x918] sm:$0xff] }
 0x1df   :  { %4611 = vmatprep.subr.bf16.mxu1 %v12613_v60  ;;  %v12669_v60 = vcombine.high %v12411_v1, %v12415_v56  ;;  %v12209_v23 = vld [vmem:[%s19635_s4 + $0x938] sm:$0xff] }
 0x1e1   :  { %4506 = vmatpush1.bf16.msra.mxu0 %v12610_v8  ;;  %v12666_v8 = vcombine.low %v12410_v55, %v12414_v24  ;;  %v12212_v55 = vld [vmem:[%s19635_s4 + $0x950] sm:$0xff] }
 0x1e2   :  { %4612 = vmatpush1.bf16.msra.mxu1 %v12612_v51  ;;  %4507 = vmatprep.subr.bf16.mxu0 %v12619_v39  ;;  %v12668_v51 = vcombine.low %v12411_v1, %v12415_v56  ;;  %v12675_v39 = vcombine.high %v12418_v17, %v12422_v42  ;;  %v12216_v24 = vld [vmem:[%s19635_s4 + $0x970] sm:$0xff]  ;;  %v12217_v1 = vld [vmem:[%s19635_s4 + $0x978] sm:$0xff]  ;;  %v12462_v56 = vcombine.low %v12204_v31, %v12208_v50 }
 0x1e3   :  { %4613 = vmatprep.subr.bf16.mxu1 %v12621_v15  ;;  %v12677_v15 = vcombine.high %v12419_v3, %v12423_v54 }
 0x1e5   :  { %4508 = vmatpush1.bf16.msra.mxu0 %v12618_v0  ;;  %v12674_v0 = vcombine.low %v12418_v17, %v12422_v42  ;;  %v12224_v17 = vld [vmem:[%s19635_s4 + $0x9b0] sm:$0xff]  ;;  %v12221_v42 = vld [vmem:[%s19635_s4 + $0x998] sm:$0xff] }
 0x1e6   :  { %4614 = vmatpush1.bf16.msra.mxu1 %v12620_v12  ;;  %4509 = vmatprep.subr.bf16.mxu0 %v12627_v57  ;;  %v12676_v12 = vcombine.low %v12419_v3, %v12423_v54  ;;  %v12431_v57 = vcombine.high %v12172_v58, %v12176_v20  ;;  %v12225_v3 = vld [vmem:[%s19635_s4 + $0x9b8] sm:$0xff]  ;;  %v12470_v54 = vcombine.low %v12212_v55, %v12216_v24 }
 0x1e7   :  { %4615 = vmatprep.subr.bf16.mxu1 %v12629_v62  ;;  %v12433_v62 = vcombine.high %v12173_v7, %v12177_v21 }
 0x1e9   :  { %4510 = vmatpush1.bf16.msra.mxu0 %v12626_v45  ;;  %v12430_v45 = vcombine.low %v12172_v58, %v12176_v20  ;;  %v12232_v58 = vld [vmem:[%s19635_s4 + $0x9f0] sm:$0xff]  ;;  %v12229_v20 = vld [vmem:[%s19635_s4 + $0x9d8] sm:$0xff] }
 0x1ea   :  { %4616 = vmatpush1.bf16.msra.mxu1 %v12628_v29  ;;  %4511 = vmatprep.subr.bf16.mxu0 %v12635_v19  ;;  %v12432_v29 = vcombine.low %v12173_v7, %v12177_v21  ;;  %v12439_v19 = vcombine.high %v12180_v28, %v12184_v34  ;;  %v12233_v7 = vld [vmem:[%s19635_s4 + $0x9f8] sm:$0xff] }
 0x1eb   :  { %4617 = vmatprep.subr.bf16.mxu1 %v12637_v38  ;;  %v12441_v38 = vcombine.high %v12181_v32, %v12185_v11 }
 0x1ed   :  { %4512 = vmatpush1.bf16.msra.mxu0 %v12634_v22  ;;  %v12438_v22 = vcombine.low %v12180_v28, %v12184_v34  ;;  %v12240_v28 = vld [vmem:[%s19635_s4 + $0xa30] sm:$0xff]  ;;  %v12237_v34 = vld [vmem:[%s19635_s4 + $0xa18] sm:$0xff] }
 0x1ee   :  { %4618 = vmatpush1.bf16.msra.mxu1 %v12636_v47  ;;  %4513 = vmatprep.subr.bf16.mxu0 %v12643_v10  ;;  %v12440_v47 = vcombine.low %v12181_v32, %v12185_v11  ;;  %v12447_v10 = vcombine.high %v12188_v48, %v12192_v2  ;;  %v12241_v32 = vld [vmem:[%s19635_s4 + $0xa38] sm:$0xff] }
 0x1ef   :  { %4619 = vmatprep.subr.bf16.mxu1 %v12645_v13  ;;  %v12449_v13 = vcombine.high %v12189_v27, %v12193_v49 }
 0x1f1   :  { %4514 = vmatpush1.bf16.msra.mxu0 %v12642_v46  ;;  %v12446_v46 = vcombine.low %v12188_v48, %v12192_v2  ;;  %v12248_v48 = vld [vmem:[%s19635_s4 + $0xa70] sm:$0xff]  ;;  %v12245_v2 = vld [vmem:[%s19635_s4 + $0xa58] sm:$0xff] }
 0x1f2   :  { %4620 = vmatpush1.bf16.msra.mxu1 %v12644_v35  ;;  %4515 = vmatprep.subr.bf16.mxu0 %v12651_v61  ;;  %v12448_v35 = vcombine.low %v12189_v27, %v12193_v49  ;;  %v12455_v61 = vcombine.high %v12196_v36, %v12200_v9  ;;  %v12249_v27 = vld [vmem:[%s19635_s4 + $0xa78] sm:$0xff] }
 0x1f3   :  { %4621 = vmatprep.subr.bf16.mxu1 %v12653_v14  ;;  %v12457_v14 = vcombine.high %v12197_v4, %v12201_v44 }
 0x1f5   :  { %4516 = vmatpush1.bf16.msra.mxu0 %v12650_v30  ;;  %v12454_v30 = vcombine.low %v12196_v36, %v12200_v9  ;;  %v12256_v36 = vld [vmem:[%s19635_s4 + $0xab0] sm:$0xff]  ;;  %v12253_v9 = vld [vmem:[%s19635_s4 + $0xa98] sm:$0xff] }
 0x1f6   :  { %4622 = vmatpush1.bf16.msra.mxu1 %v12652_v16  ;;  %4517 = vmatprep.subr.bf16.mxu0 %v12659_v25  ;;  %v12456_v16 = vcombine.low %v12197_v4, %v12201_v44  ;;  %v12463_v25 = vcombine.high %v12204_v31, %v12208_v50  ;;  %v12257_v4 = vld [vmem:[%s19635_s4 + $0xab8] sm:$0xff]  ;;  %v12264_v31 = vld [vmem:[%s19635_s4 + $0xaf0] sm:$0xff] }
 0x1f7   :  { %4623 = vmatprep.subr.bf16.mxu1 %v12661_v5  ;;  %v12465_v5 = vcombine.high %v12205_v6, %v12209_v23  ;;  %v12261_v50 = vld [vmem:[%s19635_s4 + $0xad8] sm:$0xff] }
 0x1f9   :  { %4518 = vmatpush1.bf16.msra.mxu0 %v12658_v33  ;;  %v12464_v33 = vcombine.low %v12205_v6, %v12209_v23  ;;  %v12265_v6 = vld [vmem:[%s19635_s4 + $0xaf8] sm:$0xff] }
 0x1fa   :  { %4624 = vmatpush1.bf16.msra.mxu1 %v12660_v43  ;;  %4519 = vmatprep.subr.bf16.mxu0 %v12667_v37  ;;  %v12471_v43 = vcombine.high %v12212_v55, %v12216_v24  ;;  %v12272_v55 = vld [vmem:[%s19635_s4 + $0xb30] sm:$0xff]  ;;  %v12269_v24 = vld [vmem:[%s19635_s4 + $0xb18] sm:$0xff] }
 0x1fb   :  { %4625 = vmatprep.subr.bf16.mxu1 %v12669_v60  ;;  %v12220_v60 = vld [vmem:[%s19635_s4 + $0x990] sm:$0xff] }
 0x1fc   :  { %v12478_v21 = vcombine.low %v12220_v60, %v12224_v17 }
 0x1fd   :  { %4520 = vmatpush1.bf16.msra.mxu0 %v12666_v8 }
 0x1fe   :  { %4626 = vmatpush1.bf16.msra.mxu1 %v12668_v51  ;;  %4521 = vmatprep.subr.bf16.mxu0 %v12675_v39  ;;  %v12479_v51 = vcombine.high %v12220_v60, %v12224_v17  ;;  %v12481_v39 = vcombine.high %v12221_v42, %v12225_v3  ;;  %v12280_v60 = vld [vmem:[%s19635_s4 + $0xb70] sm:$0xff]  ;;  %v12277_v17 = vld [vmem:[%s19635_s4 + $0xb58] sm:$0xff] }
 0x1ff   :  { %4627 = vmatprep.subr.bf16.mxu1 %v12677_v15  ;;  %v12228_v15 = vld [vmem:[%s19635_s4 + $0x9d0] sm:$0xff] }
 0x200   :  { %v12486_v11 = vcombine.low %v12228_v15, %v12232_v58 }
 0x201   :  { %4522 = vmatpush1.bf16.msra.mxu0 %v12674_v0  ;;  %v12480_v0 = vcombine.low %v12221_v42, %v12225_v3  ;;  %v12281_v42 = vld [vmem:[%s19635_s4 + $0xb78] sm:$0xff] }
 0x202   :  { %4628 = vmatpush1.bf16.msra.mxu1 %v12676_v12  ;;  %4650 = vmatprep.subr.bf16.mxu0 %v12431_v57  ;;  %v12487_v12 = vcombine.high %v12228_v15, %v12232_v58  ;;  %v12489_v57 = vcombine.high %v12229_v20, %v12233_v7  ;;  %v12288_v15 = vld [vmem:[%s19635_s4 + $0xbb0] sm:$0xff]  ;;  %v12285_v58 = vld [vmem:[%s19635_s4 + $0xb98] sm:$0xff] }
 0x203   :  { %4756 = vmatprep.subr.bf16.mxu1 %v12433_v62  ;;  %v12236_v62 = vld [vmem:[%s19635_s4 + $0xa10] sm:$0xff] }
 0x204   :  { %4524 = vmatmul.mubr.bf16.vlgmr.msra.gmra.mrb[32].mxu0 %v16353_v53  ;;  %v12494_v49 = vcombine.low %v12236_v62, %v12240_v28 }
 0x205   :  { %4630 = vmatmul.mubr.bf16.vlgmr.msra.gmra.mrb[32].mxu1 %v16353_v53  ;;  %4533 = vmatprep.mubr.bf16.mxu0 %v16357_v40 }
 0x206   :  { %4639 = vmatprep.mubr.bf16.mxu1 %v16357_v40  ;;  %4651 = vmatpush1.bf16.msra.mxu0 %v12430_v45  ;;  %v12488_v45 = vcombine.low %v12229_v20, %v12233_v7  ;;  %v12289_v20 = vld [vmem:[%s19635_s4 + $0xbb8] sm:$0xff] }
 0x207   :  { %4757 = vmatpush1.bf16.msra.mxu1 %v12432_v29  ;;  %4652 = vmatprep.subr.bf16.mxu0 %v12439_v19  ;;  %v12495_v29 = vcombine.high %v12236_v62, %v12240_v28  ;;  %v12497_v19 = vcombine.high %v12237_v34, %v12241_v32  ;;  %v12296_v62 = vld [vmem:[%s19635_s4 + $0xbf0] sm:$0xff]  ;;  %v12293_v28 = vld [vmem:[%s19635_s4 + $0xbd8] sm:$0xff] }
 0x208   :  { %4758 = vmatprep.subr.bf16.mxu1 %v12441_v38  ;;  %v12244_v38 = vld [vmem:[%s19635_s4 + $0xa50] sm:$0xff] }
 0x209   :  { %v12502_v44 = vcombine.low %v12244_v38, %v12248_v48 }
 0x20a   :  { %4653 = vmatpush1.bf16.msra.mxu0 %v12438_v22  ;;  %v12496_v22 = vcombine.low %v12237_v34, %v12241_v32  ;;  %v12297_v34 = vld [vmem:[%s19635_s4 + $0xbf8] sm:$0xff] }
 0x20b   :  { %4759 = vmatpush1.bf16.msra.mxu1 %v12440_v47  ;;  %4654 = vmatprep.subr.bf16.mxu0 %v12447_v10  ;;  %v12503_v47 = vcombine.high %v12244_v38, %v12248_v48  ;;  %v12505_v10 = vcombine.high %v12245_v2, %v12249_v27  ;;  %v12304_v38 = vld [vmem:[%s19635_s4 + $0xc30] sm:$0xff]  ;;  %v12301_v48 = vld [vmem:[%s19635_s4 + $0xc18] sm:$0xff] }
 0x20c   :  { %4760 = vmatprep.subr.bf16.mxu1 %v12449_v13  ;;  %4534 = vmatmul.mubr.bf16.gmra.mrb[36].mxu0 %v16359_v26  ;;  %v12252_v13 = vld [vmem:[%s19635_s4 + $0xa90] sm:$0xff] }
 0x20d   :  { %4640 = vmatmul.mubr.bf16.gmra.mrb[36].mxu1 %v16359_v26  ;;  %4682 = vmatprep.mubr.bf16.mxu0 %v16323_v41  ;;  %v12510_v23 = vcombine.low %v12252_v13, %v12256_v36 }
 0x20e   :  { %4788 = vmatprep.mubr.bf16.mxu1 %v16323_v41  ;;  %4655 = vmatpush1.bf16.msra.mxu0 %v12446_v46  ;;  %v12213_v41 = vld [vmem:[%s19635_s4 + $0x958] sm:$0xff]  ;;  %v12504_v46 = vcombine.low %v12245_v2, %v12249_v27 }
 0x20f   :  { %4761 = vmatpush1.bf16.msra.mxu1 %v12448_v35  ;;  %4656 = vmatprep.subr.bf16.mxu0 %v12455_v61  ;;  %v12473_v37 = vcombine.high %v12213_v41, %v12217_v1  ;;  %v12472_v8 = vcombine.low %v12213_v41, %v12217_v1  ;;  %v12511_v35 = vcombine.high %v12252_v13, %v12256_v36  ;;  %v12273_v41 = vld [vmem:[%s19635_s4 + $0xb38] sm:$0xff]  ;;  %v12312_v13 = vld [vmem:[%s19635_s4 + $0xc70] sm:$0xff] }
 0x210   :  { %4762 = vmatprep.subr.bf16.mxu1 %v12457_v14  ;;  %v12513_v61 = vcombine.high %v12253_v9, %v12257_v4  ;;  %v12260_v14 = vld [vmem:[%s19635_s4 + $0xad0] sm:$0xff]  ;;  %v12305_v2 = vld [vmem:[%s19635_s4 + $0xc38] sm:$0xff] }
 0x211   :  { %v12518_v1 = vcombine.low %v12260_v14, %v12264_v31  ;;  %v12309_v36 = vld [vmem:[%s19635_s4 + $0xc58] sm:$0xff] }
 0x212   :  { %4657 = vmatpush1.bf16.msra.mxu0 %v12454_v30  ;;  %v12512_v30 = vcombine.low %v12253_v9, %v12257_v4  ;;  %v12313_v9 = vld [vmem:[%s19635_s4 + $0xc78] sm:$0xff] }
 0x213   :  { %4763 = vmatpush1.bf16.msra.mxu1 %v12456_v16  ;;  %4658 = vmatprep.subr.bf16.mxu0 %v12463_v25  ;;  %v12519_v16 = vcombine.high %v12260_v14, %v12264_v31  ;;  %v12521_v25 = vcombine.high %v12261_v50, %v12265_v6  ;;  %v12320_v14 = vld [vmem:[%s19635_s4 + $0xcb0] sm:$0xff]  ;;  %v12317_v31 = vld [vmem:[%s19635_s4 + $0xc98] sm:$0xff] }
 0x214   :  { %4764 = vmatprep.subr.bf16.mxu1 %v12465_v5  ;;  %v12268_v5 = vld [vmem:[%s19635_s4 + $0xb10] sm:$0xff] }
 0x215   :  { %v12526_v3 = vcombine.low %v12268_v5, %v12272_v55 }
 0x216   :  { %4659 = vmatpush1.bf16.msra.mxu0 %v12462_v56  ;;  %v12520_v56 = vcombine.low %v12261_v50, %v12265_v6  ;;  %v12321_v50 = vld [vmem:[%s19635_s4 + $0xcb8] sm:$0xff] }
 0x217   :  { %4765 = vmatpush1.bf16.msra.mxu1 %v12464_v33  ;;  %4660 = vmatprep.subr.bf16.mxu0 %v12471_v43  ;;  %v12527_v33 = vcombine.high %v12268_v5, %v12272_v55  ;;  %v12529_v43 = vcombine.high %v12269_v24, %v12273_v41  ;;  %v12325_v5 = vld [vmem:[%s19635_s4 + $0xcd8] sm:$0xff] }
 0x218   :  { %4766 = vmatprep.subr.bf16.mxu1 %v12473_v37  ;;  %v12276_v37 = vld [vmem:[%s19635_s4 + $0xb50] sm:$0xff] }
 0x219   :  { %v12534_v7 = vcombine.low %v12276_v37, %v12280_v60 }
 0x21a   :  { %4661 = vmatpush1.bf16.msra.mxu0 %v12470_v54  ;;  %v12528_v54 = vcombine.low %v12269_v24, %v12273_v41  ;;  %v12576_v24 = vcombine.low %v12317_v31, %v12321_v50 }
 0x21b   :  { %4767 = vmatpush1.bf16.msra.mxu1 %v12472_v8  ;;  %4662 = vmatprep.subr.bf16.mxu0 %v12479_v51  ;;  %v12535_v8 = vcombine.high %v12276_v37, %v12280_v60  ;;  %v12537_v51 = vcombine.high %v12277_v17, %v12281_v42  ;;  %v12337_v37 = vld [vmem:[%s19635_s4 + $0xd38] sm:$0xff] }
 0x21c   :  { %4768 = vmatprep.subr.bf16.mxu1 %v12481_v39  ;;  %v12284_v39 = vld [vmem:[%s19635_s4 + $0xb90] sm:$0xff] }
 0x21d   :  { %v12542_v32 = vcombine.low %v12284_v39, %v12288_v15 }
 0x21e   :  { %4663 = vmatpush1.bf16.msra.mxu0 %v12478_v21  ;;  %v12536_v21 = vcombine.low %v12277_v17, %v12281_v42 }
 0x21f   :  { %4769 = vmatpush1.bf16.msra.mxu1 %v12480_v0  ;;  %4664 = vmatprep.subr.bf16.mxu0 %v12487_v12  ;;  %v12543_v0 = vcombine.high %v12284_v39, %v12288_v15  ;;  %v12545_v12 = vcombine.high %v12285_v58, %v12289_v20 }
 0x220   :  { %4770 = vmatprep.subr.bf16.mxu1 %v12489_v57  ;;  %v12292_v57 = vld [vmem:[%s19635_s4 + $0xbd0] sm:$0xff] }
 0x221   :  { %v12550_v27 = vcombine.low %v12292_v57, %v12296_v62 }
 0x222   :  { %4665 = vmatpush1.bf16.msra.mxu0 %v12486_v11  ;;  %v12544_v11 = vcombine.low %v12285_v58, %v12289_v20  ;;  %v12348_v20 = vld [vmem:[%s19635_s4 + $0xd90] sm:$0xff] }
 0x223   :  { %4771 = vmatpush1.bf16.msra.mxu1 %v12488_v45  ;;  %4666 = vmatprep.subr.bf16.mxu0 %v12495_v29  ;;  %v12551_v45 = vcombine.high %v12292_v57, %v12296_v62  ;;  %v12553_v29 = vcombine.high %v12293_v28, %v12297_v34 }
 0x224   :  { %4772 = vmatprep.subr.bf16.mxu1 %v12497_v19  ;;  %v12300_v19 = vld [vmem:[%s19635_s4 + $0xc10] sm:$0xff] }
 0x225   :  { %v12558_v4 = vcombine.low %v12300_v19, %v12304_v38 }
 0x226   :  { %4667 = vmatpush1.bf16.msra.mxu0 %v12494_v49  ;;  %v12552_v49 = vcombine.low %v12293_v28, %v12297_v34  ;;  %v12356_v34 = vld [vmem:[%s19635_s4 + $0xdd0] sm:$0xff] }
 0x227   :  { %4773 = vmatpush1.bf16.msra.mxu1 %v12496_v22  ;;  %4668 = vmatprep.subr.bf16.mxu0 %v12503_v47  ;;  %v12559_v22 = vcombine.high %v12300_v19, %v12304_v38  ;;  %v12561_v47 = vcombine.high %v12301_v48, %v12305_v2 }
 0x228   :  { %4774 = vmatprep.subr.bf16.mxu1 %v12505_v10  ;;  %v12308_v10 = vld [vmem:[%s19635_s4 + $0xc50] sm:$0xff] }
 0x229   :  { %v12566_v6 = vcombine.low %v12308_v10, %v12312_v13 }
 0x22a   :  { %4669 = vmatpush1.bf16.msra.mxu0 %v12502_v44  ;;  %v12560_v44 = vcombine.low %v12301_v48, %v12305_v2  ;;  %v12364_v2 = vld [vmem:[%s19635_s4 + $0xe10] sm:$0xff] }
 0x22b   :  { %4775 = vmatpush1.bf16.msra.mxu1 %v12504_v46  ;;  %4670 = vmatprep.subr.bf16.mxu0 %v12511_v35  ;;  %v12567_v46 = vcombine.high %v12308_v10, %v12312_v13  ;;  %v12569_v35 = vcombine.high %v12309_v36, %v12313_v9 }
 0x22c   :  { %4776 = vmatprep.subr.bf16.mxu1 %v12513_v61  ;;  %v12316_v61 = vld [vmem:[%s19635_s4 + $0xc90] sm:$0xff] }
 0x22d   :  { %v12574_v55 = vcombine.low %v12316_v61, %v12320_v14 }
 0x22e   :  { %4671 = vmatpush1.bf16.msra.mxu0 %v12510_v23  ;;  %v12568_v23 = vcombine.low %v12309_v36, %v12313_v9  ;;  %v12372_v9 = vld [vmem:[%s19635_s4 + $0xe50] sm:$0xff] }
 0x22f   :  { %4777 = vmatpush1.bf16.msra.mxu1 %v12512_v30  ;;  %4672 = vmatprep.subr.bf16.mxu0 %v12519_v16  ;;  %v12575_v30 = vcombine.high %v12316_v61, %v12320_v14  ;;  %v12324_v16 = vld [vmem:[%s19635_s4 + $0xcd0] sm:$0xff] }
 0x230   :  { %4778 = vmatprep.subr.bf16.mxu1 %v12521_v25  ;;  %v12328_v25 = vld [vmem:[%s19635_s4 + $0xcf0] sm:$0xff] }
 0x231   :  { %v12583_v41 = vcombine.high %v12324_v16, %v12328_v25  ;;  %v12582_v60 = vcombine.low %v12324_v16, %v12328_v25 }
 0x232   :  { %4673 = vmatpush1.bf16.msra.mxu0 %v12518_v1 }
 0x233   :  { %4779 = vmatpush1.bf16.msra.mxu1 %v12520_v56  ;;  %4674 = vmatprep.subr.bf16.mxu0 %v12527_v33  ;;  %v12332_v56 = vld [vmem:[%s19635_s4 + $0xd10] sm:$0xff] }
 0x234   :  { %4780 = vmatprep.subr.bf16.mxu1 %v12529_v43  ;;  %v12336_v33 = vld [vmem:[%s19635_s4 + $0xd30] sm:$0xff]  ;;  %v12333_v43 = vld [vmem:[%s19635_s4 + $0xd18] sm:$0xff] }
 0x235   :  { %v12591_v42 = vcombine.high %v12332_v56, %v12336_v33  ;;  %v12592_v39 = vcombine.low %v12333_v43, %v12337_v37 }
 0x236   :  { %4675 = vmatpush1.bf16.msra.mxu0 %v12526_v3  ;;  %v12340_v3 = vld [vmem:[%s19635_s4 + $0xd50] sm:$0xff] }
 0x237   :  { %4781 = vmatpush1.bf16.msra.mxu1 %v12528_v54  ;;  %4676 = vmatprep.subr.bf16.mxu0 %v12535_v8  ;;  %v12344_v54 = vld [vmem:[%s19635_s4 + $0xd70] sm:$0xff]  ;;  %v12341_v8 = vld [vmem:[%s19635_s4 + $0xd58] sm:$0xff] }
 0x238   :  { %4782 = vmatprep.subr.bf16.mxu1 %v12537_v51  ;;  %v12590_v51 = vcombine.low %v12332_v56, %v12336_v33  ;;  %v12599_v15 = vcombine.high %v12340_v3, %v12344_v54 }
 0x23a   :  { %4677 = vmatpush1.bf16.msra.mxu0 %v12534_v7  ;;  %v12352_v7 = vld [vmem:[%s19635_s4 + $0xdb0] sm:$0xff] }
 0x23b   :  { %4783 = vmatpush1.bf16.msra.mxu1 %v12536_v21  ;;  %4678 = vmatprep.subr.bf16.mxu0 %v12543_v0  ;;  %v12349_v21 = vld [vmem:[%s19635_s4 + $0xd98] sm:$0xff]  ;;  %v12607_v62 = vcombine.high %v12348_v20, %v12352_v7 }
 0x23c   :  { %4784 = vmatprep.subr.bf16.mxu1 %v12545_v12  ;;  %v12353_v0 = vld [vmem:[%s19635_s4 + $0xdb8] sm:$0xff]  ;;  %v12598_v12 = vcombine.low %v12340_v3, %v12344_v54 }
 0x23d   :  { %v12609_v28 = vcombine.high %v12349_v21, %v12353_v0  ;;  %v12608_v19 = vcombine.low %v12349_v21, %v12353_v0  ;;  %v12412_v0 = vld [vmem:[%s19635_s4 + $0xf90] sm:$0xff] }
 0x23e   :  { %4679 = vmatpush1.bf16.msra.mxu0 %v12542_v32  ;;  %v12360_v32 = vld [vmem:[%s19635_s4 + $0xdf0] sm:$0xff] }
 0x23f   :  { %4785 = vmatpush1.bf16.msra.mxu1 %v12544_v11  ;;  %4680 = vmatprep.subr.bf16.mxu0 %v12551_v45  ;;  %v12357_v11 = vld [vmem:[%s19635_s4 + $0xdd8] sm:$0xff]  ;;  %v12615_v38 = vcombine.high %v12356_v34, %v12360_v32 }
 0x240   :  { %4786 = vmatprep.subr.bf16.mxu1 %v12553_v29  ;;  %v12361_v45 = vld [vmem:[%s19635_s4 + $0xdf8] sm:$0xff]  ;;  %v12606_v29 = vcombine.low %v12348_v20, %v12352_v7 }
 0x241   :  { %v12617_v48 = vcombine.high %v12357_v11, %v12361_v45  ;;  %v12616_v10 = vcombine.low %v12357_v11, %v12361_v45  ;;  %v12420_v45 = vld [vmem:[%s19635_s4 + $0xfd0] sm:$0xff] }
 0x242   :  { %4681 = vmatpush1.bf16.msra.mxu0 %v12550_v27  ;;  %v12368_v27 = vld [vmem:[%s19635_s4 + $0xe30] sm:$0xff] }
 0x243   :  { %4787 = vmatpush1.bf16.msra.mxu1 %v12552_v49  ;;  %4703 = vmatprep.subr.bf16.mxu0 %v12559_v22  ;;  %v12365_v49 = vld [vmem:[%s19635_s4 + $0xe18] sm:$0xff]  ;;  %v12623_v13 = vcombine.high %v12364_v2, %v12368_v27 }
 0x244   :  { %4809 = vmatprep.subr.bf16.mxu1 %v12561_v47  ;;  %v12369_v22 = vld [vmem:[%s19635_s4 + $0xe38] sm:$0xff]  ;;  %v12614_v47 = vcombine.low %v12356_v34, %v12360_v32 }
 0x245   :  { %4683 = vmatmul.mubr.bf16.vlgmr.msra.gmra.mrb[40].mxu0 %v16327_v63  ;;  %v12625_v36 = vcombine.high %v12365_v49, %v12369_v22  ;;  %v12624_v61 = vcombine.low %v12365_v49, %v12369_v22  ;;  %v2645_v22 = vld [vmem:[%s19635_s4] sm:$0xff] }
 0x246   :  { %4789 = vmatmul.mubr.bf16.vlgmr.msra.gmra.mrb[40].mxu1 %v16327_v63  ;;  %4692 = vmatprep.mubr.bf16.mxu0 %v16332_v18  ;;  %v12577_v63 = vcombine.high %v12317_v31, %v12321_v50  ;;  %v12380_v50 = vld [vmem:[%s19635_s4 + $0xe90] sm:$0xff] }
 0x247   :  { %4704 = vmatpush1.bf16.msra.mxu0 %v12558_v4  ;;  %4798 = vmatprep.mubr.bf16.mxu1 %v16332_v18  ;;  %v12329_v18 = vld [vmem:[%s19635_s4 + $0xcf8] sm:$0xff]  ;;  %v12376_v4 = vld [vmem:[%s19635_s4 + $0xe70] sm:$0xff] }
 0x248   :  { %4810 = vmatpush1.bf16.msra.mxu1 %v12560_v44  ;;  %4705 = vmatprep.subr.bf16.mxu0 %v12567_v46  ;;  %v12585_v1 = vcombine.high %v12325_v5, %v12329_v18  ;;  %v12584_v17 = vcombine.low %v12325_v5, %v12329_v18  ;;  %v12373_v44 = vld [vmem:[%s19635_s4 + $0xe58] sm:$0xff]  ;;  %v12631_v14 = vcombine.high %v12372_v9, %v12376_v4  ;;  %v12388_v18 = vld [vmem:[%s19635_s4 + $0xed0] sm:$0xff] }
 0x249   :  { %4811 = vmatprep.subr.bf16.mxu1 %v12569_v35  ;;  %v12377_v46 = vld [vmem:[%s19635_s4 + $0xe78] sm:$0xff]  ;;  %v12622_v35 = vcombine.low %v12364_v2, %v12368_v27 }
 0x24a   :  { %v12633_v31 = vcombine.high %v12373_v44, %v12377_v46  ;;  %v12632_v16 = vcombine.low %v12373_v44, %v12377_v46  ;;  %v2653_v46 = vld [vmem:[%s19635_s4 + $0x40] sm:$0xff] }
 0x24b   :  { %4706 = vmatpush1.bf16.msra.mxu0 %v12566_v6  ;;  %v12384_v6 = vld [vmem:[%s19635_s4 + $0xeb0] sm:$0xff] }
 0x24c   :  { %4812 = vmatpush1.bf16.msra.mxu1 %v12568_v23  ;;  %4707 = vmatprep.subr.bf16.mxu0 %v12575_v30  ;;  %v12381_v23 = vld [vmem:[%s19635_s4 + $0xe98] sm:$0xff]  ;;  %v12639_v25 = vcombine.high %v12380_v50, %v12384_v6 }
 0x24d   :  { %4813 = vmatprep.subr.bf16.mxu1 %v12577_v63  ;;  %4693 = vmatmul.mubr.bf16.gmra.mrb[44].mxu0 %v16345_v59  ;;  %v12385_v30 = vld [vmem:[%s19635_s4 + $0xeb8] sm:$0xff]  ;;  %v12630_v63 = vcombine.low %v12372_v9, %v12376_v4 }
 0x24e   :  { %4799 = vmatmul.mubr.bf16.gmra.mrb[44].mxu1 %v16345_v59  ;;  %4735 = vmatprep.mubr.bf16.mxu0 %v16349_v52  ;;  %v12593_v59 = vcombine.high %v12333_v43, %v12337_v37  ;;  %v12641_v5 = vcombine.high %v12381_v23, %v12385_v30  ;;  %v12640_v56 = vcombine.low %v12381_v23, %v12385_v30  ;;  %v12396_v37 = vld [vmem:[%s19635_s4 + $0xf10] sm:$0xff]  ;;  %v2661_v30 = vld [vmem:[%s19635_s4 + $0x80] sm:$0xff] }
 0x24f   :  { %4708 = vmatpush1.bf16.msra.mxu0 %v12574_v55  ;;  %4841 = vmatprep.mubr.bf16.mxu1 %v16349_v52  ;;  %v12345_v52 = vld [vmem:[%s19635_s4 + $0xd78] sm:$0xff]  ;;  %v12392_v55 = vld [vmem:[%s19635_s4 + $0xef0] sm:$0xff] }
 0x250   :  { %4814 = vmatpush1.bf16.msra.mxu1 %v12576_v24  ;;  %4709 = vmatprep.subr.bf16.mxu0 %v12583_v41  ;;  %v12601_v58 = vcombine.high %v12341_v8, %v12345_v52  ;;  %v12600_v57 = vcombine.low %v12341_v8, %v12345_v52  ;;  %v12389_v24 = vld [vmem:[%s19635_s4 + $0xed8] sm:$0xff]  ;;  %v12647_v33 = vcombine.high %v12388_v18, %v12392_v55  ;;  %v12404_v52 = vld [vmem:[%s19635_s4 + $0xf50] sm:$0xff] }
 0x251   :  { %4815 = vmatprep.subr.bf16.mxu1 %v12585_v1  ;;  %v12393_v41 = vld [vmem:[%s19635_s4 + $0xef8] sm:$0xff]  ;;  %v12638_v1 = vcombine.low %v12380_v50, %v12384_v6 }
 0x252   :  { %v12649_v43 = vcombine.high %v12389_v24, %v12393_v41  ;;  %v12648_v3 = vcombine.low %v12389_v24, %v12393_v41  ;;  %v2578_v24 = vld [vmem:[#allocation3 + $0x28] sm:$0xff]  ;;  %v2669_v41 = vld [vmem:[%s19635_s4 + $0xc0] sm:$0xff] }
 0x253   :  { %4710 = vmatpush1.bf16.msra.mxu0 %v12582_v60  ;;  %v12400_v60 = vld [vmem:[%s19635_s4 + $0xf30] sm:$0xff] }
 0x254   :  { %4816 = vmatpush1.bf16.msra.mxu1 %v12584_v17  ;;  %4711 = vmatprep.subr.bf16.mxu0 %v12591_v42  ;;  %v12397_v17 = vld [vmem:[%s19635_s4 + $0xf18] sm:$0xff]  ;;  %v12655_v54 = vcombine.high %v12396_v37, %v12400_v60 }
 0x255   :  { %4817 = vmatprep.subr.bf16.mxu1 %v12593_v59  ;;  %v12401_v42 = vld [vmem:[%s19635_s4 + $0xf38] sm:$0xff]  ;;  %v12646_v59 = vcombine.low %v12388_v18, %v12392_v55 }
 0x256   :  { %v12657_v8 = vcombine.high %v12397_v17, %v12401_v42  ;;  %v12656_v20 = vcombine.low %v12397_v17, %v12401_v42 }
 0x257   :  { %4712 = vmatpush1.bf16.msra.mxu0 %v12590_v51  ;;  %v12408_v51 = vld [vmem:[%s19635_s4 + $0xf70] sm:$0xff] }
 0x258   :  { %4818 = vmatpush1.bf16.msra.mxu1 %v12592_v39  ;;  %4713 = vmatprep.subr.bf16.mxu0 %v12599_v15  ;;  %v12405_v39 = vld [vmem:[%s19635_s4 + $0xf58] sm:$0xff]  ;;  %v12663_v7 = vcombine.high %v12404_v52, %v12408_v51 }
 0x259   :  { %4819 = vmatprep.subr.bf16.mxu1 %v12601_v58  ;;  %v12409_v15 = vld [vmem:[%s19635_s4 + $0xf78] sm:$0xff]  ;;  %v12654_v58 = vcombine.low %v12396_v37, %v12400_v60 }
 0x25a   :  { %v12665_v21 = vcombine.high %v12405_v39, %v12409_v15  ;;  %v12664_v34 = vcombine.low %v12405_v39, %v12409_v15  ;;  %v2685_v15 = vld [vmem:[%s19635_s4 + $0x140] sm:$0xff] }
 0x25b   :  { %4714 = vmatpush1.bf16.msra.mxu0 %v12598_v12  ;;  %v12416_v12 = vld [vmem:[%s19635_s4 + $0xfb0] sm:$0xff] }
 0x25c   :  { %4820 = vmatpush1.bf16.msra.mxu1 %v12600_v57  ;;  %4715 = vmatprep.subr.bf16.mxu0 %v12607_v62  ;;  %v12413_v57 = vld [vmem:[%s19635_s4 + $0xf98] sm:$0xff]  ;;  %v12671_v32 = vcombine.high %v12412_v0, %v12416_v12 }
 0x25d   :  { %4821 = vmatprep.subr.bf16.mxu1 %v12609_v28  ;;  %v12417_v62 = vld [vmem:[%s19635_s4 + $0xfb8] sm:$0xff]  ;;  %v12662_v28 = vcombine.low %v12404_v52, %v12408_v51 }
 0x25e   :  { %v12673_v11 = vcombine.high %v12413_v57, %v12417_v62  ;;  %v12672_v2 = vcombine.low %v12413_v57, %v12417_v62  ;;  %v2693_v62 = vld [vmem:[%s19635_s4 + $0x180] sm:$0xff] }
 0x25f   :  { %4716 = vmatpush1.bf16.msra.mxu0 %v12606_v29  ;;  %v12424_v29 = vld [vmem:[%s19635_s4 + $0xff0] sm:$0xff] }
 0x260   :  { %4822 = vmatpush1.bf16.msra.mxu1 %v12608_v19  ;;  %4717 = vmatprep.subr.bf16.mxu0 %v12615_v38  ;;  %v12421_v19 = vld [vmem:[%s19635_s4 + $0xfd8] sm:$0xff]  ;;  %v12679_v27 = vcombine.high %v12420_v45, %v12424_v29 }
 0x261   :  { %4823 = vmatprep.subr.bf16.mxu1 %v12617_v48  ;;  %v12425_v38 = vld [vmem:[%s19635_s4 + $0xff8] sm:$0xff]  ;;  %v12670_v48 = vcombine.low %v12412_v0, %v12416_v12 }
 0x262   :  { %v12681_v49 = vcombine.high %v12421_v19, %v12425_v38  ;;  %v12680_v9 = vcombine.low %v12421_v19, %v12425_v38  ;;  %v2701_v38 = vld [vmem:[%s19635_s4 + $0x1c0] sm:$0xff] }
 0x263   :  { %4718 = vmatpush1.bf16.msra.mxu0 %v12614_v47  ;;  %v2649_v47 = vld [vmem:[%s19635_s4 + $0x20] sm:$0xff] }
 0x264   :  { %4824 = vmatpush1.bf16.msra.mxu1 %v12616_v10  ;;  %4719 = vmatprep.subr.bf16.mxu0 %v12623_v13  ;;  %v2646_v10 = vld [vmem:[%s19635_s4 + $0x8] sm:$0xff]  ;;  %v12683_v4 = vcombine.high %v2645_v22, %v2649_v47 }
 0x265   :  { %4825 = vmatprep.subr.bf16.mxu1 %v12625_v36  ;;  %v2650_v13 = vld [vmem:[%s19635_s4 + $0x28] sm:$0xff]  ;;  %v12678_v36 = vcombine.low %v12420_v45, %v12424_v29 }
 0x266   :  { %v12685_v44 = vcombine.high %v2646_v10, %v2650_v13  ;;  %v12684_v50 = vcombine.low %v2646_v10, %v2650_v13  ;;  %v2709_v13 = vld [vmem:[%s19635_s4 + $0x200] sm:$0xff] }
 0x267   :  { %4720 = vmatpush1.bf16.msra.mxu0 %v12622_v35  ;;  %v2657_v35 = vld [vmem:[%s19635_s4 + $0x60] sm:$0xff] }
 0x268   :  { %4826 = vmatpush1.bf16.msra.mxu1 %v12624_v61  ;;  %4721 = vmatprep.subr.bf16.mxu0 %v12631_v14  ;;  %v2654_v61 = vld [vmem:[%s19635_s4 + $0x48] sm:$0xff]  ;;  %v12691_v6 = vcombine.high %v2653_v46, %v2657_v35 }
 0x269   :  { %4827 = vmatprep.subr.bf16.mxu1 %v12633_v31  ;;  %v2658_v14 = vld [vmem:[%s19635_s4 + $0x68] sm:$0xff]  ;;  %v12682_v31 = vcombine.low %v2645_v22, %v2649_v47 }
 0x26a   :  { %v12693_v23 = vcombine.high %v2654_v61, %v2658_v14  ;;  %v12692_v18 = vcombine.low %v2654_v61, %v2658_v14  ;;  %v2717_v14 = vld [vmem:[%s19635_s4 + $0x240] sm:$0xff] }
 0x26b   :  { %4722 = vmatpush1.bf16.msra.mxu0 %v12630_v63  ;;  %v2665_v63 = vld [vmem:[%s19635_s4 + $0xa0] sm:$0xff] }
 0x26c   :  { %4828 = vmatpush1.bf16.msra.mxu1 %v12632_v16  ;;  %4723 = vmatprep.subr.bf16.mxu0 %v12639_v25  ;;  %v2662_v16 = vld [vmem:[%s19635_s4 + $0x88] sm:$0xff]  ;;  %v12699_v55 = vcombine.high %v2661_v30, %v2665_v63 }
 0x26d   :  { %4829 = vmatprep.subr.bf16.mxu1 %v12641_v5  ;;  %v2666_v25 = vld [vmem:[%s19635_s4 + $0xa8] sm:$0xff]  ;;  %v12690_v5 = vcombine.low %v2653_v46, %v2657_v35 }
 0x26e   :  { %v12700_v37 = vcombine.low %v2662_v16, %v2666_v25 }
 0x26f   :  { %4724 = vmatpush1.bf16.msra.mxu0 %v12638_v1  ;;  %v2673_v1 = vld [vmem:[%s19635_s4 + $0xe0] sm:$0xff] }
 0x270   :  { %4830 = vmatpush1.bf16.msra.mxu1 %v12640_v56  ;;  %4725 = vmatprep.subr.bf16.mxu0 %v12647_v33  ;;  %v2674_v56 = vld [vmem:[%s19635_s4 + $0xe8] sm:$0xff]  ;;  %v12698_v33 = vcombine.low %v2661_v30, %v2665_v63  ;;  %v12707_v17 = vcombine.high %v2669_v41, %v2673_v1  ;;  %v12706_v52 = vcombine.low %v2669_v41, %v2673_v1 }
 0x271   :  { %4831 = vmatprep.subr.bf16.mxu1 %v12649_v43  ;;  %v2574_v43 = vld [vmem:[#allocation3 + $0x8] sm:$0xff] }
 0x272   :  { %v16991_v60 = vpack.c.bf16 %v2578_v24, %v2574_v43  ;;  %v2738_v43 = vld [vmem:[%s19635_s4 + $0x2e8] sm:$0xff] }
 0x273   :  { %4726 = vmatpush1.bf16.msra.mxu0 %v12646_v59  ;;  %v2677_v59 = vld [vmem:[%s19635_s4 + $0x100] sm:$0xff] }
 0x274   :  { %4832 = vmatpush1.bf16.msra.mxu1 %v12648_v3  ;;  %4727 = vmatprep.subr.bf16.mxu0 %v12655_v54  ;;  %v2681_v3 = vld [vmem:[%s19635_s4 + $0x120] sm:$0xff]  ;;  %v2678_v54 = vld [vmem:[%s19635_s4 + $0x108] sm:$0xff] }
 0x275   :  { %4833 = vmatprep.subr.bf16.mxu1 %v12657_v8  ;;  %v2682_v8 = vld [vmem:[%s19635_s4 + $0x128] sm:$0xff]  ;;  %v12715_v39 = vcombine.high %v2677_v59, %v2681_v3 }
 0x276   :  { %v12716_v0 = vcombine.low %v2678_v54, %v2682_v8 }
 0x277   :  { %4728 = vmatpush1.bf16.msra.mxu0 %v12654_v58  ;;  %v2689_v58 = vld [vmem:[%s19635_s4 + $0x160] sm:$0xff] }
 0x278   :  { %4834 = vmatpush1.bf16.msra.mxu1 %v12656_v20  ;;  %4729 = vmatprep.subr.bf16.mxu0 %v12663_v7  ;;  %v2686_v20 = vld [vmem:[%s19635_s4 + $0x148] sm:$0xff]  ;;  %v12723_v12 = vcombine.high %v2685_v15, %v2689_v58 }
 0x279   :  { %4835 = vmatprep.subr.bf16.mxu1 %v12665_v21  ;;  %v2690_v7 = vld [vmem:[%s19635_s4 + $0x168] sm:$0xff]  ;;  %v12714_v21 = vcombine.low %v2677_v59, %v2681_v3  ;;  %v2741_v3 = vld [vmem:[%s19635_s4 + $0x300] sm:$0xff] }
 0x27a   :  { %v12725_v57 = vcombine.high %v2686_v20, %v2690_v7  ;;  %v12724_v45 = vcombine.low %v2686_v20, %v2690_v7  ;;  %v2753_v20 = vld [vmem:[%s19635_s4 + $0x360] sm:$0xff]  ;;  %v2750_v7 = vld [vmem:[%s19635_s4 + $0x348] sm:$0xff] }
 0x27b   :  { %4730 = vmatpush1.bf16.msra.mxu0 %v12662_v28  ;;  %v2697_v28 = vld [vmem:[%s19635_s4 + $0x1a0] sm:$0xff] }
 0x27c   :  { %4836 = vmatpush1.bf16.msra.mxu1 %v12664_v34  ;;  %4731 = vmatprep.subr.bf16.mxu0 %v12671_v32  ;;  %v2694_v34 = vld [vmem:[%s19635_s4 + $0x188] sm:$0xff]  ;;  %v12731_v29 = vcombine.high %v2693_v62, %v2697_v28 }
 0x27d   :  { %4837 = vmatprep.subr.bf16.mxu1 %v12673_v11  ;;  %v2698_v32 = vld [vmem:[%s19635_s4 + $0x1a8] sm:$0xff]  ;;  %v12722_v11 = vcombine.low %v2685_v15, %v2689_v58  ;;  %v2749_v58 = vld [vmem:[%s19635_s4 + $0x340] sm:$0xff] }
 0x27e   :  { %v12733_v19 = vcombine.high %v2694_v34, %v2698_v32  ;;  %v12732_v22 = vcombine.low %v2694_v34, %v2698_v32  ;;  %v2761_v34 = vld [vmem:[%s19635_s4 + $0x3a0] sm:$0xff]  ;;  %v2758_v32 = vld [vmem:[%s19635_s4 + $0x388] sm:$0xff] }
 0x27f   :  { %4732 = vmatpush1.bf16.msra.mxu0 %v12670_v48  ;;  %v2705_v48 = vld [vmem:[%s19635_s4 + $0x1e0] sm:$0xff] }
 0x280   :  { %4838 = vmatpush1.bf16.msra.mxu1 %v12672_v2  ;;  %4733 = vmatprep.subr.bf16.mxu0 %v12679_v27  ;;  %v2702_v2 = vld [vmem:[%s19635_s4 + $0x1c8] sm:$0xff]  ;;  %v12739_v47 = vcombine.high %v2701_v38, %v2705_v48 }
 0x281   :  { %4839 = vmatprep.subr.bf16.mxu1 %v12681_v49  ;;  %v2706_v27 = vld [vmem:[%s19635_s4 + $0x1e8] sm:$0xff]  ;;  %v12730_v49 = vcombine.low %v2693_v62, %v2697_v28  ;;  %v2757_v28 = vld [vmem:[%s19635_s4 + $0x380] sm:$0xff] }
 0x282   :  { %v12741_v10 = vcombine.high %v2702_v2, %v2706_v27  ;;  %v12740_v46 = vcombine.low %v2702_v2, %v2706_v27  ;;  %v2769_v2 = vld [vmem:[%s19635_s4 + $0x3e0] sm:$0xff]  ;;  %v2766_v27 = vld [vmem:[%s19635_s4 + $0x3c8] sm:$0xff] }
 0x283   :  { %4734 = vmatpush1.bf16.msra.mxu0 %v12678_v36  ;;  %v2713_v36 = vld [vmem:[%s19635_s4 + $0x220] sm:$0xff] }
 0x284   :  { %4840 = vmatpush1.bf16.msra.mxu1 %v12680_v9  ;;  %6142 = vmatprep.subr.bf16.mxu0 %v12683_v4  ;;  %v2710_v9 = vld [vmem:[%s19635_s4 + $0x208] sm:$0xff]  ;;  %v12747_v35 = vcombine.high %v2709_v13, %v2713_v36 }
 0x285   :  { %6248 = vmatprep.subr.bf16.mxu1 %v12685_v44  ;;  %v2714_v4 = vld [vmem:[%s19635_s4 + $0x228] sm:$0xff]  ;;  %v12738_v44 = vcombine.low %v2701_v38, %v2705_v48  ;;  %v2765_v48 = vld [vmem:[%s19635_s4 + $0x3c0] sm:$0xff] }
 0x286   :  { %4736 = vmatmul.mubr.bf16.vlgmr.msra.gmra.mrb[40].mxu0 %v16353_v53  ;;  %v12749_v61 = vcombine.high %v2710_v9, %v2714_v4  ;;  %v12748_v30 = vcombine.low %v2710_v9, %v2714_v4  ;;  %v2777_v9 = vld [vmem:[%s19635_s4 + $0x420] sm:$0xff]  ;;  %v2774_v4 = vld [vmem:[%s19635_s4 + $0x408] sm:$0xff] }
 0x287   :  { %4842 = vmatmul.mubr.bf16.vlgmr.msra.gmra.mrb[40].mxu1 %v16353_v53  ;;  %4745 = vmatprep.mubr.bf16.mxu0 %v16357_v40  ;;  %v12701_v53 = vcombine.high %v2662_v16, %v2666_v25  ;;  %v2725_v25 = vld [vmem:[%s19635_s4 + $0x280] sm:$0xff] }
 0x288   :  { %4851 = vmatprep.mubr.bf16.mxu1 %v16357_v40  ;;  %6143 = vmatpush1.bf16.msra.mxu0 %v12682_v31  ;;  %v2670_v40 = vld [vmem:[%s19635_s4 + $0xc8] sm:$0xff]  ;;  %v2721_v31 = vld [vmem:[%s19635_s4 + $0x260] sm:$0xff] }
 0x289   :  { %6249 = vmatpush1.bf16.msra.mxu1 %v12684_v50  ;;  %6144 = vmatprep.subr.bf16.mxu0 %v12691_v6  ;;  %v12709_v42 = vcombine.high %v2670_v40, %v2674_v56  ;;  %v12708_v51 = vcombine.low %v2670_v40, %v2674_v56  ;;  %v2718_v50 = vld [vmem:[%s19635_s4 + $0x248] sm:$0xff]  ;;  %v12755_v63 = vcombine.high %v2717_v14, %v2721_v31  ;;  %v2733_v40 = vld [vmem:[%s19635_s4 + $0x2c0] sm:$0xff] }
 0x28a   :  { %6250 = vmatprep.subr.bf16.mxu1 %v12693_v23  ;;  %v2722_v6 = vld [vmem:[%s19635_s4 + $0x268] sm:$0xff]  ;;  %v12746_v23 = vcombine.low %v2709_v13, %v2713_v36  ;;  %v2737_v56 = vld [vmem:[%s19635_s4 + $0x2e0] sm:$0xff] }
 0x28b   :  { %v12757_v16 = vcombine.high %v2718_v50, %v2722_v6  ;;  %v12756_v24 = vcombine.low %v2718_v50, %v2722_v6  ;;  %v2773_v36 = vld [vmem:[%s19635_s4 + $0x400] sm:$0xff]  ;;  %v2586_v50 = vld [vmem:[#allocation3 + $0x68] sm:$0xff] }
 0x28c   :  { %6145 = vmatpush1.bf16.msra.mxu0 %v12690_v5  ;;  %v2729_v5 = vld [vmem:[%s19635_s4 + $0x2a0] sm:$0xff] }
 0x28d   :  { %6251 = vmatpush1.bf16.msra.mxu1 %v12692_v18  ;;  %6146 = vmatprep.subr.bf16.mxu0 %v12699_v55  ;;  %v2726_v18 = vld [vmem:[%s19635_s4 + $0x288] sm:$0xff]  ;;  %v12763_v41 = vcombine.high %v2725_v25, %v2729_v5  ;;  %v2781_v6 = vld [vmem:[%s19635_s4 + $0x440] sm:$0xff] }
 0x28e   :  { %4746 = vmatmul.mubr.bf16.gmra.mrb[44].mxu0 %v16359_v26  ;;  %6252 = vmatprep.subr.bf16.mxu1 %v12701_v53  ;;  %v2730_v55 = vld [vmem:[%s19635_s4 + $0x2a8] sm:$0xff]  ;;  %v12754_v53 = vcombine.low %v2717_v14, %v2721_v31  ;;  %v2577_v14 = vld [vmem:[#allocation3 + $0x20] sm:$0xff] }
 0x28f   :  { %4852 = vmatmul.mubr.bf16.gmra.mrb[44].mxu1 %v16359_v26  ;;  %6174 = vmatprep.mubr.bf16.mxu0 %v16991_v60  ;;  %v12717_v26 = vcombine.high %v2678_v54, %v2682_v8  ;;  %v12765_v1 = vcombine.high %v2726_v18, %v2730_v55  ;;  %v2745_v54 = vld [vmem:[%s19635_s4 + $0x320] sm:$0xff]  ;;  %v2742_v8 = vld [vmem:[%s19635_s4 + $0x308] sm:$0xff] }
 0x290   :  { %6147 = vmatpush1.bf16.msra.mxu0 %v12698_v33  ;;  %6280 = vmatprep.mubr.bf16.mxu1 %v16991_v60  ;;  %v2734_v33 = vld [vmem:[%s19635_s4 + $0x2c8] sm:$0xff] }
 0x291   :  { %6253 = vmatpush1.bf16.msra.mxu1 %v12700_v37  ;;  %6148 = vmatprep.subr.bf16.mxu0 %v12707_v17  ;;  %v12762_v37 = vcombine.low %v2725_v25, %v2729_v5  ;;  %v12764_v17 = vcombine.low %v2726_v18, %v2730_v55  ;;  %v12773_v59 = vcombine.high %v2734_v33, %v2738_v43  ;;  %v2582_v18 = vld [vmem:[#allocation3 + $0x48] sm:$0xff] }
 0x292   :  { %6254 = vmatprep.subr.bf16.mxu1 %v12709_v42  ;;  %v12771_v42 = vcombine.high %v2733_v40, %v2737_v56  ;;  %v12810_v5 = vcombine.low %v2773_v36, %v2777_v9 }
 0x294   :  { %6149 = vmatpush1.bf16.msra.mxu0 %v12706_v52  ;;  %v2746_v52 = vld [vmem:[%s19635_s4 + $0x328] sm:$0xff] }
 0x295   :  { %6255 = vmatpush1.bf16.msra.mxu1 %v12708_v51  ;;  %6150 = vmatprep.subr.bf16.mxu0 %v12715_v39  ;;  %v12770_v51 = vcombine.low %v2733_v40, %v2737_v56  ;;  %v12772_v39 = vcombine.low %v2734_v33, %v2738_v43  ;;  %v12781_v15 = vcombine.high %v2742_v8, %v2746_v52  ;;  %v2793_v40 = vld [vmem:[%s19635_s4 + $0x4a0] sm:$0xff]  ;;  %v2790_v56 = vld [vmem:[%s19635_s4 + $0x488] sm:$0xff] }
 0x296   :  { %6256 = vmatprep.subr.bf16.mxu1 %v12717_v26  ;;  %v12779_v26 = vcombine.high %v2741_v3, %v2745_v54  ;;  %v2794_v33 = vld [vmem:[%s19635_s4 + $0x4a8] sm:$0xff] }
 0x298   :  { %6151 = vmatpush1.bf16.msra.mxu0 %v12714_v21  ;;  %v2754_v21 = vld [vmem:[%s19635_s4 + $0x368] sm:$0xff] }
 0x299   :  { %6257 = vmatpush1.bf16.msra.mxu1 %v12716_v0  ;;  %6152 = vmatprep.subr.bf16.mxu0 %v12723_v12  ;;  %v12778_v0 = vcombine.low %v2741_v3, %v2745_v54  ;;  %v12780_v12 = vcombine.low %v2742_v8, %v2746_v52  ;;  %v12789_v62 = vcombine.high %v2750_v7, %v2754_v21  ;;  %v2580_v3 = vld [vmem:[#allocation3 + $0x38] sm:$0xff]  ;;  %v2797_v54 = vld [vmem:[%s19635_s4 + $0x4c0] sm:$0xff] }
 0x29a   :  { %6258 = vmatprep.subr.bf16.mxu1 %v12725_v57  ;;  %v12787_v57 = vcombine.high %v2749_v58, %v2753_v20  ;;  %v2801_v8 = vld [vmem:[%s19635_s4 + $0x4e0] sm:$0xff] }
 0x29b   :  { %v2581_v52 = vld [vmem:[#allocation3 + $0x40] sm:$0xff] }
 0x29c   :  { %6153 = vmatpush1.bf16.msra.mxu0 %v12722_v11  ;;  %v2762_v11 = vld [vmem:[%s19635_s4 + $0x3a8] sm:$0xff] }
 0x29d   :  { %6259 = vmatpush1.bf16.msra.mxu1 %v12724_v45  ;;  %6154 = vmatprep.subr.bf16.mxu0 %v12731_v29  ;;  %v12786_v45 = vcombine.low %v2749_v58, %v2753_v20  ;;  %v12788_v29 = vcombine.low %v2750_v7, %v2754_v21  ;;  %v12797_v38 = vcombine.high %v2758_v32, %v2762_v11  ;;  %v2576_v58 = vld [vmem:[#allocation3 + $0x18] sm:$0xff] }
 0x29e   :  { %6260 = vmatprep.subr.bf16.mxu1 %v12733_v19  ;;  %v12795_v19 = vcombine.high %v2757_v28, %v2761_v34  ;;  %v12828_v20 = vcombine.low %v2790_v56, %v2794_v33  ;;  %v17199_v7 = vpack.c.bf16 %v2580_v3, %v2576_v58  ;;  %v12835_v21 = vcombine.high %v2797_v54, %v2801_v8  ;;  %v2853_v3 = vld [vmem:[%s19635_s4 + $0x680] sm:$0xff] }
 0x2a0   :  { %6155 = vmatpush1.bf16.msra.mxu0 %v12730_v49  ;;  %v2770_v49 = vld [vmem:[%s19635_s4 + $0x3e8] sm:$0xff] }
 0x2a1   :  { %6261 = vmatpush1.bf16.msra.mxu1 %v12732_v22  ;;  %6156 = vmatprep.subr.bf16.mxu0 %v12739_v47  ;;  %v12794_v22 = vcombine.low %v2757_v28, %v2761_v34  ;;  %v12796_v47 = vcombine.low %v2758_v32, %v2762_v11  ;;  %v12805_v13 = vcombine.high %v2766_v27, %v2770_v49  ;;  %v2810_v28 = vld [vmem:[%s19635_s4 + $0x528] sm:$0xff] }
 0x2a2   :  { %6262 = vmatprep.subr.bf16.mxu1 %v12741_v10  ;;  %v12803_v10 = vcombine.high %v2765_v48, %v2769_v2  ;;  %v12834_v34 = vcombine.low %v2797_v54, %v2801_v8  ;;  %v2857_v54 = vld [vmem:[%s19635_s4 + $0x6a0] sm:$0xff]  ;;  %v2854_v8 = vld [vmem:[%s19635_s4 + $0x688] sm:$0xff] }
 0x2a4   :  { %6157 = vmatpush1.bf16.msra.mxu0 %v12738_v44  ;;  %v2778_v44 = vld [vmem:[%s19635_s4 + $0x428] sm:$0xff] }
 0x2a5   :  { %6263 = vmatpush1.bf16.msra.mxu1 %v12740_v46  ;;  %6158 = vmatprep.subr.bf16.mxu0 %v12747_v35  ;;  %v12802_v46 = vcombine.low %v2765_v48, %v2769_v2  ;;  %v12804_v35 = vcombine.low %v2766_v27, %v2770_v49  ;;  %v12813_v31 = vcombine.high %v2774_v4, %v2778_v44  ;;  %v2818_v48 = vld [vmem:[%s19635_s4 + $0x568] sm:$0xff] }
 0x2a6   :  { %6264 = vmatprep.subr.bf16.mxu1 %v12749_v61  ;;  %v12811_v61 = vcombine.high %v2773_v36, %v2777_v9  ;;  %v12812_v55 = vcombine.low %v2774_v4, %v2778_v44  ;;  %v2826_v36 = vld [vmem:[%s19635_s4 + $0x5a8] sm:$0xff] }
 0x2a8   :  { %6159 = vmatpush1.bf16.msra.mxu0 %v12746_v23  ;;  %v2785_v23 = vld [vmem:[%s19635_s4 + $0x460] sm:$0xff] }
 0x2a9   :  { %6265 = vmatpush1.bf16.msra.mxu1 %v12748_v30  ;;  %6160 = vmatprep.subr.bf16.mxu0 %v12755_v63  ;;  %v2573_v30 = vld [vmem:[#allocation3] sm:$0xff]  ;;  %v2782_v63 = vld [vmem:[%s19635_s4 + $0x448] sm:$0xff]  ;;  %v12818_v43 = vcombine.low %v2781_v6, %v2785_v23 }
 0x2aa   :  { %6266 = vmatprep.subr.bf16.mxu1 %v12757_v16  ;;  %v2786_v16 = vld [vmem:[%s19635_s4 + $0x468] sm:$0xff]  ;;  %v17165_v25 = vpack.c.bf16 %v2577_v14, %v2573_v30 }
 0x2ab   :  { %v2830_v14 = vld [vmem:[%s19635_s4 + $0x5c8] sm:$0xff] }
 0x2ac   :  { %6161 = vmatpush1.bf16.msra.mxu0 %v12754_v53  ;;  %v17167_v53 = vpack.c.bf16 %v2586_v50, %v2582_v18  ;;  %v2842_v18 = vld [vmem:[%s19635_s4 + $0x628] sm:$0xff] }
 0x2ad   :  { %6267 = vmatpush1.bf16.msra.mxu1 %v12756_v24  ;;  %6162 = vmatprep.subr.bf16.mxu0 %v12763_v41  ;;  %v12819_v24 = vcombine.high %v2781_v6, %v2785_v23  ;;  %v12821_v41 = vcombine.high %v2782_v63, %v2786_v16 }
 0x2ae   :  { %6268 = vmatprep.subr.bf16.mxu1 %v12765_v1  ;;  %v2789_v1 = vld [vmem:[%s19635_s4 + $0x480] sm:$0xff] }
 0x2b0   :  { %6163 = vmatpush1.bf16.msra.mxu0 %v12762_v37  ;;  %v12820_v37 = vcombine.low %v2782_v63, %v2786_v16  ;;  %v2837_v63 = vld [vmem:[%s19635_s4 + $0x600] sm:$0xff] }
 0x2b1   :  { %6269 = vmatpush1.bf16.msra.mxu1 %v12764_v17  ;;  %6164 = vmatprep.subr.bf16.mxu0 %v12771_v42  ;;  %v2585_v17 = vld [vmem:[#allocation3 + $0x60] sm:$0xff]  ;;  %v12827_v42 = vcombine.high %v2789_v1, %v2793_v40 }
 0x2b2   :  { %6270 = vmatprep.subr.bf16.mxu1 %v12773_v59  ;;  %v12829_v59 = vcombine.high %v2790_v56, %v2794_v33  ;;  %v2841_v16 = vld [vmem:[%s19635_s4 + $0x620] sm:$0xff]  ;;  %v2846_v33 = vld [vmem:[%s19635_s4 + $0x648] sm:$0xff] }
 0x2b3   :  { %v2849_v56 = vld [vmem:[%s19635_s4 + $0x660] sm:$0xff] }
 0x2b4   :  { %6165 = vmatpush1.bf16.msra.mxu0 %v12770_v51  ;;  %v2798_v51 = vld [vmem:[%s19635_s4 + $0x4c8] sm:$0xff] }
 0x2b5   :  { %6271 = vmatpush1.bf16.msra.mxu1 %v12772_v39  ;;  %6166 = vmatprep.subr.bf16.mxu0 %v12779_v26  ;;  %v2802_v39 = vld [vmem:[%s19635_s4 + $0x4e8] sm:$0xff]  ;;  %v17197_v26 = vpack.c.bf16 %v2585_v17, %v2581_v52 }
 0x2b6   :  { %6272 = vmatprep.subr.bf16.mxu1 %v12781_v15  ;;  %v12826_v15 = vcombine.low %v2789_v1, %v2793_v40  ;;  %v12836_v32 = vcombine.low %v2798_v51, %v2802_v39  ;;  %v2845_v40 = vld [vmem:[%s19635_s4 + $0x640] sm:$0xff]  ;;  %v2858_v52 = vld [vmem:[%s19635_s4 + $0x6a8] sm:$0xff] }
 0x2b7   :  { %v12893_v58 = vcombine.high %v2854_v8, %v2858_v52 }
 0x2b8   :  { %6167 = vmatpush1.bf16.msra.mxu0 %v12778_v0  ;;  %v12837_v0 = vcombine.high %v2798_v51, %v2802_v39  ;;  %v12882_v51 = vcombine.low %v2845_v40, %v2849_v56 }
 0x2b9   :  { %6273 = vmatpush1.bf16.msra.mxu1 %v12780_v12  ;;  %6168 = vmatprep.subr.bf16.mxu0 %v12787_v57  ;;  %v2805_v12 = vld [vmem:[%s19635_s4 + $0x500] sm:$0xff] }
 0x2ba   :  { %6274 = vmatprep.subr.bf16.mxu1 %v12789_v62  ;;  %v2809_v57 = vld [vmem:[%s19635_s4 + $0x520] sm:$0xff]  ;;  %v2806_v62 = vld [vmem:[%s19635_s4 + $0x508] sm:$0xff] }
 0x2bb   :  { %v12843_v11 = vcombine.high %v2805_v12, %v2809_v57  ;;  %v12842_v2 = vcombine.low %v2805_v12, %v2809_v57  ;;  %v12844_v27 = vcombine.low %v2806_v62, %v2810_v28  ;;  %v2866_v12 = vld [vmem:[%s19635_s4 + $0x6e8] sm:$0xff]  ;;  %v12890_v57 = vcombine.low %v2853_v3, %v2857_v54 }
 0x2bc   :  { %6169 = vmatpush1.bf16.msra.mxu0 %v12786_v45  ;;  %v12845_v45 = vcombine.high %v2806_v62, %v2810_v28  ;;  %v12892_v62 = vcombine.low %v2854_v8, %v2858_v52  ;;  %v2656_v8 = vld [vmem:[%s19635_s4 + $0x58] sm:$0xff] }
 0x2bd   :  { %6275 = vmatpush1.bf16.msra.mxu1 %v12788_v29  ;;  %6170 = vmatprep.subr.bf16.mxu0 %v12795_v19  ;;  %v2813_v29 = vld [vmem:[%s19635_s4 + $0x540] sm:$0xff]  ;;  %v2660_v52 = vld [vmem:[%s19635_s4 + $0x78] sm:$0xff] }
 0x2be   :  { %6276 = vmatprep.subr.bf16.mxu1 %v12797_v38  ;;  %v2817_v19 = vld [vmem:[%s19635_s4 + $0x560] sm:$0xff]  ;;  %v2814_v38 = vld [vmem:[%s19635_s4 + $0x548] sm:$0xff] }
 0x2bf   :  { %v12851_v49 = vcombine.high %v2813_v29, %v2817_v19  ;;  %v12850_v9 = vcombine.low %v2813_v29, %v2817_v19  ;;  %v12852_v4 = vcombine.low %v2814_v38, %v2818_v48  ;;  %v2874_v29 = vld [vmem:[%s19635_s4 + $0x728] sm:$0xff] }
 0x2c0   :  { %6171 = vmatpush1.bf16.msra.mxu0 %v12794_v22  ;;  %v12853_v22 = vcombine.high %v2814_v38, %v2818_v48 }
 0x2c1   :  { %6277 = vmatpush1.bf16.msra.mxu1 %v12796_v47  ;;  %6172 = vmatprep.subr.bf16.mxu0 %v12803_v10  ;;  %v2821_v47 = vld [vmem:[%s19635_s4 + $0x580] sm:$0xff] }
 0x2c2   :  { %6278 = vmatprep.subr.bf16.mxu1 %v12805_v13  ;;  %v2825_v10 = vld [vmem:[%s19635_s4 + $0x5a0] sm:$0xff]  ;;  %v2822_v13 = vld [vmem:[%s19635_s4 + $0x588] sm:$0xff] }
 0x2c3   :  { %v12859_v44 = vcombine.high %v2821_v47, %v2825_v10  ;;  %v12858_v50 = vcombine.low %v2821_v47, %v2825_v10  ;;  %v12860_v6 = vcombine.low %v2822_v13, %v2826_v36  ;;  %v2882_v47 = vld [vmem:[%s19635_s4 + $0x768] sm:$0xff] }
 0x2c4   :  { %6173 = vmatpush1.bf16.msra.mxu0 %v12802_v46  ;;  %v12861_v46 = vcombine.high %v2822_v13, %v2826_v36 }
 0x2c5   :  { %6279 = vmatpush1.bf16.msra.mxu1 %v12804_v35  ;;  %6195 = vmatprep.subr.bf16.mxu0 %v12811_v61  ;;  %v2829_v35 = vld [vmem:[%s19635_s4 + $0x5c0] sm:$0xff] }
 0x2c6   :  { %6301 = vmatprep.subr.bf16.mxu1 %v12813_v31  ;;  %v2833_v61 = vld [vmem:[%s19635_s4 + $0x5e0] sm:$0xff]  ;;  %v2834_v31 = vld [vmem:[%s19635_s4 + $0x5e8] sm:$0xff] }
 0x2c7   :  { %6175 = vmatmul.mubr.bf16.vlgmr.msra.gmra.mrb[32].mxu0 %v17165_v25  ;;  %v12867_v23 = vcombine.high %v2829_v35, %v2833_v61  ;;  %v12869_v30 = vcombine.high %v2830_v14, %v2834_v31 }
 0x2c8   :  { %6281 = vmatmul.mubr.bf16.vlgmr.msra.gmra.mrb[32].mxu1 %v17165_v25  ;;  %6184 = vmatprep.mubr.bf16.mxu0 %v17167_v53 }
 0x2c9   :  { %6196 = vmatpush1.bf16.msra.mxu0 %v12810_v5  ;;  %6290 = vmatprep.mubr.bf16.mxu1 %v17167_v53  ;;  %v2838_v5 = vld [vmem:[%s19635_s4 + $0x608] sm:$0xff] }
 0x2ca   :  { %6302 = vmatpush1.bf16.msra.mxu1 %v12812_v55  ;;  %6197 = vmatprep.subr.bf16.mxu0 %v12819_v24  ;;  %v12866_v55 = vcombine.low %v2829_v35, %v2833_v61  ;;  %v12868_v24 = vcombine.low %v2830_v14, %v2834_v31  ;;  %v12877_v1 = vcombine.high %v2838_v5, %v2842_v18  ;;  %v2890_v35 = vld [vmem:[%s19635_s4 + $0x7a8] sm:$0xff] }
 0x2cb   :  { %6303 = vmatprep.subr.bf16.mxu1 %v12821_v41  ;;  %v12875_v41 = vcombine.high %v2837_v63, %v2841_v16  ;;  %v12876_v17 = vcombine.low %v2838_v5, %v2842_v18 }
 0x2cd   :  { %6198 = vmatpush1.bf16.msra.mxu0 %v12818_v43  ;;  %v2850_v43 = vld [vmem:[%s19635_s4 + $0x668] sm:$0xff] }
 0x2ce   :  { %6304 = vmatpush1.bf16.msra.mxu1 %v12820_v37  ;;  %6199 = vmatprep.subr.bf16.mxu0 %v12827_v42  ;;  %v12874_v37 = vcombine.low %v2837_v63, %v2841_v16  ;;  %v12883_v42 = vcombine.high %v2845_v40, %v2849_v56  ;;  %v12884_v39 = vcombine.low %v2846_v33, %v2850_v43  ;;  %v2898_v63 = vld [vmem:[%s19635_s4 + $0x7e8] sm:$0xff]  ;;  %v2652_v40 = vld [vmem:[%s19635_s4 + $0x38] sm:$0xff] }
 0x2cf   :  { %6185 = vmatmul.mubr.bf16.gmra.mrb[36].mxu0 %v17197_v26  ;;  %6305 = vmatprep.subr.bf16.mxu1 %v12829_v59  ;;  %v12885_v59 = vcombine.high %v2846_v33, %v2850_v43 }
 0x2d0   :  { %6291 = vmatmul.mubr.bf16.gmra.mrb[36].mxu1 %v17197_v26  ;;  %6227 = vmatprep.mubr.bf16.mxu0 %v17199_v7 }
 0x2d1   :  { %6200 = vmatpush1.bf16.msra.mxu0 %v12826_v15  ;;  %6333 = vmatprep.mubr.bf16.mxu1 %v17199_v7  ;;  %v12891_v15 = vcombine.high %v2853_v3, %v2857_v54  ;;  %v2659_v3 = vld [vmem:[%s19635_s4 + $0x70] sm:$0xff] }
 0x2d2   :  { %6306 = vmatpush1.bf16.msra.mxu1 %v12828_v20  ;;  %6201 = vmatprep.subr.bf16.mxu0 %v12835_v21  ;;  %v2861_v20 = vld [vmem:[%s19635_s4 + $0x6c0] sm:$0xff]  ;;  %v2575_v54 = vld [vmem:[#allocation3 + $0x10] sm:$0xff] }
 0x2d3   :  { %6307 = vmatprep.subr.bf16.mxu1 %v12837_v0  ;;  %v2865_v21 = vld [vmem:[%s19635_s4 + $0x6e0] sm:$0xff]  ;;  %v2862_v0 = vld [vmem:[%s19635_s4 + $0x6c8] sm:$0xff] }
 0x2d4   :  { %v12899_v28 = vcombine.high %v2861_v20, %v2865_v21  ;;  %v12898_v19 = vcombine.low %v2861_v20, %v2865_v21  ;;  %v12900_v38 = vcombine.low %v2862_v0, %v2866_v12 }
 0x2d5   :  { %6202 = vmatpush1.bf16.msra.mxu0 %v12834_v34  ;;  %v12901_v34 = vcombine.high %v2862_v0, %v2866_v12  ;;  %v12697_v0 = vcombine.high %v2656_v8, %v2660_v52  ;;  %v2663_v12 = vld [vmem:[%s19635_s4 + $0x90] sm:$0xff] }
 0x2d6   :  { %6308 = vmatpush1.bf16.msra.mxu1 %v12836_v32  ;;  %6203 = vmatprep.subr.bf16.mxu0 %v12843_v11  ;;  %v2869_v32 = vld [vmem:[%s19635_s4 + $0x700] sm:$0xff] }
 0x2d7   :  { %6309 = vmatprep.subr.bf16.mxu1 %v12845_v45  ;;  %v2873_v11 = vld [vmem:[%s19635_s4 + $0x720] sm:$0xff]  ;;  %v2870_v45 = vld [vmem:[%s19635_s4 + $0x708] sm:$0xff] }
 0x2d8   :  { %v12907_v48 = vcombine.high %v2869_v32, %v2873_v11  ;;  %v12906_v10 = vcombine.low %v2869_v32, %v2873_v11  ;;  %v12908_v13 = vcombine.low %v2870_v45, %v2874_v29  ;;  %v12696_v32 = vcombine.low %v2656_v8, %v2660_v52  ;;  %v2587_v11 = vld [vmem:[#allocation3 + $0x70] sm:$0xff] }
 0x2d9   :  { %6204 = vmatpush1.bf16.msra.mxu0 %v12842_v2  ;;  %v12909_v2 = vcombine.high %v2870_v45, %v2874_v29  ;;  %v2711_v8 = vld [vmem:[%s19635_s4 + $0x210] sm:$0xff] }
 0x2da   :  { %6310 = vmatpush1.bf16.msra.mxu1 %v12844_v27  ;;  %6205 = vmatprep.subr.bf16.mxu0 %v12851_v49  ;;  %v2877_v27 = vld [vmem:[%s19635_s4 + $0x740] sm:$0xff]  ;;  %v2715_v52 = vld [vmem:[%s19635_s4 + $0x230] sm:$0xff] }
 0x2db   :  { %6311 = vmatprep.subr.bf16.mxu1 %v12853_v22  ;;  %v2881_v49 = vld [vmem:[%s19635_s4 + $0x760] sm:$0xff]  ;;  %v2878_v22 = vld [vmem:[%s19635_s4 + $0x748] sm:$0xff] }
 0x2dc   :  { %v12915_v36 = vcombine.high %v2877_v27, %v2881_v49  ;;  %v12914_v61 = vcombine.low %v2877_v27, %v2881_v49  ;;  %v12916_v14 = vcombine.low %v2878_v22, %v2882_v47  ;;  %v2676_v27 = vld [vmem:[%s19635_s4 + $0xf8] sm:$0xff] }
 0x2dd   :  { %6206 = vmatpush1.bf16.msra.mxu0 %v12850_v9  ;;  %v12917_v9 = vcombine.high %v2878_v22, %v2882_v47 }
 0x2de   :  { %6312 = vmatpush1.bf16.msra.mxu1 %v12852_v4  ;;  %6207 = vmatprep.subr.bf16.mxu0 %v12859_v44  ;;  %v2885_v4 = vld [vmem:[%s19635_s4 + $0x780] sm:$0xff] }
 0x2df   :  { %6313 = vmatprep.subr.bf16.mxu1 %v12861_v46  ;;  %v2889_v44 = vld [vmem:[%s19635_s4 + $0x7a0] sm:$0xff]  ;;  %v2886_v46 = vld [vmem:[%s19635_s4 + $0x788] sm:$0xff] }
 0x2e0   :  { %v12923_v31 = vcombine.high %v2885_v4, %v2889_v44  ;;  %v12922_v16 = vcombine.low %v2885_v4, %v2889_v44  ;;  %v12924_v5 = vcombine.low %v2886_v46, %v2890_v35  ;;  %v2680_v4 = vld [vmem:[%s19635_s4 + $0x118] sm:$0xff] }
 0x2e1   :  { %6208 = vmatpush1.bf16.msra.mxu0 %v12858_v50  ;;  %v12925_v50 = vcombine.high %v2886_v46, %v2890_v35  ;;  %v2684_v44 = vld [vmem:[%s19635_s4 + $0x138] sm:$0xff] }
 0x2e2   :  { %6314 = vmatpush1.bf16.msra.mxu1 %v12860_v6  ;;  %6209 = vmatprep.subr.bf16.mxu0 %v12867_v23  ;;  %v2893_v6 = vld [vmem:[%s19635_s4 + $0x7c0] sm:$0xff] }
 0x2e3   :  { %6315 = vmatprep.subr.bf16.mxu1 %v12869_v30  ;;  %v2897_v23 = vld [vmem:[%s19635_s4 + $0x7e0] sm:$0xff]  ;;  %v2894_v30 = vld [vmem:[%s19635_s4 + $0x7c8] sm:$0xff] }
 0x2e4   :  { %v12931_v18 = vcombine.high %v2893_v6, %v2897_v23  ;;  %v12930_v56 = vcombine.low %v2893_v6, %v2897_v23  ;;  %v12932_v33 = vcombine.low %v2894_v30, %v2898_v63  ;;  %v2688_v6 = vld [vmem:[%s19635_s4 + $0x158] sm:$0xff] }
 0x2e5   :  { %6210 = vmatpush1.bf16.msra.mxu0 %v12866_v55  ;;  %v12933_v55 = vcombine.high %v2894_v30, %v2898_v63  ;;  %v12720_v30 = vcombine.low %v2680_v4, %v2684_v44 }
 0x2e6   :  { %6316 = vmatpush1.bf16.msra.mxu1 %v12868_v24  ;;  %6211 = vmatprep.subr.bf16.mxu0 %v12875_v41  ;;  %v2647_v24 = vld [vmem:[%s19635_s4 + $0x10] sm:$0xff] }
 0x2e7   :  { %6317 = vmatprep.subr.bf16.mxu1 %v12877_v1  ;;  %v2651_v41 = vld [vmem:[%s19635_s4 + $0x30] sm:$0xff]  ;;  %v2648_v1 = vld [vmem:[%s19635_s4 + $0x18] sm:$0xff] }
 0x2e8   :  { %v12687_v43 = vcombine.high %v2647_v24, %v2651_v41 }
 0x2e9   :  { %6212 = vmatpush1.bf16.msra.mxu0 %v12874_v37  ;;  %v2579_v37 = vld [vmem:[#allocation3 + $0x30] sm:$0xff] }
 0x2ea   :  { %6318 = vmatpush1.bf16.msra.mxu1 %v12876_v17  ;;  %6213 = vmatprep.subr.bf16.mxu0 %v12883_v42  ;;  %v12689_v17 = vcombine.high %v2648_v1, %v2652_v40  ;;  %v2588_v42 = vld [vmem:[#allocation3 + $0x78] sm:$0xff] }
 0x2eb   :  { %6319 = vmatprep.subr.bf16.mxu1 %v12885_v59  ;;  %v2655_v59 = vld [vmem:[%s19635_s4 + $0x50] sm:$0xff] }
 0x2ec   :  { %v12695_v21 = vcombine.high %v2655_v59, %v2659_v3 }
 0x2ed   :  { %6214 = vmatpush1.bf16.msra.mxu0 %v12882_v51  ;;  %v17373_v51 = vpack.c.bf16 %v2579_v37, %v2575_v54  ;;  %v2704_v37 = vld [vmem:[%s19635_s4 + $0x1d8] sm:$0xff] }
 0x2ee   :  { %6320 = vmatpush1.bf16.msra.mxu1 %v12884_v39  ;;  %6215 = vmatprep.subr.bf16.mxu0 %v12891_v15  ;;  %v12686_v39 = vcombine.low %v2647_v24, %v2651_v41  ;;  %v2584_v15 = vld [vmem:[#allocation3 + $0x58] sm:$0xff] }
 0x2ef   :  { %6321 = vmatprep.subr.bf16.mxu1 %v12893_v58  ;;  %v12688_v58 = vcombine.low %v2648_v1, %v2652_v40  ;;  %v17375_v20 = vpack.c.bf16 %v2588_v42, %v2584_v15  ;;  %v2700_v24 = vld [vmem:[%s19635_s4 + $0x1b8] sm:$0xff] }
 0x2f0   :  { %v2716_v15 = vld [vmem:[%s19635_s4 + $0x238] sm:$0xff] }
 0x2f1   :  { %6216 = vmatpush1.bf16.msra.mxu0 %v12890_v57  ;;  %v2667_v57 = vld [vmem:[%s19635_s4 + $0xb0] sm:$0xff] }
 0x2f2   :  { %6322 = vmatpush1.bf16.msra.mxu1 %v12892_v62  ;;  %6217 = vmatprep.subr.bf16.mxu0 %v12899_v28  ;;  %v2664_v62 = vld [vmem:[%s19635_s4 + $0x98] sm:$0xff]  ;;  %v12703_v45 = vcombine.high %v2663_v12, %v2667_v57  ;;  %v12702_v22 = vcombine.low %v2663_v12, %v2667_v57  ;;  %v2719_v57 = vld [vmem:[%s19635_s4 + $0x250] sm:$0xff] }
 0x2f3   :  { %6323 = vmatprep.subr.bf16.mxu1 %v12901_v34  ;;  %v2668_v28 = vld [vmem:[%s19635_s4 + $0xb8] sm:$0xff]  ;;  %v12694_v34 = vcombine.low %v2655_v59, %v2659_v3 }
 0x2f4   :  { %v12705_v29 = vcombine.high %v2664_v62, %v2668_v28  ;;  %v12704_v47 = vcombine.low %v2664_v62, %v2668_v28  ;;  %v2723_v62 = vld [vmem:[%s19635_s4 + $0x270] sm:$0xff]  ;;  %v2720_v28 = vld [vmem:[%s19635_s4 + $0x258] sm:$0xff] }
 0x2f5   :  { %6218 = vmatpush1.bf16.msra.mxu0 %v12898_v19  ;;  %v2671_v19 = vld [vmem:[%s19635_s4 + $0xd0] sm:$0xff] }
 0x2f6   :  { %6324 = vmatpush1.bf16.msra.mxu1 %v12900_v38  ;;  %6219 = vmatprep.subr.bf16.mxu0 %v12907_v48  ;;  %v2675_v38 = vld [vmem:[%s19635_s4 + $0xf0] sm:$0xff] }
 0x2f7   :  { %6325 = vmatprep.subr.bf16.mxu1 %v12909_v2  ;;  %v2583_v48 = vld [vmem:[#allocation3 + $0x50] sm:$0xff]  ;;  %v2672_v2 = vld [vmem:[%s19635_s4 + $0xd8] sm:$0xff]  ;;  %v12710_v46 = vcombine.low %v2671_v19, %v2675_v38 }
 0x2f8   :  { %v17405_v49 = vpack.c.bf16 %v2587_v11, %v2583_v48  ;;  %v12712_v35 = vcombine.low %v2672_v2, %v2676_v27  ;;  %v2728_v48 = vld [vmem:[%s19635_s4 + $0x298] sm:$0xff] }
 0x2f9   :  { %6220 = vmatpush1.bf16.msra.mxu0 %v12906_v10  ;;  %v12711_v10 = vcombine.high %v2671_v19, %v2675_v38  ;;  %v2727_v19 = vld [vmem:[%s19635_s4 + $0x290] sm:$0xff] }
 0x2fa   :  { %6326 = vmatpush1.bf16.msra.mxu1 %v12908_v13  ;;  %6221 = vmatprep.subr.bf16.mxu0 %v12915_v36  ;;  %v12713_v13 = vcombine.high %v2672_v2, %v2676_v27  ;;  %v2679_v36 = vld [vmem:[%s19635_s4 + $0x110] sm:$0xff]  ;;  %v2732_v2 = vld [vmem:[%s19635_s4 + $0x2b8] sm:$0xff]  ;;  %v12758_v27 = vcombine.low %v2719_v57, %v2723_v62 }
 0x2fb   :  { %6327 = vmatprep.subr.bf16.mxu1 %v12917_v9  ;;  %v2683_v9 = vld [vmem:[%s19635_s4 + $0x130] sm:$0xff] }
 0x2fc   :  { %v12718_v23 = vcombine.low %v2679_v36, %v2683_v9  ;;  %v2731_v38 = vld [vmem:[%s19635_s4 + $0x2b0] sm:$0xff] }
 0x2fd   :  { %6222 = vmatpush1.bf16.msra.mxu0 %v12914_v61  ;;  %v12719_v61 = vcombine.high %v2679_v36, %v2683_v9  ;;  %v2739_v36 = vld [vmem:[%s19635_s4 + $0x2f0] sm:$0xff]  ;;  %v2736_v9 = vld [vmem:[%s19635_s4 + $0x2d8] sm:$0xff] }
 0x2fe   :  { %6328 = vmatpush1.bf16.msra.mxu1 %v12916_v14  ;;  %6223 = vmatprep.subr.bf16.mxu0 %v12923_v31  ;;  %v12721_v14 = vcombine.high %v2680_v4, %v2684_v44  ;;  %v2687_v31 = vld [vmem:[%s19635_s4 + $0x150] sm:$0xff]  ;;  %v2740_v4 = vld [vmem:[%s19635_s4 + $0x2f8] sm:$0xff]  ;;  %v12766_v44 = vcombine.low %v2727_v19, %v2731_v38 }
 0x2ff   :  { %6329 = vmatprep.subr.bf16.mxu1 %v12925_v50  ;;  %v2691_v50 = vld [vmem:[%s19635_s4 + $0x170] sm:$0xff] }
 0x300   :  { %v12727_v63 = vcombine.high %v2687_v31, %v2691_v50  ;;  %v12726_v41 = vcombine.low %v2687_v31, %v2691_v50  ;;  %v2747_v31 = vld [vmem:[%s19635_s4 + $0x330] sm:$0xff]  ;;  %v2744_v50 = vld [vmem:[%s19635_s4 + $0x318] sm:$0xff] }
 0x301   :  { %6224 = vmatpush1.bf16.msra.mxu0 %v12922_v16 }
 0x302   :  { %6330 = vmatpush1.bf16.msra.mxu1 %v12924_v5  ;;  %6225 = vmatprep.subr.bf16.mxu0 %v12931_v18  ;;  %v2695_v5 = vld [vmem:[%s19635_s4 + $0x190] sm:$0xff] }
 0x303   :  { %6331 = vmatprep.subr.bf16.mxu1 %v12933_v55  ;;  %v2699_v18 = vld [vmem:[%s19635_s4 + $0x1b0] sm:$0xff]  ;;  %v2696_v55 = vld [vmem:[%s19635_s4 + $0x198] sm:$0xff] }
 0x304   :  { %v12735_v40 = vcombine.high %v2695_v5, %v2699_v18  ;;  %v12734_v42 = vcombine.low %v2695_v5, %v2699_v18  ;;  %v12736_v59 = vcombine.low %v2696_v55, %v2700_v24  ;;  %v2755_v5 = vld [vmem:[%s19635_s4 + $0x370] sm:$0xff]  ;;  %v2752_v18 = vld [vmem:[%s19635_s4 + $0x358] sm:$0xff] }
 0x305   :  { %6226 = vmatpush1.bf16.msra.mxu0 %v12930_v56  ;;  %v12737_v56 = vcombine.high %v2696_v55, %v2700_v24  ;;  %v2756_v55 = vld [vmem:[%s19635_s4 + $0x378] sm:$0xff] }
 0x306   :  { %6332 = vmatpush1.bf16.msra.mxu1 %v12932_v33  ;;  %6354 = vmatprep.subr.bf16.mxu0 %v12687_v43  ;;  %v2703_v33 = vld [vmem:[%s19635_s4 + $0x1d0] sm:$0xff] }
 0x307   :  { %6460 = vmatprep.subr.bf16.mxu1 %v12689_v17  ;;  %v2707_v43 = vld [vmem:[%s19635_s4 + $0x1f0] sm:$0xff]  ;;  %v2708_v17 = vld [vmem:[%s19635_s4 + $0x1f8] sm:$0xff] }
 0x308   :  { %6228 = vmatmul.mubr.bf16.vlgmr.msra.gmra.mrb[32].mxu0 %v17373_v51  ;;  %v12743_v3 = vcombine.high %v2703_v33, %v2707_v43  ;;  %v12745_v54 = vcombine.high %v2704_v37, %v2708_v17 }
 0x309   :  { %6334 = vmatmul.mubr.bf16.vlgmr.msra.gmra.mrb[32].mxu1 %v17373_v51  ;;  %6237 = vmatprep.mubr.bf16.mxu0 %v17375_v20 }
 0x30a   :  { %6343 = vmatprep.mubr.bf16.mxu1 %v17375_v20  ;;  %6355 = vmatpush1.bf16.msra.mxu0 %v12686_v39  ;;  %v2712_v39 = vld [vmem:[%s19635_s4 + $0x218] sm:$0xff] }
 0x30b   :  { %6461 = vmatpush1.bf16.msra.mxu1 %v12688_v58  ;;  %6356 = vmatprep.subr.bf16.mxu0 %v12695_v21  ;;  %v12742_v58 = vcombine.low %v2703_v33, %v2707_v43  ;;  %v12744_v21 = vcombine.low %v2704_v37, %v2708_v17  ;;  %v12753_v12 = vcombine.high %v2712_v39, %v2716_v15  ;;  %v2763_v33 = vld [vmem:[%s19635_s4 + $0x3b0] sm:$0xff]  ;;  %v2760_v43 = vld [vmem:[%s19635_s4 + $0x398] sm:$0xff] }
 0x30c   :  { %6462 = vmatprep.subr.bf16.mxu1 %v12697_v0  ;;  %v12751_v0 = vcombine.high %v2711_v8, %v2715_v52  ;;  %v12752_v11 = vcombine.low %v2712_v39, %v2716_v15  ;;  %v2764_v37 = vld [vmem:[%s19635_s4 + $0x3b8] sm:$0xff] }
 0x30d   :  { %v2772_v39 = vld [vmem:[%s19635_s4 + $0x3f8] sm:$0xff] }
 0x30e   :  { %6357 = vmatpush1.bf16.msra.mxu0 %v12694_v34  ;;  %v2724_v34 = vld [vmem:[%s19635_s4 + $0x278] sm:$0xff] }
 0x30f   :  { %6463 = vmatpush1.bf16.msra.mxu1 %v12696_v32  ;;  %6358 = vmatprep.subr.bf16.mxu0 %v12703_v45  ;;  %v12750_v32 = vcombine.low %v2711_v8, %v2715_v52  ;;  %v12759_v45 = vcombine.high %v2719_v57, %v2723_v62  ;;  %v2771_v8 = vld [vmem:[%s19635_s4 + $0x3f0] sm:$0xff]  ;;  %v2768_v52 = vld [vmem:[%s19635_s4 + $0x3d8] sm:$0xff] }
 0x310   :  { %6238 = vmatmul.mubr.bf16.gmra.mrb[36].mxu0 %v17405_v49  ;;  %6464 = vmatprep.subr.bf16.mxu1 %v12705_v29  ;;  %v12761_v29 = vcombine.high %v2720_v28, %v2724_v34  ;;  %v2779_v57 = vld [vmem:[%s19635_s4 + $0x430] sm:$0xff]  ;;  %v2776_v62 = vld [vmem:[%s19635_s4 + $0x418] sm:$0xff] }
 0x311   :  { %6344 = vmatmul.mubr.bf16.gmra.mrb[36].mxu1 %v17405_v49  ;;  %6386 = vmatprep.mubr.bf16.mxu0 %v16991_v60 }
 0x312   :  { %6359 = vmatpush1.bf16.msra.mxu0 %v12702_v22  ;;  %6492 = vmatprep.mubr.bf16.mxu1 %v16991_v60  ;;  %v2692_v60 = vld [vmem:[%s19635_s4 + $0x178] sm:$0xff]  ;;  %v12760_v22 = vcombine.low %v2720_v28, %v2724_v34 }
 0x313   :  { %6465 = vmatpush1.bf16.msra.mxu1 %v12704_v47  ;;  %6360 = vmatprep.subr.bf16.mxu0 %v12711_v10  ;;  %v12729_v16 = vcombine.high %v2688_v6, %v2692_v60  ;;  %v12728_v1 = vcombine.low %v2688_v6, %v2692_v60  ;;  %v12767_v47 = vcombine.high %v2727_v19, %v2731_v38  ;;  %v2748_v6 = vld [vmem:[%s19635_s4 + $0x338] sm:$0xff]  ;;  %v2787_v19 = vld [vmem:[%s19635_s4 + $0x470] sm:$0xff] }
 0x314   :  { %6466 = vmatprep.subr.bf16.mxu1 %v12713_v13  ;;  %v12769_v10 = vcombine.high %v2728_v48, %v2732_v2  ;;  %v2735_v13 = vld [vmem:[%s19635_s4 + $0x2d0] sm:$0xff]  ;;  %v2780_v28 = vld [vmem:[%s19635_s4 + $0x438] sm:$0xff] }
 0x315   :  { %v12774_v60 = vcombine.low %v2735_v13, %v2739_v36  ;;  %v2784_v38 = vld [vmem:[%s19635_s4 + $0x458] sm:$0xff] }
 0x316   :  { %6361 = vmatpush1.bf16.msra.mxu0 %v12710_v46  ;;  %v12768_v46 = vcombine.low %v2728_v48, %v2732_v2  ;;  %v2788_v48 = vld [vmem:[%s19635_s4 + $0x478] sm:$0xff] }
 0x317   :  { %6467 = vmatpush1.bf16.msra.mxu1 %v12712_v35  ;;  %6362 = vmatprep.subr.bf16.mxu0 %v12719_v61  ;;  %v12775_v35 = vcombine.high %v2735_v13, %v2739_v36  ;;  %v12777_v61 = vcombine.high %v2736_v9, %v2740_v4  ;;  %v2795_v13 = vld [vmem:[%s19635_s4 + $0x4b0] sm:$0xff]  ;;  %v2792_v36 = vld [vmem:[%s19635_s4 + $0x498] sm:$0xff] }
 0x318   :  { %6468 = vmatprep.subr.bf16.mxu1 %v12721_v14  ;;  %v2743_v14 = vld [vmem:[%s19635_s4 + $0x310] sm:$0xff] }
 0x319   :  { %v12782_v24 = vcombine.low %v2743_v14, %v2747_v31 }
 0x31a   :  { %6363 = vmatpush1.bf16.msra.mxu0 %v12718_v23  ;;  %v12776_v23 = vcombine.low %v2736_v9, %v2740_v4  ;;  %v2796_v9 = vld [vmem:[%s19635_s4 + $0x4b8] sm:$0xff] }
 0x31b   :  { %6469 = vmatpush1.bf16.msra.mxu1 %v12720_v30  ;;  %6364 = vmatprep.subr.bf16.mxu0 %v12727_v63  ;;  %v12783_v30 = vcombine.high %v2743_v14, %v2747_v31  ;;  %v12785_v63 = vcombine.high %v2744_v50, %v2748_v6  ;;  %v2800_v14 = vld [vmem:[%s19635_s4 + $0x4d8] sm:$0xff] }
 0x31c   :  { %6470 = vmatprep.subr.bf16.mxu1 %v12729_v16  ;;  %v2751_v16 = vld [vmem:[%s19635_s4 + $0x350] sm:$0xff] }
 0x31d   :  { %v12790_v17 = vcombine.low %v2751_v16, %v2755_v5 }
 0x31e   :  { %6365 = vmatpush1.bf16.msra.mxu0 %v12726_v41  ;;  %v12784_v41 = vcombine.low %v2744_v50, %v2748_v6  ;;  %v12832_v50 = vcombine.low %v2792_v36, %v2796_v9 }
 0x31f   :  { %6471 = vmatpush1.bf16.msra.mxu1 %v12728_v1  ;;  %6366 = vmatprep.subr.bf16.mxu0 %v12735_v40  ;;  %v12791_v1 = vcombine.high %v2751_v16, %v2755_v5  ;;  %v12793_v40 = vcombine.high %v2752_v18, %v2756_v55  ;;  %v2812_v16 = vld [vmem:[%s19635_s4 + $0x538] sm:$0xff] }
 0x320   :  { %6472 = vmatprep.subr.bf16.mxu1 %v12737_v56  ;;  %v2759_v56 = vld [vmem:[%s19635_s4 + $0x390] sm:$0xff] }
 0x321   :  { %v12798_v15 = vcombine.low %v2759_v56, %v2763_v33 }
 0x322   :  { %6367 = vmatpush1.bf16.msra.mxu0 %v12734_v42  ;;  %v12792_v42 = vcombine.low %v2752_v18, %v2756_v55 }
 0x323   :  { %6473 = vmatpush1.bf16.msra.mxu1 %v12736_v59  ;;  %6368 = vmatprep.subr.bf16.mxu0 %v12743_v3  ;;  %v12799_v59 = vcombine.high %v2759_v56, %v2763_v33  ;;  %v12801_v3 = vcombine.high %v2760_v43, %v2764_v37 }
 0x324   :  { %6474 = vmatprep.subr.bf16.mxu1 %v12745_v54  ;;  %v2767_v54 = vld [vmem:[%s19635_s4 + $0x3d0] sm:$0xff] }
 0x325   :  { %v12806_v34 = vcombine.low %v2767_v54, %v2771_v8 }
 0x326   :  { %6369 = vmatpush1.bf16.msra.mxu0 %v12742_v58  ;;  %v12800_v58 = vcombine.low %v2760_v43, %v2764_v37  ;;  %v2823_v37 = vld [vmem:[%s19635_s4 + $0x590] sm:$0xff] }
 0x327   :  { %6475 = vmatpush1.bf16.msra.mxu1 %v12744_v21  ;;  %6370 = vmatprep.subr.bf16.mxu0 %v12751_v0  ;;  %v12807_v21 = vcombine.high %v2767_v54, %v2771_v8  ;;  %v12809_v0 = vcombine.high %v2768_v52, %v2772_v39 }
 0x328   :  { %6476 = vmatprep.subr.bf16.mxu1 %v12753_v12  ;;  %v2775_v12 = vld [vmem:[%s19635_s4 + $0x410] sm:$0xff] }
 0x329   :  { %v12814_v2 = vcombine.low %v2775_v12, %v2779_v57 }
 0x32a   :  { %6371 = vmatpush1.bf16.msra.mxu0 %v12750_v32  ;;  %v12808_v32 = vcombine.low %v2768_v52, %v2772_v39  ;;  %v2831_v39 = vld [vmem:[%s19635_s4 + $0x5d0] sm:$0xff] }
 0x32b   :  { %6477 = vmatpush1.bf16.msra.mxu1 %v12752_v11  ;;  %6372 = vmatprep.subr.bf16.mxu0 %v12759_v45  ;;  %v12815_v11 = vcombine.high %v2775_v12, %v2779_v57  ;;  %v12817_v45 = vcombine.high %v2776_v62, %v2780_v28 }
 0x32c   :  { %6478 = vmatprep.subr.bf16.mxu1 %v12761_v29  ;;  %v2783_v29 = vld [vmem:[%s19635_s4 + $0x450] sm:$0xff] }
 0x32d   :  { %v12822_v4 = vcombine.low %v2783_v29, %v2787_v19 }
 0x32e   :  { %6373 = vmatpush1.bf16.msra.mxu0 %v12758_v27  ;;  %v12816_v27 = vcombine.low %v2776_v62, %v2780_v28  ;;  %v2839_v28 = vld [vmem:[%s19635_s4 + $0x610] sm:$0xff] }
 0x32f   :  { %6479 = vmatpush1.bf16.msra.mxu1 %v12760_v22  ;;  %6374 = vmatprep.subr.bf16.mxu0 %v12767_v47  ;;  %v12823_v22 = vcombine.high %v2783_v29, %v2787_v19  ;;  %v12825_v47 = vcombine.high %v2784_v38, %v2788_v48 }
 0x330   :  { %6480 = vmatprep.subr.bf16.mxu1 %v12769_v10  ;;  %v2791_v10 = vld [vmem:[%s19635_s4 + $0x490] sm:$0xff] }
 0x331   :  { %v12830_v31 = vcombine.low %v2791_v10, %v2795_v13 }
 0x332   :  { %6375 = vmatpush1.bf16.msra.mxu0 %v12766_v44  ;;  %v12824_v44 = vcombine.low %v2784_v38, %v2788_v48  ;;  %v2847_v48 = vld [vmem:[%s19635_s4 + $0x650] sm:$0xff] }
 0x333   :  { %6481 = vmatpush1.bf16.msra.mxu1 %v12768_v46  ;;  %6376 = vmatprep.subr.bf16.mxu0 %v12775_v35  ;;  %v12831_v46 = vcombine.high %v2791_v10, %v2795_v13  ;;  %v2799_v35 = vld [vmem:[%s19635_s4 + $0x4d0] sm:$0xff] }
 0x334   :  { %6482 = vmatprep.subr.bf16.mxu1 %v12777_v61  ;;  %v2803_v61 = vld [vmem:[%s19635_s4 + $0x4f0] sm:$0xff] }
 0x335   :  { %v12839_v6 = vcombine.high %v2799_v35, %v2803_v61  ;;  %v12838_v5 = vcombine.low %v2799_v35, %v2803_v61 }
 0x336   :  { %6377 = vmatpush1.bf16.msra.mxu0 %v12774_v60 }
 0x337   :  { %6483 = vmatpush1.bf16.msra.mxu1 %v12776_v23  ;;  %6378 = vmatprep.subr.bf16.mxu0 %v12783_v30  ;;  %v2807_v23 = vld [vmem:[%s19635_s4 + $0x510] sm:$0xff] }
 0x338   :  { %6484 = vmatprep.subr.bf16.mxu1 %v12785_v63  ;;  %v2811_v30 = vld [vmem:[%s19635_s4 + $0x530] sm:$0xff]  ;;  %v2808_v63 = vld [vmem:[%s19635_s4 + $0x518] sm:$0xff] }
 0x339   :  { %v12847_v55 = vcombine.high %v2807_v23, %v2811_v30  ;;  %v12848_v56 = vcombine.low %v2808_v63, %v2812_v16 }
 0x33a   :  { %6379 = vmatpush1.bf16.msra.mxu0 %v12782_v24  ;;  %v2815_v24 = vld [vmem:[%s19635_s4 + $0x550] sm:$0xff] }
 0x33b   :  { %6485 = vmatpush1.bf16.msra.mxu1 %v12784_v41  ;;  %6380 = vmatprep.subr.bf16.mxu0 %v12791_v1  ;;  %v2819_v41 = vld [vmem:[%s19635_s4 + $0x570] sm:$0xff]  ;;  %v2816_v1 = vld [vmem:[%s19635_s4 + $0x558] sm:$0xff] }
 0x33c   :  { %6486 = vmatprep.subr.bf16.mxu1 %v12793_v40  ;;  %v12846_v40 = vcombine.low %v2807_v23, %v2811_v30  ;;  %v12855_v33 = vcombine.high %v2815_v24, %v2819_v41 }
 0x33e   :  { %6381 = vmatpush1.bf16.msra.mxu0 %v12790_v17  ;;  %v2827_v17 = vld [vmem:[%s19635_s4 + $0x5b0] sm:$0xff] }
 0x33f   :  { %6487 = vmatpush1.bf16.msra.mxu1 %v12792_v42  ;;  %6382 = vmatprep.subr.bf16.mxu0 %v12799_v59  ;;  %v2824_v42 = vld [vmem:[%s19635_s4 + $0x598] sm:$0xff]  ;;  %v12863_v8 = vcombine.high %v2823_v37, %v2827_v17 }
 0x340   :  { %6488 = vmatprep.subr.bf16.mxu1 %v12801_v3  ;;  %v2828_v59 = vld [vmem:[%s19635_s4 + $0x5b8] sm:$0xff]  ;;  %v12854_v3 = vcombine.low %v2815_v24, %v2819_v41 }
 0x341   :  { %v12865_v52 = vcombine.high %v2824_v42, %v2828_v59  ;;  %v12864_v12 = vcombine.low %v2824_v42, %v2828_v59  ;;  %v2887_v59 = vld [vmem:[%s19635_s4 + $0x790] sm:$0xff] }
 0x342   :  { %6383 = vmatpush1.bf16.msra.mxu0 %v12798_v15  ;;  %v2835_v15 = vld [vmem:[%s19635_s4 + $0x5f0] sm:$0xff] }
 0x343   :  { %6489 = vmatpush1.bf16.msra.mxu1 %v12800_v58  ;;  %6384 = vmatprep.subr.bf16.mxu0 %v12807_v21  ;;  %v2832_v58 = vld [vmem:[%s19635_s4 + $0x5d8] sm:$0xff]  ;;  %v12871_v57 = vcombine.high %v2831_v39, %v2835_v15 }
 0x344   :  { %6490 = vmatprep.subr.bf16.mxu1 %v12809_v0  ;;  %v2836_v21 = vld [vmem:[%s19635_s4 + $0x5f8] sm:$0xff]  ;;  %v12862_v0 = vcombine.low %v2823_v37, %v2827_v17 }
 0x345   :  { %v12873_v62 = vcombine.high %v2832_v58, %v2836_v21  ;;  %v12872_v29 = vcombine.low %v2832_v58, %v2836_v21  ;;  %v2895_v21 = vld [vmem:[%s19635_s4 + $0x7d0] sm:$0xff] }
 0x346   :  { %6385 = vmatpush1.bf16.msra.mxu0 %v12806_v34  ;;  %v2843_v34 = vld [vmem:[%s19635_s4 + $0x630] sm:$0xff] }
 0x347   :  { %6491 = vmatpush1.bf16.msra.mxu1 %v12808_v32  ;;  %6407 = vmatprep.subr.bf16.mxu0 %v12815_v11  ;;  %v2840_v32 = vld [vmem:[%s19635_s4 + $0x618] sm:$0xff]  ;;  %v12879_v19 = vcombine.high %v2839_v28, %v2843_v34 }
 0x348   :  { %6513 = vmatprep.subr.bf16.mxu1 %v12817_v45  ;;  %v2844_v11 = vld [vmem:[%s19635_s4 + $0x638] sm:$0xff]  ;;  %v12870_v45 = vcombine.low %v2831_v39, %v2835_v15 }
 0x349   :  { %6387 = vmatmul.mubr.bf16.vlgmr.msra.gmra.mrb[40].mxu0 %v17165_v25  ;;  %v12881_v38 = vcombine.high %v2840_v32, %v2844_v11  ;;  %v12880_v10 = vcombine.low %v2840_v32, %v2844_v11  ;;  %v12938_v11 = vld [vmem:[%s19635_s4 + $0x1000] sm:$0xff] }
 0x34a   :  { %6493 = vmatmul.mubr.bf16.vlgmr.msra.gmra.mrb[40].mxu1 %v17165_v25  ;;  %6396 = vmatprep.mubr.bf16.mxu0 %v17167_v53  ;;  %v12833_v25 = vcombine.high %v2792_v36, %v2796_v9  ;;  %v2855_v9 = vld [vmem:[%s19635_s4 + $0x690] sm:$0xff] }
 0x34b   :  { %6408 = vmatpush1.bf16.msra.mxu0 %v12814_v2  ;;  %6502 = vmatprep.mubr.bf16.mxu1 %v17167_v53  ;;  %v2804_v53 = vld [vmem:[%s19635_s4 + $0x4f8] sm:$0xff]  ;;  %v2851_v2 = vld [vmem:[%s19635_s4 + $0x670] sm:$0xff] }
 0x34c   :  { %6514 = vmatpush1.bf16.msra.mxu1 %v12816_v27  ;;  %6409 = vmatprep.subr.bf16.mxu0 %v12823_v22  ;;  %v12841_v60 = vcombine.high %v2800_v14, %v2804_v53  ;;  %v12840_v18 = vcombine.low %v2800_v14, %v2804_v53  ;;  %v2848_v27 = vld [vmem:[%s19635_s4 + $0x658] sm:$0xff]  ;;  %v12887_v13 = vcombine.high %v2847_v48, %v2851_v2  ;;  %v2863_v53 = vld [vmem:[%s19635_s4 + $0x6d0] sm:$0xff] }
 0x34d   :  { %6515 = vmatprep.subr.bf16.mxu1 %v12825_v47  ;;  %v2852_v22 = vld [vmem:[%s19635_s4 + $0x678] sm:$0xff]  ;;  %v12878_v47 = vcombine.low %v2839_v28, %v2843_v34 }
 0x34e   :  { %v12889_v36 = vcombine.high %v2848_v27, %v2852_v22  ;;  %v12888_v35 = vcombine.low %v2848_v27, %v2852_v22  ;;  %v12946_v22 = vld [vmem:[%s19635_s4 + $0x1040] sm:$0xff] }
 0x34f   :  { %6410 = vmatpush1.bf16.msra.mxu0 %v12822_v4  ;;  %v2859_v4 = vld [vmem:[%s19635_s4 + $0x6b0] sm:$0xff] }
 0x350   :  { %6516 = vmatpush1.bf16.msra.mxu1 %v12824_v44  ;;  %6411 = vmatprep.subr.bf16.mxu0 %v12831_v46  ;;  %v2856_v44 = vld [vmem:[%s19635_s4 + $0x698] sm:$0xff]  ;;  %v12895_v61 = vcombine.high %v2855_v9, %v2859_v4 }
 0x351   :  { %6397 = vmatmul.mubr.bf16.gmra.mrb[44].mxu0 %v17197_v26  ;;  %6517 = vmatprep.subr.bf16.mxu1 %v12833_v25  ;;  %v2860_v46 = vld [vmem:[%s19635_s4 + $0x6b8] sm:$0xff]  ;;  %v12886_v25 = vcombine.low %v2847_v48, %v2851_v2 }
 0x352   :  { %6503 = vmatmul.mubr.bf16.gmra.mrb[44].mxu1 %v17197_v26  ;;  %6439 = vmatprep.mubr.bf16.mxu0 %v17199_v7  ;;  %v12849_v26 = vcombine.high %v2808_v63, %v2812_v16  ;;  %v12897_v14 = vcombine.high %v2856_v44, %v2860_v46  ;;  %v12896_v23 = vcombine.low %v2856_v44, %v2860_v46  ;;  %v2871_v16 = vld [vmem:[%s19635_s4 + $0x710] sm:$0xff]  ;;  %v12954_v46 = vld [vmem:[%s19635_s4 + $0x1080] sm:$0xff] }
 0x353   :  { %6412 = vmatpush1.bf16.msra.mxu0 %v12830_v31  ;;  %6545 = vmatprep.mubr.bf16.mxu1 %v17199_v7  ;;  %v2820_v7 = vld [vmem:[%s19635_s4 + $0x578] sm:$0xff]  ;;  %v2867_v31 = vld [vmem:[%s19635_s4 + $0x6f0] sm:$0xff] }
 0x354   :  { %6518 = vmatpush1.bf16.msra.mxu1 %v12832_v50  ;;  %6413 = vmatprep.subr.bf16.mxu0 %v12839_v6  ;;  %v12857_v43 = vcombine.high %v2816_v1, %v2820_v7  ;;  %v12856_v54 = vcombine.low %v2816_v1, %v2820_v7  ;;  %v2864_v50 = vld [vmem:[%s19635_s4 + $0x6d8] sm:$0xff]  ;;  %v12903_v30 = vcombine.high %v2863_v53, %v2867_v31  ;;  %v2879_v7 = vld [vmem:[%s19635_s4 + $0x750] sm:$0xff] }
 0x355   :  { %6519 = vmatprep.subr.bf16.mxu1 %v12841_v60  ;;  %v2868_v6 = vld [vmem:[%s19635_s4 + $0x6f8] sm:$0xff]  ;;  %v12894_v60 = vcombine.low %v2855_v9, %v2859_v4 }
 0x356   :  { %v12905_v63 = vcombine.high %v2864_v50, %v2868_v6  ;;  %v12904_v24 = vcombine.low %v2864_v50, %v2868_v6  ;;  %v2626_v50 = vld [vmem:[#allocation3 + $0xa8] sm:$0xff]  ;;  %v12962_v6 = vld [vmem:[%s19635_s4 + $0x10c0] sm:$0xff] }
 0x357   :  { %6414 = vmatpush1.bf16.msra.mxu0 %v12838_v5  ;;  %v2875_v5 = vld [vmem:[%s19635_s4 + $0x730] sm:$0xff] }
 0x358   :  { %6520 = vmatpush1.bf16.msra.mxu1 %v12840_v18  ;;  %6415 = vmatprep.subr.bf16.mxu0 %v12847_v55  ;;  %v2872_v18 = vld [vmem:[%s19635_s4 + $0x718] sm:$0xff]  ;;  %v12911_v41 = vcombine.high %v2871_v16, %v2875_v5 }
 0x359   :  { %6521 = vmatprep.subr.bf16.mxu1 %v12849_v26  ;;  %v2876_v55 = vld [vmem:[%s19635_s4 + $0x738] sm:$0xff]  ;;  %v12902_v26 = vcombine.low %v2863_v53, %v2867_v31 }
 0x35a   :  { %v12913_v1 = vcombine.high %v2872_v18, %v2876_v55  ;;  %v12912_v37 = vcombine.low %v2872_v18, %v2876_v55 }
 0x35b   :  { %6416 = vmatpush1.bf16.msra.mxu0 %v12846_v40  ;;  %v2883_v40 = vld [vmem:[%s19635_s4 + $0x770] sm:$0xff] }
 0x35c   :  { %6522 = vmatpush1.bf16.msra.mxu1 %v12848_v56  ;;  %6417 = vmatprep.subr.bf16.mxu0 %v12855_v33  ;;  %v2880_v56 = vld [vmem:[%s19635_s4 + $0x758] sm:$0xff]  ;;  %v12919_v17 = vcombine.high %v2879_v7, %v2883_v40 }
 0x35d   :  { %6523 = vmatprep.subr.bf16.mxu1 %v12857_v43  ;;  %v2884_v33 = vld [vmem:[%s19635_s4 + $0x778] sm:$0xff]  ;;  %v12910_v43 = vcombine.low %v2871_v16, %v2875_v5 }
 0x35e   :  { %v12921_v42 = vcombine.high %v2880_v56, %v2884_v33  ;;  %v12920_v39 = vcombine.low %v2880_v56, %v2884_v33  ;;  %v12978_v33 = vld [vmem:[%s19635_s4 + $0x1140] sm:$0xff] }
 0x35f   :  { %6418 = vmatpush1.bf16.msra.mxu0 %v12854_v3  ;;  %v2891_v3 = vld [vmem:[%s19635_s4 + $0x7b0] sm:$0xff] }
 0x360   :  { %6524 = vmatpush1.bf16.msra.mxu1 %v12856_v54  ;;  %6419 = vmatprep.subr.bf16.mxu0 %v12863_v8  ;;  %v2888_v54 = vld [vmem:[%s19635_s4 + $0x798] sm:$0xff]  ;;  %v12927_v15 = vcombine.high %v2887_v59, %v2891_v3 }
 0x361   :  { %6525 = vmatprep.subr.bf16.mxu1 %v12865_v52  ;;  %v2892_v8 = vld [vmem:[%s19635_s4 + $0x7b8] sm:$0xff]  ;;  %v12918_v52 = vcombine.low %v2879_v7, %v2883_v40 }
 0x362   :  { %v12929_v58 = vcombine.high %v2888_v54, %v2892_v8  ;;  %v12928_v28 = vcombine.low %v2888_v54, %v2892_v8  ;;  %v12986_v8 = vld [vmem:[%s19635_s4 + $0x1180] sm:$0xff] }
 0x363   :  { %6420 = vmatpush1.bf16.msra.mxu0 %v12862_v0  ;;  %v2899_v0 = vld [vmem:[%s19635_s4 + $0x7f0] sm:$0xff] }
 0x364   :  { %6526 = vmatpush1.bf16.msra.mxu1 %v12864_v12  ;;  %6421 = vmatprep.subr.bf16.mxu0 %v12871_v57  ;;  %v2896_v12 = vld [vmem:[%s19635_s4 + $0x7d8] sm:$0xff]  ;;  %v12935_v34 = vcombine.high %v2895_v21, %v2899_v0 }
 0x365   :  { %6527 = vmatprep.subr.bf16.mxu1 %v12873_v62  ;;  %v2900_v57 = vld [vmem:[%s19635_s4 + $0x7f8] sm:$0xff]  ;;  %v12926_v62 = vcombine.low %v2887_v59, %v2891_v3 }
 0x366   :  { %v12937_v32 = vcombine.high %v2896_v12, %v2900_v57  ;;  %v12936_v48 = vcombine.low %v2896_v12, %v2900_v57  ;;  %v12994_v57 = vld [vmem:[%s19635_s4 + $0x11c0] sm:$0xff] }
 0x367   :  { %6422 = vmatpush1.bf16.msra.mxu0 %v12870_v45  ;;  %v12942_v45 = vld [vmem:[%s19635_s4 + $0x1020] sm:$0xff] }
 0x368   :  { %6528 = vmatpush1.bf16.msra.mxu1 %v12872_v29  ;;  %6423 = vmatprep.subr.bf16.mxu0 %v12879_v19  ;;  %v12939_v29 = vld [vmem:[%s19635_s4 + $0x1008] sm:$0xff]  ;;  %v13195_v2 = vcombine.high %v12938_v11, %v12942_v45 }
 0x369   :  { %6529 = vmatprep.subr.bf16.mxu1 %v12881_v38  ;;  %v12943_v19 = vld [vmem:[%s19635_s4 + $0x1028] sm:$0xff]  ;;  %v12934_v38 = vcombine.low %v2895_v21, %v2899_v0 }
 0x36a   :  { %v13197_v27 = vcombine.high %v12939_v29, %v12943_v19  ;;  %v13196_v9 = vcombine.low %v12939_v29, %v12943_v19  ;;  %v13002_v19 = vld [vmem:[%s19635_s4 + $0x1200] sm:$0xff] }
 0x36b   :  { %6424 = vmatpush1.bf16.msra.mxu0 %v12878_v47  ;;  %v12950_v47 = vld [vmem:[%s19635_s4 + $0x1060] sm:$0xff] }
 0x36c   :  { %6530 = vmatpush1.bf16.msra.mxu1 %v12880_v10  ;;  %6425 = vmatprep.subr.bf16.mxu0 %v12887_v13  ;;  %v12947_v10 = vld [vmem:[%s19635_s4 + $0x1048] sm:$0xff]  ;;  %v13203_v4 = vcombine.high %v12946_v22, %v12950_v47 }
 0x36d   :  { %6531 = vmatprep.subr.bf16.mxu1 %v12889_v36  ;;  %v12951_v13 = vld [vmem:[%s19635_s4 + $0x1068] sm:$0xff]  ;;  %v13194_v36 = vcombine.low %v12938_v11, %v12942_v45 }
 0x36e   :  { %v13205_v44 = vcombine.high %v12947_v10, %v12951_v13  ;;  %v13204_v53 = vcombine.low %v12947_v10, %v12951_v13  ;;  %v13010_v13 = vld [vmem:[%s19635_s4 + $0x1240] sm:$0xff] }
 0x36f   :  { %6426 = vmatpush1.bf16.msra.mxu0 %v12886_v25  ;;  %v12958_v25 = vld [vmem:[%s19635_s4 + $0x10a0] sm:$0xff] }
 0x370   :  { %6532 = vmatpush1.bf16.msra.mxu1 %v12888_v35  ;;  %6427 = vmatprep.subr.bf16.mxu0 %v12895_v61  ;;  %v12955_v35 = vld [vmem:[%s19635_s4 + $0x1088] sm:$0xff]  ;;  %v13211_v31 = vcombine.high %v12954_v46, %v12958_v25 }
 0x371   :  { %6533 = vmatprep.subr.bf16.mxu1 %v12897_v14  ;;  %v12959_v61 = vld [vmem:[%s19635_s4 + $0x10a8] sm:$0xff]  ;;  %v13202_v14 = vcombine.low %v12946_v22, %v12950_v47 }
 0x372   :  { %v13212_v16 = vcombine.low %v12955_v35, %v12959_v61 }
 0x373   :  { %6428 = vmatpush1.bf16.msra.mxu0 %v12894_v60  ;;  %v12966_v60 = vld [vmem:[%s19635_s4 + $0x10e0] sm:$0xff] }
 0x374   :  { %6534 = vmatpush1.bf16.msra.mxu1 %v12896_v23  ;;  %6429 = vmatprep.subr.bf16.mxu0 %v12903_v30  ;;  %v12967_v23 = vld [vmem:[%s19635_s4 + $0x10e8] sm:$0xff]  ;;  %v13210_v30 = vcombine.low %v12954_v46, %v12958_v25  ;;  %v13219_v18 = vcombine.high %v12962_v6, %v12966_v60  ;;  %v13218_v7 = vcombine.low %v12962_v6, %v12966_v60 }
 0x375   :  { %6535 = vmatprep.subr.bf16.mxu1 %v12905_v63  ;;  %v2622_v63 = vld [vmem:[#allocation3 + $0x88] sm:$0xff] }
 0x376   :  { %v17807_v5 = vpack.c.bf16 %v2626_v50, %v2622_v63  ;;  %v13031_v63 = vld [vmem:[%s19635_s4 + $0x12e8] sm:$0xff] }
 0x377   :  { %6430 = vmatpush1.bf16.msra.mxu0 %v12902_v26  ;;  %v12970_v26 = vld [vmem:[%s19635_s4 + $0x1100] sm:$0xff] }
 0x378   :  { %6536 = vmatpush1.bf16.msra.mxu1 %v12904_v24  ;;  %6431 = vmatprep.subr.bf16.mxu0 %v12911_v41  ;;  %v12974_v24 = vld [vmem:[%s19635_s4 + $0x1120] sm:$0xff]  ;;  %v12971_v41 = vld [vmem:[%s19635_s4 + $0x1108] sm:$0xff] }
 0x379   :  { %6537 = vmatprep.subr.bf16.mxu1 %v12913_v1  ;;  %v12975_v1 = vld [vmem:[%s19635_s4 + $0x1128] sm:$0xff]  ;;  %v13227_v56 = vcombine.high %v12970_v26, %v12974_v24 }
 0x37a   :  { %v13228_v59 = vcombine.low %v12971_v41, %v12975_v1 }
 0x37b   :  { %6432 = vmatpush1.bf16.msra.mxu0 %v12910_v43  ;;  %v12982_v43 = vld [vmem:[%s19635_s4 + $0x1160] sm:$0xff] }
 0x37c   :  { %6538 = vmatpush1.bf16.msra.mxu1 %v12912_v37  ;;  %6433 = vmatprep.subr.bf16.mxu0 %v12919_v17  ;;  %v12979_v37 = vld [vmem:[%s19635_s4 + $0x1148] sm:$0xff]  ;;  %v13235_v3 = vcombine.high %v12978_v33, %v12982_v43 }
 0x37d   :  { %6539 = vmatprep.subr.bf16.mxu1 %v12921_v42  ;;  %v12983_v17 = vld [vmem:[%s19635_s4 + $0x1168] sm:$0xff]  ;;  %v13226_v42 = vcombine.low %v12970_v26, %v12974_v24  ;;  %v13034_v24 = vld [vmem:[%s19635_s4 + $0x1300] sm:$0xff] }
 0x37e   :  { %v13237_v54 = vcombine.high %v12979_v37, %v12983_v17  ;;  %v13236_v21 = vcombine.low %v12979_v37, %v12983_v17  ;;  %v13046_v37 = vld [vmem:[%s19635_s4 + $0x1360] sm:$0xff]  ;;  %v13043_v17 = vld [vmem:[%s19635_s4 + $0x1348] sm:$0xff] }
 0x37f   :  { %6434 = vmatpush1.bf16.msra.mxu0 %v12918_v52  ;;  %v12990_v52 = vld [vmem:[%s19635_s4 + $0x11a0] sm:$0xff] }
 0x380   :  { %6540 = vmatpush1.bf16.msra.mxu1 %v12920_v39  ;;  %6435 = vmatprep.subr.bf16.mxu0 %v12927_v15  ;;  %v12987_v39 = vld [vmem:[%s19635_s4 + $0x1188] sm:$0xff]  ;;  %v13243_v0 = vcombine.high %v12986_v8, %v12990_v52 }
 0x381   :  { %6541 = vmatprep.subr.bf16.mxu1 %v12929_v58  ;;  %v12991_v15 = vld [vmem:[%s19635_s4 + $0x11a8] sm:$0xff]  ;;  %v13234_v58 = vcombine.low %v12978_v33, %v12982_v43  ;;  %v13042_v43 = vld [vmem:[%s19635_s4 + $0x1340] sm:$0xff] }
 0x382   :  { %v13245_v12 = vcombine.high %v12987_v39, %v12991_v15  ;;  %v13244_v11 = vcombine.low %v12987_v39, %v12991_v15  ;;  %v13054_v39 = vld [vmem:[%s19635_s4 + $0x13a0] sm:$0xff]  ;;  %v13051_v15 = vld [vmem:[%s19635_s4 + $0x1388] sm:$0xff] }
 0x383   :  { %6436 = vmatpush1.bf16.msra.mxu0 %v12926_v62  ;;  %v12998_v62 = vld [vmem:[%s19635_s4 + $0x11e0] sm:$0xff] }
 0x384   :  { %6542 = vmatpush1.bf16.msra.mxu1 %v12928_v28  ;;  %6437 = vmatprep.subr.bf16.mxu0 %v12935_v34  ;;  %v12995_v28 = vld [vmem:[%s19635_s4 + $0x11c8] sm:$0xff]  ;;  %v13251_v45 = vcombine.high %v12994_v57, %v12998_v62 }
 0x385   :  { %6543 = vmatprep.subr.bf16.mxu1 %v12937_v32  ;;  %v12999_v34 = vld [vmem:[%s19635_s4 + $0x11e8] sm:$0xff]  ;;  %v13242_v32 = vcombine.low %v12986_v8, %v12990_v52  ;;  %v13050_v52 = vld [vmem:[%s19635_s4 + $0x1380] sm:$0xff] }
 0x386   :  { %v13253_v29 = vcombine.high %v12995_v28, %v12999_v34  ;;  %v13252_v22 = vcombine.low %v12995_v28, %v12999_v34  ;;  %v13062_v28 = vld [vmem:[%s19635_s4 + $0x13e0] sm:$0xff]  ;;  %v13059_v34 = vld [vmem:[%s19635_s4 + $0x13c8] sm:$0xff] }
 0x387   :  { %6438 = vmatpush1.bf16.msra.mxu0 %v12934_v38  ;;  %v13006_v38 = vld [vmem:[%s19635_s4 + $0x1220] sm:$0xff] }
 0x388   :  { %6544 = vmatpush1.bf16.msra.mxu1 %v12936_v48  ;;  %8103 = vmatprep.subr.bf16.mxu0 %v13195_v2  ;;  %v13003_v48 = vld [vmem:[%s19635_s4 + $0x1208] sm:$0xff]  ;;  %v13259_v47 = vcombine.high %v13002_v19, %v13006_v38 }
 0x389   :  { %8209 = vmatprep.subr.bf16.mxu1 %v13197_v27  ;;  %v13007_v2 = vld [vmem:[%s19635_s4 + $0x1228] sm:$0xff]  ;;  %v13250_v27 = vcombine.low %v12994_v57, %v12998_v62  ;;  %v13058_v62 = vld [vmem:[%s19635_s4 + $0x13c0] sm:$0xff] }
 0x38a   :  { %6440 = vmatmul.mubr.bf16.vlgmr.msra.gmra.mrb[40].mxu0 %v17373_v51  ;;  %v13261_v10 = vcombine.high %v13003_v48, %v13007_v2  ;;  %v13260_v46 = vcombine.low %v13003_v48, %v13007_v2  ;;  %v13070_v48 = vld [vmem:[%s19635_s4 + $0x1420] sm:$0xff]  ;;  %v13067_v2 = vld [vmem:[%s19635_s4 + $0x1408] sm:$0xff] }
 0x38b   :  { %6546 = vmatmul.mubr.bf16.vlgmr.msra.gmra.mrb[40].mxu1 %v17373_v51  ;;  %6449 = vmatprep.mubr.bf16.mxu0 %v17375_v20  ;;  %v13213_v51 = vcombine.high %v12955_v35, %v12959_v61  ;;  %v13018_v61 = vld [vmem:[%s19635_s4 + $0x1280] sm:$0xff] }
 0x38c   :  { %6555 = vmatprep.mubr.bf16.mxu1 %v17375_v20  ;;  %8104 = vmatpush1.bf16.msra.mxu0 %v13194_v36  ;;  %v12963_v20 = vld [vmem:[%s19635_s4 + $0x10c8] sm:$0xff]  ;;  %v13014_v36 = vld [vmem:[%s19635_s4 + $0x1260] sm:$0xff] }
 0x38d   :  { %8210 = vmatpush1.bf16.msra.mxu1 %v13196_v9  ;;  %8105 = vmatprep.subr.bf16.mxu0 %v13203_v4  ;;  %v13221_v55 = vcombine.high %v12963_v20, %v12967_v23  ;;  %v13220_v40 = vcombine.low %v12963_v20, %v12967_v23  ;;  %v13011_v9 = vld [vmem:[%s19635_s4 + $0x1248] sm:$0xff]  ;;  %v13267_v25 = vcombine.high %v13010_v13, %v13014_v36  ;;  %v13026_v20 = vld [vmem:[%s19635_s4 + $0x12c0] sm:$0xff] }
 0x38e   :  { %8211 = vmatprep.subr.bf16.mxu1 %v13205_v44  ;;  %v13015_v4 = vld [vmem:[%s19635_s4 + $0x1268] sm:$0xff]  ;;  %v13258_v44 = vcombine.low %v13002_v19, %v13006_v38  ;;  %v13030_v23 = vld [vmem:[%s19635_s4 + $0x12e0] sm:$0xff] }
 0x38f   :  { %v13269_v35 = vcombine.high %v13011_v9, %v13015_v4  ;;  %v13268_v50 = vcombine.low %v13011_v9, %v13015_v4  ;;  %v13066_v38 = vld [vmem:[%s19635_s4 + $0x1400] sm:$0xff]  ;;  %v2634_v9 = vld [vmem:[#allocation3 + $0xe8] sm:$0xff] }
 0x390   :  { %8106 = vmatpush1.bf16.msra.mxu0 %v13202_v14  ;;  %v13022_v14 = vld [vmem:[%s19635_s4 + $0x12a0] sm:$0xff] }
 0x391   :  { %8212 = vmatpush1.bf16.msra.mxu1 %v13204_v53  ;;  %8107 = vmatprep.subr.bf16.mxu0 %v13211_v31  ;;  %v13019_v53 = vld [vmem:[%s19635_s4 + $0x1288] sm:$0xff]  ;;  %v13275_v6 = vcombine.high %v13018_v61, %v13022_v14  ;;  %v13074_v4 = vld [vmem:[%s19635_s4 + $0x1440] sm:$0xff] }
 0x392   :  { %6450 = vmatmul.mubr.bf16.gmra.mrb[44].mxu0 %v17405_v49  ;;  %8213 = vmatprep.subr.bf16.mxu1 %v13213_v51  ;;  %v13023_v31 = vld [vmem:[%s19635_s4 + $0x12a8] sm:$0xff]  ;;  %v13266_v51 = vcombine.low %v13010_v13, %v13014_v36  ;;  %v2625_v13 = vld [vmem:[#allocation3 + $0xa0] sm:$0xff] }
 0x393   :  { %6556 = vmatmul.mubr.bf16.gmra.mrb[44].mxu1 %v17405_v49  ;;  %8135 = vmatprep.mubr.bf16.mxu0 %v17807_v5  ;;  %v13229_v49 = vcombine.high %v12971_v41, %v12975_v1  ;;  %v13277_v60 = vcombine.high %v13019_v53, %v13023_v31  ;;  %v13038_v41 = vld [vmem:[%s19635_s4 + $0x1320] sm:$0xff]  ;;  %v13035_v1 = vld [vmem:[%s19635_s4 + $0x1308] sm:$0xff] }
 0x394   :  { %8108 = vmatpush1.bf16.msra.mxu0 %v13210_v30  ;;  %8241 = vmatprep.mubr.bf16.mxu1 %v17807_v5  ;;  %v13027_v30 = vld [vmem:[%s19635_s4 + $0x12c8] sm:$0xff] }
 0x395   :  { %8214 = vmatpush1.bf16.msra.mxu1 %v13212_v16  ;;  %8109 = vmatprep.subr.bf16.mxu0 %v13219_v18  ;;  %v13274_v16 = vcombine.low %v13018_v61, %v13022_v14  ;;  %v13276_v18 = vcombine.low %v13019_v53, %v13023_v31  ;;  %v13285_v26 = vcombine.high %v13027_v30, %v13031_v63  ;;  %v2630_v53 = vld [vmem:[#allocation3 + $0xc8] sm:$0xff] }
 0x396   :  { %8215 = vmatprep.subr.bf16.mxu1 %v13221_v55  ;;  %v13283_v55 = vcombine.high %v13026_v20, %v13030_v23  ;;  %v13322_v14 = vcombine.low %v13066_v38, %v13070_v48 }
 0x398   :  { %8110 = vmatpush1.bf16.msra.mxu0 %v13218_v7  ;;  %v13039_v7 = vld [vmem:[%s19635_s4 + $0x1328] sm:$0xff] }
 0x399   :  { %8216 = vmatpush1.bf16.msra.mxu1 %v13220_v40  ;;  %8111 = vmatprep.subr.bf16.mxu0 %v13227_v56  ;;  %v13282_v40 = vcombine.low %v13026_v20, %v13030_v23  ;;  %v13284_v56 = vcombine.low %v13027_v30, %v13031_v63  ;;  %v13293_v33 = vcombine.high %v13035_v1, %v13039_v7  ;;  %v13086_v20 = vld [vmem:[%s19635_s4 + $0x14a0] sm:$0xff]  ;;  %v13083_v23 = vld [vmem:[%s19635_s4 + $0x1488] sm:$0xff] }
 0x39a   :  { %8217 = vmatprep.subr.bf16.mxu1 %v13229_v49  ;;  %v13291_v49 = vcombine.high %v13034_v24, %v13038_v41  ;;  %v13087_v30 = vld [vmem:[%s19635_s4 + $0x14a8] sm:$0xff] }
 0x39c   :  { %8112 = vmatpush1.bf16.msra.mxu0 %v13226_v42  ;;  %v13047_v42 = vld [vmem:[%s19635_s4 + $0x1368] sm:$0xff] }
 0x39d   :  { %8218 = vmatpush1.bf16.msra.mxu1 %v13228_v59  ;;  %8113 = vmatprep.subr.bf16.mxu0 %v13235_v3  ;;  %v13290_v59 = vcombine.low %v13034_v24, %v13038_v41  ;;  %v13292_v3 = vcombine.low %v13035_v1, %v13039_v7  ;;  %v13301_v8 = vcombine.high %v13043_v17, %v13047_v42  ;;  %v2628_v24 = vld [vmem:[#allocation3 + $0xb8] sm:$0xff]  ;;  %v13090_v41 = vld [vmem:[%s19635_s4 + $0x14c0] sm:$0xff] }
 0x39e   :  { %8219 = vmatprep.subr.bf16.mxu1 %v13237_v54  ;;  %v13299_v54 = vcombine.high %v13042_v43, %v13046_v37  ;;  %v13094_v1 = vld [vmem:[%s19635_s4 + $0x14e0] sm:$0xff] }
 0x39f   :  { %v2629_v7 = vld [vmem:[#allocation3 + $0xc0] sm:$0xff] }
 0x3a0   :  { %8114 = vmatpush1.bf16.msra.mxu0 %v13234_v58  ;;  %v13055_v58 = vld [vmem:[%s19635_s4 + $0x13a8] sm:$0xff] }
 0x3a1   :  { %8220 = vmatpush1.bf16.msra.mxu1 %v13236_v21  ;;  %8115 = vmatprep.subr.bf16.mxu0 %v13243_v0  ;;  %v13298_v21 = vcombine.low %v13042_v43, %v13046_v37  ;;  %v13300_v0 = vcombine.low %v13043_v17, %v13047_v42  ;;  %v13309_v57 = vcombine.high %v13051_v15, %v13055_v58  ;;  %v2624_v43 = vld [vmem:[#allocation3 + $0x98] sm:$0xff] }
 0x3a2   :  { %8221 = vmatprep.subr.bf16.mxu1 %v13245_v12  ;;  %v13307_v12 = vcombine.high %v13050_v52, %v13054_v39  ;;  %v13340_v37 = vcombine.low %v13083_v23, %v13087_v30  ;;  %v18015_v17 = vpack.c.bf16 %v2628_v24, %v2624_v43  ;;  %v13347_v42 = vcombine.high %v13090_v41, %v13094_v1  ;;  %v13146_v24 = vld [vmem:[%s19635_s4 + $0x1680] sm:$0xff] }
 0x3a4   :  { %8116 = vmatpush1.bf16.msra.mxu0 %v13242_v32  ;;  %v13063_v32 = vld [vmem:[%s19635_s4 + $0x13e8] sm:$0xff] }
 0x3a5   :  { %8222 = vmatpush1.bf16.msra.mxu1 %v13244_v11  ;;  %8117 = vmatprep.subr.bf16.mxu0 %v13251_v45  ;;  %v13306_v11 = vcombine.low %v13050_v52, %v13054_v39  ;;  %v13308_v45 = vcombine.low %v13051_v15, %v13055_v58  ;;  %v13317_v19 = vcombine.high %v13059_v34, %v13063_v32  ;;  %v13103_v52 = vld [vmem:[%s19635_s4 + $0x1528] sm:$0xff] }
 0x3a6   :  { %8223 = vmatprep.subr.bf16.mxu1 %v13253_v29  ;;  %v13315_v29 = vcombine.high %v13058_v62, %v13062_v28  ;;  %v13346_v39 = vcombine.low %v13090_v41, %v13094_v1  ;;  %v13150_v41 = vld [vmem:[%s19635_s4 + $0x16a0] sm:$0xff]  ;;  %v13147_v1 = vld [vmem:[%s19635_s4 + $0x1688] sm:$0xff] }
 0x3a8   :  { %8118 = vmatpush1.bf16.msra.mxu0 %v13250_v27  ;;  %v13071_v27 = vld [vmem:[%s19635_s4 + $0x1428] sm:$0xff] }
 0x3a9   :  { %8224 = vmatpush1.bf16.msra.mxu1 %v13252_v22  ;;  %8119 = vmatprep.subr.bf16.mxu0 %v13259_v47  ;;  %v13314_v22 = vcombine.low %v13058_v62, %v13062_v28  ;;  %v13316_v47 = vcombine.low %v13059_v34, %v13063_v32  ;;  %v13325_v36 = vcombine.high %v13067_v2, %v13071_v27  ;;  %v13111_v62 = vld [vmem:[%s19635_s4 + $0x1568] sm:$0xff] }
 0x3aa   :  { %8225 = vmatprep.subr.bf16.mxu1 %v13261_v10  ;;  %v13323_v10 = vcombine.high %v13066_v38, %v13070_v48  ;;  %v13324_v31 = vcombine.low %v13067_v2, %v13071_v27  ;;  %v13119_v38 = vld [vmem:[%s19635_s4 + $0x15a8] sm:$0xff] }
 0x3ac   :  { %8120 = vmatpush1.bf16.msra.mxu0 %v13258_v44  ;;  %v13078_v44 = vld [vmem:[%s19635_s4 + $0x1460] sm:$0xff] }
 0x3ad   :  { %8226 = vmatpush1.bf16.msra.mxu1 %v13260_v46  ;;  %8121 = vmatprep.subr.bf16.mxu0 %v13267_v25  ;;  %v2621_v46 = vld [vmem:[#allocation3 + $0x80] sm:$0xff]  ;;  %v13075_v25 = vld [vmem:[%s19635_s4 + $0x1448] sm:$0xff]  ;;  %v13330_v63 = vcombine.low %v13074_v4, %v13078_v44 }
 0x3ae   :  { %8227 = vmatprep.subr.bf16.mxu1 %v13269_v35  ;;  %v13079_v35 = vld [vmem:[%s19635_s4 + $0x1468] sm:$0xff]  ;;  %v17981_v61 = vpack.c.bf16 %v2625_v13, %v2621_v46 }
 0x3af   :  { %v13123_v13 = vld [vmem:[%s19635_s4 + $0x15c8] sm:$0xff] }
 0x3b0   :  { %8122 = vmatpush1.bf16.msra.mxu0 %v13266_v51  ;;  %v17983_v51 = vpack.c.bf16 %v2634_v9, %v2630_v53  ;;  %v13135_v53 = vld [vmem:[%s19635_s4 + $0x1628] sm:$0xff] }
 0x3b1   :  { %8228 = vmatpush1.bf16.msra.mxu1 %v13268_v50  ;;  %8123 = vmatprep.subr.bf16.mxu0 %v13275_v6  ;;  %v13331_v50 = vcombine.high %v13074_v4, %v13078_v44  ;;  %v13333_v6 = vcombine.high %v13075_v25, %v13079_v35 }
 0x3b2   :  { %8229 = vmatprep.subr.bf16.mxu1 %v13277_v60  ;;  %v13082_v60 = vld [vmem:[%s19635_s4 + $0x1480] sm:$0xff] }
 0x3b4   :  { %8124 = vmatpush1.bf16.msra.mxu0 %v13274_v16  ;;  %v13332_v16 = vcombine.low %v13075_v25, %v13079_v35  ;;  %v13130_v25 = vld [vmem:[%s19635_s4 + $0x1600] sm:$0xff] }
 0x3b5   :  { %8230 = vmatpush1.bf16.msra.mxu1 %v13276_v18  ;;  %8125 = vmatprep.subr.bf16.mxu0 %v13283_v55  ;;  %v2633_v18 = vld [vmem:[#allocation3 + $0xe0] sm:$0xff]  ;;  %v13339_v55 = vcombine.high %v13082_v60, %v13086_v20 }
 0x3b6   :  { %8231 = vmatprep.subr.bf16.mxu1 %v13285_v26  ;;  %v13341_v26 = vcombine.high %v13083_v23, %v13087_v30  ;;  %v13134_v35 = vld [vmem:[%s19635_s4 + $0x1620] sm:$0xff]  ;;  %v13139_v30 = vld [vmem:[%s19635_s4 + $0x1648] sm:$0xff] }
 0x3b7   :  { %v13142_v23 = vld [vmem:[%s19635_s4 + $0x1660] sm:$0xff] }
 0x3b8   :  { %8126 = vmatpush1.bf16.msra.mxu0 %v13282_v40  ;;  %v13091_v40 = vld [vmem:[%s19635_s4 + $0x14c8] sm:$0xff] }
 0x3b9   :  { %8232 = vmatpush1.bf16.msra.mxu1 %v13284_v56  ;;  %8127 = vmatprep.subr.bf16.mxu0 %v13291_v49  ;;  %v13095_v56 = vld [vmem:[%s19635_s4 + $0x14e8] sm:$0xff]  ;;  %v18013_v49 = vpack.c.bf16 %v2633_v18, %v2629_v7 }
 0x3ba   :  { %8233 = vmatprep.subr.bf16.mxu1 %v13293_v33  ;;  %v13338_v33 = vcombine.low %v13082_v60, %v13086_v20  ;;  %v13348_v15 = vcombine.low %v13091_v40, %v13095_v56  ;;  %v13138_v20 = vld [vmem:[%s19635_s4 + $0x1640] sm:$0xff]  ;;  %v13151_v7 = vld [vmem:[%s19635_s4 + $0x16a8] sm:$0xff] }
 0x3bb   :  { %v13405_v43 = vcombine.high %v13147_v1, %v13151_v7 }
 0x3bc   :  { %8128 = vmatpush1.bf16.msra.mxu0 %v13290_v59  ;;  %v13349_v59 = vcombine.high %v13091_v40, %v13095_v56  ;;  %v13394_v40 = vcombine.low %v13138_v20, %v13142_v23 }
 0x3bd   :  { %8234 = vmatpush1.bf16.msra.mxu1 %v13292_v3  ;;  %8129 = vmatprep.subr.bf16.mxu0 %v13299_v54  ;;  %v13098_v3 = vld [vmem:[%s19635_s4 + $0x1500] sm:$0xff] }
 0x3be   :  { %8235 = vmatprep.subr.bf16.mxu1 %v13301_v8  ;;  %v13102_v54 = vld [vmem:[%s19635_s4 + $0x1520] sm:$0xff]  ;;  %v13099_v8 = vld [vmem:[%s19635_s4 + $0x1508] sm:$0xff] }
 0x3bf   :  { %v13355_v58 = vcombine.high %v13098_v3, %v13102_v54  ;;  %v13354_v28 = vcombine.low %v13098_v3, %v13102_v54  ;;  %v13356_v34 = vcombine.low %v13099_v8, %v13103_v52  ;;  %v13159_v3 = vld [vmem:[%s19635_s4 + $0x16e8] sm:$0xff]  ;;  %v13402_v54 = vcombine.low %v13146_v24, %v13150_v41 }
 0x3c0   :  { %8130 = vmatpush1.bf16.msra.mxu0 %v13298_v21  ;;  %v13357_v21 = vcombine.high %v13099_v8, %v13103_v52  ;;  %v13404_v8 = vcombine.low %v13147_v1, %v13151_v7  ;;  %v12949_v1 = vld [vmem:[%s19635_s4 + $0x1058] sm:$0xff] }
 0x3c1   :  { %8236 = vmatpush1.bf16.msra.mxu1 %v13300_v0  ;;  %8131 = vmatprep.subr.bf16.mxu0 %v13307_v12  ;;  %v13106_v0 = vld [vmem:[%s19635_s4 + $0x1540] sm:$0xff]  ;;  %v12953_v7 = vld [vmem:[%s19635_s4 + $0x1078] sm:$0xff] }
 0x3c2   :  { %8237 = vmatprep.subr.bf16.mxu1 %v13309_v57  ;;  %v13110_v12 = vld [vmem:[%s19635_s4 + $0x1560] sm:$0xff]  ;;  %v13107_v57 = vld [vmem:[%s19635_s4 + $0x1548] sm:$0xff] }
 0x3c3   :  { %v13363_v32 = vcombine.high %v13106_v0, %v13110_v12  ;;  %v13362_v48 = vcombine.low %v13106_v0, %v13110_v12  ;;  %v13364_v2 = vcombine.low %v13107_v57, %v13111_v62  ;;  %v13167_v0 = vld [vmem:[%s19635_s4 + $0x1728] sm:$0xff] }
 0x3c4   :  { %8132 = vmatpush1.bf16.msra.mxu0 %v13306_v11  ;;  %v13365_v11 = vcombine.high %v13107_v57, %v13111_v62 }
 0x3c5   :  { %8238 = vmatpush1.bf16.msra.mxu1 %v13308_v45  ;;  %8133 = vmatprep.subr.bf16.mxu0 %v13315_v29  ;;  %v13114_v45 = vld [vmem:[%s19635_s4 + $0x1580] sm:$0xff] }
 0x3c6   :  { %8239 = vmatprep.subr.bf16.mxu1 %v13317_v19  ;;  %v13118_v29 = vld [vmem:[%s19635_s4 + $0x15a0] sm:$0xff]  ;;  %v13115_v19 = vld [vmem:[%s19635_s4 + $0x1588] sm:$0xff] }
 0x3c7   :  { %v13371_v27 = vcombine.high %v13114_v45, %v13118_v29  ;;  %v13370_v9 = vcombine.low %v13114_v45, %v13118_v29  ;;  %v13372_v4 = vcombine.low %v13115_v19, %v13119_v38  ;;  %v13175_v45 = vld [vmem:[%s19635_s4 + $0x1768] sm:$0xff] }
 0x3c8   :  { %8134 = vmatpush1.bf16.msra.mxu0 %v13314_v22  ;;  %v13373_v22 = vcombine.high %v13115_v19, %v13119_v38 }
 0x3c9   :  { %8240 = vmatpush1.bf16.msra.mxu1 %v13316_v47  ;;  %8156 = vmatprep.subr.bf16.mxu0 %v13323_v10  ;;  %v13122_v47 = vld [vmem:[%s19635_s4 + $0x15c0] sm:$0xff] }
 0x3ca   :  { %8262 = vmatprep.subr.bf16.mxu1 %v13325_v36  ;;  %v13126_v10 = vld [vmem:[%s19635_s4 + $0x15e0] sm:$0xff]  ;;  %v13127_v36 = vld [vmem:[%s19635_s4 + $0x15e8] sm:$0xff] }
 0x3cb   :  { %8136 = vmatmul.mubr.bf16.vlgmr.msra.gmra.mrb[32].mxu0 %v17981_v61  ;;  %v13379_v44 = vcombine.high %v13122_v47, %v13126_v10  ;;  %v13381_v46 = vcombine.high %v13123_v13, %v13127_v36 }
 0x3cc   :  { %8242 = vmatmul.mubr.bf16.vlgmr.msra.gmra.mrb[32].mxu1 %v17981_v61  ;;  %8145 = vmatprep.mubr.bf16.mxu0 %v17983_v51 }
 0x3cd   :  { %8157 = vmatpush1.bf16.msra.mxu0 %v13322_v14  ;;  %8251 = vmatprep.mubr.bf16.mxu1 %v17983_v51  ;;  %v13131_v14 = vld [vmem:[%s19635_s4 + $0x1608] sm:$0xff] }
 0x3ce   :  { %8263 = vmatpush1.bf16.msra.mxu1 %v13324_v31  ;;  %8158 = vmatprep.subr.bf16.mxu0 %v13331_v50  ;;  %v13378_v31 = vcombine.low %v13122_v47, %v13126_v10  ;;  %v13380_v50 = vcombine.low %v13123_v13, %v13127_v36  ;;  %v13389_v60 = vcombine.high %v13131_v14, %v13135_v53  ;;  %v13183_v47 = vld [vmem:[%s19635_s4 + $0x17a8] sm:$0xff] }
 0x3cf   :  { %8264 = vmatprep.subr.bf16.mxu1 %v13333_v6  ;;  %v13387_v6 = vcombine.high %v13130_v25, %v13134_v35  ;;  %v13388_v18 = vcombine.low %v13131_v14, %v13135_v53 }
 0x3d1   :  { %8159 = vmatpush1.bf16.msra.mxu0 %v13330_v63  ;;  %v13143_v63 = vld [vmem:[%s19635_s4 + $0x1668] sm:$0xff] }
 0x3d2   :  { %8265 = vmatpush1.bf16.msra.mxu1 %v13332_v16  ;;  %8160 = vmatprep.subr.bf16.mxu0 %v13339_v55  ;;  %v13386_v16 = vcombine.low %v13130_v25, %v13134_v35  ;;  %v13395_v55 = vcombine.high %v13138_v20, %v13142_v23  ;;  %v13396_v56 = vcombine.low %v13139_v30, %v13143_v63  ;;  %v13191_v25 = vld [vmem:[%s19635_s4 + $0x17e8] sm:$0xff]  ;;  %v12945_v20 = vld [vmem:[%s19635_s4 + $0x1038] sm:$0xff] }
 0x3d3   :  { %8146 = vmatmul.mubr.bf16.gmra.mrb[36].mxu0 %v18013_v49  ;;  %8266 = vmatprep.subr.bf16.mxu1 %v13341_v26  ;;  %v13397_v26 = vcombine.high %v13139_v30, %v13143_v63 }
 0x3d4   :  { %8252 = vmatmul.mubr.bf16.gmra.mrb[36].mxu1 %v18013_v49  ;;  %8188 = vmatprep.mubr.bf16.mxu0 %v18015_v17 }
 0x3d5   :  { %8161 = vmatpush1.bf16.msra.mxu0 %v13338_v33  ;;  %8294 = vmatprep.mubr.bf16.mxu1 %v18015_v17  ;;  %v13403_v33 = vcombine.high %v13146_v24, %v13150_v41  ;;  %v12952_v24 = vld [vmem:[%s19635_s4 + $0x1070] sm:$0xff] }
 0x3d6   :  { %8267 = vmatpush1.bf16.msra.mxu1 %v13340_v37  ;;  %8162 = vmatprep.subr.bf16.mxu0 %v13347_v42  ;;  %v13154_v37 = vld [vmem:[%s19635_s4 + $0x16c0] sm:$0xff]  ;;  %v2623_v41 = vld [vmem:[#allocation3 + $0x90] sm:$0xff] }
 0x3d7   :  { %8268 = vmatprep.subr.bf16.mxu1 %v13349_v59  ;;  %v13158_v42 = vld [vmem:[%s19635_s4 + $0x16e0] sm:$0xff]  ;;  %v13155_v59 = vld [vmem:[%s19635_s4 + $0x16c8] sm:$0xff] }
 0x3d8   :  { %v13411_v52 = vcombine.high %v13154_v37, %v13158_v42  ;;  %v13410_v12 = vcombine.low %v13154_v37, %v13158_v42  ;;  %v13412_v57 = vcombine.low %v13155_v59, %v13159_v3 }
 0x3d9   :  { %8163 = vmatpush1.bf16.msra.mxu0 %v13346_v39  ;;  %v13413_v39 = vcombine.high %v13155_v59, %v13159_v3  ;;  %v13209_v59 = vcombine.high %v12949_v1, %v12953_v7  ;;  %v12956_v3 = vld [vmem:[%s19635_s4 + $0x1090] sm:$0xff] }
 0x3da   :  { %8269 = vmatpush1.bf16.msra.mxu1 %v13348_v15  ;;  %8164 = vmatprep.subr.bf16.mxu0 %v13355_v58  ;;  %v13162_v15 = vld [vmem:[%s19635_s4 + $0x1700] sm:$0xff] }
 0x3db   :  { %8270 = vmatprep.subr.bf16.mxu1 %v13357_v21  ;;  %v13166_v58 = vld [vmem:[%s19635_s4 + $0x1720] sm:$0xff]  ;;  %v13163_v21 = vld [vmem:[%s19635_s4 + $0x1708] sm:$0xff] }
 0x3dc   :  { %v13419_v62 = vcombine.high %v13162_v15, %v13166_v58  ;;  %v13418_v29 = vcombine.low %v13162_v15, %v13166_v58  ;;  %v13420_v19 = vcombine.low %v13163_v21, %v13167_v0  ;;  %v13208_v15 = vcombine.low %v12949_v1, %v12953_v7  ;;  %v2635_v58 = vld [vmem:[#allocation3 + $0xf0] sm:$0xff] }
 0x3dd   :  { %8165 = vmatpush1.bf16.msra.mxu0 %v13354_v28  ;;  %v13421_v28 = vcombine.high %v13163_v21, %v13167_v0  ;;  %v13004_v1 = vld [vmem:[%s19635_s4 + $0x1210] sm:$0xff] }
 0x3de   :  { %8271 = vmatpush1.bf16.msra.mxu1 %v13356_v34  ;;  %8166 = vmatprep.subr.bf16.mxu0 %v13363_v32  ;;  %v13170_v34 = vld [vmem:[%s19635_s4 + $0x1740] sm:$0xff]  ;;  %v13008_v7 = vld [vmem:[%s19635_s4 + $0x1230] sm:$0xff] }
 0x3df   :  { %8272 = vmatprep.subr.bf16.mxu1 %v13365_v11  ;;  %v13174_v32 = vld [vmem:[%s19635_s4 + $0x1760] sm:$0xff]  ;;  %v13171_v11 = vld [vmem:[%s19635_s4 + $0x1748] sm:$0xff] }
 0x3e0   :  { %v13427_v38 = vcombine.high %v13170_v34, %v13174_v32  ;;  %v13426_v10 = vcombine.low %v13170_v34, %v13174_v32  ;;  %v13428_v13 = vcombine.low %v13171_v11, %v13175_v45  ;;  %v12969_v34 = vld [vmem:[%s19635_s4 + $0x10f8] sm:$0xff] }
 0x3e1   :  { %8167 = vmatpush1.bf16.msra.mxu0 %v13362_v48  ;;  %v13429_v48 = vcombine.high %v13171_v11, %v13175_v45 }
 0x3e2   :  { %8273 = vmatpush1.bf16.msra.mxu1 %v13364_v2  ;;  %8168 = vmatprep.subr.bf16.mxu0 %v13371_v27  ;;  %v13178_v2 = vld [vmem:[%s19635_s4 + $0x1780] sm:$0xff] }
 0x3e3   :  { %8274 = vmatprep.subr.bf16.mxu1 %v13373_v22  ;;  %v13182_v27 = vld [vmem:[%s19635_s4 + $0x17a0] sm:$0xff]  ;;  %v13179_v22 = vld [vmem:[%s19635_s4 + $0x1788] sm:$0xff] }
 0x3e4   :  { %v13435_v36 = vcombine.high %v13178_v2, %v13182_v27  ;;  %v13434_v35 = vcombine.low %v13178_v2, %v13182_v27  ;;  %v13436_v14 = vcombine.low %v13179_v22, %v13183_v47  ;;  %v12973_v2 = vld [vmem:[%s19635_s4 + $0x1118] sm:$0xff] }
 0x3e5   :  { %8169 = vmatpush1.bf16.msra.mxu0 %v13370_v9  ;;  %v13437_v9 = vcombine.high %v13179_v22, %v13183_v47  ;;  %v12977_v27 = vld [vmem:[%s19635_s4 + $0x1138] sm:$0xff] }
 0x3e6   :  { %8275 = vmatpush1.bf16.msra.mxu1 %v13372_v4  ;;  %8170 = vmatprep.subr.bf16.mxu0 %v13379_v44  ;;  %v13186_v4 = vld [vmem:[%s19635_s4 + $0x17c0] sm:$0xff] }
 0x3e7   :  { %8276 = vmatprep.subr.bf16.mxu1 %v13381_v46  ;;  %v13190_v44 = vld [vmem:[%s19635_s4 + $0x17e0] sm:$0xff]  ;;  %v13187_v46 = vld [vmem:[%s19635_s4 + $0x17c8] sm:$0xff] }
 0x3e8   :  { %v13443_v53 = vcombine.high %v13186_v4, %v13190_v44  ;;  %v13442_v23 = vcombine.low %v13186_v4, %v13190_v44  ;;  %v13444_v30 = vcombine.low %v13187_v46, %v13191_v25  ;;  %v12981_v4 = vld [vmem:[%s19635_s4 + $0x1158] sm:$0xff] }
 0x3e9   :  { %8171 = vmatpush1.bf16.msra.mxu0 %v13378_v31  ;;  %v13445_v31 = vcombine.high %v13187_v46, %v13191_v25  ;;  %v13232_v46 = vcombine.low %v12973_v2, %v12977_v27 }
 0x3ea   :  { %8277 = vmatpush1.bf16.msra.mxu1 %v13380_v50  ;;  %8172 = vmatprep.subr.bf16.mxu0 %v13387_v6  ;;  %v12940_v50 = vld [vmem:[%s19635_s4 + $0x1010] sm:$0xff] }
 0x3eb   :  { %8278 = vmatprep.subr.bf16.mxu1 %v13389_v60  ;;  %v12944_v6 = vld [vmem:[%s19635_s4 + $0x1030] sm:$0xff]  ;;  %v12941_v60 = vld [vmem:[%s19635_s4 + $0x1018] sm:$0xff] }
 0x3ec   :  { %v13199_v63 = vcombine.high %v12940_v50, %v12944_v6 }
 0x3ed   :  { %8173 = vmatpush1.bf16.msra.mxu0 %v13386_v16  ;;  %v2627_v16 = vld [vmem:[#allocation3 + $0xb0] sm:$0xff] }
 0x3ee   :  { %8279 = vmatpush1.bf16.msra.mxu1 %v13388_v18  ;;  %8174 = vmatprep.subr.bf16.mxu0 %v13395_v55  ;;  %v13201_v18 = vcombine.high %v12941_v60, %v12945_v20  ;;  %v2636_v55 = vld [vmem:[#allocation3 + $0xf8] sm:$0xff] }
 0x3ef   :  { %8280 = vmatprep.subr.bf16.mxu1 %v13397_v26  ;;  %v12948_v26 = vld [vmem:[%s19635_s4 + $0x1050] sm:$0xff] }
 0x3f0   :  { %v13207_v42 = vcombine.high %v12948_v26, %v12952_v24 }
 0x3f1   :  { %8175 = vmatpush1.bf16.msra.mxu0 %v13394_v40  ;;  %v18189_v40 = vpack.c.bf16 %v2627_v16, %v2623_v41  ;;  %v12997_v16 = vld [vmem:[%s19635_s4 + $0x11d8] sm:$0xff] }
 0x3f2   :  { %8281 = vmatpush1.bf16.msra.mxu1 %v13396_v56  ;;  %8176 = vmatprep.subr.bf16.mxu0 %v13403_v33  ;;  %v13198_v56 = vcombine.low %v12940_v50, %v12944_v6  ;;  %v2632_v33 = vld [vmem:[#allocation3 + $0xd8] sm:$0xff] }
 0x3f3   :  { %8282 = vmatprep.subr.bf16.mxu1 %v13405_v43  ;;  %v13200_v43 = vcombine.low %v12941_v60, %v12945_v20  ;;  %v18191_v37 = vpack.c.bf16 %v2636_v55, %v2632_v33  ;;  %v12993_v50 = vld [vmem:[%s19635_s4 + $0x11b8] sm:$0xff] }
 0x3f4   :  { %v13009_v33 = vld [vmem:[%s19635_s4 + $0x1238] sm:$0xff] }
 0x3f5   :  { %8177 = vmatpush1.bf16.msra.mxu0 %v13402_v54  ;;  %v12960_v54 = vld [vmem:[%s19635_s4 + $0x10b0] sm:$0xff] }
 0x3f6   :  { %8283 = vmatpush1.bf16.msra.mxu1 %v13404_v8  ;;  %8178 = vmatprep.subr.bf16.mxu0 %v13411_v52  ;;  %v12957_v8 = vld [vmem:[%s19635_s4 + $0x1098] sm:$0xff]  ;;  %v13215_v21 = vcombine.high %v12956_v3, %v12960_v54  ;;  %v13214_v11 = vcombine.low %v12956_v3, %v12960_v54  ;;  %v13012_v54 = vld [vmem:[%s19635_s4 + $0x1250] sm:$0xff] }
 0x3f7   :  { %8284 = vmatprep.subr.bf16.mxu1 %v13413_v39  ;;  %v12961_v52 = vld [vmem:[%s19635_s4 + $0x10b8] sm:$0xff]  ;;  %v13206_v39 = vcombine.low %v12948_v26, %v12952_v24 }
 0x3f8   :  { %v13217_v0 = vcombine.high %v12957_v8, %v12961_v52  ;;  %v13216_v45 = vcombine.low %v12957_v8, %v12961_v52  ;;  %v13016_v8 = vld [vmem:[%s19635_s4 + $0x1270] sm:$0xff]  ;;  %v13013_v52 = vld [vmem:[%s19635_s4 + $0x1258] sm:$0xff] }
 0x3f9   :  { %8179 = vmatpush1.bf16.msra.mxu0 %v13410_v12  ;;  %v12964_v12 = vld [vmem:[%s19635_s4 + $0x10d0] sm:$0xff] }
 0x3fa   :  { %8285 = vmatpush1.bf16.msra.mxu1 %v13412_v57  ;;  %8180 = vmatprep.subr.bf16.mxu0 %v13419_v62  ;;  %v12968_v57 = vld [vmem:[%s19635_s4 + $0x10f0] sm:$0xff] }
 0x3fb   :  { %8286 = vmatprep.subr.bf16.mxu1 %v13421_v28  ;;  %v2631_v62 = vld [vmem:[#allocation3 + $0xd0] sm:$0xff]  ;;  %v12965_v28 = vld [vmem:[%s19635_s4 + $0x10d8] sm:$0xff]  ;;  %v13222_v22 = vcombine.low %v12964_v12, %v12968_v57 }
 0x3fc   :  { %v18221_v32 = vpack.c.bf16 %v2635_v58, %v2631_v62  ;;  %v13224_v47 = vcombine.low %v12965_v28, %v12969_v34  ;;  %v13021_v62 = vld [vmem:[%s19635_s4 + $0x1298] sm:$0xff] }
 0x3fd   :  { %8181 = vmatpush1.bf16.msra.mxu0 %v13418_v29  ;;  %v13223_v29 = vcombine.high %v12964_v12, %v12968_v57  ;;  %v13020_v12 = vld [vmem:[%s19635_s4 + $0x1290] sm:$0xff] }
 0x3fe   :  { %8287 = vmatpush1.bf16.msra.mxu1 %v13420_v19  ;;  %8182 = vmatprep.subr.bf16.mxu0 %v13427_v38  ;;  %v13225_v19 = vcombine.high %v12965_v28, %v12969_v34  ;;  %v12972_v38 = vld [vmem:[%s19635_s4 + $0x1110] sm:$0xff]  ;;  %v13025_v28 = vld [vmem:[%s19635_s4 + $0x12b8] sm:$0xff]  ;;  %v13270_v34 = vcombine.low %v13012_v54, %v13016_v8 }
 0x3ff   :  { %8288 = vmatprep.subr.bf16.mxu1 %v13429_v48  ;;  %v12976_v48 = vld [vmem:[%s19635_s4 + $0x1130] sm:$0xff] }
 0x400   :  { %v13230_v44 = vcombine.low %v12972_v38, %v12976_v48  ;;  %v13024_v57 = vld [vmem:[%s19635_s4 + $0x12b0] sm:$0xff] }
 0x401   :  { %8183 = vmatpush1.bf16.msra.mxu0 %v13426_v10  ;;  %v13231_v10 = vcombine.high %v12972_v38, %v12976_v48  ;;  %v13032_v38 = vld [vmem:[%s19635_s4 + $0x12f0] sm:$0xff]  ;;  %v13029_v48 = vld [vmem:[%s19635_s4 + $0x12d8] sm:$0xff] }
 0x402   :  { %8289 = vmatpush1.bf16.msra.mxu1 %v13428_v13  ;;  %8184 = vmatprep.subr.bf16.mxu0 %v13435_v36  ;;  %v13233_v13 = vcombine.high %v12973_v2, %v12977_v27  ;;  %v12980_v36 = vld [vmem:[%s19635_s4 + $0x1150] sm:$0xff]  ;;  %v13033_v2 = vld [vmem:[%s19635_s4 + $0x12f8] sm:$0xff]  ;;  %v13278_v27 = vcombine.low %v13020_v12, %v13024_v57 }
 0x403   :  { %8290 = vmatprep.subr.bf16.mxu1 %v13437_v9  ;;  %v12984_v9 = vld [vmem:[%s19635_s4 + $0x1170] sm:$0xff] }
 0x404   :  { %v13239_v25 = vcombine.high %v12980_v36, %v12984_v9  ;;  %v13238_v6 = vcombine.low %v12980_v36, %v12984_v9  ;;  %v13040_v36 = vld [vmem:[%s19635_s4 + $0x1330] sm:$0xff]  ;;  %v13037_v9 = vld [vmem:[%s19635_s4 + $0x1318] sm:$0xff] }
 0x405   :  { %8185 = vmatpush1.bf16.msra.mxu0 %v13434_v35 }
 0x406   :  { %8291 = vmatpush1.bf16.msra.mxu1 %v13436_v14  ;;  %8186 = vmatprep.subr.bf16.mxu0 %v13443_v53  ;;  %v12988_v14 = vld [vmem:[%s19635_s4 + $0x1190] sm:$0xff] }
 0x407   :  { %8292 = vmatprep.subr.bf16.mxu1 %v13445_v31  ;;  %v12992_v53 = vld [vmem:[%s19635_s4 + $0x11b0] sm:$0xff]  ;;  %v12989_v31 = vld [vmem:[%s19635_s4 + $0x1198] sm:$0xff] }
 0x408   :  { %v13247_v20 = vcombine.high %v12988_v14, %v12992_v53  ;;  %v13246_v55 = vcombine.low %v12988_v14, %v12992_v53  ;;  %v13248_v26 = vcombine.low %v12989_v31, %v12993_v50  ;;  %v13048_v14 = vld [vmem:[%s19635_s4 + $0x1370] sm:$0xff]  ;;  %v13045_v53 = vld [vmem:[%s19635_s4 + $0x1358] sm:$0xff] }
 0x409   :  { %8187 = vmatpush1.bf16.msra.mxu0 %v13442_v23  ;;  %v13249_v23 = vcombine.high %v12989_v31, %v12993_v50  ;;  %v13049_v31 = vld [vmem:[%s19635_s4 + $0x1378] sm:$0xff] }
 0x40a   :  { %8293 = vmatpush1.bf16.msra.mxu1 %v13444_v30  ;;  %8315 = vmatprep.subr.bf16.mxu0 %v13199_v63  ;;  %v12996_v30 = vld [vmem:[%s19635_s4 + $0x11d0] sm:$0xff] }
 0x40b   :  { %8421 = vmatprep.subr.bf16.mxu1 %v13201_v18  ;;  %v13000_v63 = vld [vmem:[%s19635_s4 + $0x11f0] sm:$0xff]  ;;  %v13001_v18 = vld [vmem:[%s19635_s4 + $0x11f8] sm:$0xff] }
 0x40c   :  { %8189 = vmatmul.mubr.bf16.vlgmr.msra.gmra.mrb[32].mxu0 %v18189_v40  ;;  %v13255_v24 = vcombine.high %v12996_v30, %v13000_v63  ;;  %v13257_v41 = vcombine.high %v12997_v16, %v13001_v18 }
 0x40d   :  { %8295 = vmatmul.mubr.bf16.vlgmr.msra.gmra.mrb[32].mxu1 %v18189_v40  ;;  %8198 = vmatprep.mubr.bf16.mxu0 %v18191_v37 }
 0x40e   :  { %8304 = vmatprep.mubr.bf16.mxu1 %v18191_v37  ;;  %8316 = vmatpush1.bf16.msra.mxu0 %v13198_v56  ;;  %v13005_v56 = vld [vmem:[%s19635_s4 + $0x1218] sm:$0xff] }
 0x40f   :  { %8422 = vmatpush1.bf16.msra.mxu1 %v13200_v43  ;;  %8317 = vmatprep.subr.bf16.mxu0 %v13207_v42  ;;  %v13254_v43 = vcombine.low %v12996_v30, %v13000_v63  ;;  %v13256_v42 = vcombine.low %v12997_v16, %v13001_v18  ;;  %v13265_v3 = vcombine.high %v13005_v56, %v13009_v33  ;;  %v13056_v30 = vld [vmem:[%s19635_s4 + $0x13b0] sm:$0xff]  ;;  %v13053_v63 = vld [vmem:[%s19635_s4 + $0x1398] sm:$0xff] }
 0x410   :  { %8423 = vmatprep.subr.bf16.mxu1 %v13209_v59  ;;  %v13263_v59 = vcombine.high %v13004_v1, %v13008_v7  ;;  %v13264_v58 = vcombine.low %v13005_v56, %v13009_v33  ;;  %v13057_v16 = vld [vmem:[%s19635_s4 + $0x13b8] sm:$0xff] }
 0x411   :  { %v13065_v56 = vld [vmem:[%s19635_s4 + $0x13f8] sm:$0xff] }
 0x412   :  { %8318 = vmatpush1.bf16.msra.mxu0 %v13206_v39  ;;  %v13017_v39 = vld [vmem:[%s19635_s4 + $0x1278] sm:$0xff] }
 0x413   :  { %8424 = vmatpush1.bf16.msra.mxu1 %v13208_v15  ;;  %8319 = vmatprep.subr.bf16.mxu0 %v13215_v21  ;;  %v13262_v15 = vcombine.low %v13004_v1, %v13008_v7  ;;  %v13271_v21 = vcombine.high %v13012_v54, %v13016_v8  ;;  %v13064_v1 = vld [vmem:[%s19635_s4 + $0x13f0] sm:$0xff]  ;;  %v13061_v7 = vld [vmem:[%s19635_s4 + $0x13d8] sm:$0xff] }
 0x414   :  { %8199 = vmatmul.mubr.bf16.gmra.mrb[36].mxu0 %v18221_v32  ;;  %8425 = vmatprep.subr.bf16.mxu1 %v13217_v0  ;;  %v13273_v0 = vcombine.high %v13013_v52, %v13017_v39  ;;  %v13072_v54 = vld [vmem:[%s19635_s4 + $0x1430] sm:$0xff]  ;;  %v13069_v8 = vld [vmem:[%s19635_s4 + $0x1418] sm:$0xff] }
 0x415   :  { %8305 = vmatmul.mubr.bf16.gmra.mrb[36].mxu1 %v18221_v32  ;;  %8347 = vmatprep.mubr.bf16.mxu0 %v17807_v5 }
 0x416   :  { %8320 = vmatpush1.bf16.msra.mxu0 %v13214_v11  ;;  %8453 = vmatprep.mubr.bf16.mxu1 %v17807_v5  ;;  %v12985_v5 = vld [vmem:[%s19635_s4 + $0x1178] sm:$0xff]  ;;  %v13272_v11 = vcombine.low %v13013_v52, %v13017_v39 }
 0x417   :  { %8426 = vmatpush1.bf16.msra.mxu1 %v13216_v45  ;;  %8321 = vmatprep.subr.bf16.mxu0 %v13223_v29  ;;  %v13241_v35 = vcombine.high %v12981_v4, %v12985_v5  ;;  %v13240_v60 = vcombine.low %v12981_v4, %v12985_v5  ;;  %v13279_v45 = vcombine.high %v13020_v12, %v13024_v57  ;;  %v13041_v4 = vld [vmem:[%s19635_s4 + $0x1338] sm:$0xff]  ;;  %v13080_v12 = vld [vmem:[%s19635_s4 + $0x1470] sm:$0xff] }
 0x418   :  { %8427 = vmatprep.subr.bf16.mxu1 %v13225_v19  ;;  %v13281_v29 = vcombine.high %v13021_v62, %v13025_v28  ;;  %v13028_v19 = vld [vmem:[%s19635_s4 + $0x12d0] sm:$0xff]  ;;  %v13073_v52 = vld [vmem:[%s19635_s4 + $0x1438] sm:$0xff] }
 0x419   :  { %v13286_v5 = vcombine.low %v13028_v19, %v13032_v38  ;;  %v13077_v57 = vld [vmem:[%s19635_s4 + $0x1458] sm:$0xff] }
 0x41a   :  { %8322 = vmatpush1.bf16.msra.mxu0 %v13222_v22  ;;  %v13280_v22 = vcombine.low %v13021_v62, %v13025_v28  ;;  %v13081_v62 = vld [vmem:[%s19635_s4 + $0x1478] sm:$0xff] }
 0x41b   :  { %8428 = vmatpush1.bf16.msra.mxu1 %v13224_v47  ;;  %8323 = vmatprep.subr.bf16.mxu0 %v13231_v10  ;;  %v13287_v47 = vcombine.high %v13028_v19, %v13032_v38  ;;  %v13289_v10 = vcombine.high %v13029_v48, %v13033_v2  ;;  %v13088_v19 = vld [vmem:[%s19635_s4 + $0x14b0] sm:$0xff]  ;;  %v13085_v38 = vld [vmem:[%s19635_s4 + $0x1498] sm:$0xff] }
 0x41c   :  { %8429 = vmatprep.subr.bf16.mxu1 %v13233_v13  ;;  %v13036_v13 = vld [vmem:[%s19635_s4 + $0x1310] sm:$0xff] }
 0x41d   :  { %v13294_v50 = vcombine.low %v13036_v13, %v13040_v36 }
 0x41e   :  { %8324 = vmatpush1.bf16.msra.mxu0 %v13230_v44  ;;  %v13288_v44 = vcombine.low %v13029_v48, %v13033_v2  ;;  %v13089_v48 = vld [vmem:[%s19635_s4 + $0x14b8] sm:$0xff] }
 0x41f   :  { %8430 = vmatpush1.bf16.msra.mxu1 %v13232_v46  ;;  %8325 = vmatprep.subr.bf16.mxu0 %v13239_v25  ;;  %v13295_v46 = vcombine.high %v13036_v13, %v13040_v36  ;;  %v13297_v25 = vcombine.high %v13037_v9, %v13041_v4  ;;  %v13093_v13 = vld [vmem:[%s19635_s4 + $0x14d8] sm:$0xff] }
 0x420   :  { %8431 = vmatprep.subr.bf16.mxu1 %v13241_v35  ;;  %v13044_v35 = vld [vmem:[%s19635_s4 + $0x1350] sm:$0xff] }
 0x421   :  { %v13302_v18 = vcombine.low %v13044_v35, %v13048_v14 }
 0x422   :  { %8326 = vmatpush1.bf16.msra.mxu0 %v13238_v6  ;;  %v13296_v6 = vcombine.low %v13037_v9, %v13041_v4  ;;  %v13344_v9 = vcombine.low %v13085_v38, %v13089_v48 }
 0x423   :  { %8432 = vmatpush1.bf16.msra.mxu1 %v13240_v60  ;;  %8327 = vmatprep.subr.bf16.mxu0 %v13247_v20  ;;  %v13303_v60 = vcombine.high %v13044_v35, %v13048_v14  ;;  %v13305_v20 = vcombine.high %v13045_v53, %v13049_v31  ;;  %v13105_v35 = vld [vmem:[%s19635_s4 + $0x1538] sm:$0xff] }
 0x424   :  { %8433 = vmatprep.subr.bf16.mxu1 %v13249_v23  ;;  %v13052_v23 = vld [vmem:[%s19635_s4 + $0x1390] sm:$0xff] }
 0x425   :  { %v13310_v33 = vcombine.low %v13052_v23, %v13056_v30 }
 0x426   :  { %8328 = vmatpush1.bf16.msra.mxu0 %v13246_v55  ;;  %v13304_v55 = vcombine.low %v13045_v53, %v13049_v31 }
 0x427   :  { %8434 = vmatpush1.bf16.msra.mxu1 %v13248_v26  ;;  %8329 = vmatprep.subr.bf16.mxu0 %v13255_v24  ;;  %v13311_v26 = vcombine.high %v13052_v23, %v13056_v30  ;;  %v13313_v24 = vcombine.high %v13053_v63, %v13057_v16 }
 0x428   :  { %8435 = vmatprep.subr.bf16.mxu1 %v13257_v41  ;;  %v13060_v41 = vld [vmem:[%s19635_s4 + $0x13d0] sm:$0xff] }
 0x429   :  { %v13318_v39 = vcombine.low %v13060_v41, %v13064_v1 }
 0x42a   :  { %8330 = vmatpush1.bf16.msra.mxu0 %v13254_v43  ;;  %v13312_v43 = vcombine.low %v13053_v63, %v13057_v16  ;;  %v13116_v16 = vld [vmem:[%s19635_s4 + $0x1590] sm:$0xff] }
 0x42b   :  { %8436 = vmatpush1.bf16.msra.mxu1 %v13256_v42  ;;  %8331 = vmatprep.subr.bf16.mxu0 %v13263_v59  ;;  %v13319_v42 = vcombine.high %v13060_v41, %v13064_v1  ;;  %v13321_v59 = vcombine.high %v13061_v7, %v13065_v56 }
 0x42c   :  { %8437 = vmatprep.subr.bf16.mxu1 %v13265_v3  ;;  %v13068_v3 = vld [vmem:[%s19635_s4 + $0x1410] sm:$0xff] }
 0x42d   :  { %v13326_v28 = vcombine.low %v13068_v3, %v13072_v54 }
 0x42e   :  { %8332 = vmatpush1.bf16.msra.mxu0 %v13262_v15  ;;  %v13320_v15 = vcombine.low %v13061_v7, %v13065_v56  ;;  %v13124_v56 = vld [vmem:[%s19635_s4 + $0x15d0] sm:$0xff] }
 0x42f   :  { %8438 = vmatpush1.bf16.msra.mxu1 %v13264_v58  ;;  %8333 = vmatprep.subr.bf16.mxu0 %v13271_v21  ;;  %v13327_v58 = vcombine.high %v13068_v3, %v13072_v54  ;;  %v13329_v21 = vcombine.high %v13069_v8, %v13073_v52 }
 0x430   :  { %8439 = vmatprep.subr.bf16.mxu1 %v13273_v0  ;;  %v13076_v0 = vld [vmem:[%s19635_s4 + $0x1450] sm:$0xff] }
 0x431   :  { %v13334_v2 = vcombine.low %v13076_v0, %v13080_v12 }
 0x432   :  { %8334 = vmatpush1.bf16.msra.mxu0 %v13270_v34  ;;  %v13328_v34 = vcombine.low %v13069_v8, %v13073_v52  ;;  %v13132_v52 = vld [vmem:[%s19635_s4 + $0x1610] sm:$0xff] }
 0x433   :  { %8440 = vmatpush1.bf16.msra.mxu1 %v13272_v11  ;;  %8335 = vmatprep.subr.bf16.mxu0 %v13279_v45  ;;  %v13335_v11 = vcombine.high %v13076_v0, %v13080_v12  ;;  %v13337_v45 = vcombine.high %v13077_v57, %v13081_v62 }
 0x434   :  { %8441 = vmatprep.subr.bf16.mxu1 %v13281_v29  ;;  %v13084_v29 = vld [vmem:[%s19635_s4 + $0x1490] sm:$0xff] }
 0x435   :  { %v13342_v36 = vcombine.low %v13084_v29, %v13088_v19 }
 0x436   :  { %8336 = vmatpush1.bf16.msra.mxu0 %v13278_v27  ;;  %v13336_v27 = vcombine.low %v13077_v57, %v13081_v62  ;;  %v13140_v62 = vld [vmem:[%s19635_s4 + $0x1650] sm:$0xff] }
 0x437   :  { %8442 = vmatpush1.bf16.msra.mxu1 %v13280_v22  ;;  %8337 = vmatprep.subr.bf16.mxu0 %v13287_v47  ;;  %v13343_v22 = vcombine.high %v13084_v29, %v13088_v19  ;;  %v13092_v47 = vld [vmem:[%s19635_s4 + $0x14d0] sm:$0xff] }
 0x438   :  { %8443 = vmatprep.subr.bf16.mxu1 %v13289_v10  ;;  %v13096_v10 = vld [vmem:[%s19635_s4 + $0x14f0] sm:$0xff] }
 0x439   :  { %v13351_v4 = vcombine.high %v13092_v47, %v13096_v10  ;;  %v13350_v14 = vcombine.low %v13092_v47, %v13096_v10 }
 0x43a   :  { %8338 = vmatpush1.bf16.msra.mxu0 %v13286_v5 }
 0x43b   :  { %8444 = vmatpush1.bf16.msra.mxu1 %v13288_v44  ;;  %8339 = vmatprep.subr.bf16.mxu0 %v13295_v46  ;;  %v13100_v44 = vld [vmem:[%s19635_s4 + $0x1510] sm:$0xff] }
 0x43c   :  { %8445 = vmatprep.subr.bf16.mxu1 %v13297_v25  ;;  %v13104_v46 = vld [vmem:[%s19635_s4 + $0x1530] sm:$0xff]  ;;  %v13101_v25 = vld [vmem:[%s19635_s4 + $0x1518] sm:$0xff] }
 0x43d   :  { %v13359_v31 = vcombine.high %v13100_v44, %v13104_v46  ;;  %v13360_v23 = vcombine.low %v13101_v25, %v13105_v35 }
 0x43e   :  { %8340 = vmatpush1.bf16.msra.mxu0 %v13294_v50  ;;  %v13108_v50 = vld [vmem:[%s19635_s4 + $0x1550] sm:$0xff] }
 0x43f   :  { %8446 = vmatpush1.bf16.msra.mxu1 %v13296_v6  ;;  %8341 = vmatprep.subr.bf16.mxu0 %v13303_v60  ;;  %v13112_v6 = vld [vmem:[%s19635_s4 + $0x1570] sm:$0xff]  ;;  %v13109_v60 = vld [vmem:[%s19635_s4 + $0x1558] sm:$0xff] }
 0x440   :  { %8447 = vmatprep.subr.bf16.mxu1 %v13305_v20  ;;  %v13358_v20 = vcombine.low %v13100_v44, %v13104_v46  ;;  %v13367_v30 = vcombine.high %v13108_v50, %v13112_v6 }
 0x442   :  { %8342 = vmatpush1.bf16.msra.mxu0 %v13302_v18  ;;  %v13120_v18 = vld [vmem:[%s19635_s4 + $0x15b0] sm:$0xff] }
 0x443   :  { %8448 = vmatpush1.bf16.msra.mxu1 %v13304_v55  ;;  %8343 = vmatprep.subr.bf16.mxu0 %v13311_v26  ;;  %v13117_v55 = vld [vmem:[%s19635_s4 + $0x1598] sm:$0xff]  ;;  %v13375_v1 = vcombine.high %v13116_v16, %v13120_v18 }
 0x444   :  { %8449 = vmatprep.subr.bf16.mxu1 %v13313_v24  ;;  %v13121_v26 = vld [vmem:[%s19635_s4 + $0x15b8] sm:$0xff]  ;;  %v13366_v24 = vcombine.low %v13108_v50, %v13112_v6 }
 0x445   :  { %v13377_v7 = vcombine.high %v13117_v55, %v13121_v26  ;;  %v13376_v3 = vcombine.low %v13117_v55, %v13121_v26  ;;  %v13180_v26 = vld [vmem:[%s19635_s4 + $0x1790] sm:$0xff] }
 0x446   :  { %8344 = vmatpush1.bf16.msra.mxu0 %v13310_v33  ;;  %v13128_v33 = vld [vmem:[%s19635_s4 + $0x15f0] sm:$0xff] }
 0x447   :  { %8450 = vmatpush1.bf16.msra.mxu1 %v13312_v43  ;;  %8345 = vmatprep.subr.bf16.mxu0 %v13319_v42  ;;  %v13125_v43 = vld [vmem:[%s19635_s4 + $0x15d8] sm:$0xff]  ;;  %v13383_v54 = vcombine.high %v13124_v56, %v13128_v33 }
 0x448   :  { %8451 = vmatprep.subr.bf16.mxu1 %v13321_v59  ;;  %v13129_v42 = vld [vmem:[%s19635_s4 + $0x15f8] sm:$0xff]  ;;  %v13374_v59 = vcombine.low %v13116_v16, %v13120_v18 }
 0x449   :  { %v13385_v8 = vcombine.high %v13125_v43, %v13129_v42  ;;  %v13384_v0 = vcombine.low %v13125_v43, %v13129_v42  ;;  %v13188_v42 = vld [vmem:[%s19635_s4 + $0x17d0] sm:$0xff] }
 0x44a   :  { %8346 = vmatpush1.bf16.msra.mxu0 %v13318_v39  ;;  %v13136_v39 = vld [vmem:[%s19635_s4 + $0x1630] sm:$0xff] }
 0x44b   :  { %8452 = vmatpush1.bf16.msra.mxu1 %v13320_v15  ;;  %8368 = vmatprep.subr.bf16.mxu0 %v13327_v58  ;;  %v13133_v15 = vld [vmem:[%s19635_s4 + $0x1618] sm:$0xff]  ;;  %v13391_v12 = vcombine.high %v13132_v52, %v13136_v39 }
 0x44c   :  { %8474 = vmatprep.subr.bf16.mxu1 %v13329_v21  ;;  %v13137_v58 = vld [vmem:[%s19635_s4 + $0x1638] sm:$0xff]  ;;  %v13382_v21 = vcombine.low %v13124_v56, %v13128_v33 }
 0x44d   :  { %8348 = vmatmul.mubr.bf16.vlgmr.msra.gmra.mrb[40].mxu0 %v17981_v61  ;;  %v13393_v57 = vcombine.high %v13133_v15, %v13137_v58  ;;  %v13392_v29 = vcombine.low %v13133_v15, %v13137_v58 }
 0x44e   :  { %8454 = vmatmul.mubr.bf16.vlgmr.msra.gmra.mrb[40].mxu1 %v17981_v61  ;;  %8357 = vmatprep.mubr.bf16.mxu0 %v17983_v51  ;;  %v13345_v61 = vcombine.high %v13085_v38, %v13089_v48  ;;  %v13148_v48 = vld [vmem:[%s19635_s4 + $0x1690] sm:$0xff] }
 0x44f   :  { %8369 = vmatpush1.bf16.msra.mxu0 %v13326_v28  ;;  %8463 = vmatprep.mubr.bf16.mxu1 %v17983_v51  ;;  %v13097_v51 = vld [vmem:[%s19635_s4 + $0x14f8] sm:$0xff]  ;;  %v13144_v28 = vld [vmem:[%s19635_s4 + $0x1670] sm:$0xff] }
 0x450   :  { %8475 = vmatpush1.bf16.msra.mxu1 %v13328_v34  ;;  %8370 = vmatprep.subr.bf16.mxu0 %v13335_v11  ;;  %v13353_v5 = vcombine.high %v13093_v13, %v13097_v51  ;;  %v13352_v53 = vcombine.low %v13093_v13, %v13097_v51  ;;  %v13141_v34 = vld [vmem:[%s19635_s4 + $0x1658] sm:$0xff]  ;;  %v13399_v19 = vcombine.high %v13140_v62, %v13144_v28  ;;  %v13156_v51 = vld [vmem:[%s19635_s4 + $0x16d0] sm:$0xff] }
 0x451   :  { %8476 = vmatprep.subr.bf16.mxu1 %v13337_v45  ;;  %v13145_v11 = vld [vmem:[%s19635_s4 + $0x1678] sm:$0xff]  ;;  %v13390_v45 = vcombine.low %v13132_v52, %v13136_v39 }
 0x452   :  { %v13401_v38 = vcombine.high %v13141_v34, %v13145_v11  ;;  %v13400_v47 = vcombine.low %v13141_v34, %v13145_v11 }
 0x453   :  { %8371 = vmatpush1.bf16.msra.mxu0 %v13334_v2  ;;  %v13152_v2 = vld [vmem:[%s19635_s4 + $0x16b0] sm:$0xff] }
 0x454   :  { %8477 = vmatpush1.bf16.msra.mxu1 %v13336_v27  ;;  %8372 = vmatprep.subr.bf16.mxu0 %v13343_v22  ;;  %v13149_v27 = vld [vmem:[%s19635_s4 + $0x1698] sm:$0xff]  ;;  %v13407_v10 = vcombine.high %v13148_v48, %v13152_v2 }
 0x455   :  { %8358 = vmatmul.mubr.bf16.gmra.mrb[44].mxu0 %v18013_v49  ;;  %8478 = vmatprep.subr.bf16.mxu1 %v13345_v61  ;;  %v13153_v22 = vld [vmem:[%s19635_s4 + $0x16b8] sm:$0xff]  ;;  %v13398_v61 = vcombine.low %v13140_v62, %v13144_v28 }
 0x456   :  { %8464 = vmatmul.mubr.bf16.gmra.mrb[44].mxu1 %v18013_v49  ;;  %8400 = vmatprep.mubr.bf16.mxu0 %v18015_v17  ;;  %v13361_v49 = vcombine.high %v13101_v25, %v13105_v35  ;;  %v13409_v13 = vcombine.high %v13149_v27, %v13153_v22  ;;  %v13408_v44 = vcombine.low %v13149_v27, %v13153_v22  ;;  %v13164_v35 = vld [vmem:[%s19635_s4 + $0x1710] sm:$0xff]  ;;  %v14697_v27 = vld [vmem:[%s19638_s7 + $0x140] sm:$0xff]  }
 0x457   :  { %8373 = vmatpush1.bf16.msra.mxu0 %v13342_v36  ;;  %8506 = vmatprep.mubr.bf16.mxu1 %v18015_v17  ;;  %v13113_v17 = vld [vmem:[%s19635_s4 + $0x1578] sm:$0xff]  ;;  %v13160_v36 = vld [vmem:[%s19635_s4 + $0x16f0] sm:$0xff]  ;;  %v14698_v22 = vld [vmem:[%s19638_s7 + $0x1c0] sm:$0xff]  }
 0x458   :  { %8479 = vmatpush1.bf16.msra.mxu1 %v13344_v9  ;;  %8374 = vmatprep.subr.bf16.mxu0 %v13351_v4  ;;  %v13369_v63 = vcombine.high %v13109_v60, %v13113_v17  ;;  %v13368_v41 = vcombine.low %v13109_v60, %v13113_v17  ;;  %v13157_v9 = vld [vmem:[%s19635_s4 + $0x16d8] sm:$0xff]  ;;  %v13415_v46 = vcombine.high %v13156_v51, %v13160_v36  ;;  %v13172_v17 = vld [vmem:[%s19635_s4 + $0x1750] sm:$0xff] }
 0x459   :  { %8480 = vmatprep.subr.bf16.mxu1 %v13353_v5  ;;  %v13161_v4 = vld [vmem:[%s19635_s4 + $0x16f8] sm:$0xff]  ;;  %v13406_v5 = vcombine.low %v13148_v48, %v13152_v2 }
 0x45a   :  { %v13417_v25 = vcombine.high %v13157_v9, %v13161_v4  ;;  %v13416_v50 = vcombine.low %v13157_v9, %v13161_v4  ;;  %v14705_v9 = vld [vmem:[%s19638_s7 + $0x150] sm:$0xff]  }
 0x45b   :  { %8375 = vmatpush1.bf16.msra.mxu0 %v13350_v14  ;;  %v13168_v14 = vld [vmem:[%s19635_s4 + $0x1730] sm:$0xff] }
 0x45c   :  { %8481 = vmatpush1.bf16.msra.mxu1 %v13352_v53  ;;  %8376 = vmatprep.subr.bf16.mxu0 %v13359_v31  ;;  %v13165_v53 = vld [vmem:[%s19635_s4 + $0x1718] sm:$0xff]  ;;  %v13423_v6 = vcombine.high %v13164_v35, %v13168_v14  ;;  %v14706_v4 = vld [vmem:[%s19638_s7 + $0x1d0] sm:$0xff]  }
 0x45d   :  { %8482 = vmatprep.subr.bf16.mxu1 %v13361_v49  ;;  %v13169_v31 = vld [vmem:[%s19635_s4 + $0x1738] sm:$0xff]  ;;  %v13414_v49 = vcombine.low %v13156_v51, %v13160_v36  ;;  %v14703_v51 = vld [vmem:[%s19638_s7 + $0x108] sm:$0xff]  }
 0x45e   :  { %v13425_v60 = vcombine.high %v13165_v53, %v13169_v31  ;;  %v13424_v16 = vcombine.low %v13165_v53, %v13169_v31  ;;  %v14704_v36 = vld [vmem:[%s19638_s7 + $0x188] sm:$0xff]   ;;  %v14713_v53 = vld [vmem:[%s19638_s7 + $0x160] sm:$0xff]  }
 0x45f   :  { %8377 = vmatpush1.bf16.msra.mxu0 %v13358_v20  ;;  %v13176_v20 = vld [vmem:[%s19635_s4 + $0x1770] sm:$0xff]  ;;  %v14714_v31 = vld [vmem:[%s19638_s7 + $0x1e0] sm:$0xff]  }
 0x460   :  { %8483 = vmatpush1.bf16.msra.mxu1 %v13360_v23  ;;  %8378 = vmatprep.subr.bf16.mxu0 %v13367_v30  ;;  %v13173_v23 = vld [vmem:[%s19635_s4 + $0x1758] sm:$0xff]  ;;  %v13431_v18 = vcombine.high %v13172_v17, %v13176_v20 }
 0x461   :  { %8484 = vmatprep.subr.bf16.mxu1 %v13369_v63  ;;  %v13177_v30 = vld [vmem:[%s19635_s4 + $0x1778] sm:$0xff]  ;;  %v13422_v63 = vcombine.low %v13164_v35, %v13168_v14 }
 0x462   :  { %v13433_v55 = vcombine.high %v13173_v23, %v13177_v30  ;;  %v13432_v56 = vcombine.low %v13173_v23, %v13177_v30  ;;  %v14711_v35 = vld [vmem:[%s19638_s7 + $0x118] sm:$0xff]   ;;  %v14721_v23 = vld [vmem:[%s19638_s7 + $0x170] sm:$0xff]  }
 0x463   :  { %8379 = vmatpush1.bf16.msra.mxu0 %v13366_v24  ;;  %v13184_v24 = vld [vmem:[%s19635_s4 + $0x17b0] sm:$0xff]  ;;  %v14712_v14 = vld [vmem:[%s19638_s7 + $0x198] sm:$0xff]  }
 0x464   :  { %8485 = vmatpush1.bf16.msra.mxu1 %v13368_v41  ;;  %8380 = vmatprep.subr.bf16.mxu0 %v13375_v1  ;;  %v13181_v41 = vld [vmem:[%s19635_s4 + $0x1798] sm:$0xff]  ;;  %v13439_v33 = vcombine.high %v13180_v26, %v13184_v24  ;;  %v14722_v30 = vld [vmem:[%s19638_s7 + $0x1f0] sm:$0xff]  }
 0x465   :  { %8486 = vmatprep.subr.bf16.mxu1 %v13377_v7  ;;  %v13185_v1 = vld [vmem:[%s19635_s4 + $0x17b8] sm:$0xff]  ;;  %v13430_v7 = vcombine.low %v13172_v17, %v13176_v20  ;;  %v14719_v17 = vld [vmem:[%s19638_s7 + $0x128] sm:$0xff]  }
 0x466   :  { %v13441_v43 = vcombine.high %v13181_v41, %v13185_v1  ;;  %v13440_v52 = vcombine.low %v13181_v41, %v13185_v1  ;;  %v14720_v20 = vld [vmem:[%s19638_s7 + $0x1a8] sm:$0xff]   ;;  %v14729_v41 = vld [vmem:[%s19638_s7 + $0x40] sm:$0xff]  }
 0x467   :  { %8381 = vmatpush1.bf16.msra.mxu0 %v13374_v59  ;;  %v13192_v59 = vld [vmem:[%s19635_s4 + $0x17f0] sm:$0xff]  ;;  %v14730_v1 = vld [vmem:[%s19638_s7 + $0xc0] sm:$0xff]  }
 0x468   :  { %8487 = vmatpush1.bf16.msra.mxu1 %v13376_v3  ;;  %8382 = vmatprep.subr.bf16.mxu0 %v13383_v54  ;;  %v13189_v3 = vld [vmem:[%s19635_s4 + $0x17d8] sm:$0xff]  ;;  %v13447_v39 = vcombine.high %v13188_v42, %v13192_v59  ;;  %v13446_v58 = vcombine.low %v13188_v42, %v13192_v59  ;;  %v19699_v42 = vld [vmem:[#allocation12_spill] sm:$0xff] }
 0x469   :  { %8488 = vmatprep.subr.bf16.mxu1 %v13385_v8  ;;  %v13193_v54 = vld [vmem:[%s19635_s4 + $0x17f8] sm:$0xff]  ;;  %v13438_v8 = vcombine.low %v13180_v26, %v13184_v24 }
 0x46a   :  { %v13449_v15 = vcombine.high %v13189_v3, %v13193_v54  ;;  %v14727_v26 = vld [vmem:[%s19638_s7 + $0x138] sm:$0xff]  }
 0x46b   :  { %8383 = vmatpush1.bf16.msra.mxu0 %v13382_v21  ;;  %v13448_v21 = vcombine.low %v13189_v3, %v13193_v54  ;;  %v14728_v24 = vld [vmem:[%s19638_s7 + $0x1b8] sm:$0xff]   ;;  %v19700_v3 = vld [vmem:[#allocation13_spill] sm:$0xff] }
 0x46c   :  { %8489 = vmatpush1.bf16.msra.mxu1 %v13384_v0  ;;  %8384 = vmatprep.subr.bf16.mxu0 %v13391_v12 }
 0x46d   :  { %8490 = vmatprep.subr.bf16.mxu1 %v13393_v57 }
 0x46f   :  { %8385 = vmatpush1.bf16.msra.mxu0 %v13390_v45 }
 0x470   :  { %8491 = vmatpush1.bf16.msra.mxu1 %v13392_v29  ;;  %8386 = vmatprep.subr.bf16.mxu0 %v13399_v19 }
 0x471   :  { %8492 = vmatprep.subr.bf16.mxu1 %v13401_v38 }
 0x473   :  { %8387 = vmatpush1.bf16.msra.mxu0 %v13398_v61  ;;  %v14699_v61 = vld [vmem:[%s19638_s7 + $0x100] sm:$0xff]  }
 0x474   :  { %8493 = vmatpush1.bf16.msra.mxu1 %v13400_v47  ;;  %8388 = vmatprep.subr.bf16.mxu0 %v13407_v10  ;;  %v14700_v47 = vld [vmem:[%s19638_s7 + $0x180] sm:$0xff]   ;;  %v14701_v10 = vld [vmem:[%s19638_s7 + $0x148] sm:$0xff]  }
 0x475   :  { %8494 = vmatprep.subr.bf16.mxu1 %v13409_v13  ;;  %v14702_v13 = vld [vmem:[%s19638_s7 + $0x1c8] sm:$0xff]  }
 0x477   :  { %8389 = vmatpush1.bf16.msra.mxu0 %v13406_v5  ;;  %v14707_v5 = vld [vmem:[%s19638_s7 + $0x110] sm:$0xff]  }
 0x478   :  { %8495 = vmatpush1.bf16.msra.mxu1 %v13408_v44  ;;  %8390 = vmatprep.subr.bf16.mxu0 %v13415_v46  ;;  %v14708_v44 = vld [vmem:[%s19638_s7 + $0x190] sm:$0xff]   ;;  %v14709_v46 = vld [vmem:[%s19638_s7 + $0x158] sm:$0xff]  }
 0x479   :  { %8496 = vmatprep.subr.bf16.mxu1 %v13417_v25  ;;  %v14710_v25 = vld [vmem:[%s19638_s7 + $0x1d8] sm:$0xff]  }
 0x47b   :  { %8391 = vmatpush1.bf16.msra.mxu0 %v13414_v49  ;;  %v14715_v49 = vld [vmem:[%s19638_s7 + $0x120] sm:$0xff]  }
 0x47c   :  { %8497 = vmatpush1.bf16.msra.mxu1 %v13416_v50  ;;  %8392 = vmatprep.subr.bf16.mxu0 %v13423_v6  ;;  %v14716_v50 = vld [vmem:[%s19638_s7 + $0x1a0] sm:$0xff]   ;;  %v14717_v6 = vld [vmem:[%s19638_s7 + $0x168] sm:$0xff]  }
 0x47d   :  { %8498 = vmatprep.subr.bf16.mxu1 %v13425_v60  ;;  %v14718_v60 = vld [vmem:[%s19638_s7 + $0x1e8] sm:$0xff]  }
 0x47f   :  { %8393 = vmatpush1.bf16.msra.mxu0 %v13422_v63  ;;  %v14723_v63 = vld [vmem:[%s19638_s7 + $0x130] sm:$0xff]  }
 0x480   :  { %8499 = vmatpush1.bf16.msra.mxu1 %v13424_v16  ;;  %8394 = vmatprep.subr.bf16.mxu0 %v13431_v18  ;;  %v14724_v16 = vld [vmem:[%s19638_s7 + $0x1b0] sm:$0xff]   ;;  %v14725_v18 = vld [vmem:[%s19638_s7 + $0x178] sm:$0xff]  }
 0x481   :  { %8500 = vmatprep.subr.bf16.mxu1 %v13433_v55  ;;  %v14726_v55 = vld [vmem:[%s19638_s7 + $0x1f8] sm:$0xff]  }
 0x483   :  { %8395 = vmatpush1.bf16.msra.mxu0 %v13430_v7  ;;  %v8559_v7 = vld [vmem:[%s19636_s5] sm:$0xff] }
 0x484   :  { %8501 = vmatpush1.bf16.msra.mxu1 %v13432_v56  ;;  %8396 = vmatprep.subr.bf16.mxu0 %v13439_v33  ;;  %v19698_v56 = vld [vmem:[#allocation11_spill] sm:$0xff]  ;;  %v8572_v59 = vrot.slane %v8559_v7, %v19699_v42  ;;  %v8568_v54 = vrot.slane %v8559_v7, %v19700_v3 }
 0x485   :  { %8502 = vmatprep.subr.bf16.mxu1 %v13441_v43  ;;  %v8564_v33 = vrot.slane %v8559_v7, %v19698_v56  ;;  %v8633_v43 = vld [vmem:[%s19637_s6] sm:$0xff] }
 0x487   :  { %8397 = vmatpush1.bf16.msra.mxu0 %v13438_v8  ;;  %v19701_v8 = vld [vmem:[#allocation14_spill] sm:$0xff] }
 0x488   :  { %8503 = vmatpush1.bf16.msra.mxu1 %v13440_v52  ;;  %8398 = vmatprep.subr.bf16.mxu0 %v13447_v39  ;;  %v18721_v52 = vrot.slane %v8559_v7, %v19701_v8 }
 0x489   :  { %8504 = vmatprep.subr.bf16.mxu1 %v13449_v15  ;;  %v18725_v15 = vrot.slane %v8633_v43, %v19698_v56 }
 0x48b   :  { %8399 = vmatpush1.bf16.msra.mxu0 %v13446_v58 }
 0x48c   :  { %8505 = vmatpush1.bf16.msra.mxu1 %v13448_v21  ;;  %14068 = vmatprep.subr.bf16.mxu0 %v14697_v27  ;;  %v18729_v21 = vrot.slane %v8633_v43, %v19699_v42 }
 0x48d   :  { %14090 = vmatprep.subr.bf16.mxu1 %v14698_v22  ;;  %v18733_v22 = vrot.slane %v8633_v43, %v19700_v3 }
 0x48e   :  { %8401 = vmatmul.mubr.bf16.vlgmr.msra.gmra.mrb[40].mxu0 %v18189_v40 }
 0x48f   :  { %8507 = vmatmul.mubr.bf16.vlgmr.msra.gmra.mrb[40].mxu1 %v18189_v40  ;;  %8410 = vmatprep.mubr.bf16.mxu0 %v18191_v37 }
 0x490   :  { %8516 = vmatprep.mubr.bf16.mxu1 %v18191_v37  ;;  %14069 = vmatpush3.bf16.msra.mxu0 %v14699_v61 }
 0x491   :  { %14091 = vmatpush3.bf16.msra.mxu1 %v14700_v47  ;;  %14070 = vmatprep.subr.bf16.mxu0 %v14701_v10  ;;  %v18738_v47 = vrot.slane %v8633_v43, %v19701_v8 }
 0x492   :  { %14092 = vmatprep.subr.bf16.mxu1 %v14702_v13 }
 0x494   :  { %14071 = vmatpush3.bf16.msra.mxu0 %v14703_v51  ;;  %v19702_v51 = vld [vmem:[#allocation15_spill] sm:$0xff] }
 0x495   :  { %14093 = vmatpush3.bf16.msra.mxu1 %v14704_v36  ;;  %14072 = vmatprep.subr.bf16.mxu0 %v14705_v9  ;;  %v18749_v36 = vrot.slane %v8559_v7, %v19702_v51 }
 0x496   :  { %8411 = vmatmul.mubr.bf16.gmra.mrb[44].mxu0 %v18221_v32  ;;  %14094 = vmatprep.subr.bf16.mxu1 %v14706_v4 }
 0x497   :  { %8517 = vmatmul.mubr.bf16.gmra.mrb[44].mxu1 %v18221_v32 }
 0x498   :  { %14073 = vmatpush3.bf16.msra.mxu0 %v14707_v5 }
 0x499   :  { %14095 = vmatpush3.bf16.msra.mxu1 %v14708_v44  ;;  %14074 = vmatprep.subr.bf16.mxu0 %v14709_v46  ;;  %v19704_v44 = vld [vmem:[#allocation17_spill] sm:$0xff] }
 0x49a   :  { %14096 = vmatprep.subr.bf16.mxu1 %v14710_v25  ;;  %v18771_v46 = vrot.slane %v8559_v7, %v19704_v44 }
 0x49c   :  { %14075 = vmatpush3.bf16.msra.mxu0 %v14711_v35 }
 0x49d   :  { %14097 = vmatpush3.bf16.msra.mxu1 %v14712_v14  ;;  %14076 = vmatprep.subr.bf16.mxu0 %v14713_v53  ;;  %v19705_v14 = vld [vmem:[#allocation18_spill] sm:$0xff] }
 0x49e   :  { %14098 = vmatprep.subr.bf16.mxu1 %v14714_v31  ;;  %v18783_v53 = vrot.slane %v8559_v7, %v19705_v14 }
 0x4a0   :  { %14077 = vmatpush3.bf16.msra.mxu0 %v14715_v49 }
 0x4a1   :  { %14099 = vmatpush3.bf16.msra.mxu1 %v14716_v50  ;;  %14078 = vmatprep.subr.bf16.mxu0 %v14717_v6  ;;  %v18790_v6 = vrot.slane %v8633_v43, %v19704_v44 }
 0x4a2   :  { %14100 = vmatprep.subr.bf16.mxu1 %v14718_v60  ;;  %v18793_v60 = vrot.slane %v8633_v43, %v19705_v14 }
 0x4a4   :  { %14079 = vmatpush3.bf16.msra.mxu0 %v14719_v17 }
 0x4a5   :  { %14101 = vmatpush3.bf16.msra.mxu1 %v14720_v20  ;;  %14080 = vmatprep.subr.bf16.mxu0 %v14721_v23 }
 0x4a6   :  { %14102 = vmatprep.subr.bf16.mxu1 %v14722_v30 }
 0x4a8   :  { %14081 = vmatpush3.bf16.msra.mxu0 %v14723_v63 }
 0x4a9   :  { %14103 = vmatpush3.bf16.msra.mxu1 %v14724_v16  ;;  %14082 = vmatprep.subr.bf16.mxu0 %v14725_v18 }
 0x4aa   :  { %14104 = vmatprep.subr.bf16.mxu1 %v14726_v55 }
 0x4ac   :  { %14083 = vmatpush3.bf16.msra.mxu0 %v14727_v26 }
 0x4ad   :  { %14105 = vmatpush3.bf16.msra.mxu1 %v14728_v24  ;;  %14112 = vmatprep.subr.bf16.mxu0 %v14729_v41 }
 0x4ae   :  { %14134 = vmatprep.subr.bf16.mxu1 %v14730_v1 }
 0x4df   :  { %v18577_v0 = vpop.f32.mrb[32].mxu0 }
 0x4e0   :  { %v18579_v12 = vpop.f32.mrb[32].mxu1  ;;  %v18581_v57 = vpop.f32.mrb[33].mxu0  ;;  %v8601_v39 = vmul.f32 %v8564_v33, %v18577_v0 }
 0x4e1   :  { %v18583_v62 = vpop.f32.mrb[33].mxu1  ;;  %v18585_v28 = vpop.f32.mrb[34].mxu0  ;;  %v8603_v58 = vmul.f32 %v8572_v59, %v18579_v12  ;;  %v8602_v27 = vmul.f32 %v8568_v54, %v18581_v57 }
 0x4e2   :  { %v18587_v34 = vpop.f32.mrb[34].mxu1  ;;  %v18589_v40 = vpop.f32.mrb[35].mxu0  ;;  %v8604_v61 = vmul.f32 %v18721_v52, %v18583_v62  ;;  %v8609_v0 = vmul.f32 %v8564_v33, %v18585_v28  ;;  %v18744_v13 = vadd.f32 %v18725_v15, %v8601_v39 }
 0x4e3   :  { %v18591_v11 = vpop.f32.mrb[35].mxu1  ;;  %v8611_v10 = vmul.f32 %v8572_v59, %v18587_v34  ;;  %v8610_v12 = vmul.f32 %v8568_v54, %v18589_v40  ;;  %v18752_v62 = vadd.f32 %v18729_v21, %v8603_v58  ;;  %v18755_v9 = vadd.f32 %v18733_v22, %v8602_v27 }
 0x4e4   :  { %v8612_v57 = vmul.f32 %v18721_v52, %v18591_v11  ;;  %v18759_v34 = vrot.slane %v8633_v43, %v19702_v51  ;;  %v18762_v40 = vadd.f32 %v18738_v47, %v8604_v61  ;;  %v18765_v4 = vadd.f32 %v18725_v15, %v8609_v0  ;;  %v19703_v11 = vld [vmem:[#allocation16_spill] sm:$0xff] }
 0x4e5   :  { %v18768_v5 = vrot.slane %v8559_v7, %v19703_v11  ;;  %v18774_v25 = vadd.f32 %v18729_v21, %v8611_v10  ;;  %v18780_v35 = vrot.slane %v8633_v43, %v19703_v11 }
 0x4e6   :  { %v18786_v31 = vadd.f32 %v18738_v47, %v8612_v57 }
 0x4e7   :  { %v18593_v37 = vpop.f32.mrb[36].mxu0 }
 0x4e8   :  { %v18595_v45 = vpop.f32.mrb[36].mxu1  ;;  %v18597_v32 = vpop.f32.mrb[37].mxu0  ;;  %v8617_v28 = vmul.f32 %v8564_v33, %v18593_v37  ;;  %v18777_v37 = vadd.f32 %v18733_v22, %v8610_v12 }
 0x4e9   :  { %v18599_v29 = vpop.f32.mrb[37].mxu1  ;;  %v18601_v19 = vpop.f32.mrb[38].mxu0  ;;  %v8619_v49 = vmul.f32 %v8572_v59, %v18595_v45  ;;  %v8618_v20 = vmul.f32 %v8568_v54, %v18597_v32 }
 0x4ea   :  { %v18603_v38 = vpop.f32.mrb[38].mxu1  ;;  %v18605_v48 = vpop.f32.mrb[39].mxu0  ;;  %v18796_v17 = vadd.f32 %v18725_v15, %v8617_v28  ;;  %v8620_v23 = vmul.f32 %v18721_v52, %v18599_v29  ;;  %v8625_v45 = vmul.f32 %v8564_v33, %v18601_v19 }
 0x4eb   :  { %v18607_v2 = vpop.f32.mrb[39].mxu1  ;;  %v8627_v18 = vmul.f32 %v8572_v59, %v18603_v38  ;;  %v8626_v1 = vmul.f32 %v8568_v54, %v18605_v48  ;;  %v8693_v44 = vadd.f32 %v18729_v21, %v8619_v49  ;;  %v8692_v14 = vadd.f32 %v18733_v22, %v8618_v20 }
 0x4ec   :  { %v8628_v51 = vmul.f32 %v18721_v52, %v18607_v2 }
 0x4ed   :  { %v8700_v49 = vadd.f32 %v18733_v22, %v8626_v1 }
 0x561   :  { %v8402_v50 = vpop.f32.mrb[40].mxu0 }
 0x562   :  { %v8605_v30 = vmul.f32 %v18749_v36, %v8402_v50  ;;  %v8508_v63 = vpop.f32.mrb[40].mxu1  ;;  %v8404_v16 = vpop.f32.mrb[41].mxu0 }
 0x563   :  { %v8607_v55 = vmul.f32 %v18768_v5, %v8508_v63  ;;  %v8606_v26 = vmul.f32 %v18771_v46, %v8404_v16  ;;  %v8510_v24 = vpop.f32.mrb[41].mxu1  ;;  %v8406_v41 = vpop.f32.mrb[42].mxu0  ;;  %v8699_v63 = vadd.f32 %v18725_v15, %v8625_v45  ;;  %v8701_v16 = vadd.f32 %v18729_v21, %v8627_v18 }
 0x564   :  { %v8679_v32 = vadd.f32 %v18759_v34, %v8605_v30  ;;  %v8608_v29 = vmul.f32 %v18783_v53, %v8510_v24  ;;  %v8613_v7 = vmul.f32 %v18749_v36, %v8406_v41  ;;  %v8512_v43 = vpop.f32.mrb[42].mxu1  ;;  %v8408_v39 = vpop.f32.mrb[43].mxu0  ;;  %v8694_v30 = vadd.f32 %v18738_v47, %v8620_v23 }
 0x565   :  { %v8681_v19 = vadd.f32 %v18780_v35, %v8607_v55  ;;  %v8680_v38 = vadd.f32 %v18790_v6, %v8606_v26  ;;  %v8615_v33 = vmul.f32 %v18768_v5, %v8512_v43  ;;  %v8614_v59 = vmul.f32 %v18771_v46, %v8408_v39  ;;  %v8514_v58 = vpop.f32.mrb[43].mxu1 }
 0x566   :  { %v8707_v27 = vmax.f32 %v18744_v13, %v8679_v32  ;;  %v8682_v48 = vadd.f32 %v18793_v60, %v8608_v29  ;;  %v8687_v54 = vadd.f32 %v18759_v34, %v8613_v7  ;;  %v8616_v61 = vmul.f32 %v18783_v53, %v8514_v58 }
 0x567   :  { %v8709_v0 = vmax.f32 %v18752_v62, %v8681_v19  ;;  %v8708_v10 = vmax.f32 %v18755_v9, %v8680_v38  ;;  %v8689_v12 = vadd.f32 %v18780_v35, %v8615_v33  ;;  %v8688_v57 = vadd.f32 %v18790_v6, %v8614_v59 }
 0x568   :  { %v8710_v28 = vmax.f32 %v18762_v40, %v8682_v48  ;;  %v8711_v13 = vmax.f32 %v18765_v4, %v8687_v54  ;;  %v8690_v11 = vadd.f32 %v18793_v60, %v8616_v61  ;;  %v8702_v23 = vadd.f32 %v18738_v47, %v8628_v51 }
 0x569   :  { %v8713_v62 = vmax.f32 %v18774_v25, %v8689_v12  ;;  %v8712_v9 = vmax.f32 %v18777_v37, %v8688_v57  ;;  %v8412_v50 = vpop.f32.mrb[44].mxu0 }
 0x56a   :  { %v8714_v2 = vmax.f32 %v18786_v31, %v8690_v11  ;;  %v8621_v52 = vmul.f32 %v18749_v36, %v8412_v50  ;;  %v8518_v40 = vpop.f32.mrb[44].mxu1  ;;  %v8414_v4 = vpop.f32.mrb[45].mxu0 }
 0x56b   :  { %v8623_v20 = vmul.f32 %v18768_v5, %v8518_v40  ;;  %v8622_v25 = vmul.f32 %v18771_v46, %v8414_v4  ;;  %v8520_v37 = vpop.f32.mrb[45].mxu1  ;;  %v8416_v55 = vpop.f32.mrb[46].mxu0 }
 0x56c   :  { %v8695_v15 = vadd.f32 %v18759_v34, %v8621_v52  ;;  %v8624_v31 = vmul.f32 %v18783_v53, %v8520_v37  ;;  %v8629_v45 = vmul.f32 %v18749_v36, %v8416_v55  ;;  %v8522_v26 = vpop.f32.mrb[46].mxu1  ;;  %v8418_v24 = vpop.f32.mrb[47].mxu0 }
 0x56d   :  { %v8697_v21 = vadd.f32 %v18780_v35, %v8623_v20  ;;  %v8696_v22 = vadd.f32 %v18790_v6, %v8622_v25  ;;  %v8631_v18 = vmul.f32 %v18768_v5, %v8522_v26  ;;  %v8630_v41 = vmul.f32 %v18771_v46, %v8418_v24  ;;  %v8524_v1 = vpop.f32.mrb[47].mxu1 }
 0x56e   :  { %v8715_v32 = vmax.f32 %v18796_v17, %v8695_v15  ;;  %v8698_v47 = vadd.f32 %v18793_v60, %v8624_v31  ;;  %v8703_v29 = vadd.f32 %v18759_v34, %v8629_v45  ;;  %v8632_v7 = vmul.f32 %v18783_v53, %v8524_v1 }
 0x56f   :  { %v8717_v36 = vmax.f32 %v8693_v44, %v8697_v21  ;;  %v8716_v43 = vmax.f32 %v8692_v14, %v8696_v22  ;;  %v8705_v39 = vadd.f32 %v18780_v35, %v8631_v18  ;;  %v8704_v19 = vadd.f32 %v18790_v6, %v8630_v41 }
 0x570   :  { %v8723_v38 = vmax.f32 %v8707_v27, %v8715_v32  ;;  %v8718_v33 = vmax.f32 %v8694_v30, %v8698_v47  ;;  %v8719_v5 = vmax.f32 %v8699_v63, %v8703_v29  ;;  %v8706_v46 = vadd.f32 %v18793_v60, %v8632_v7 }
 0x571   :  { %v8725_v59 = vmax.f32 %v8709_v0, %v8717_v36  ;;  %v8724_v58 = vmax.f32 %v8708_v10, %v8716_v43  ;;  %v8721_v17 = vmax.f32 %v8701_v16, %v8705_v39  ;;  %v8720_v48 = vmax.f32 %v8700_v49, %v8704_v19 }
 0x572   :  { %v8731_v54 = vmax.f32 %v8723_v38, 0.0  ;;  %v8726_v61 = vmax.f32 %v8710_v28, %v8718_v33  ;;  %v8727_v34 = vmax.f32 %v8711_v13, %v8719_v5  ;;  %v8722_v12 = vmax.f32 %v8702_v23, %v8706_v46 }
 0x573   :  { %v8733_v53 = vmax.f32 %v8725_v59, 0.0  ;;  %v8732_v57 = vmax.f32 %v8724_v58, 0.0  ;;  %v8729_v51 = vmax.f32 %v8713_v62, %v8721_v17  ;;  %v8728_v11 = vmax.f32 %v8712_v9, %v8720_v48 }
 0x574   :  { %8739 = vst [vmem:[#allocation4] sm:$0xff] %v8731_v54  ;;  %v8734_v35 = vmax.f32 %v8726_v61, 0.0  ;;  %v8735_v6 = vmax.f32 %v8727_v34, 0.0  ;;  %v8730_v27 = vmax.f32 %v8714_v2, %v8722_v12  ;;  %v14731_v34 = vld [vmem:[%s19638_s7] sm:$0xff]  }
 0x575   :  { %8741 = vst [vmem:[#allocation4 + $0x10] sm:$0xff] %v8733_v53  ;;  %8740 = vst [vmem:[#allocation4 + $0x8] sm:$0xff] %v8732_v57  ;;  %v8737_v44 = vmax.f32 %v8729_v51, 0.0  ;;  %v8736_v60 = vmax.f32 %v8728_v11, 0.0  ;;  %v14732_v12 = vld [vmem:[%s19638_s7 + $0x80] sm:$0xff]  }
 0x576   :  { %8742 = vst [vmem:[#allocation4 + $0x18] sm:$0xff] %v8734_v35  ;;  %8743 = vst [vmem:[#allocation4 + $0x20] sm:$0xff] %v8735_v6  ;;  %v8738_v0 = vmax.f32 %v8730_v27, 0.0  ;;  %v14733_v35 = vld [vmem:[%s19638_s7 + $0x48] sm:$0xff]  }
 0x577   :  { %8745 = vst [vmem:[#allocation4 + $0x30] sm:$0xff] %v8737_v44  ;;  %8744 = vst [vmem:[#allocation4 + $0x28] sm:$0xff] %v8736_v60  ;;  %v14734_v6 = vld [vmem:[%s19638_s7 + $0xc8] sm:$0xff]  }
 0x578   :  { %8746 = vst [vmem:[#allocation4 + $0x38] sm:$0xff] %v8738_v0 }
 0x57d   :  { %v8865_v10 = vld [vmem:[#allocation4 + $0x1] ss:$8 sm:$0xf]  ;;  %v18854_v28 = vld [vmem:[#allocation4] ss:$8 sm:$0xf] }
 0x57e   :  { %v8877_v13 = vrot.slane %v8865_v10, %v19700_v3  ;;  %v8885_v14 = vrot.slane %v8865_v10, %v19701_v8  ;;  %v8873_v62 = vrot.slane %v8865_v10, %v19698_v56  ;;  %v8881_v9 = vrot.slane %v8865_v10, %v19699_v42  ;;  %v14735_v10 = vld [vmem:[%s19638_s7 + $0x8] sm:$0xff]  }
 0x57f   :  { %v8867_v50 = vld [vmem:[#allocation4 + $0x21] ss:$8 sm:$0xf]  ;;  %v8759_v30 = vrot.slane %v18854_v28, %v19700_v3  ;;  %v18866_v20 = vld [vmem:[#allocation4 + $0x20] ss:$8 sm:$0xf]  ;;  %v8767_v23 = vrot.slane %v18854_v28, %v19701_v8 }
 0x580   :  { %v8893_v63 = vrot.slane %v8867_v50, %v19700_v3  ;;  %v8911_v2 = vpack.c.bf16 %v8877_v13, %v8877_v13  ;;  %v8901_v52 = vrot.slane %v8867_v50, %v19701_v8  ;;  %v8913_v40 = vpack.c.bf16 %v8885_v14, %v8885_v14  ;;  %v14736_v14 = vld [vmem:[%s19638_s7 + $0x88] sm:$0xff]  }
 0x581   :  { %v8889_v4 = vrot.slane %v8867_v50, %v19698_v56  ;;  %v8910_v16 = vpack.c.bf16 %v8873_v62, %v8873_v62  ;;  %v8897_v49 = vrot.slane %v8867_v50, %v19699_v42  ;;  %v8912_v55 = vpack.c.bf16 %v8881_v9, %v8881_v9  ;;  %v14737_v62 = vld [vmem:[%s19638_s7 + $0x50] sm:$0xff]  }
 0x582   :  { %v8915_v25 = vpack.c.bf16 %v8893_v63, %v8893_v63  ;;  %v8917_v37 = vpack.c.bf16 %v8901_v52, %v8901_v52  ;;  %v8992_v15 = vunpack.c.l.b16 %v8911_v2  ;;  %v8994_v31 = vunpack.c.l.b16 %v8913_v40  ;;  %v14738_v50 = vld [vmem:[%s19638_s7 + $0xd0] sm:$0xff]   ;;  %v14741_v2 = vld [vmem:[%s19638_s7 + $0x58] sm:$0xff]  }
 0x583   :  { %v8914_v45 = vpack.c.bf16 %v8889_v4, %v8889_v4  ;;  %v8916_v26 = vpack.c.bf16 %v8897_v49, %v8897_v49  ;;  %v8775_v22 = vrot.slane %v18866_v20, %v19700_v3  ;;  %v8793_v18 = vpack.c.bf16 %v8759_v30, %v8759_v30  ;;  %v14739_v30 = vld [vmem:[%s19638_s7 + $0x10] sm:$0xff]   ;;  %v14742_v52 = vld [vmem:[%s19638_s7 + $0xd8] sm:$0xff]  }
 0x584   :  { %v8996_v24 = vunpack.c.l.b16 %v8915_v25  ;;  %v8998_v21 = vunpack.c.l.b16 %v8917_v37  ;;  %v8991_v41 = vunpack.c.l.b16 %v8910_v16  ;;  %v8783_v47 = vrot.slane %v18866_v20, %v19701_v8  ;;  %v14740_v63 = vld [vmem:[%s19638_s7 + $0x90] sm:$0xff]   ;;  %v14743_v40 = vld [vmem:[%s19638_s7 + $0x18] sm:$0xff]   ;;  %v14745_v16 = vld [vmem:[%s19638_s7 + $0x60] sm:$0xff]  }
 0x585   :  { %v8995_v1 = vunpack.c.l.b16 %v8914_v45  ;;  %v8997_v32 = vunpack.c.l.b16 %v8916_v26  ;;  %v8993_v36 = vunpack.c.l.b16 %v8912_v55  ;;  %v8797_v43 = vpack.c.bf16 %v8775_v22, %v8775_v22  ;;  %v14744_v4 = vld [vmem:[%s19638_s7 + $0x98] sm:$0xff]   ;;  %v14746_v25 = vld [vmem:[%s19638_s7 + $0xe0] sm:$0xff]   ;;  %v14749_v45 = vld [vmem:[%s19638_s7 + $0x68] sm:$0xff]  }
 0x586   :  { %v9002_v29 = vrot.slane %v8996_v24, 7  ;;  %v9006_v7 = vrot.slane %v8998_v21, 7  ;;  %v8795_v38 = vpack.c.bf16 %v8767_v23, %v8767_v23  ;;  %v8799_v33 = vpack.c.bf16 %v8783_v47, %v8783_v47  ;;  %v18925_v49 = vld [vmem:[#allocation4 + $0x22] ss:$8 sm:$0xf] }
 0x587   :  { %v8999_v39 = vrot.slane %v8995_v1, 7  ;;  %v9004_v19 = vrot.slane %v8997_v32, 7  ;;  %v9297_v59 = vunpack.c.l.b16 %v8793_v18  ;;  %v9301_v58 = vunpack.c.l.b16 %v8797_v43  ;;  %v14747_v23 = vld [vmem:[%s19638_s7 + $0x20] sm:$0xff]   ;;  %v14750_v26 = vld [vmem:[%s19638_s7 + $0xe8] sm:$0xff]   ;;  %v14753_v47 = vld [vmem:[%s19638_s7 + $0x70] sm:$0xff]  }
 0x588   :  { %v9003_v5 = vsel %vm9000_vm1, %v9002_v29, %v8992_v15  ;;  %v9007_v46 = vsel %vm9000_vm1, %v9006_v7, %v8994_v31  ;;  %v9303_v11 = vunpack.c.l.b16 %v8799_v33  ;;  %v9299_v44 = vunpack.c.l.b16 %v8795_v38  ;;  %v14748_v31 = vld [vmem:[%s19638_s7 + $0xa0] sm:$0xff]   ;;  %v14751_v18 = vld [vmem:[%s19638_s7 + $0x28] sm:$0xff]   ;;  %v14755_v33 = vld [vmem:[%s19638_s7 + $0x30] sm:$0xff]  }
 0x589   :  { %v9009_v17 = vpack.c.b16 %v9003_v5, %v9003_v5  ;;  %v9011_v48 = vpack.c.b16 %v9007_v46, %v9007_v46  ;;  %v9001_v54 = vsel %vm9000_vm1, %v8999_v39, %v8991_v41  ;;  %v9005_v61 = vsel %vm9000_vm1, %v9004_v19, %v8993_v36  ;;  %v18950_v22 = vld [vmem:[#allocation4 + $0x2] ss:$8 sm:$0xf] }
 0x58a   :  { %v9008_v53 = vpack.c.b16 %v9001_v54, %v9001_v54  ;;  %v9010_v57 = vpack.c.b16 %v9005_v61, %v9005_v61  ;;  %v9306_v51 = vrot.slane %v9301_v58, 7  ;;  %v9310_v60 = vrot.slane %v9303_v11, 7  ;;  %v14752_v32 = vld [vmem:[%s19638_s7 + $0xa8] sm:$0xff]   ;;  %v14754_v36 = vld [vmem:[%s19638_s7 + $0xf0] sm:$0xff]   ;;  %v14760_v11 = vld [vmem:[%s19638_s7 + $0xb8] sm:$0xff]  }
 0x58b   :  { %9240 = vmatprep.mubr.bf16.mxu0 %v9009_v17  ;;  %9280 = vmatprep.mubr.bf16.mxu1 %v9011_v48  ;;  %v8771_v37 = vrot.slane %v18866_v20, %v19698_v56  ;;  %v8779_v55 = vrot.slane %v18866_v20, %v19699_v42  ;;  %v9621_v15 = vrot.slane %v18925_v49, %v19700_v3  ;;  %v14756_v46 = vld [vmem:[%s19638_s7 + $0xb0] sm:$0xff]   ;;  %v14758_v48 = vld [vmem:[%s19638_s7 + $0xf8] sm:$0xff]  }
 0x58c   :  { %9241 = vmatmul.mubr.bf16.vlgmr.msra.gmra.mrb[48].mxu0 %v9008_v53  ;;  %9281 = vmatmul.mubr.bf16.vlgmr.msra.gmra.mrb[48].mxu1 %v9010_v57  ;;  %v9307_v27 = vsel %vm9000_vm1, %v9306_v51, %v9297_v59  ;;  %v9311_v13 = vsel %vm9000_vm1, %v9310_v60, %v9299_v44  ;;  %v9629_v20 = vrot.slane %v18925_v49, %v19701_v8  ;;  %v14757_v59 = vld [vmem:[%s19638_s7 + $0x78] sm:$0xff]   ;;  %v14762_v60 = vld [vmem:[%s19638_s7 + $0x2c0] sm:$0xff]  }
 0x58d   :  { %14113 = vmatpush3.bf16.msra.mxu0 %v14731_v34  ;;  %14135 = vmatpush3.bf16.msra.mxu1 %v14732_v12  ;;  %v9313_v0 = vpack.c.b16 %v9307_v27, %v9307_v27  ;;  %v9315_v9 = vpack.c.b16 %v9311_v13, %v9311_v13  ;;  %v8796_v24 = vpack.c.bf16 %v8771_v37, %v8771_v37  ;;  %v14759_v53 = vld [vmem:[%s19638_s7 + $0x38] sm:$0xff]   ;;  %v14769_v37 = vld [vmem:[%s19638_s7 + $0x250] sm:$0xff]  }
 0x58e   :  { %14114 = vmatprep.subr.bf16.mxu0 %v14733_v35  ;;  %14136 = vmatprep.subr.bf16.mxu1 %v14734_v6  ;;  %v8798_v21 = vpack.c.bf16 %v8779_v55, %v8779_v55  ;;  %v8755_v41 = vrot.slane %v18854_v28, %v19698_v56  ;;  %v9643_v1 = vpack.c.bf16 %v9621_v15, %v9621_v15  ;;  %v14761_v6 = vld [vmem:[%s19638_s7 + $0x240] sm:$0xff]   ;;  %v14770_v55 = vld [vmem:[%s19638_s7 + $0x2d0] sm:$0xff]  }
 0x58f   :  { %9544 = vmatprep.mubr.bf16.mxu0 %v9313_v0  ;;  %9584 = vmatprep.mubr.bf16.mxu1 %v9315_v9  ;;  %v8763_v29 = vrot.slane %v18854_v28, %v19699_v42  ;;  %v9645_v7 = vpack.c.bf16 %v9629_v20, %v9629_v20  ;;  %v9300_v43 = vunpack.c.l.b16 %v8796_v24  ;;  %v9605_v39 = vrot.slane %v18950_v22, %v19700_v3  ;;  %v14772_v15 = vld [vmem:[%s19638_s7 + $0x290] sm:$0xff]   ;;  %v14775_v20 = vld [vmem:[%s19638_s7 + $0x218] sm:$0xff]   ;;  %v14777_v24 = vld [vmem:[%s19638_s7 + $0x260] sm:$0xff]  }
 0x590   :  { %v9302_v19 = vunpack.c.l.b16 %v8798_v21  ;;  %v9613_v38 = vrot.slane %v18950_v22, %v19701_v8  ;;  %v8792_v28 = vpack.c.bf16 %v8755_v41, %v8755_v41  ;;  %v9724_v5 = vunpack.c.l.b16 %v9643_v1  ;;  %v19045_v21 = vld [vmem:[#allocation4 + $0x23] ss:$8 sm:$0xf] }
 0x591   :  { %14115 = vmatpush3.bf16.msra.mxu0 %v14735_v10  ;;  %14137 = vmatpush3.bf16.msra.mxu1 %v14736_v14  ;;  %v8794_v58 = vpack.c.bf16 %v8763_v29, %v8763_v29  ;;  %v9726_v17 = vunpack.c.l.b16 %v9645_v7  ;;  %v9304_v54 = vrot.slane %v9300_v43, 7  ;;  %v9639_v61 = vpack.c.bf16 %v9605_v39, %v9605_v39  ;;  %v14763_v14 = vld [vmem:[%s19638_s7 + $0x200] sm:$0xff]   ;;  %v14781_v7 = vld [vmem:[%s19638_s7 + $0x268] sm:$0xff]  }
 0x592   :  { %14116 = vmatprep.subr.bf16.mxu0 %v14737_v62  ;;  %14138 = vmatprep.subr.bf16.mxu1 %v14738_v50  ;;  %v9308_v34 = vrot.slane %v9302_v19, 7  ;;  %v9641_v12 = vpack.c.bf16 %v9613_v38, %v9613_v38  ;;  %v9296_v57 = vunpack.c.l.b16 %v8792_v28  ;;  %v9729_v51 = vrot.slane %v9724_v5, 7  ;;  %v14764_v50 = vld [vmem:[%s19638_s7 + $0x280] sm:$0xff]   ;;  %v14783_v38 = vld [vmem:[%s19638_s7 + $0x228] sm:$0xff]  }
 0x593   :  { %v9298_v35 = vunpack.c.l.b16 %v8794_v58  ;;  %v9733_v27 = vrot.slane %v9726_v17, 7  ;;  %v9720_v0 = vunpack.c.l.b16 %v9639_v61  ;;  %v9617_v41 = vrot.slane %v18925_v49, %v19698_v56  ;;  %v14780_v29 = vld [vmem:[%s19638_s7 + $0x2a0] sm:$0xff]   ;;  %v14784_v5 = vld [vmem:[%s19638_s7 + $0x2a8] sm:$0xff]   ;;  %v14786_v17 = vld [vmem:[%s19638_s7 + $0x2f0] sm:$0xff]  }
 0x594   :  { %v9305_v44 = vsel %vm9000_vm1, %v9304_v54, %v9296_v57  ;;  %v9722_v13 = vunpack.c.l.b16 %v9641_v12  ;;  %v9625_v1 = vrot.slane %v18925_v49, %v19699_v42  ;;  %v10053_v49 = vrot.slane %v19045_v21, %v19701_v8  ;;  %v19070_v19 = vld [vmem:[#allocation4 + $0x3] ss:$8 sm:$0xf] }
 0x595   :  { %14117 = vmatpush3.bf16.msra.mxu0 %v14739_v30  ;;  %14139 = vmatpush3.bf16.msra.mxu1 %v14740_v63  ;;  %v9309_v10 = vsel %vm9000_vm1, %v9308_v34, %v9298_v35  ;;  %v9730_v62 = vsel %vm9000_vm1, %v9729_v51, %v9720_v0  ;;  %v9312_v9 = vpack.c.b16 %v9305_v44, %v9305_v44  ;;  %v14787_v12 = vld [vmem:[%s19638_s7 + $0x230] sm:$0xff]   ;;  %v14789_v51 = vld [vmem:[%s19638_s7 + $0x278] sm:$0xff]  }
 0x596   :  { %14118 = vmatprep.subr.bf16.mxu0 %v14741_v2  ;;  %14140 = vmatprep.subr.bf16.mxu1 %v14742_v52  ;;  %v9734_v30 = vsel %vm9000_vm1, %v9733_v27, %v9722_v13  ;;  %v9314_v63 = vpack.c.b16 %v9309_v10, %v9309_v10  ;;  %v14765_v2 = vld [vmem:[%s19638_s7 + $0x248] sm:$0xff]   ;;  %v9736_v52 = vpack.c.b16 %v9730_v62, %v9730_v62  ;;  %v14788_v57 = vld [vmem:[%s19638_s7 + $0x2b0] sm:$0xff]   ;;  %v14791_v10 = vld [vmem:[%s19638_s7 + $0x238] sm:$0xff]  }
 0x597   :  { %v9642_v43 = vpack.c.bf16 %v9617_v41, %v9617_v41  ;;  %v9644_v39 = vpack.c.bf16 %v9625_v1, %v9625_v1  ;;  %v10069_v58 = vpack.c.bf16 %v10053_v49, %v10053_v49  ;;  %v10029_v54 = vrot.slane %v19070_v19, %v19700_v3  ;;  %v14792_v62 = vld [vmem:[%s19638_s7 + $0x2b8] sm:$0xff]   ;;  %v14801_v41 = vld [vmem:[%s19638_s7 + $0x350] sm:$0xff]  }
 0x598   :  { %v10037_v34 = vrot.slane %v19070_v19, %v19701_v8  ;;  %v14802_v1 = vld [vmem:[%s19638_s7 + $0x3d0] sm:$0xff]   ;;  %v14807_v49 = vld [vmem:[%s19638_s7 + $0x318] sm:$0xff]  }
 0x599   :  { %14119 = vmatpush3.bf16.msra.mxu0 %v14743_v40  ;;  %14141 = vmatpush3.bf16.msra.mxu1 %v14744_v4  ;;  %v14766_v40 = vld [vmem:[%s19638_s7 + $0x2c8] sm:$0xff]   ;;  %v9738_v4 = vpack.c.b16 %v9734_v30, %v9734_v30  ;;  %v9725_v61 = vunpack.c.l.b16 %v9644_v39  ;;  %v10150_v35 = vunpack.c.l.b16 %v10069_v58  ;;  %v10063_v44 = vpack.c.bf16 %v10029_v54, %v10029_v54 }
 0x59a   :  { %14120 = vmatprep.subr.bf16.mxu0 %v14745_v16  ;;  %14142 = vmatprep.subr.bf16.mxu1 %v14746_v25  ;;  %v14767_v16 = vld [vmem:[%s19638_s7 + $0x208] sm:$0xff]   ;;  %v10065_v0 = vpack.c.bf16 %v10037_v34, %v10037_v34 }
 0x59b   :  { %v14768_v25 = vld [vmem:[%s19638_s7 + $0x288] sm:$0xff]   ;;  %v10157_v30 = vrot.slane %v10150_v35, 7  ;;  %v14818_v35 = vld [vmem:[%s19638_s7 + $0x3f0] sm:$0xff]  }
 0x59c   :  { %v19165_v39 = vld [vmem:[#allocation4 + $0x24] ss:$8 sm:$0xf] }
 0x59d   :  { %14121 = vmatpush3.bf16.msra.mxu0 %v14747_v23  ;;  %14143 = vmatpush3.bf16.msra.mxu1 %v14748_v31  ;;  %v14771_v23 = vld [vmem:[%s19638_s7 + $0x210] sm:$0xff]   ;;  %v14773_v31 = vld [vmem:[%s19638_s7 + $0x258] sm:$0xff]   ;;  %v14813_v58 = vld [vmem:[%s19638_s7 + $0x368] sm:$0xff]  }
 0x59e   :  { %14122 = vmatprep.subr.bf16.mxu0 %v14749_v45  ;;  %14144 = vmatprep.subr.bf16.mxu1 %v14750_v26  ;;  %v14774_v45 = vld [vmem:[%s19638_s7 + $0x2d8] sm:$0xff]   ;;  %v14815_v34 = vld [vmem:[%s19638_s7 + $0x328] sm:$0xff]  }
 0x59f   :  { %v14776_v26 = vld [vmem:[%s19638_s7 + $0x298] sm:$0xff]  }
 0x5a1   :  { %14123 = vmatpush3.bf16.msra.mxu0 %v14751_v18  ;;  %14145 = vmatpush3.bf16.msra.mxu1 %v14752_v32  ;;  %v14778_v18 = vld [vmem:[%s19638_s7 + $0x2e0] sm:$0xff]  }
 0x5a2   :  { %14124 = vmatprep.subr.bf16.mxu0 %v14753_v47  ;;  %14146 = vmatprep.subr.bf16.mxu1 %v14754_v36  ;;  %v14779_v32 = vld [vmem:[%s19638_s7 + $0x220] sm:$0xff]   ;;  %v10045_v47 = vrot.slane %v19045_v21, %v19700_v3  ;;  %v14782_v36 = vld [vmem:[%s19638_s7 + $0x2e8] sm:$0xff]  }
 0x5a4   :  { %v10067_v28 = vpack.c.bf16 %v10045_v47, %v10045_v47  ;;  %v14804_v47 = vld [vmem:[%s19638_s7 + $0x390] sm:$0xff]  }
 0x5a5   :  { %14125 = vmatpush3.bf16.msra.mxu0 %v14755_v33  ;;  %14147 = vmatpush3.bf16.msra.mxu1 %v14756_v46  ;;  %v9601_v33 = vrot.slane %v18950_v22, %v19698_v56  ;;  %v14785_v46 = vld [vmem:[%s19638_s7 + $0x270] sm:$0xff]  }
 0x5a6   :  { %14126 = vmatprep.subr.bf16.mxu0 %v14757_v59  ;;  %14148 = vmatprep.subr.bf16.mxu1 %v14758_v48  ;;  %v9609_v59 = vrot.slane %v18950_v22, %v19699_v42  ;;  %v9723_v48 = vunpack.c.l.b16 %v9642_v43  ;;  %v14809_v43 = vld [vmem:[%s19638_s7 + $0x360] sm:$0xff]  }
 0x5a7   :  { %v9638_v22 = vpack.c.bf16 %v9601_v33, %v9601_v33  ;;  %v10041_v33 = vrot.slane %v19045_v21, %v19698_v56 }
 0x5a8   :  { %v9727_v27 = vrot.slane %v9723_v48, 7 }
 0x5a9   :  { %14127 = vmatpush3.bf16.msra.mxu0 %v14759_v53  ;;  %14149 = vmatpush3.bf16.msra.mxu1 %v14760_v11  ;;  %v10148_v53 = vunpack.c.l.b16 %v10067_v28  ;;  %v9640_v11 = vpack.c.bf16 %v9609_v59, %v9609_v59  ;;  %v9719_v13 = vunpack.c.l.b16 %v9638_v22  ;;  %v10049_v28 = vrot.slane %v19045_v21, %v19699_v42  ;;  %v14812_v59 = vld [vmem:[%s19638_s7 + $0x3a0] sm:$0xff]  }
 0x5aa   :  { %14156 = vmatprep.subr.bf16.mxu0 %v14761_v6  ;;  %14178 = vmatprep.subr.bf16.mxu1 %v14762_v60  ;;  %v14790_v6 = vld [vmem:[%s19638_s7 + $0x2f8] sm:$0xff]   ;;  %v9731_v60 = vrot.slane %v9725_v61, 7  ;;  %v10477_v21 = vrot.slane %v19165_v39, %v19701_v8  ;;  %v10066_v48 = vpack.c.bf16 %v10041_v33, %v10041_v33  ;;  %v14833_v33 = vld [vmem:[%s19638_s7 + $0x450] sm:$0xff]  }
 0x5ab   :  { %v10068_v54 = vpack.c.bf16 %v10049_v28, %v10049_v28  ;;  %v19190_v61 = vld [vmem:[#allocation4 + $0x4] ss:$8 sm:$0xf] }
 0x5ac   :  { %9545 = vmatmul.mubr.bf16.vlgmr.msra.gmra.mrb[52].mxu0 %v9312_v9  ;;  %9585 = vmatmul.mubr.bf16.vlgmr.msra.gmra.mrb[52].mxu1 %v9314_v63  ;;  %v9721_v9 = vunpack.c.l.b16 %v9640_v11  ;;  %v9728_v63 = vsel %vm9000_vm1, %v9727_v27, %v9719_v13  ;;  %v10493_v11 = vpack.c.bf16 %v10477_v21, %v10477_v21  ;;  %v10453_v27 = vrot.slane %v19190_v61, %v19700_v3  ;;  %v14820_v13 = vld [vmem:[%s19638_s7 + $0x3b0] sm:$0xff]   ;;  %v14839_v21 = vld [vmem:[%s19638_s7 + $0x418] sm:$0xff]  }
 0x5ad   :  { %14157 = vmatpush3.bf16.msra.mxu0 %v14763_v14  ;;  %9967 = vmatprep.mubr.bf16.mxu0 %v9736_v52  ;;  %v10153_v14 = vrot.slane %v10148_v53, 7  ;;  %v10144_v52 = vunpack.c.l.b16 %v10063_v44  ;;  %v14816_v53 = vld [vmem:[%s19638_s7 + $0x3a8] sm:$0xff]   ;;  %v10149_v44 = vunpack.c.l.b16 %v10068_v54  ;;  %v14834_v28 = vld [vmem:[%s19638_s7 + $0x4d0] sm:$0xff]  }
 0x5ae   :  { %14179 = vmatpush3.bf16.msra.mxu1 %v14764_v50  ;;  %10007 = vmatprep.mubr.bf16.mxu1 %v9738_v4  ;;  %v14793_v50 = vld [vmem:[%s19638_s7 + $0x340] sm:$0xff]   ;;  %v10146_v4 = vunpack.c.l.b16 %v10065_v0  ;;  %v14819_v0 = vld [vmem:[%s19638_s7 + $0x330] sm:$0xff]  }
 0x5af   :  { %14158 = vmatprep.subr.bf16.mxu0 %v14765_v2  ;;  %14180 = vmatprep.subr.bf16.mxu1 %v14766_v40  ;;  %v14794_v2 = vld [vmem:[%s19638_s7 + $0x3c0] sm:$0xff]   ;;  %v9732_v40 = vsel %vm9000_vm1, %v9731_v60, %v9721_v9  ;;  %v10461_v60 = vrot.slane %v19190_v61, %v19701_v8  ;;  %v10574_v9 = vunpack.c.l.b16 %v10493_v11  ;;  %v14845_v11 = vld [vmem:[%s19638_s7 + $0x468] sm:$0xff]  }
 0x5b0   :  { %v19285_v54 = vld [vmem:[#allocation4 + $0x25] ss:$8 sm:$0xf] }
 0x5b1   :  { %14159 = vmatpush3.bf16.msra.mxu0 %v14767_v16  ;;  %v14795_v16 = vld [vmem:[%s19638_s7 + $0x300] sm:$0xff]  }
 0x5b2   :  { %14181 = vmatpush3.bf16.msra.mxu1 %v14768_v25  ;;  %14160 = vmatprep.subr.bf16.mxu0 %v14769_v37  ;;  %v10154_v25 = vsel %vm9000_vm1, %v10153_v14, %v10144_v52  ;;  %v9735_v37 = vpack.c.b16 %v9728_v63, %v9728_v63  ;;  %v14821_v14 = vld [vmem:[%s19638_s7 + $0x378] sm:$0xff]   ;;  %v10487_v63 = vpack.c.bf16 %v10453_v27, %v10453_v27 }
 0x5b3   :  { %14182 = vmatprep.subr.bf16.mxu1 %v14770_v55  ;;  %v14796_v55 = vld [vmem:[%s19638_s7 + $0x380] sm:$0xff]   ;;  %v10489_v52 = vpack.c.bf16 %v10461_v60, %v10461_v60  ;;  %v14847_v60 = vld [vmem:[%s19638_s7 + $0x428] sm:$0xff]  }
 0x5b5   :  { %14161 = vmatpush3.bf16.msra.mxu0 %v14771_v23  ;;  %v10158_v23 = vsel %vm9000_vm1, %v10157_v30, %v10146_v4 }
 0x5b6   :  { %14183 = vmatpush3.bf16.msra.mxu1 %v14772_v15  ;;  %14162 = vmatprep.subr.bf16.mxu0 %v14773_v31  ;;  %v9737_v15 = vpack.c.b16 %v9732_v40, %v9732_v40  ;;  %v14797_v31 = vld [vmem:[%s19638_s7 + $0x348] sm:$0xff]   ;;  %v14823_v40 = vld [vmem:[%s19638_s7 + $0x338] sm:$0xff]  }
 0x5b7   :  { %14184 = vmatprep.subr.bf16.mxu1 %v14774_v45  ;;  %v10160_v45 = vpack.c.b16 %v10154_v25, %v10154_v25  ;;  %v14824_v25 = vld [vmem:[%s19638_s7 + $0x3b8] sm:$0xff]  }
 0x5b9   :  { %14163 = vmatpush3.bf16.msra.mxu0 %v14775_v20  ;;  %v14798_v20 = vld [vmem:[%s19638_s7 + $0x3c8] sm:$0xff]  }
 0x5ba   :  { %14185 = vmatpush3.bf16.msra.mxu1 %v14776_v26  ;;  %14164 = vmatprep.subr.bf16.mxu0 %v14777_v24  ;;  %v10162_v26 = vpack.c.b16 %v10158_v23, %v10158_v23  ;;  %v14799_v24 = vld [vmem:[%s19638_s7 + $0x308] sm:$0xff]   ;;  %v10581_v23 = vrot.slane %v10574_v9, 7  ;;  %v14850_v9 = vld [vmem:[%s19638_s7 + $0x4f0] sm:$0xff]  }
 0x5bb   :  { %14186 = vmatprep.subr.bf16.mxu1 %v14778_v18  ;;  %v14800_v18 = vld [vmem:[%s19638_s7 + $0x388] sm:$0xff]  }
 0x5bd   :  { %14165 = vmatpush3.bf16.msra.mxu0 %v14779_v32  ;;  %v14803_v32 = vld [vmem:[%s19638_s7 + $0x310] sm:$0xff]  }
 0x5be   :  { %14187 = vmatpush3.bf16.msra.mxu1 %v14780_v29  ;;  %14166 = vmatprep.subr.bf16.mxu0 %v14781_v7  ;;  %v14805_v29 = vld [vmem:[%s19638_s7 + $0x358] sm:$0xff]  }
 0x5bf   :  { %14188 = vmatprep.subr.bf16.mxu1 %v14782_v36  ;;  %v14806_v7 = vld [vmem:[%s19638_s7 + $0x3d8] sm:$0xff]  }
 0x5c0   :  { %v14808_v36 = vld [vmem:[%s19638_s7 + $0x398] sm:$0xff]  }
 0x5c1   :  { %14167 = vmatpush3.bf16.msra.mxu0 %v14783_v38  ;;  %v14810_v38 = vld [vmem:[%s19638_s7 + $0x3e0] sm:$0xff]  }
 0x5c2   :  { %14189 = vmatpush3.bf16.msra.mxu1 %v14784_v5  ;;  %14168 = vmatprep.subr.bf16.mxu0 %v14785_v46  ;;  %v14811_v5 = vld [vmem:[%s19638_s7 + $0x320] sm:$0xff]   ;;  %v10469_v46 = vrot.slane %v19165_v39, %v19700_v3 }
 0x5c3   :  { %14190 = vmatprep.subr.bf16.mxu1 %v14786_v17  ;;  %v14814_v17 = vld [vmem:[%s19638_s7 + $0x3e8] sm:$0xff]  }
 0x5c4   :  { %v10491_v22 = vpack.c.bf16 %v10469_v46, %v10469_v46  ;;  %v14836_v46 = vld [vmem:[%s19638_s7 + $0x490] sm:$0xff]  }
 0x5c5   :  { %14169 = vmatpush3.bf16.msra.mxu0 %v14787_v12  ;;  %v10025_v12 = vrot.slane %v19070_v19, %v19698_v56 }
 0x5c6   :  { %14191 = vmatpush3.bf16.msra.mxu1 %v14788_v57  ;;  %14170 = vmatprep.subr.bf16.mxu0 %v14789_v51  ;;  %v14817_v57 = vld [vmem:[%s19638_s7 + $0x370] sm:$0xff]   ;;  %v10033_v51 = vrot.slane %v19070_v19, %v19699_v42 }
 0x5c7   :  { %14192 = vmatprep.subr.bf16.mxu1 %v14790_v6  ;;  %v10147_v6 = vunpack.c.l.b16 %v10066_v48  ;;  %v10062_v19 = vpack.c.bf16 %v10025_v12, %v10025_v12  ;;  %v14841_v48 = vld [vmem:[%s19638_s7 + $0x460] sm:$0xff]   ;;  %v10465_v12 = vrot.slane %v19165_v39, %v19698_v56 }
 0x5c9   :  { %14171 = vmatpush3.bf16.msra.mxu0 %v14791_v10  ;;  %v10572_v10 = vunpack.c.l.b16 %v10491_v22  ;;  %v10151_v30 = vrot.slane %v10147_v6, 7  ;;  %v10143_v4 = vunpack.c.l.b16 %v10062_v19  ;;  %v10473_v22 = vrot.slane %v19165_v39, %v19699_v42 }
 0x5ca   :  { %14193 = vmatpush3.bf16.msra.mxu1 %v14792_v62  ;;  %14200 = vmatprep.subr.bf16.mxu0 %v14793_v50  ;;  %v10064_v62 = vpack.c.bf16 %v10033_v51, %v10033_v51  ;;  %v14822_v50 = vld [vmem:[%s19638_s7 + $0x3f8] sm:$0xff]   ;;  %v14844_v51 = vld [vmem:[%s19638_s7 + $0x4a0] sm:$0xff]   ;;  %v10901_v39 = vrot.slane %v19285_v54, %v19701_v8  ;;  %v10490_v6 = vpack.c.bf16 %v10465_v12, %v10465_v12  ;;  %v14865_v12 = vld [vmem:[%s19638_s7 + $0x550] sm:$0xff]  }
 0x5cb   :  { %14222 = vmatprep.subr.bf16.mxu1 %v14794_v2  ;;  %v10155_v2 = vrot.slane %v10149_v44, 7  ;;  %v10492_v27 = vpack.c.bf16 %v10473_v22, %v10473_v22  ;;  %v19310_v44 = vld [vmem:[#allocation4 + $0x5] ss:$8 sm:$0xf] }
 0x5cc   :  { %9968 = vmatmul.mubr.bf16.vlgmr.msra.gmra.mrb[56].mxu0 %v9735_v37  ;;  %v10145_v37 = vunpack.c.l.b16 %v10064_v62  ;;  %v10917_v62 = vpack.c.bf16 %v10901_v39, %v10901_v39  ;;  %v14866_v22 = vld [vmem:[%s19638_s7 + $0x5d0] sm:$0xff]   ;;  %v14871_v39 = vld [vmem:[%s19638_s7 + $0x518] sm:$0xff]  }
 0x5cd   :  { %10008 = vmatmul.mubr.bf16.vlgmr.msra.gmra.mrb[56].mxu1 %v9737_v15  ;;  %14201 = vmatpush3.bf16.msra.mxu0 %v14795_v16  ;;  %v10577_v16 = vrot.slane %v10572_v10, 7  ;;  %v10152_v15 = vsel %vm9000_vm1, %v10151_v30, %v10143_v4  ;;  %v14848_v10 = vld [vmem:[%s19638_s7 + $0x4a8] sm:$0xff]   ;;  %v10877_v30 = vrot.slane %v19310_v44, %v19700_v3  ;;  %v14852_v4 = vld [vmem:[%s19638_s7 + $0x4b0] sm:$0xff]  }
 0x5ce   :  { %10391 = vmatprep.mubr.bf16.mxu0 %v10160_v45  ;;  %14223 = vmatpush3.bf16.msra.mxu1 %v14796_v55  ;;  %v14825_v55 = vld [vmem:[%s19638_s7 + $0x440] sm:$0xff]   ;;  %v10568_v45 = vunpack.c.l.b16 %v10487_v63  ;;  %v10573_v63 = vunpack.c.l.b16 %v10492_v27 }
 0x5cf   :  { %10431 = vmatprep.mubr.bf16.mxu1 %v10162_v26  ;;  %14202 = vmatprep.subr.bf16.mxu0 %v14797_v31  ;;  %v14826_v31 = vld [vmem:[%s19638_s7 + $0x4c0] sm:$0xff]   ;;  %v10570_v26 = vunpack.c.l.b16 %v10489_v52  ;;  %v14851_v52 = vld [vmem:[%s19638_s7 + $0x430] sm:$0xff]  }
 0x5d0   :  { %14224 = vmatprep.subr.bf16.mxu1 %v14798_v20  ;;  %v10156_v20 = vsel %vm9000_vm1, %v10155_v2, %v10145_v37  ;;  %v10885_v2 = vrot.slane %v19310_v44, %v19701_v8  ;;  %v10998_v37 = vunpack.c.l.b16 %v10917_v62  ;;  %v19405_v27 = vld [vmem:[#allocation4 + $0x26] ss:$8 sm:$0xf] }
 0x5d1   :  { %14203 = vmatpush3.bf16.msra.mxu0 %v14799_v24  ;;  %v14827_v24 = vld [vmem:[%s19638_s7 + $0x400] sm:$0xff]   ;;  %v14877_v62 = vld [vmem:[%s19638_s7 + $0x568] sm:$0xff]  }
 0x5d2   :  { %14225 = vmatpush3.bf16.msra.mxu1 %v14800_v18  ;;  %14204 = vmatprep.subr.bf16.mxu0 %v14801_v41  ;;  %v10578_v18 = vsel %vm9000_vm1, %v10577_v16, %v10568_v45  ;;  %v10159_v41 = vpack.c.b16 %v10152_v15, %v10152_v15  ;;  %v14853_v16 = vld [vmem:[%s19638_s7 + $0x478] sm:$0xff]   ;;  %v10911_v15 = vpack.c.bf16 %v10877_v30, %v10877_v30 }
 0x5d3   :  { %14226 = vmatprep.subr.bf16.mxu1 %v14802_v1  ;;  %v14828_v1 = vld [vmem:[%s19638_s7 + $0x480] sm:$0xff]   ;;  %v10913_v45 = vpack.c.bf16 %v10885_v2, %v10885_v2  ;;  %v14879_v2 = vld [vmem:[%s19638_s7 + $0x528] sm:$0xff]  }
 0x5d5   :  { %14205 = vmatpush3.bf16.msra.mxu0 %v14803_v32  ;;  %v10582_v32 = vsel %vm9000_vm1, %v10581_v23, %v10570_v26 }
 0x5d6   :  { %14227 = vmatpush3.bf16.msra.mxu1 %v14804_v47  ;;  %14206 = vmatprep.subr.bf16.mxu0 %v14805_v29  ;;  %v10161_v47 = vpack.c.b16 %v10156_v20, %v10156_v20  ;;  %v14829_v29 = vld [vmem:[%s19638_s7 + $0x448] sm:$0xff]   ;;  %v14855_v20 = vld [vmem:[%s19638_s7 + $0x438] sm:$0xff]  }
 0x5d7   :  { %14228 = vmatprep.subr.bf16.mxu1 %v14806_v7  ;;  %v10584_v7 = vpack.c.b16 %v10578_v18, %v10578_v18  ;;  %v14856_v18 = vld [vmem:[%s19638_s7 + $0x4b8] sm:$0xff]  }
 0x5d9   :  { %14207 = vmatpush3.bf16.msra.mxu0 %v14807_v49  ;;  %v14830_v49 = vld [vmem:[%s19638_s7 + $0x4c8] sm:$0xff]  }
 0x5da   :  { %14229 = vmatpush3.bf16.msra.mxu1 %v14808_v36  ;;  %14208 = vmatprep.subr.bf16.mxu0 %v14809_v43  ;;  %v10586_v36 = vpack.c.b16 %v10582_v32, %v10582_v32  ;;  %v14831_v43 = vld [vmem:[%s19638_s7 + $0x408] sm:$0xff]   ;;  %v11005_v32 = vrot.slane %v10998_v37, 7  ;;  %v14882_v37 = vld [vmem:[%s19638_s7 + $0x5f0] sm:$0xff]  }
 0x5db   :  { %14230 = vmatprep.subr.bf16.mxu1 %v14810_v38  ;;  %v14832_v38 = vld [vmem:[%s19638_s7 + $0x488] sm:$0xff]  }
 0x5dd   :  { %14209 = vmatpush3.bf16.msra.mxu0 %v14811_v5  ;;  %v14835_v5 = vld [vmem:[%s19638_s7 + $0x410] sm:$0xff]  }
 0x5de   :  { %14231 = vmatpush3.bf16.msra.mxu1 %v14812_v59  ;;  %14210 = vmatprep.subr.bf16.mxu0 %v14813_v58  ;;  %v14837_v59 = vld [vmem:[%s19638_s7 + $0x458] sm:$0xff]  }
 0x5df   :  { %14232 = vmatprep.subr.bf16.mxu1 %v14814_v17  ;;  %v14838_v58 = vld [vmem:[%s19638_s7 + $0x4d8] sm:$0xff]  }
 0x5e0   :  { %v14840_v17 = vld [vmem:[%s19638_s7 + $0x498] sm:$0xff]  }
 0x5e1   :  { %14211 = vmatpush3.bf16.msra.mxu0 %v14815_v34  ;;  %v14842_v34 = vld [vmem:[%s19638_s7 + $0x4e0] sm:$0xff]  }
 0x5e2   :  { %14233 = vmatpush3.bf16.msra.mxu1 %v14816_v53  ;;  %14212 = vmatprep.subr.bf16.mxu0 %v14817_v57  ;;  %v14843_v53 = vld [vmem:[%s19638_s7 + $0x420] sm:$0xff]   ;;  %v10893_v57 = vrot.slane %v19285_v54, %v19700_v3 }
 0x5e3   :  { %14234 = vmatprep.subr.bf16.mxu1 %v14818_v35  ;;  %v14846_v35 = vld [vmem:[%s19638_s7 + $0x4e8] sm:$0xff]  }
 0x5e4   :  { %v10915_v19 = vpack.c.bf16 %v10893_v57, %v10893_v57  ;;  %v14868_v57 = vld [vmem:[%s19638_s7 + $0x590] sm:$0xff]  }
 0x5e5   :  { %14213 = vmatpush3.bf16.msra.mxu0 %v14819_v0  ;;  %v10449_v0 = vrot.slane %v19190_v61, %v19698_v56 }
 0x5e6   :  { %14235 = vmatpush3.bf16.msra.mxu1 %v14820_v13  ;;  %14214 = vmatprep.subr.bf16.mxu0 %v14821_v14  ;;  %v14849_v13 = vld [vmem:[%s19638_s7 + $0x470] sm:$0xff]   ;;  %v10457_v14 = vrot.slane %v19190_v61, %v19699_v42 }
 0x5e7   :  { %14236 = vmatprep.subr.bf16.mxu1 %v14822_v50  ;;  %v10571_v50 = vunpack.c.l.b16 %v10490_v6  ;;  %v10486_v61 = vpack.c.bf16 %v10449_v0, %v10449_v0  ;;  %v14873_v6 = vld [vmem:[%s19638_s7 + $0x560] sm:$0xff]   ;;  %v10889_v0 = vrot.slane %v19285_v54, %v19698_v56 }
 0x5e9   :  { %14215 = vmatpush3.bf16.msra.mxu0 %v14823_v40  ;;  %v10996_v40 = vunpack.c.l.b16 %v10915_v19  ;;  %v10575_v23 = vrot.slane %v10571_v50, 7  ;;  %v10567_v26 = vunpack.c.l.b16 %v10486_v61  ;;  %v10897_v19 = vrot.slane %v19285_v54, %v19699_v42 }
 0x5ea   :  { %14237 = vmatpush3.bf16.msra.mxu1 %v14824_v25  ;;  %14244 = vmatprep.subr.bf16.mxu0 %v14825_v55  ;;  %v10488_v25 = vpack.c.bf16 %v10457_v14, %v10457_v14  ;;  %v14854_v55 = vld [vmem:[%s19638_s7 + $0x4f8] sm:$0xff]   ;;  %v14876_v14 = vld [vmem:[%s19638_s7 + $0x5a0] sm:$0xff]   ;;  %v11325_v54 = vrot.slane %v19405_v27, %v19701_v8  ;;  %v10914_v50 = vpack.c.bf16 %v10889_v0, %v10889_v0  ;;  %v14899_v0 = vld [vmem:[%s19638_s7 + $0x610] sm:$0xff]  }
 0x5eb   :  { %14266 = vmatprep.subr.bf16.mxu1 %v14826_v31  ;;  %v10579_v31 = vrot.slane %v10573_v63, 7  ;;  %v10916_v30 = vpack.c.bf16 %v10897_v19, %v10897_v19  ;;  %v19430_v63 = vld [vmem:[#allocation4 + $0x6] ss:$8 sm:$0xf] }
 0x5ec   :  { %10392 = vmatmul.mubr.bf16.vlgmr.msra.gmra.mrb[60].mxu0 %v10159_v41  ;;  %v10569_v41 = vunpack.c.l.b16 %v10488_v25  ;;  %v11341_v25 = vpack.c.bf16 %v11325_v54, %v11325_v54  ;;  %v14900_v19 = vld [vmem:[%s19638_s7 + $0x690] sm:$0xff]   ;;  %v14905_v54 = vld [vmem:[%s19638_s7 + $0x660] sm:$0xff]  }
 0x5ed   :  { %10432 = vmatmul.mubr.bf16.vlgmr.msra.gmra.mrb[60].mxu1 %v10161_v47  ;;  %14245 = vmatpush3.bf16.msra.mxu0 %v14827_v24  ;;  %v11001_v24 = vrot.slane %v10996_v40, 7  ;;  %v10576_v47 = vsel %vm9000_vm1, %v10575_v23, %v10567_v26  ;;  %v14880_v40 = vld [vmem:[%s19638_s7 + $0x5a8] sm:$0xff]   ;;  %v11301_v23 = vrot.slane %v19430_v63, %v19700_v3  ;;  %v14884_v26 = vld [vmem:[%s19638_s7 + $0x5b0] sm:$0xff]  }
 0x5ee   :  { %10815 = vmatprep.mubr.bf16.mxu0 %v10584_v7  ;;  %14267 = vmatpush3.bf16.msra.mxu1 %v14828_v1  ;;  %v14857_v1 = vld [vmem:[%s19638_s7 + $0x540] sm:$0xff]   ;;  %v10992_v7 = vunpack.c.l.b16 %v10911_v15  ;;  %v10997_v15 = vunpack.c.l.b16 %v10916_v30  ;;  %v11321_v30 = vrot.slane %v19405_v27, %v19699_v42 }
 0x5ef   :  { %10855 = vmatprep.mubr.bf16.mxu1 %v10586_v36  ;;  %14246 = vmatprep.subr.bf16.mxu0 %v14829_v29  ;;  %v14858_v29 = vld [vmem:[%s19638_s7 + $0x5c0] sm:$0xff]   ;;  %v10994_v36 = vunpack.c.l.b16 %v10913_v45  ;;  %v14883_v45 = vld [vmem:[%s19638_s7 + $0x530] sm:$0xff]  }
 0x5f0   :  { %14268 = vmatprep.subr.bf16.mxu1 %v14830_v49  ;;  %v10580_v49 = vsel %vm9000_vm1, %v10579_v31, %v10569_v41  ;;  %v11309_v31 = vrot.slane %v19430_v63, %v19701_v8  ;;  %v14886_v8 = vld [vmem:[%s19638_s7 + $0x5f8] sm:$0xff]  }
 0x5f1   :  { %14247 = vmatpush3.bf16.msra.mxu0 %v14831_v43  ;;  %v14859_v43 = vld [vmem:[%s19638_s7 + $0x500] sm:$0xff]  }
 0x5f2   :  { %14269 = vmatpush3.bf16.msra.mxu1 %v14832_v38  ;;  %14248 = vmatprep.subr.bf16.mxu0 %v14833_v33  ;;  %v11002_v38 = vsel %vm9000_vm1, %v11001_v24, %v10992_v7  ;;  %v10583_v33 = vpack.c.b16 %v10576_v47, %v10576_v47  ;;  %v11337_v47 = vpack.c.bf16 %v11309_v31, %v11309_v31 }
 0x5f3   :  { %14270 = vmatprep.subr.bf16.mxu1 %v14834_v28  ;;  %v14860_v28 = vld [vmem:[%s19638_s7 + $0x580] sm:$0xff]  }
 0x5f5   :  { %14249 = vmatpush3.bf16.msra.mxu0 %v14835_v5  ;;  %v11006_v5 = vsel %vm9000_vm1, %v11005_v32, %v10994_v36  ;;  %v11003_v32 = vrot.slane %v10997_v15, 7  ;;  %v14888_v36 = vld [vmem:[%s19638_s7 + $0x5b8] sm:$0xff]   ;;  %v14914_v15 = vld [vmem:[%s19638_s7 + $0x6f0] sm:$0xff]  }
 0x5f6   :  { %14271 = vmatpush3.bf16.msra.mxu1 %v14836_v46  ;;  %14250 = vmatprep.subr.bf16.mxu0 %v14837_v59  ;;  %v10585_v46 = vpack.c.b16 %v10580_v49, %v10580_v49  ;;  %v14861_v59 = vld [vmem:[%s19638_s7 + $0x548] sm:$0xff]  }
 0x5f7   :  { %14272 = vmatprep.subr.bf16.mxu1 %v14838_v58  ;;  %v11008_v58 = vpack.c.b16 %v11002_v38, %v11002_v38  ;;  %v14889_v38 = vld [vmem:[%s19638_s7 + $0x640] sm:$0xff]  }
 0x5f9   :  { %14251 = vmatpush3.bf16.msra.mxu0 %v14839_v21  ;;  %v14862_v21 = vld [vmem:[%s19638_s7 + $0x5c8] sm:$0xff]  }
 0x5fa   :  { %14273 = vmatpush3.bf16.msra.mxu1 %v14840_v17  ;;  %14252 = vmatprep.subr.bf16.mxu0 %v14841_v48  ;;  %v11010_v17 = vpack.c.b16 %v11006_v5, %v11006_v5  ;;  %v14863_v48 = vld [vmem:[%s19638_s7 + $0x508] sm:$0xff]   ;;  %v14890_v5 = vld [vmem:[%s19638_s7 + $0x6c0] sm:$0xff]  }
 0x5fb   :  { %14274 = vmatprep.subr.bf16.mxu1 %v14842_v34  ;;  %v14864_v34 = vld [vmem:[%s19638_s7 + $0x588] sm:$0xff]  }
 0x5fd   :  { %14253 = vmatpush3.bf16.msra.mxu0 %v14843_v53  ;;  %v14867_v53 = vld [vmem:[%s19638_s7 + $0x510] sm:$0xff]  }
 0x5fe   :  { %14275 = vmatpush3.bf16.msra.mxu1 %v14844_v51  ;;  %14254 = vmatprep.subr.bf16.mxu0 %v14845_v11  ;;  %v14869_v51 = vld [vmem:[%s19638_s7 + $0x558] sm:$0xff]  }
 0x5ff   :  { %14276 = vmatprep.subr.bf16.mxu1 %v14846_v35  ;;  %v14870_v11 = vld [vmem:[%s19638_s7 + $0x5d8] sm:$0xff]  }
 0x600   :  { %v14872_v35 = vld [vmem:[%s19638_s7 + $0x598] sm:$0xff]  }
 0x601   :  { %14255 = vmatpush3.bf16.msra.mxu0 %v14847_v60  ;;  %v14874_v60 = vld [vmem:[%s19638_s7 + $0x5e0] sm:$0xff]  }
 0x602   :  { %14277 = vmatpush3.bf16.msra.mxu1 %v14848_v10  ;;  %14256 = vmatprep.subr.bf16.mxu0 %v14849_v13  ;;  %v14875_v10 = vld [vmem:[%s19638_s7 + $0x520] sm:$0xff]   ;;  %v11317_v13 = vrot.slane %v19405_v27, %v19700_v3  ;;  %v14885_v3 = vld [vmem:[%s19638_s7 + $0x578] sm:$0xff]  }
 0x603   :  { %14278 = vmatprep.subr.bf16.mxu1 %v14850_v9  ;;  %v14878_v9 = vld [vmem:[%s19638_s7 + $0x5e8] sm:$0xff]  }
 0x604   :  { %v11339_v61 = vpack.c.bf16 %v11317_v13, %v11317_v13  ;;  %v14902_v13 = vld [vmem:[%s19638_s7 + $0x6d8] sm:$0xff]  }
 0x605   :  { %14257 = vmatpush3.bf16.msra.mxu0 %v14851_v52  ;;  %v10873_v52 = vrot.slane %v19310_v44, %v19698_v56 }
 0x606   :  { %14279 = vmatpush3.bf16.msra.mxu1 %v14852_v4  ;;  %14258 = vmatprep.subr.bf16.mxu0 %v14853_v16  ;;  %v14881_v4 = vld [vmem:[%s19638_s7 + $0x570] sm:$0xff]   ;;  %v10881_v16 = vrot.slane %v19310_v44, %v19699_v42 }
 0x607   :  { %14280 = vmatprep.subr.bf16.mxu1 %v14854_v55  ;;  %v10995_v55 = vunpack.c.l.b16 %v10914_v50  ;;  %v10910_v44 = vpack.c.bf16 %v10873_v52, %v10873_v52  ;;  %v11313_v50 = vrot.slane %v19405_v27, %v19698_v56  ;;  %v14908_v52 = vld [vmem:[%s19638_s7 + $0x6a0] sm:$0xff]   ;;  %v14910_v27 = vld [vmem:[%s19638_s7 + $0x6e8] sm:$0xff]  }
 0x608   :  { %v10912_v24 = vpack.c.bf16 %v10881_v16, %v10881_v16  ;;  %v14911_v16 = vld [vmem:[%s19638_s7 + $0x628] sm:$0xff]  }
 0x609   :  { %14259 = vmatpush3.bf16.msra.mxu0 %v14855_v20  ;;  %v11420_v20 = vunpack.c.l.b16 %v11339_v61  ;;  %v10999_v41 = vrot.slane %v10995_v55, 7  ;;  %v10991_v7 = vunpack.c.l.b16 %v10910_v44  ;;  %v14909_v61 = vld [vmem:[%s19638_s7 + $0x668] sm:$0xff]   ;;  %v14913_v55 = vld [vmem:[%s19638_s7 + $0x670] sm:$0xff]  }
 0x60a   :  { %14281 = vmatpush3.bf16.msra.mxu1 %v14856_v18  ;;  %14288 = vmatprep.subr.bf16.mxu0 %v14857_v1  ;;  %v11422_v18 = vunpack.c.l.b16 %v11341_v25  ;;  %v11335_v1 = vpack.c.bf16 %v11301_v23, %v11301_v23  ;;  %v11297_v25 = vrot.slane %v19430_v63, %v19698_v56  ;;  %v11305_v23 = vrot.slane %v19430_v63, %v19699_v42  ;;  %v14917_v42 = vld [vmem:[%s19638_s7 + $0x678] sm:$0xff]  }
 0x60b   :  { %14310 = vmatprep.subr.bf16.mxu1 %v14858_v29  ;;  %v14887_v29 = vld [vmem:[%s19638_s7 + $0x538] sm:$0xff]   ;;  %v11425_v49 = vrot.slane %v11420_v20, 7  ;;  %v14916_v20 = vld [vmem:[%s19638_s7 + $0x6b0] sm:$0xff]  }
 0x60c   :  { %10816 = vmatmul.mubr.bf16.vlgmr.msra.gmra.mrb[64].mxu0 %v10583_v33  ;;  %v11429_v33 = vrot.slane %v11422_v18, 7  ;;  %v11334_v44 = vpack.c.bf16 %v11297_v25, %v11297_v25  ;;  %v11336_v63 = vpack.c.bf16 %v11305_v23, %v11305_v23  ;;  %v14919_v18 = vld [vmem:[%s19638_s7 + $0x638] sm:$0xff]   ;;  %v14926_v25 = vld [vmem:[%s19640_s9 + $0x28] sm:$0xff]  }
 0x60d   :  { %10856 = vmatmul.mubr.bf16.vlgmr.msra.gmra.mrb[64].mxu1 %v10585_v46  ;;  %14289 = vmatpush3.bf16.msra.mxu0 %v14859_v43  ;;  %v10993_v43 = vunpack.c.l.b16 %v10912_v24  ;;  %v11416_v46 = vunpack.c.l.b16 %v11335_v1 }
 0x60e   :  { %11239 = vmatprep.mubr.bf16.mxu0 %v11008_v58  ;;  %14311 = vmatpush3.bf16.msra.mxu1 %v14860_v28  ;;  %v11000_v28 = vsel %vm9000_vm1, %v10999_v41, %v10991_v7  ;;  %v11418_v58 = vunpack.c.l.b16 %v11337_v47  ;;  %v14920_v41 = vld [vmem:[%s19638_s7 + $0x6b8] sm:$0xff]   ;;  %v11417_v1 = vunpack.c.l.b16 %v11336_v63  ;;  %v19706_v7 = vmov 0.0  }
 0x60f   :  { %11279 = vmatprep.mubr.bf16.mxu1 %v11010_v17  ;;  %14290 = vmatprep.subr.bf16.mxu0 %v14861_v59  ;;  %v11004_v59 = vsel %vm9000_vm1, %v11003_v32, %v10993_v43  ;;  %v11426_v17 = vsel %vm9000_vm1, %v11425_v49, %v11416_v46 }
 0x610   :  { %14312 = vmatprep.subr.bf16.mxu1 %v14862_v21  ;;  %v14891_v21 = vld [vmem:[%s19638_s7 + $0x600] sm:$0xff]  }
 0x611   :  { %14291 = vmatpush3.bf16.msra.mxu0 %v14863_v48  ;;  %v11007_v48 = vpack.c.b16 %v11000_v28, %v11000_v28 }
 0x612   :  { %14313 = vmatpush3.bf16.msra.mxu1 %v14864_v34  ;;  %14292 = vmatprep.subr.bf16.mxu0 %v14865_v12  ;;  %v14892_v34 = vld [vmem:[%s19638_s7 + $0x680] sm:$0xff]   ;;  %v11430_v12 = vsel %vm9000_vm1, %v11429_v33, %v11418_v58 }
 0x613   :  { %14314 = vmatprep.subr.bf16.mxu1 %v14866_v22  ;;  %v11009_v22 = vpack.c.b16 %v11004_v59, %v11004_v59 }
 0x615   :  { %14293 = vmatpush3.bf16.msra.mxu0 %v14867_v53  ;;  %v14893_v53 = vld [vmem:[%s19638_s7 + $0x648] sm:$0xff]  }
 0x616   :  { %14315 = vmatpush3.bf16.msra.mxu1 %v14868_v57  ;;  %14294 = vmatprep.subr.bf16.mxu0 %v14869_v51  ;;  %v11432_v57 = vpack.c.b16 %v11426_v17, %v11426_v17  ;;  %v14894_v51 = vld [vmem:[%s19638_s7 + $0x6c8] sm:$0xff]  }
 0x617   :  { %14316 = vmatprep.subr.bf16.mxu1 %v14870_v11  ;;  %v11434_v11 = vpack.c.b16 %v11430_v12, %v11430_v12 }
 0x619   :  { %14295 = vmatpush3.bf16.msra.mxu0 %v14871_v39  ;;  %v14895_v39 = vld [vmem:[%s19638_s7 + $0x608] sm:$0xff]  }
 0x61a   :  { %14317 = vmatpush3.bf16.msra.mxu1 %v14872_v35  ;;  %14296 = vmatprep.subr.bf16.mxu0 %v14873_v6  ;;  %v14896_v35 = vld [vmem:[%s19638_s7 + $0x688] sm:$0xff]   ;;  %v14897_v6 = vld [vmem:[%s19638_s7 + $0x650] sm:$0xff]  }
 0x61b   :  { %14318 = vmatprep.subr.bf16.mxu1 %v14874_v60  ;;  %v14898_v60 = vld [vmem:[%s19638_s7 + $0x6d0] sm:$0xff]  }
 0x61d   :  { %14297 = vmatpush3.bf16.msra.mxu0 %v14875_v10  ;;  %v14901_v10 = vld [vmem:[%s19638_s7 + $0x658] sm:$0xff]  }
 0x61e   :  { %14319 = vmatpush3.bf16.msra.mxu1 %v14876_v14  ;;  %14298 = vmatprep.subr.bf16.mxu0 %v14877_v62  ;;  %v14903_v14 = vld [vmem:[%s19638_s7 + $0x618] sm:$0xff]  }
 0x61f   :  { %14320 = vmatprep.subr.bf16.mxu1 %v14878_v9  ;;  %v14904_v62 = vld [vmem:[%s19638_s7 + $0x698] sm:$0xff]   ;;  %v14906_v9 = vld [vmem:[%s19638_s7 + $0x6e0] sm:$0xff]  }
 0x621   :  { %14299 = vmatpush3.bf16.msra.mxu0 %v14879_v2  ;;  %v14907_v2 = vld [vmem:[%s19638_s7 + $0x620] sm:$0xff]  }
 0x622   :  { %14321 = vmatpush3.bf16.msra.mxu1 %v14880_v40  ;;  %14300 = vmatprep.subr.bf16.mxu0 %v14881_v4  ;;  %v11338_v40 = vpack.c.bf16 %v11313_v50, %v11313_v50  ;;  %v11340_v4 = vpack.c.bf16 %v11321_v30, %v11321_v30 }
 0x623   :  { %14322 = vmatprep.subr.bf16.mxu1 %v14882_v37  ;;  %v14912_v37 = vld [vmem:[%s19638_s7 + $0x6a8] sm:$0xff]  }
 0x624   :  { %v11419_v31 = vunpack.c.l.b16 %v11338_v40  ;;  %v11421_v56 = vunpack.c.l.b16 %v11340_v4 }
 0x625   :  { %14301 = vmatpush3.bf16.msra.mxu0 %v14883_v45  ;;  %v14915_v45 = vld [vmem:[%s19638_s7 + $0x630] sm:$0xff]  }
 0x626   :  { %14323 = vmatpush3.bf16.msra.mxu1 %v14884_v26  ;;  %14302 = vmatprep.subr.bf16.mxu0 %v14885_v3  ;;  %v14918_v26 = vld [vmem:[%s19638_s7 + $0x6f8] sm:$0xff]   ;;  %v11423_v3 = vrot.slane %v11419_v31, 7  ;;  %v11427_v24 = vrot.slane %v11421_v56, 7 }
 0x627   :  { %14324 = vmatprep.subr.bf16.mxu1 %v14886_v8  ;;  %v11415_v8 = vunpack.c.l.b16 %v11334_v44 }
 0x628   :  { %v11428_v47 = vsel %vm9000_vm1, %v11427_v24, %v11417_v1 }
 0x629   :  { %14303 = vmatpush3.bf16.msra.mxu0 %v14887_v29  ;;  %v11424_v32 = vsel %vm9000_vm1, %v11423_v3, %v11415_v8  ;;  %v11433_v49 = vpack.c.b16 %v11428_v47, %v11428_v47 }
 0x62a   :  { %14325 = vmatpush3.bf16.msra.mxu1 %v14888_v36  ;;  %14332 = vmatprep.subr.bf16.mxu0 %v14889_v38  ;;  %v11431_v29 = vpack.c.b16 %v11424_v32, %v11424_v32 }
 0x62b   :  { %14354 = vmatprep.subr.bf16.mxu1 %v14890_v5 }
 0x62c   :  { %11240 = vmatmul.mubr.bf16.vlgmr.msra.gmra.mrb[68].mxu0 %v11007_v48 }
 0x62d   :  { %11280 = vmatmul.mubr.bf16.vlgmr.msra.gmra.mrb[68].mxu1 %v11009_v22  ;;  %14333 = vmatpush3.bf16.msra.mxu0 %v14891_v21 }
 0x62e   :  { %11663 = vmatprep.mubr.bf16.mxu0 %v11432_v57  ;;  %14355 = vmatpush3.bf16.msra.mxu1 %v14892_v34 }
 0x62f   :  { %11703 = vmatprep.mubr.bf16.mxu1 %v11434_v11  ;;  %14334 = vmatprep.subr.bf16.mxu0 %v14893_v53 }
 0x630   :  { %14356 = vmatprep.subr.bf16.mxu1 %v14894_v51 }
 0x631   :  { %14335 = vmatpush3.bf16.msra.mxu0 %v14895_v39 }
 0x632   :  { %14357 = vmatpush3.bf16.msra.mxu1 %v14896_v35  ;;  %14336 = vmatprep.subr.bf16.mxu0 %v14897_v6 }
 0x633   :  { %14358 = vmatprep.subr.bf16.mxu1 %v14898_v60 }
 0x635   :  { %14337 = vmatpush3.bf16.msra.mxu0 %v14899_v0  ;;  %v14921_v0 = vld [vmem:[%s19640_s9] sm:$0xff]  }
 0x636   :  { %14359 = vmatpush3.bf16.msra.mxu1 %v14900_v19  ;;  %14338 = vmatprep.subr.bf16.mxu0 %v14901_v10  ;;  %v14922_v19 = vld [vmem:[%s19640_s9 + $0x8] sm:$0xff]   ;;  %v14923_v10 = vld [vmem:[%s19640_s9 + $0x10] sm:$0xff]  }
 0x637   :  { %14360 = vmatprep.subr.bf16.mxu1 %v14902_v13  ;;  %v14924_v13 = vld [vmem:[%s19640_s9 + $0x18] sm:$0xff]  }
 0x639   :  { %14339 = vmatpush3.bf16.msra.mxu0 %v14903_v14  ;;  %v14925_v14 = vld [vmem:[%s19640_s9 + $0x20] sm:$0xff]  }
 0x63a   :  { %14361 = vmatpush3.bf16.msra.mxu1 %v14904_v62  ;;  %14340 = vmatprep.subr.bf16.mxu0 %v14905_v54 }
 0x63b   :  { %14362 = vmatprep.subr.bf16.mxu1 %v14906_v9 }
 0x63d   :  { %14341 = vmatpush3.bf16.msra.mxu0 %v14907_v2 }
 0x63e   :  { %14363 = vmatpush3.bf16.msra.mxu1 %v14908_v52  ;;  %14342 = vmatprep.subr.bf16.mxu0 %v14909_v61 }
 0x63f   :  { %14364 = vmatprep.subr.bf16.mxu1 %v14910_v27 }
 0x641   :  { %14343 = vmatpush3.bf16.msra.mxu0 %v14911_v16 }
 0x642   :  { %14365 = vmatpush3.bf16.msra.mxu1 %v14912_v37  ;;  %14344 = vmatprep.subr.bf16.mxu0 %v14913_v55  ;;  %v14927_v37 = vld [vmem:[%s19640_s9 + $0x30] sm:$0xff]   ;;  %v14928_v55 = vld [vmem:[%s19640_s9 + $0x38] sm:$0xff]  }
 0x643   :  { %14366 = vmatprep.subr.bf16.mxu1 %v14914_v15 }
 0x645   :  { %14345 = vmatpush3.bf16.msra.mxu0 %v14915_v45 }
 0x646   :  { %14367 = vmatpush3.bf16.msra.mxu1 %v14916_v20  ;;  %14346 = vmatprep.subr.bf16.mxu0 %v14917_v42 }
 0x647   :  { %14368 = vmatprep.subr.bf16.mxu1 %v14918_v26 }
 0x649   :  { %14347 = vmatpush3.bf16.msra.mxu0 %v14919_v18 }
 0x64a   :  { %14369 = vmatpush3.bf16.msra.mxu1 %v14920_v41  ;;  %14385 = vmatprep.subr.bf16.mxu0 %v19706_v7 }
 0x64c   :  { %11664 = vmatmul.mubr.bf16.vlgmr.msra.gmra.mrb[72].mxu0 %v11431_v29 }
 0x64d   :  { %11704 = vmatmul.mubr.bf16.vlgmr.msra.gmra.mrb[72].mxu1 %v11433_v49  ;;  %14386 = vmatpush3.bf16.msra.mxu0 %v14921_v0 }
 0x64e   :  { %14387 = vmatprep.subr.bf16.mxu0 %v19706_v7  ;;  %14401 = vmatprep.mubr.msk.bf16.mxu0 %vm14955_vm2, %v19706_v7 }
 0x651   :  { %14388 = vmatpush3.bf16.msra.mxu0 %v14922_v19 }
 0x652   :  { %14389 = vmatprep.subr.bf16.mxu0 %v19706_v7 }
 0x655   :  { %14390 = vmatpush3.bf16.msra.mxu0 %v14923_v10 }
 0x656   :  { %14391 = vmatprep.subr.bf16.mxu0 %v19706_v7 }
 0x659   :  { %14392 = vmatpush3.bf16.msra.mxu0 %v14924_v13  ;;  %v14058_v13 = vld [vmem:[%s19639_s8] ss:$0 sm:$0xff] }
 0x65a   :  { %14393 = vmatprep.subr.bf16.mxu0 %v19706_v7 }
 0x65d   :  { %14394 = vmatpush3.bf16.msra.mxu0 %v14925_v14 }
 0x65e   :  { %14395 = vmatprep.subr.bf16.mxu0 %v19706_v7 }
 0x65f   :  { %v14084_v36 = vpop.f32.mrb[48].mxu0  ;;  %v14106_v43 = vpop.f32.mrb[48].mxu1 }
 0x660   :  { %v14085_v38 = vpop.f32.mrb[49].mxu0  ;;  %v14107_v33 = vpop.f32.mrb[49].mxu1 }
 0x661   :  { %v14086_v28 = vadd.f32 %v14085_v38, %v14084_v36  ;;  %v14108_v5 = vadd.f32 %v14107_v33, %v14106_v43  ;;  %v14087_v46 = vpop.f32.mrb[50].mxu0  ;;  %v14109_v59 = vpop.f32.mrb[50].mxu1  ;;  %14396 = vmatpush3.bf16.msra.mxu0 %v14926_v25 }
 0x662   :  { %v14088_v58 = vpop.f32.mrb[51].mxu0  ;;  %v14110_v21 = vpop.f32.mrb[51].mxu1  ;;  %14397 = vmatprep.subr.bf16.mxu0 %v19706_v7 }
 0x663   :  { %v9283_v17 = vadd.f32 %v14108_v5, %v14086_v28 }
 0x665   :  { %14398 = vmatpush3.bf16.msra.mxu0 %v14927_v37 }
 0x666   :  { %14399 = vmatprep.subr.bf16.mxu0 %v19706_v7 }
 0x669   :  { %14400 = vmatpush3.bf16.msra.mxu0 %v14928_v55 }
 0x67f   :  { %v14128_v48 = vpop.f32.mrb[52].mxu0  ;;  %v14150_v34 = vpop.f32.mrb[52].mxu1 }
 0x680   :  { %v14129_v12 = vpop.f32.mrb[53].mxu0  ;;  %v14151_v53 = vpop.f32.mrb[53].mxu1 }
 0x681   :  { %v14130_v22 = vadd.f32 %v14129_v12, %v14128_v48  ;;  %v14131_v57 = vpop.f32.mrb[54].mxu0  ;;  %v14152_v51 = vadd.f32 %v14151_v53, %v14150_v34  ;;  %v14153_v11 = vpop.f32.mrb[54].mxu1 }
 0x682   :  { %v14132_v39 = vpop.f32.mrb[55].mxu0  ;;  %v14154_v6 = vpop.f32.mrb[55].mxu1 }
 0x683   :  { %v9547_v35 = vadd.f32 %v14130_v22, %v9283_v17 }
 0x685   :  { %v9587_v60 = vadd.f32 %v14152_v51, %v9547_v35 }
 0x69f   :  { %v14172_v62 = vpop.f32.mrb[56].mxu0 }
 0x6a0   :  { %v14194_v54 = vpop.f32.mrb[56].mxu1  ;;  %v14173_v9 = vpop.f32.mrb[57].mxu0 }
 0x6a1   :  { %v14174_v50 = vadd.f32 %v14173_v9, %v14172_v62  ;;  %v14195_v30 = vpop.f32.mrb[57].mxu1  ;;  %v14175_v2 = vpop.f32.mrb[58].mxu0 }
 0x6a2   :  { %v14196_v52 = vadd.f32 %v14195_v30, %v14194_v54  ;;  %v14197_v61 = vpop.f32.mrb[58].mxu1  ;;  %v14176_v27 = vpop.f32.mrb[59].mxu0 }
 0x6a3   :  { %v14198_v40 = vpop.f32.mrb[59].mxu1 }
 0x6a4   :  { %v10010_v4 = vadd.f32 %v14196_v52, %v14174_v50  ;;  %v14059_v50 = vld [vmem:[%s19641_s10] ss:$0 sm:$0xff] }
 0x6a6   :  { %v10015_v16 = vadd.f32 %v10010_v4, %v9587_v60 }
 0x6bf   :  { %v14216_v23 = vpop.f32.mrb[60].mxu0 }
 0x6c0   :  { %v14238_v15 = vpop.f32.mrb[60].mxu1  ;;  %v14217_v31 = vpop.f32.mrb[61].mxu0 }
 0x6c1   :  { %v14218_v56 = vadd.f32 %v14217_v31, %v14216_v23  ;;  %v14239_v45 = vpop.f32.mrb[61].mxu1  ;;  %v14219_v44 = vpop.f32.mrb[62].mxu0 }
 0x6c2   :  { %v14240_v20 = vadd.f32 %v14239_v45, %v14238_v15  ;;  %v14241_v42 = vpop.f32.mrb[62].mxu1  ;;  %v14220_v63 = vpop.f32.mrb[63].mxu0 }
 0x6c3   :  { %v14242_v26 = vpop.f32.mrb[63].mxu1 }
 0x6c4   :  { %v10434_v3 = vadd.f32 %v14240_v20, %v14218_v56 }
 0x6c6   :  { %v10439_v24 = vadd.f32 %v10434_v3, %v10015_v16 }
 0x6df   :  { %v14260_v18 = vpop.f32.mrb[64].mxu0 }
 0x6e0   :  { %v14282_v8 = vpop.f32.mrb[64].mxu1  ;;  %v14261_v41 = vpop.f32.mrb[65].mxu0 }
 0x6e1   :  { %v14262_v1 = vadd.f32 %v14261_v41, %v14260_v18  ;;  %v14283_v32 = vpop.f32.mrb[65].mxu1  ;;  %v14263_v47 = vpop.f32.mrb[66].mxu0 }
 0x6e2   :  { %v14284_v29 = vadd.f32 %v14283_v32, %v14282_v8  ;;  %v14285_v7 = vpop.f32.mrb[66].mxu1  ;;  %v14264_v49 = vpop.f32.mrb[67].mxu0 }
 0x6e3   :  { %v14286_v36 = vpop.f32.mrb[67].mxu1 }
 0x6e4   :  { %v10858_v43 = vadd.f32 %v14284_v29, %v14262_v1 }
 0x6e6   :  { %v10863_v38 = vadd.f32 %v10858_v43, %v10439_v24 }
 0x6ff   :  { %v14304_v33 = vpop.f32.mrb[68].mxu0 }
 0x700   :  { %v14326_v28 = vpop.f32.mrb[68].mxu1  ;;  %v14305_v5 = vpop.f32.mrb[69].mxu0 }
 0x701   :  { %v14306_v46 = vadd.f32 %v14305_v5, %v14304_v33  ;;  %v14327_v59 = vpop.f32.mrb[69].mxu1  ;;  %v14307_v58 = vpop.f32.mrb[70].mxu0 }
 0x702   :  { %v14328_v21 = vadd.f32 %v14327_v59, %v14326_v28  ;;  %v14329_v17 = vpop.f32.mrb[70].mxu1  ;;  %v14308_v48 = vpop.f32.mrb[71].mxu0 }
 0x703   :  { %v14330_v34 = vpop.f32.mrb[71].mxu1 }
 0x704   :  { %v11282_v12 = vadd.f32 %v14328_v21, %v14306_v46 }
 0x706   :  { %v11287_v22 = vadd.f32 %v11282_v12, %v10863_v38 }
 0x71f   :  { %v14348_v53 = vpop.f32.mrb[72].mxu0 }
 0x720   :  { %v14370_v57 = vpop.f32.mrb[72].mxu1  ;;  %v14349_v51 = vpop.f32.mrb[73].mxu0 }
 0x721   :  { %v14350_v11 = vadd.f32 %v14349_v51, %v14348_v53  ;;  %v14371_v39 = vpop.f32.mrb[73].mxu1  ;;  %v14351_v35 = vpop.f32.mrb[74].mxu0 }
 0x722   :  { %v14372_v6 = vadd.f32 %v14371_v39, %v14370_v57  ;;  %v14373_v60 = vpop.f32.mrb[74].mxu1  ;;  %v14352_v0 = vpop.f32.mrb[75].mxu0 }
 0x723   :  { %v14374_v19 = vpop.f32.mrb[75].mxu1 }
 0x724   :  { %v11706_v10 = vadd.f32 %v14372_v6, %v14350_v11 }
 0x726   :  { %v11711_v14 = vadd.f32 %v11706_v10, %v11287_v22 }
 0x728   :  { %v11719_v62 = vadd.f32 %v14058_v13, %v11711_v14 }
 0x72a   :  { %v11720_v54 = vmax.f32 %v11719_v62, 0.0 }
 0x72c   :  { %v11721_v9 = vpack.c.bf16 %v11720_v54, %v11720_v54 }
 0x72e   :  { %14402 = vmatmul.mubr.bf16.vlgmr.msra.gmra.mrb[76].mxu0 %v11721_v9 }
 0x801   :  { %v11827_v30 = vpop.f32.mrb[76].mxu0 }
 0x802   :  { %v11828_v2 = vadd.f32 %v14059_v50, %v11827_v30  ;;  %v14403_v52 = vpop.f32.mrb[77].mxu0 }
 0x803   :  { %v11830_v61 = vpop.f32.mrb[78].mxu0 }
 0x804   :  { %11833 = vst [vmem:[#allocation5] sm:$0x3] %v11828_v2  ;;  %v14404_v27 = vpop.f32.mrb[79].mxu0 }
 0x805   :  { %14940 = shalt.err (!%p14937_p4)
}
 0x806   :  { %s14941_s10 = scalar_lea.hbm %s19642_s11, 32 }
 0x807   :  { %p14942_p5 = scmp.ne.s32.totalorder %s19642_s11, %s14941_s10  ;;  %p14945_p6 = scmp.lt.u32.totalorder %s14941_s10, %s19642_s11 }
 0x809   :  { %p14947_p7 = pnand %p14945_p6, %p14942_p5 }
 0x80b   :  { %14950 = shalt.err (!%p14947_p7)
}
 0x80c   :  { %11843 = dma.vmem_to_hbm [thread:$0]  %s11841_s15, 32, %s19642_s11, [#allocation6]  }
 0x80d   :  { %14951 = dma.done.wait [#allocation6], 32  }
 0x80e   :  { %14952 = vsyncadd [#allocation6], 4294967264 }
 0x80f   :  { %11847 = vsyncpa [#allocation6], 1 }

</bundles_post_ra>
